<compile_context>
chip_gen: v6e
topology: v6e:2x2x1
jax: 0.10.0
libtpu: 0.0.40
codegen_flags: <defaults>
</compile_context>

<pallas_src>
import functools
import math

import jax
import jax.numpy as jnp
from jax import lax
from jax.experimental import pallas as pl
from jax.experimental.pallas import tpu as pltpu

EPS_BCOS = 1e-6   # BcosConv2d patch-norm epsilon
EPS_PN = 1e-5     # PositionNorm (LayerNorm) epsilon
PADL = 16         # left halo offset on the W (sublane) axis: multiple of 16 keeps the
PADR = 16         # bf16-packed interior store tile-aligned; PADR == PADL (shared zero block)


# ---------------------------- in-kernel helpers ----------------------------

def _patch_sqsum(inp_flat, sq_ref, is_w_first, is_w_last, H, W):
    """Zero-padded 3x3 box sum of the per-position squared L2 norm of the conv input.

    Runs in f32 on the pre-truncation input (the matmul operands are bf16, but the
    patch norm keeps full precision).  Separable: one channel reduce, then a horizontal
    and a vertical 3-tap pass on (H*W, 1) columns staged through a small f32 scratch
    whose first/last W rows are permanently zero (handles the h boundary); the w
    boundary is handled with the precomputed row-start / row-end masks.
    """
    HW = H * W
    csum = jnp.sum(inp_flat * inp_flat, axis=-1, keepdims=True)          # (HW, 1) f32
    sq_ref[W:W + HW, :] = csum
    left = jnp.where(is_w_first, 0.0, sq_ref[W - 1:W - 1 + HW, :])       # csum[p-1]
    right = jnp.where(is_w_last, 0.0, sq_ref[W + 1:W + 1 + HW, :])       # csum[p+1]
    row3 = csum + left + right                                           # horizontal pass
    sq_ref[W:W + HW, :] = row3
    up = sq_ref[0:HW, :]                                                 # row3[p-W], zero at h==0
    down = sq_ref[2 * W:2 * W + HW, :]                                   # row3[p+W], zero at h==H-1
    return row3 + up + down


def _bcos_conv3x3(inp_flat, pad_ref, im_ref, sq_ref, w, is_w_first, is_w_last,
                  H, W, C, inv_scale):
    """B-cos 3x3 / stride-1 conv (b=2, max_out=2) -> (H*W, C) f32 activation.

    inp_flat: (H*W, C) f32 conv input (also used, pre-truncation, for the patch norm).
    pad_ref:  (H+2, PADL+W+PADR, C) bf16 zero-halo scratch (halo ring already zero).
    im_ref:   (H*W, 9*C) bf16 im2col staging scratch.
    w:        (9*C, 2*C) bf16 weight value, rows ordered (dh, dw, cin),
              output cols = [MaxOut candidate A | candidate B].
    """
    HW = H * W
    # interior store (bf16, tile-aligned); the zero halo ring written at kernel start is
    # never touched, so both convs of the block reuse it (documented invariant).
    pad_ref[1:H + 1, PADL:PADL + W, :] = inp_flat.reshape(H, W, C).astype(jnp.bfloat16)

    # im2col staging: hoist the three dw-shifted slabs once (only dw=0/2 are sublane-
    # misaligned); the per-dh slices are along the untiled leading axis and are free.
    for dw in range(3):
        slab = pad_ref[:, PADL - 1 + dw:PADL - 1 + dw + W, :]            # (H+2, W, C) bf16
        for dh in range(3):
            t = dh * 3 + dw
            im_ref[:, t * C:(t + 1) * C] = slab[dh:dh + H].reshape(HW, C)

    # single MXU matmul per conv: K = 9*C (vs 9 dots with K = C); bf16 in, f32 accumulate
    acc = lax.dot_general(im_ref[...], w, (((1,), (0,)), ((), ())),
                          preferred_element_type=jnp.float32)            # (HW, 2C)
    lin = jnp.maximum(acc[:, :C], acc[:, C:])                            # MaxOut pairs (2c, 2c+1)

    sqsum = _patch_sqsum(inp_flat, sq_ref, is_w_first, is_w_last, H, W)  # (HW, 1) f32
    inv_norm = lax.rsqrt(sqsum + EPS_BCOS) * inv_scale                   # EUP rsqrt, 1/scale folded
    return lin * jnp.abs(lin) * inv_norm


def _position_norm(y, gamma):
    """NoBias position norm: LayerNorm over the channel (last) axis, learnable weight."""
    mu = jnp.mean(y, axis=-1, keepdims=True)
    d = y - mu
    var = jnp.mean(d * d, axis=-1, keepdims=True)
    return d * lax.rsqrt(var + EPS_PN) * gamma


# -------------------------------- kernel -----------------------------------

def basic_block_kernel(x_ref, w1_ref, w2_ref, g1_ref, g2_ref, o_ref,
                       pad_ref, im_ref, sq_ref, *, H, W, C, inv_scale):
    HW = H * W
    Hp, Wp = H + 2, PADL + W + PADR

    x = x_ref[0]                                                   # (H, W, C) f32
    x_flat = x.reshape(HW, C)

    # ---- zero the halo ring once per grid step (tile-aligned block stores only) ----
    zrow = jnp.zeros((1, Wp, C), jnp.bfloat16)
    zcol = jnp.zeros((Hp, PADL, C), jnp.bfloat16)
    pad_ref[0:1, :, :] = zrow
    pad_ref[H + 1:H + 2, :, :] = zrow
    pad_ref[:, 0:PADL, :] = zcol
    pad_ref[:, PADL + W:Wp, :] = zcol
    sq_ref[0:W, :] = jnp.zeros((W, 1), jnp.float32)
    sq_ref[W + HW:2 * W + HW, :] = jnp.zeros((W, 1), jnp.float32)

    # row-start / row-end masks for the patch-norm horizontal pass (hoisted: used twice)
    pidx = lax.broadcasted_iota(jnp.int32, (HW, 1), 0)
    if (W & (W - 1)) == 0:
        w_idx = jnp.bitwise_and(pidx, W - 1)
    else:
        w_idx = pidx % W
    is_w_first = w_idx == 0
    is_w_last = w_idx == W - 1

    # ---- conv1 (B-cos) + bn1 (position norm, no bias) ----
    out1 = _bcos_conv3x3(x_flat, pad_ref, im_ref, sq_ref, w1_ref[...],
                         is_w_first, is_w_last, H, W, C, inv_scale)
    out1 = _position_norm(out1, g1_ref[...])                      # (HW, C)

    # ---- conv2 (B-cos) + bn2 (scratches reused; halo ring still zero) ----
    out2 = _bcos_conv3x3(out1, pad_ref, im_ref, sq_ref, w2_ref[...],
                         is_w_first, is_w_last, H, W, C, inv_scale)
    out2 = _position_norm(out2, g2_ref[...])

    # stochastic_depth_prob=0 -> identity; downsample=None -> identity shortcut
    o_ref[0] = out2.reshape(H, W, C) + x


# -------------------------------- wrappers ----------------------------------

def prepare_basic_block_params(w1, w2, g1, g2):
    """One-time weight repack (outside the hot path):
    torch-OIHW (2C, C, 3, 3) -> MaxOut-fused im2col weight (9C, 2C) bf16,
    rows ordered (dh, dw, cin), cols = [candidate A | candidate B]."""
    def repack(w):
        C = w.shape[1]
        w = jnp.transpose(w, (2, 3, 1, 0)).astype(jnp.float32)            # OIHW -> HWIO
        w = jnp.concatenate([w[..., 0::2], w[..., 1::2]], axis=-1)        # pairs (2c, 2c+1)
        return w.reshape(9 * C, 2 * C).astype(jnp.bfloat16)
    return (repack(w1), repack(w2),
            g1.reshape(1, -1).astype(jnp.float32),
            g2.reshape(1, -1).astype(jnp.float32))


@jax.jit
def basic_block_nhwc(x, params):
    """x: (N, H, W, C) float32 NHWC (channels on lanes); params from prepare_basic_block_params."""
    w1f, w2f, g1, g2 = params
    N, H, W, C = x.shape
    inv_scale = 100.0 / math.sqrt(9.0 * C)       # 1 / (sqrt(k*k*Cin)/100), B-cos v1 default

    kern = functools.partial(basic_block_kernel, H=H, W=W, C=C, inv_scale=inv_scale)
    return pl.pallas_call(
        kern,
        out_shape=jax.ShapeDtypeStruct((N, H, W, C), jnp.float32),
        grid=(N,),
        in_specs=[
            pl.BlockSpec((1, H, W, C), lambda n: (n, 0, 0, 0)),
            pl.BlockSpec((9 * C, 2 * C), lambda n: (0, 0)),     # constant-resident weights
            pl.BlockSpec((9 * C, 2 * C), lambda n: (0, 0)),
            pl.BlockSpec((1, C), lambda n: (0, 0)),
            pl.BlockSpec((1, C), lambda n: (0, 0)),
        ],
        out_specs=pl.BlockSpec((1, H, W, C), lambda n: (n, 0, 0, 0)),
        scratch_shapes=[
            pltpu.VMEM((H + 2, PADL + W + PADR, C), jnp.bfloat16),  # zero-halo padded input
            pltpu.VMEM((H * W, 9 * C), jnp.bfloat16),               # im2col staging
            pltpu.VMEM((H * W + 2 * W, 1), jnp.float32),            # f32 patch-norm column pad
        ],
        compiler_params=pltpu.CompilerParams(
            dimension_semantics=("parallel",),
            # explicit VMEM budget: double-buffered x/out blocks + both weights +
            # bf16 scratches + f32 temporaries stay far below this on all generations
            vmem_limit_bytes=32 * 1024 * 1024,
        ),
    )(x, w1f, w2f, g1, g2)


def basic_block_nchw(x_nchw, params):
    """PyTorch-layout adapter.  A real network would keep activations NHWC end-to-end,
    making these two boundary transposes disappear from the hot path."""
    x = jnp.transpose(x_nchw, (0, 2, 3, 1)).astype(jnp.float32)
    out = basic_block_nhwc(x, params)
    return jnp.transpose(out, (0, 3, 1, 2))


# ----------------------------- pure-JAX reference --------------------------

def _ref_bcos(x, w_oihw, scale):
    """B-cos conv reference with the same numerical contract as the kernel:
    bf16 matmul operands / f32 accumulation, patch norm in f32."""
    w = jnp.transpose(w_oihw, (2, 3, 1, 0)).astype(jnp.float32)           # OIHW -> HWIO
    lin = lax.conv_general_dilated(
        x.astype(jnp.bfloat16), w.astype(jnp.bfloat16), (1, 1), ((1, 1), (1, 1)),
        dimension_numbers=("NHWC", "HWIO", "NHWC"),
        preferred_element_type=jnp.float32)
    lin = jnp.maximum(lin[..., 0::2], lin[..., 1::2])                     # MaxOut pairs
    sq = jnp.sum(x * x, axis=-1, keepdims=True)
    patch = lax.reduce_window(sq, 0.0, lax.add, (1, 3, 3, 1), (1, 1, 1, 1),
                              [(0, 0), (1, 1), (1, 1), (0, 0)])
    return lin * jnp.abs(lin) / jnp.sqrt(patch + EPS_BCOS) / scale


def _ref_block(x_nchw, w1, w2, g1, g2):
    N, C, H, W = x_nchw.shape
    x = jnp.transpose(x_nchw, (0, 2, 3, 1)).astype(jnp.float32)
    scale = math.sqrt(9.0 * C) / 100.0
    h1 = _position_norm(_ref_bcos(x, w1, scale), g1.reshape(1, 1, 1, C))
    h2 = _position_norm(_ref_bcos(h1, w2, scale), g2.reshape(1, 1, 1, C))
    return jnp.transpose(h2 + x, (0, 3, 1, 2))


# --------------------------------- main -------------------------------------

if __name__ == "__main__":
    key = jax.random.PRNGKey(0)
    N, C, H, W = 2, 8, 16, 16          # inplanes == planes so the identity shortcut is valid
    k1, k2, k3 = jax.random.split(key, 3)

    x = jax.random.normal(k1, (N, C, H, W), jnp.float32)
    fan_in = C * 3 * 3
    # BcosConv2d internal conv has 2*C output channels (MaxOut factor 2), no bias
    w1 = jax.random.normal(k2, (2 * C, C, 3, 3), jnp.float32) / math.sqrt(fan_in)
    w2 = jax.random.normal(k3, (2 * C, C, 3, 3), jnp.float32) / math.sqrt(fan_in)
    g1 = jnp.ones((C,), jnp.float32)   # LayerNorm weight default init
    g2 = jnp.ones((C,), jnp.float32)

    params = prepare_basic_block_params(w1, w2, g1, g2)          # one-time repack
    out = jax.block_until_ready(basic_block_nchw(x, params))
    assert out.shape == (N, C, H, W) and out.dtype == jnp.float32

    ref = jax.block_until_ready(_ref_block(x, w1, w2, g1, g2))
    # Kernel and reference share the same numerical contract (bf16 matmul operands,
    # f32 accumulation, f32 patch norm), so only accumulation-order noise remains.
    err = float(jnp.max(jnp.abs(out - ref)))
    assert jnp.allclose(out, ref, rtol=1e-2, atol=1e-2), f"max abs err {err}"

    print("KERNEL_OK")
</pallas_src>

<mosaic_0001>
module attributes {stable_mosaic.version = 11 : i64} {
  func.func @basic_block_kernel(%arg0: i32, %arg1: memref<1x16x16x8xf32, #tpu.memory_space<vmem>>, %arg2: memref<72x16xbf16, #tpu.memory_space<vmem>>, %arg3: memref<72x16xbf16, #tpu.memory_space<vmem>>, %arg4: memref<1x8xf32, #tpu.memory_space<vmem>>, %arg5: memref<1x8xf32, #tpu.memory_space<vmem>>, %arg6: memref<1x16x16x8xf32, #tpu.memory_space<vmem>>, %arg7: memref<18x48x8xbf16, #tpu.memory_space<vmem>>, %arg8: memref<256x72xbf16, #tpu.memory_space<vmem>>, %arg9: memref<288x1xf32, #tpu.memory_space<vmem>>) attributes {dimension_semantics = [#tpu.dimension_semantics<parallel>], iteration_bounds = array<i64: 2>, scalar_prefetch = 0 : i64, scratch_operands = 3 : i64, tpu.core_type = #tpu.core_type<tc>, window_params = [{transform_indices = @transform_0, window_bounds = array<i64: 1, 16, 16, 8>}, {pipeline_mode = #tpu.pipeline_mode<synchronous>, transform_indices = @transform_1, window_bounds = array<i64: 72, 16>}, {pipeline_mode = #tpu.pipeline_mode<synchronous>, transform_indices = @transform_2, window_bounds = array<i64: 72, 16>}, {pipeline_mode = #tpu.pipeline_mode<synchronous>, transform_indices = @transform_3, window_bounds = array<i64: 1, 8>}, {pipeline_mode = #tpu.pipeline_mode<synchronous>, transform_indices = @transform_4, window_bounds = array<i64: 1, 8>}, {transform_indices = @transform_5, window_bounds = array<i64: 1, 16, 16, 8>}]} {
    %c0 = arith.constant 0 : index
    %c0_0 = arith.constant 0 : index
    %c0_1 = arith.constant 0 : index
    %c0_2 = arith.constant 0 : index
    %0 = vector.load %arg1[%c0, %c0_0, %c0_1, %c0_2] : memref<1x16x16x8xf32, #tpu.memory_space<vmem>>, vector<1x16x16x8xf32>
    %1 = vector.shape_cast %0 : vector<1x16x16x8xf32> to vector<16x16x8xf32>
    %2 = vector.shape_cast %1 : vector<16x16x8xf32> to vector<256x8xf32>
    %cst = arith.constant 0.000000e+00 : bf16
    %3 = vector.broadcast %cst : bf16 to vector<1x48x8xbf16>
    %cst_3 = arith.constant 0.000000e+00 : bf16
    %4 = vector.broadcast %cst_3 : bf16 to vector<18x16x8xbf16>
    %c0_4 = arith.constant 0 : index
    %c0_5 = arith.constant 0 : index
    %c0_6 = arith.constant 0 : index
    %5 = vector.load %arg7[%c0_4, %c0_5, %c0_6] : memref<18x48x8xbf16, #tpu.memory_space<vmem>>, vector<1x48x8xbf16>
    tpu.vector_store %arg7[%c0_4, %c0_5, %c0_6], %3 {strides = array<i32>} : memref<18x48x8xbf16, #tpu.memory_space<vmem>>, vector<1x48x8xbf16>,
    %c17 = arith.constant 17 : index
    %c0_7 = arith.constant 0 : index
    %c0_8 = arith.constant 0 : index
    %6 = vector.load %arg7[%c17, %c0_7, %c0_8] : memref<18x48x8xbf16, #tpu.memory_space<vmem>>, vector<1x48x8xbf16>
    tpu.vector_store %arg7[%c17, %c0_7, %c0_8], %3 {strides = array<i32>} : memref<18x48x8xbf16, #tpu.memory_space<vmem>>, vector<1x48x8xbf16>,
    %c0_9 = arith.constant 0 : index
    %c0_10 = arith.constant 0 : index
    %c0_11 = arith.constant 0 : index
    %7 = vector.load %arg7[%c0_9, %c0_10, %c0_11] : memref<18x48x8xbf16, #tpu.memory_space<vmem>>, vector<18x16x8xbf16>
    tpu.vector_store %arg7[%c0_9, %c0_10, %c0_11], %4 {strides = array<i32>} : memref<18x48x8xbf16, #tpu.memory_space<vmem>>, vector<18x16x8xbf16>,
    %c0_12 = arith.constant 0 : index
    %c32 = arith.constant 32 : index
    %c0_13 = arith.constant 0 : index
    %8 = vector.load %arg7[%c0_12, %c32, %c0_13] : memref<18x48x8xbf16, #tpu.memory_space<vmem>>, vector<18x16x8xbf16>
    tpu.vector_store %arg7[%c0_12, %c32, %c0_13], %4 {strides = array<i32>} : memref<18x48x8xbf16, #tpu.memory_space<vmem>>, vector<18x16x8xbf16>,
    %cst_14 = arith.constant 0.000000e+00 : f32
    %9 = vector.broadcast %cst_14 : f32 to vector<16x1xf32>
    %c0_15 = arith.constant 0 : index
    %c0_16 = arith.constant 0 : index
    %10 = vector.load %arg9[%c0_15, %c0_16] : memref<288x1xf32, #tpu.memory_space<vmem>>, vector<16x1xf32>
    tpu.vector_store %arg9[%c0_15, %c0_16], %9 {strides = array<i32>} : memref<288x1xf32, #tpu.memory_space<vmem>>, vector<16x1xf32>,
    %cst_17 = arith.constant 0.000000e+00 : f32
    %11 = vector.broadcast %cst_17 : f32 to vector<16x1xf32>
    %c272 = arith.constant 272 : index
    %c0_18 = arith.constant 0 : index
    %12 = vector.load %arg9[%c272, %c0_18] : memref<288x1xf32, #tpu.memory_space<vmem>>, vector<16x1xf32>
    tpu.vector_store %arg9[%c272, %c0_18], %11 {strides = array<i32>} : memref<288x1xf32, #tpu.memory_space<vmem>>, vector<16x1xf32>,
    %13 = tpu.iota {dimensions = array<i32: 0>} : vector<256x1xi32>
    %c15_i32 = arith.constant 15 : i32
    %14 = vector.broadcast %c15_i32 : i32 to vector<256x1xi32>
    %15 = arith.andi %13, %14 : vector<256x1xi32>
    %c0_i32 = arith.constant 0 : i32
    %16 = vector.broadcast %c0_i32 : i32 to vector<256x1xi32>
    %17 = arith.cmpi eq, %15, %16 : vector<256x1xi32>
    %c15_i32_19 = arith.constant 15 : i32
    %18 = vector.broadcast %c15_i32_19 : i32 to vector<256x1xi32>
    %19 = arith.cmpi eq, %15, %18 : vector<256x1xi32>
    %c0_20 = arith.constant 0 : index
    %c0_21 = arith.constant 0 : index
    %20 = vector.load %arg2[%c0_20, %c0_21] : memref<72x16xbf16, #tpu.memory_space<vmem>>, vector<72x16xbf16>
    %21 = vector.shape_cast %2 : vector<256x8xf32> to vector<16x16x8xf32>
    %22 = arith.truncf %21 : vector<16x16x8xf32> to vector<16x16x8xbf16>
    %c1 = arith.constant 1 : index
    %c16 = arith.constant 16 : index
    %c0_22 = arith.constant 0 : index
    %23 = vector.load %arg7[%c1, %c16, %c0_22] : memref<18x48x8xbf16, #tpu.memory_space<vmem>>, vector<16x16x8xbf16>
    tpu.vector_store %arg7[%c1, %c16, %c0_22], %22 {strides = array<i32>} : memref<18x48x8xbf16, #tpu.memory_space<vmem>>, vector<16x16x8xbf16>,
    %c0_23 = arith.constant 0 : index
    %c15 = arith.constant 15 : index
    %c0_24 = arith.constant 0 : index
    %24 = vector.load %arg7[%c0_23, %c15, %c0_24] : memref<18x48x8xbf16, #tpu.memory_space<vmem>>, vector<18x16x8xbf16>
    %25 = vector.extract_strided_slice %24 {offsets = [0, 0, 0], sizes = [16, 16, 8], strides = [1, 1, 1]} : vector<18x16x8xbf16> to vector<16x16x8xbf16>
    %26 = vector.shape_cast %25 : vector<16x16x8xbf16> to vector<256x8xbf16>
    %c0_25 = arith.constant 0 : index
    %c0_26 = arith.constant 0 : index
    %27 = vector.load %arg8[%c0_25, %c0_26] : memref<256x72xbf16, #tpu.memory_space<vmem>>, vector<256x8xbf16>
    tpu.vector_store %arg8[%c0_25, %c0_26], %26 {strides = array<i32>} : memref<256x72xbf16, #tpu.memory_space<vmem>>, vector<256x8xbf16>,
    %28 = vector.extract_strided_slice %24 {offsets = [1, 0, 0], sizes = [16, 16, 8], strides = [1, 1, 1]} : vector<18x16x8xbf16> to vector<16x16x8xbf16>
    %29 = vector.shape_cast %28 : vector<16x16x8xbf16> to vector<256x8xbf16>
    %c0_27 = arith.constant 0 : index
    %c24 = arith.constant 24 : index
    %30 = vector.load %arg8[%c0_27, %c24] : memref<256x72xbf16, #tpu.memory_space<vmem>>, vector<256x8xbf16>
    tpu.vector_store %arg8[%c0_27, %c24], %29 {strides = array<i32>} : memref<256x72xbf16, #tpu.memory_space<vmem>>, vector<256x8xbf16>,
    %31 = vector.extract_strided_slice %24 {offsets = [2, 0, 0], sizes = [16, 16, 8], strides = [1, 1, 1]} : vector<18x16x8xbf16> to vector<16x16x8xbf16>
    %32 = vector.shape_cast %31 : vector<16x16x8xbf16> to vector<256x8xbf16>
    %c0_28 = arith.constant 0 : index
    %c48 = arith.constant 48 : index
    %33 = vector.load %arg8[%c0_28, %c48] : memref<256x72xbf16, #tpu.memory_space<vmem>>, vector<256x8xbf16>
    tpu.vector_store %arg8[%c0_28, %c48], %32 {strides = array<i32>} : memref<256x72xbf16, #tpu.memory_space<vmem>>, vector<256x8xbf16>,
    %c0_29 = arith.constant 0 : index
    %c16_30 = arith.constant 16 : index
    %c0_31 = arith.constant 0 : index
    %34 = vector.load %arg7[%c0_29, %c16_30, %c0_31] : memref<18x48x8xbf16, #tpu.memory_space<vmem>>, vector<18x16x8xbf16>
    %35 = vector.extract_strided_slice %34 {offsets = [0, 0, 0], sizes = [16, 16, 8], strides = [1, 1, 1]} : vector<18x16x8xbf16> to vector<16x16x8xbf16>
    %36 = vector.shape_cast %35 : vector<16x16x8xbf16> to vector<256x8xbf16>
    %c0_32 = arith.constant 0 : index
    %c8 = arith.constant 8 : index
    %37 = vector.load %arg8[%c0_32, %c8] : memref<256x72xbf16, #tpu.memory_space<vmem>>, vector<256x8xbf16>
    tpu.vector_store %arg8[%c0_32, %c8], %36 {strides = array<i32>} : memref<256x72xbf16, #tpu.memory_space<vmem>>, vector<256x8xbf16>,
    %38 = vector.extract_strided_slice %34 {offsets = [1, 0, 0], sizes = [16, 16, 8], strides = [1, 1, 1]} : vector<18x16x8xbf16> to vector<16x16x8xbf16>
    %39 = vector.shape_cast %38 : vector<16x16x8xbf16> to vector<256x8xbf16>
    %c0_33 = arith.constant 0 : index
    %c32_34 = arith.constant 32 : index
    %40 = vector.load %arg8[%c0_33, %c32_34] : memref<256x72xbf16, #tpu.memory_space<vmem>>, vector<256x8xbf16>
    tpu.vector_store %arg8[%c0_33, %c32_34], %39 {strides = array<i32>} : memref<256x72xbf16, #tpu.memory_space<vmem>>, vector<256x8xbf16>,
    %41 = vector.extract_strided_slice %34 {offsets = [2, 0, 0], sizes = [16, 16, 8], strides = [1, 1, 1]} : vector<18x16x8xbf16> to vector<16x16x8xbf16>
    %42 = vector.shape_cast %41 : vector<16x16x8xbf16> to vector<256x8xbf16>
    %c0_35 = arith.constant 0 : index
    %c56 = arith.constant 56 : index
    %43 = vector.load %arg8[%c0_35, %c56] : memref<256x72xbf16, #tpu.memory_space<vmem>>, vector<256x8xbf16>
    tpu.vector_store %arg8[%c0_35, %c56], %42 {strides = array<i32>} : memref<256x72xbf16, #tpu.memory_space<vmem>>, vector<256x8xbf16>,
    %c0_36 = arith.constant 0 : index
    %c17_37 = arith.constant 17 : index
    %c0_38 = arith.constant 0 : index
    %44 = vector.load %arg7[%c0_36, %c17_37, %c0_38] : memref<18x48x8xbf16, #tpu.memory_space<vmem>>, vector<18x16x8xbf16>
    %45 = vector.extract_strided_slice %44 {offsets = [0, 0, 0], sizes = [16, 16, 8], strides = [1, 1, 1]} : vector<18x16x8xbf16> to vector<16x16x8xbf16>
    %46 = vector.shape_cast %45 : vector<16x16x8xbf16> to vector<256x8xbf16>
    %c0_39 = arith.constant 0 : index
    %c16_40 = arith.constant 16 : index
    %47 = vector.load %arg8[%c0_39, %c16_40] : memref<256x72xbf16, #tpu.memory_space<vmem>>, vector<256x8xbf16>
    tpu.vector_store %arg8[%c0_39, %c16_40], %46 {strides = array<i32>} : memref<256x72xbf16, #tpu.memory_space<vmem>>, vector<256x8xbf16>,
    %48 = vector.extract_strided_slice %44 {offsets = [1, 0, 0], sizes = [16, 16, 8], strides = [1, 1, 1]} : vector<18x16x8xbf16> to vector<16x16x8xbf16>
    %49 = vector.shape_cast %48 : vector<16x16x8xbf16> to vector<256x8xbf16>
    %c0_41 = arith.constant 0 : index
    %c40 = arith.constant 40 : index
    %50 = vector.load %arg8[%c0_41, %c40] : memref<256x72xbf16, #tpu.memory_space<vmem>>, vector<256x8xbf16>
    tpu.vector_store %arg8[%c0_41, %c40], %49 {strides = array<i32>} : memref<256x72xbf16, #tpu.memory_space<vmem>>, vector<256x8xbf16>,
    %51 = vector.extract_strided_slice %44 {offsets = [2, 0, 0], sizes = [16, 16, 8], strides = [1, 1, 1]} : vector<18x16x8xbf16> to vector<16x16x8xbf16>
    %52 = vector.shape_cast %51 : vector<16x16x8xbf16> to vector<256x8xbf16>
    %c0_42 = arith.constant 0 : index
    %c64 = arith.constant 64 : index
    %53 = vector.load %arg8[%c0_42, %c64] : memref<256x72xbf16, #tpu.memory_space<vmem>>, vector<256x8xbf16>
    tpu.vector_store %arg8[%c0_42, %c64], %52 {strides = array<i32>} : memref<256x72xbf16, #tpu.memory_space<vmem>>, vector<256x8xbf16>,
    %c0_43 = arith.constant 0 : index
    %c0_44 = arith.constant 0 : index
    %54 = vector.load %arg8[%c0_43, %c0_44] : memref<256x72xbf16, #tpu.memory_space<vmem>>, vector<256x72xbf16>
    %cst_45 = arith.constant dense<0.000000e+00> : vector<256x16xf32>
    %55 = tpu.matmul %54, %20, %cst_45 {dimension_numbers = #tpu.dot_dimension_numbers<[1], [0], [0], [1], [0, 0, 1, 1], [], []>} : vector<256x72xbf16>, vector<72x16xbf16>, vector<256x16xf32> -> vector<256x16xf32>
    %56 = vector.extract_strided_slice %55 {offsets = [0, 0], sizes = [256, 8], strides = [1, 1]} : vector<256x16xf32> to vector<256x8xf32>
    %57 = vector.extract_strided_slice %55 {offsets = [0, 8], sizes = [256, 8], strides = [1, 1]} : vector<256x16xf32> to vector<256x8xf32>
    %58 = arith.maximumf %56, %57 : vector<256x8xf32>
    %59 = arith.mulf %2, %2 : vector<256x8xf32>
    %cst_46 = arith.constant dense<0.000000e+00> : vector<256xf32>
    %60 = vector.multi_reduction <add>, %59, %cst_46 [1] : vector<256x8xf32> to vector<256xf32>
    %61 = vector.shape_cast %60 : vector<256xf32> to vector<256x1xf32>
    %c16_47 = arith.constant 16 : index
    %c0_48 = arith.constant 0 : index
    %62 = vector.load %arg9[%c16_47, %c0_48] : memref<288x1xf32, #tpu.memory_space<vmem>>, vector<256x1xf32>
    tpu.vector_store %arg9[%c16_47, %c0_48], %61 {strides = array<i32>} : memref<288x1xf32, #tpu.memory_space<vmem>>, vector<256x1xf32>,
    %c15_49 = arith.constant 15 : index
    %c0_50 = arith.constant 0 : index
    %63 = vector.load %arg9[%c15_49, %c0_50] : memref<288x1xf32, #tpu.memory_space<vmem>>, vector<256x1xf32>
    %cst_51 = arith.constant 0.000000e+00 : f32
    %64 = vector.broadcast %cst_51 : f32 to vector<256x1xf32>
    %65 = arith.select %17, %64, %63 : vector<256x1xi1>, vector<256x1xf32>
    %c17_52 = arith.constant 17 : index
    %c0_53 = arith.constant 0 : index
    %66 = vector.load %arg9[%c17_52, %c0_53] : memref<288x1xf32, #tpu.memory_space<vmem>>, vector<256x1xf32>
    %cst_54 = arith.constant 0.000000e+00 : f32
    %67 = vector.broadcast %cst_54 : f32 to vector<256x1xf32>
    %68 = arith.select %19, %67, %66 : vector<256x1xi1>, vector<256x1xf32>
    %69 = arith.addf %61, %65 : vector<256x1xf32>
    %70 = arith.addf %69, %68 : vector<256x1xf32>
    %c16_55 = arith.constant 16 : index
    %c0_56 = arith.constant 0 : index
    %71 = vector.load %arg9[%c16_55, %c0_56] : memref<288x1xf32, #tpu.memory_space<vmem>>, vector<256x1xf32>
    tpu.vector_store %arg9[%c16_55, %c0_56], %70 {strides = array<i32>} : memref<288x1xf32, #tpu.memory_space<vmem>>, vector<256x1xf32>,
    %c0_57 = arith.constant 0 : index
    %c0_58 = arith.constant 0 : index
    %72 = vector.load %arg9[%c0_57, %c0_58] : memref<288x1xf32, #tpu.memory_space<vmem>>, vector<256x1xf32>
    %c32_59 = arith.constant 32 : index
    %c0_60 = arith.constant 0 : index
    %73 = vector.load %arg9[%c32_59, %c0_60] : memref<288x1xf32, #tpu.memory_space<vmem>>, vector<256x1xf32>
    %74 = arith.addf %70, %72 : vector<256x1xf32>
    %75 = arith.addf %74, %73 : vector<256x1xf32>
    %cst_61 = arith.constant 9.99999997E-7 : f32
    %76 = vector.broadcast %cst_61 : f32 to vector<256x1xf32>
    %77 = arith.addf %75, %76 : vector<256x1xf32>
    %78 = math.rsqrt %77 : vector<256x1xf32>
    %cst_62 = arith.constant 11.7851133 : f32
    %79 = vector.broadcast %cst_62 : f32 to vector<256x1xf32>
    %80 = arith.mulf %78, %79 : vector<256x1xf32>
    %81 = math.absf %58 : vector<256x8xf32>
    %82 = arith.mulf %58, %81 : vector<256x8xf32>
    %83 = vector.broadcast %80 : vector<256x1xf32> to vector<256x8xf32>
    %84 = arith.mulf %82, %83 : vector<256x8xf32>
    %c0_63 = arith.constant 0 : index
    %c0_64 = arith.constant 0 : index
    %85 = vector.load %arg4[%c0_63, %c0_64] : memref<1x8xf32, #tpu.memory_space<vmem>>, vector<1x8xf32>
    %cst_65 = arith.constant dense<0.000000e+00> : vector<256xf32>
    %86 = vector.multi_reduction <add>, %84, %cst_65 [1] : vector<256x8xf32> to vector<256xf32>
    %87 = vector.shape_cast %86 : vector<256xf32> to vector<256x1xf32>
    %cst_66 = arith.constant 8.000000e+00 : f32
    %88 = vector.broadcast %cst_66 : f32 to vector<256x1xf32>
    %89 = arith.divf %87, %88 : vector<256x1xf32>
    %90 = vector.broadcast %89 : vector<256x1xf32> to vector<256x8xf32>
    %91 = arith.subf %84, %90 : vector<256x8xf32>
    %92 = arith.mulf %91, %91 : vector<256x8xf32>
    %cst_67 = arith.constant dense<0.000000e+00> : vector<256xf32>
    %93 = vector.multi_reduction <add>, %92, %cst_67 [1] : vector<256x8xf32> to vector<256xf32>
    %94 = vector.shape_cast %93 : vector<256xf32> to vector<256x1xf32>
    %cst_68 = arith.constant 8.000000e+00 : f32
    %95 = vector.broadcast %cst_68 : f32 to vector<256x1xf32>
    %96 = arith.divf %94, %95 : vector<256x1xf32>
    %cst_69 = arith.constant 9.99999974E-6 : f32
    %97 = vector.broadcast %cst_69 : f32 to vector<256x1xf32>
    %98 = arith.addf %96, %97 : vector<256x1xf32>
    %99 = math.rsqrt %98 : vector<256x1xf32>
    %100 = vector.broadcast %99 : vector<256x1xf32> to vector<256x8xf32>
    %101 = arith.mulf %91, %100 : vector<256x8xf32>
    %102 = vector.broadcast %85 : vector<1x8xf32> to vector<256x8xf32>
    %103 = arith.mulf %101, %102 : vector<256x8xf32>
    %c0_70 = arith.constant 0 : index
    %c0_71 = arith.constant 0 : index
    %104 = vector.load %arg3[%c0_70, %c0_71] : memref<72x16xbf16, #tpu.memory_space<vmem>>, vector<72x16xbf16>
    %105 = vector.shape_cast %103 : vector<256x8xf32> to vector<16x16x8xf32>
    %106 = arith.truncf %105 : vector<16x16x8xf32> to vector<16x16x8xbf16>
    %c1_72 = arith.constant 1 : index
    %c16_73 = arith.constant 16 : index
    %c0_74 = arith.constant 0 : index
    %107 = vector.load %arg7[%c1_72, %c16_73, %c0_74] : memref<18x48x8xbf16, #tpu.memory_space<vmem>>, vector<16x16x8xbf16>
    tpu.vector_store %arg7[%c1_72, %c16_73, %c0_74], %106 {strides = array<i32>} : memref<18x48x8xbf16, #tpu.memory_space<vmem>>, vector<16x16x8xbf16>,
    %c0_75 = arith.constant 0 : index
    %c15_76 = arith.constant 15 : index
    %c0_77 = arith.constant 0 : index
    %108 = vector.load %arg7[%c0_75, %c15_76, %c0_77] : memref<18x48x8xbf16, #tpu.memory_space<vmem>>, vector<18x16x8xbf16>
    %109 = vector.extract_strided_slice %108 {offsets = [0, 0, 0], sizes = [16, 16, 8], strides = [1, 1, 1]} : vector<18x16x8xbf16> to vector<16x16x8xbf16>
    %110 = vector.shape_cast %109 : vector<16x16x8xbf16> to vector<256x8xbf16>
    %c0_78 = arith.constant 0 : index
    %c0_79 = arith.constant 0 : index
    %111 = vector.load %arg8[%c0_78, %c0_79] : memref<256x72xbf16, #tpu.memory_space<vmem>>, vector<256x8xbf16>
    tpu.vector_store %arg8[%c0_78, %c0_79], %110 {strides = array<i32>} : memref<256x72xbf16, #tpu.memory_space<vmem>>, vector<256x8xbf16>,
    %112 = vector.extract_strided_slice %108 {offsets = [1, 0, 0], sizes = [16, 16, 8], strides = [1, 1, 1]} : vector<18x16x8xbf16> to vector<16x16x8xbf16>
    %113 = vector.shape_cast %112 : vector<16x16x8xbf16> to vector<256x8xbf16>
    %c0_80 = arith.constant 0 : index
    %c24_81 = arith.constant 24 : index
    %114 = vector.load %arg8[%c0_80, %c24_81] : memref<256x72xbf16, #tpu.memory_space<vmem>>, vector<256x8xbf16>
    tpu.vector_store %arg8[%c0_80, %c24_81], %113 {strides = array<i32>} : memref<256x72xbf16, #tpu.memory_space<vmem>>, vector<256x8xbf16>,
    %115 = vector.extract_strided_slice %108 {offsets = [2, 0, 0], sizes = [16, 16, 8], strides = [1, 1, 1]} : vector<18x16x8xbf16> to vector<16x16x8xbf16>
    %116 = vector.shape_cast %115 : vector<16x16x8xbf16> to vector<256x8xbf16>
    %c0_82 = arith.constant 0 : index
    %c48_83 = arith.constant 48 : index
    %117 = vector.load %arg8[%c0_82, %c48_83] : memref<256x72xbf16, #tpu.memory_space<vmem>>, vector<256x8xbf16>
    tpu.vector_store %arg8[%c0_82, %c48_83], %116 {strides = array<i32>} : memref<256x72xbf16, #tpu.memory_space<vmem>>, vector<256x8xbf16>,
    %c0_84 = arith.constant 0 : index
    %c16_85 = arith.constant 16 : index
    %c0_86 = arith.constant 0 : index
    %118 = vector.load %arg7[%c0_84, %c16_85, %c0_86] : memref<18x48x8xbf16, #tpu.memory_space<vmem>>, vector<18x16x8xbf16>
    %119 = vector.extract_strided_slice %118 {offsets = [0, 0, 0], sizes = [16, 16, 8], strides = [1, 1, 1]} : vector<18x16x8xbf16> to vector<16x16x8xbf16>
    %120 = vector.shape_cast %119 : vector<16x16x8xbf16> to vector<256x8xbf16>
    %c0_87 = arith.constant 0 : index
    %c8_88 = arith.constant 8 : index
    %121 = vector.load %arg8[%c0_87, %c8_88] : memref<256x72xbf16, #tpu.memory_space<vmem>>, vector<256x8xbf16>
    tpu.vector_store %arg8[%c0_87, %c8_88], %120 {strides = array<i32>} : memref<256x72xbf16, #tpu.memory_space<vmem>>, vector<256x8xbf16>,
    %122 = vector.extract_strided_slice %118 {offsets = [1, 0, 0], sizes = [16, 16, 8], strides = [1, 1, 1]} : vector<18x16x8xbf16> to vector<16x16x8xbf16>
    %123 = vector.shape_cast %122 : vector<16x16x8xbf16> to vector<256x8xbf16>
    %c0_89 = arith.constant 0 : index
    %c32_90 = arith.constant 32 : index
    %124 = vector.load %arg8[%c0_89, %c32_90] : memref<256x72xbf16, #tpu.memory_space<vmem>>, vector<256x8xbf16>
    tpu.vector_store %arg8[%c0_89, %c32_90], %123 {strides = array<i32>} : memref<256x72xbf16, #tpu.memory_space<vmem>>, vector<256x8xbf16>,
    %125 = vector.extract_strided_slice %118 {offsets = [2, 0, 0], sizes = [16, 16, 8], strides = [1, 1, 1]} : vector<18x16x8xbf16> to vector<16x16x8xbf16>
    %126 = vector.shape_cast %125 : vector<16x16x8xbf16> to vector<256x8xbf16>
    %c0_91 = arith.constant 0 : index
    %c56_92 = arith.constant 56 : index
    %127 = vector.load %arg8[%c0_91, %c56_92] : memref<256x72xbf16, #tpu.memory_space<vmem>>, vector<256x8xbf16>
    tpu.vector_store %arg8[%c0_91, %c56_92], %126 {strides = array<i32>} : memref<256x72xbf16, #tpu.memory_space<vmem>>, vector<256x8xbf16>,
    %c0_93 = arith.constant 0 : index
    %c17_94 = arith.constant 17 : index
    %c0_95 = arith.constant 0 : index
    %128 = vector.load %arg7[%c0_93, %c17_94, %c0_95] : memref<18x48x8xbf16, #tpu.memory_space<vmem>>, vector<18x16x8xbf16>
    %129 = vector.extract_strided_slice %128 {offsets = [0, 0, 0], sizes = [16, 16, 8], strides = [1, 1, 1]} : vector<18x16x8xbf16> to vector<16x16x8xbf16>
    %130 = vector.shape_cast %129 : vector<16x16x8xbf16> to vector<256x8xbf16>
    %c0_96 = arith.constant 0 : index
    %c16_97 = arith.constant 16 : index
    %131 = vector.load %arg8[%c0_96, %c16_97] : memref<256x72xbf16, #tpu.memory_space<vmem>>, vector<256x8xbf16>
    tpu.vector_store %arg8[%c0_96, %c16_97], %130 {strides = array<i32>} : memref<256x72xbf16, #tpu.memory_space<vmem>>, vector<256x8xbf16>,
    %132 = vector.extract_strided_slice %128 {offsets = [1, 0, 0], sizes = [16, 16, 8], strides = [1, 1, 1]} : vector<18x16x8xbf16> to vector<16x16x8xbf16>
    %133 = vector.shape_cast %132 : vector<16x16x8xbf16> to vector<256x8xbf16>
    %c0_98 = arith.constant 0 : index
    %c40_99 = arith.constant 40 : index
    %134 = vector.load %arg8[%c0_98, %c40_99] : memref<256x72xbf16, #tpu.memory_space<vmem>>, vector<256x8xbf16>
    tpu.vector_store %arg8[%c0_98, %c40_99], %133 {strides = array<i32>} : memref<256x72xbf16, #tpu.memory_space<vmem>>, vector<256x8xbf16>,
    %135 = vector.extract_strided_slice %128 {offsets = [2, 0, 0], sizes = [16, 16, 8], strides = [1, 1, 1]} : vector<18x16x8xbf16> to vector<16x16x8xbf16>
    %136 = vector.shape_cast %135 : vector<16x16x8xbf16> to vector<256x8xbf16>
    %c0_100 = arith.constant 0 : index
    %c64_101 = arith.constant 64 : index
    %137 = vector.load %arg8[%c0_100, %c64_101] : memref<256x72xbf16, #tpu.memory_space<vmem>>, vector<256x8xbf16>
    tpu.vector_store %arg8[%c0_100, %c64_101], %136 {strides = array<i32>} : memref<256x72xbf16, #tpu.memory_space<vmem>>, vector<256x8xbf16>,
    %c0_102 = arith.constant 0 : index
    %c0_103 = arith.constant 0 : index
    %138 = vector.load %arg8[%c0_102, %c0_103] : memref<256x72xbf16, #tpu.memory_space<vmem>>, vector<256x72xbf16>
    %cst_104 = arith.constant dense<0.000000e+00> : vector<256x16xf32>
    %139 = tpu.matmul %138, %104, %cst_104 {dimension_numbers = #tpu.dot_dimension_numbers<[1], [0], [0], [1], [0, 0, 1, 1], [], []>} : vector<256x72xbf16>, vector<72x16xbf16>, vector<256x16xf32> -> vector<256x16xf32>
    %140 = vector.extract_strided_slice %139 {offsets = [0, 0], sizes = [256, 8], strides = [1, 1]} : vector<256x16xf32> to vector<256x8xf32>
    %141 = vector.extract_strided_slice %139 {offsets = [0, 8], sizes = [256, 8], strides = [1, 1]} : vector<256x16xf32> to vector<256x8xf32>
    %142 = arith.maximumf %140, %141 : vector<256x8xf32>
    %143 = arith.mulf %103, %103 : vector<256x8xf32>
    %cst_105 = arith.constant dense<0.000000e+00> : vector<256xf32>
    %144 = vector.multi_reduction <add>, %143, %cst_105 [1] : vector<256x8xf32> to vector<256xf32>
    %145 = vector.shape_cast %144 : vector<256xf32> to vector<256x1xf32>
    %c16_106 = arith.constant 16 : index
    %c0_107 = arith.constant 0 : index
    %146 = vector.load %arg9[%c16_106, %c0_107] : memref<288x1xf32, #tpu.memory_space<vmem>>, vector<256x1xf32>
    tpu.vector_store %arg9[%c16_106, %c0_107], %145 {strides = array<i32>} : memref<288x1xf32, #tpu.memory_space<vmem>>, vector<256x1xf32>,
    %c15_108 = arith.constant 15 : index
    %c0_109 = arith.constant 0 : index
    %147 = vector.load %arg9[%c15_108, %c0_109] : memref<288x1xf32, #tpu.memory_space<vmem>>, vector<256x1xf32>
    %cst_110 = arith.constant 0.000000e+00 : f32
    %148 = vector.broadcast %cst_110 : f32 to vector<256x1xf32>
    %149 = arith.select %17, %148, %147 : vector<256x1xi1>, vector<256x1xf32>
    %c17_111 = arith.constant 17 : index
    %c0_112 = arith.constant 0 : index
    %150 = vector.load %arg9[%c17_111, %c0_112] : memref<288x1xf32, #tpu.memory_space<vmem>>, vector<256x1xf32>
    %cst_113 = arith.constant 0.000000e+00 : f32
    %151 = vector.broadcast %cst_113 : f32 to vector<256x1xf32>
    %152 = arith.select %19, %151, %150 : vector<256x1xi1>, vector<256x1xf32>
    %153 = arith.addf %145, %149 : vector<256x1xf32>
    %154 = arith.addf %153, %152 : vector<256x1xf32>
    %c16_114 = arith.constant 16 : index
    %c0_115 = arith.constant 0 : index
    %155 = vector.load %arg9[%c16_114, %c0_115] : memref<288x1xf32, #tpu.memory_space<vmem>>, vector<256x1xf32>
    tpu.vector_store %arg9[%c16_114, %c0_115], %154 {strides = array<i32>} : memref<288x1xf32, #tpu.memory_space<vmem>>, vector<256x1xf32>,
    %c0_116 = arith.constant 0 : index
    %c0_117 = arith.constant 0 : index
    %156 = vector.load %arg9[%c0_116, %c0_117] : memref<288x1xf32, #tpu.memory_space<vmem>>, vector<256x1xf32>
    %c32_118 = arith.constant 32 : index
    %c0_119 = arith.constant 0 : index
    %157 = vector.load %arg9[%c32_118, %c0_119] : memref<288x1xf32, #tpu.memory_space<vmem>>, vector<256x1xf32>
    %158 = arith.addf %154, %156 : vector<256x1xf32>
    %159 = arith.addf %158, %157 : vector<256x1xf32>
    %cst_120 = arith.constant 9.99999997E-7 : f32
    %160 = vector.broadcast %cst_120 : f32 to vector<256x1xf32>
    %161 = arith.addf %159, %160 : vector<256x1xf32>
    %162 = math.rsqrt %161 : vector<256x1xf32>
    %cst_121 = arith.constant 11.7851133 : f32
    %163 = vector.broadcast %cst_121 : f32 to vector<256x1xf32>
    %164 = arith.mulf %162, %163 : vector<256x1xf32>
    %165 = math.absf %142 : vector<256x8xf32>
    %166 = arith.mulf %142, %165 : vector<256x8xf32>
    %167 = vector.broadcast %164 : vector<256x1xf32> to vector<256x8xf32>
    %168 = arith.mulf %166, %167 : vector<256x8xf32>
    %c0_122 = arith.constant 0 : index
    %c0_123 = arith.constant 0 : index
    %169 = vector.load %arg5[%c0_122, %c0_123] : memref<1x8xf32, #tpu.memory_space<vmem>>, vector<1x8xf32>
    %cst_124 = arith.constant dense<0.000000e+00> : vector<256xf32>
    %170 = vector.multi_reduction <add>, %168, %cst_124 [1] : vector<256x8xf32> to vector<256xf32>
    %171 = vector.shape_cast %170 : vector<256xf32> to vector<256x1xf32>
    %cst_125 = arith.constant 8.000000e+00 : f32
    %172 = vector.broadcast %cst_125 : f32 to vector<256x1xf32>
    %173 = arith.divf %171, %172 : vector<256x1xf32>
    %174 = vector.broadcast %173 : vector<256x1xf32> to vector<256x8xf32>
    %175 = arith.subf %168, %174 : vector<256x8xf32>
    %176 = arith.mulf %175, %175 : vector<256x8xf32>
    %cst_126 = arith.constant dense<0.000000e+00> : vector<256xf32>
    %177 = vector.multi_reduction <add>, %176, %cst_126 [1] : vector<256x8xf32> to vector<256xf32>
    %178 = vector.shape_cast %177 : vector<256xf32> to vector<256x1xf32>
    %cst_127 = arith.constant 8.000000e+00 : f32
    %179 = vector.broadcast %cst_127 : f32 to vector<256x1xf32>
    %180 = arith.divf %178, %179 : vector<256x1xf32>
    %cst_128 = arith.constant 9.99999974E-6 : f32
    %181 = vector.broadcast %cst_128 : f32 to vector<256x1xf32>
    %182 = arith.addf %180, %181 : vector<256x1xf32>
    %183 = math.rsqrt %182 : vector<256x1xf32>
    %184 = vector.broadcast %183 : vector<256x1xf32> to vector<256x8xf32>
    %185 = arith.mulf %175, %184 : vector<256x8xf32>
    %186 = vector.broadcast %169 : vector<1x8xf32> to vector<256x8xf32>
    %187 = arith.mulf %185, %186 : vector<256x8xf32>
    %188 = vector.shape_cast %187 : vector<256x8xf32> to vector<16x16x8xf32>
    %189 = arith.addf %188, %1 : vector<16x16x8xf32>
    %c0_129 = arith.constant 0 : index
    %c0_130 = arith.constant 0 : index
    %c0_131 = arith.constant 0 : index
    %c0_132 = arith.constant 0 : index
    %190 = vector.load %arg6[%c0_129, %c0_130, %c0_131, %c0_132] : memref<1x16x16x8xf32, #tpu.memory_space<vmem>>, vector<1x16x16x8xf32>
    %191 = vector.shape_cast %190 : vector<1x16x16x8xf32> to vector<16x16x8xf32>
    %192 = vector.shape_cast %189 : vector<16x16x8xf32> to vector<1x16x16x8xf32>
    tpu.vector_store %arg6[%c0_129, %c0_130, %c0_131, %c0_132], %192 {strides = array<i32>} : memref<1x16x16x8xf32, #tpu.memory_space<vmem>>, vector<1x16x16x8xf32>,
    return
  }
  func.func @transform_0(%arg0: i32) -> (i32, i32, i32, i32) {
    %c0_i32 = arith.constant 0 : i32
    %c0_i32_0 = arith.constant 0 : i32
    %c0_i32_1 = arith.constant 0 : i32
    %c0_i32_2 = arith.constant 0 : i32
    return %arg0, %c0_i32, %c0_i32_0, %c0_i32_1 : i32, i32, i32, i32
  }
  func.func @transform_1(%arg0: i32) -> (i32, i32) {
    %c0_i32 = arith.constant 0 : i32
    %c0_i32_0 = arith.constant 0 : i32
    %c0_i32_1 = arith.constant 0 : i32
    return %c0_i32, %c0_i32_0 : i32, i32
  }
  func.func @transform_2(%arg0: i32) -> (i32, i32) {
    %c0_i32 = arith.constant 0 : i32
    %c0_i32_0 = arith.constant 0 : i32
    %c0_i32_1 = arith.constant 0 : i32
    return %c0_i32, %c0_i32_0 : i32, i32
  }
  func.func @transform_3(%arg0: i32) -> (i32, i32) {
    %c0_i32 = arith.constant 0 : i32
    %c0_i32_0 = arith.constant 0 : i32
    %c0_i32_1 = arith.constant 0 : i32
    return %c0_i32, %c0_i32_0 : i32, i32
  }
  func.func @transform_4(%arg0: i32) -> (i32, i32) {
    %c0_i32 = arith.constant 0 : i32
    %c0_i32_0 = arith.constant 0 : i32
    %c0_i32_1 = arith.constant 0 : i32
    return %c0_i32, %c0_i32_0 : i32, i32
  }
  func.func @transform_5(%arg0: i32) -> (i32, i32, i32, i32) {
    %c0_i32 = arith.constant 0 : i32
    %c0_i32_0 = arith.constant 0 : i32
    %c0_i32_1 = arith.constant 0 : i32
    %c0_i32_2 = arith.constant 0 : i32
    return %arg0, %c0_i32, %c0_i32_0, %c0_i32_1 : i32, i32, i32, i32
  }
}

</mosaic_0001>

<bundles_post_ra>
// kernel: basic_block_nhwc.1
= control target key start
LH: loop header
LB: loop body
LE: loop exit
PB: predicated region body
PF: predicated region fallthrough
CT: control target
= control target key end

     0   :  { %s9562_s18 = smov 0   ;;  %s14938_s0 = inlined_call_operand.vmem [shape: f32[2,16,16,8], index: 0, kind: input, shape index: {}]   ;;  %s14939_s1 = inlined_call_operand.vmem [shape: bf16[72,16], index: 1, kind: input, shape index: {}]   ;;  %s14940_s2 = inlined_call_operand.vmem [shape: bf16[72,16], index: 2, kind: input, shape index: {}]   ;;  %s14941_s3 = inlined_call_operand.vmem [shape: f32[1,8], index: 3, kind: input, shape index: {}]   ;;  %s14942_s4 = inlined_call_operand.vmem [shape: f32[1,8], index: 4, kind: input, shape index: {}]   ;;  %s14943_s5 = inlined_call_operand.vmem [shape: f32[2,16,16,8], index: 5, kind: output, shape index: {}]  }
   0x1 LB: > { %s8750_s19 = sadd.s32 4294967295, %s9519_s18   ;;  %p8754_p0 = scmp.ge.s32.totalorder %s9519_s18, 1  ;;  %s9519_s18 = sphi %s9562_s18, %s15_s18  }
   0x2   : > { %p187_p1 = scmp.lt.s32.totalorder %s9519_s18, 3 }
   0x4   : > { %p188_p2 = pnand %p8754_p0, %p187_p1 }
   0x6   : > { %191 = sbr.rel (%p188_p2) target bundleno = 3151 (0xc4f), region = 40 }
   0xb   : > { %p9572_p3 = scmp.lt.s32.totalorder %s8750_s19, 1  ;;  %vm14982_vm0 = vcmask 60416   ;;  %v9521_v0 = vmov 0   ;;  %vm702_vm1 = vsmask.f32 256  ;;  %s9522_s25 = smov 24  }
   0xc   : > { %277 = vst.msk [vmem:[#allocation2 + $0x34] sm:$0xf] %vm14982_vm0, %v9521_v0  ;;  %260 = vst.msk [vmem:[#allocation2 + $0x4] sm:$0xf] %vm14982_vm0, %v9521_v0  ;;  %9150 = vset.pattern.permute.xlu1 %v9521_v0  ;;  %9151 = vset.pattern.permute.xlu0 %v9521_v0  ;;  %vm703_vm2 = vsmask.f32 4368 }
   0xd   : > { %261 = vst.msk [vmem:[#allocation2 + $0x8] sm:$0xf] %vm14982_vm0, %v9521_v0  ;;  %262 = vst.msk [vmem:[#allocation2 + $0xc] sm:$0xf] %vm14982_vm0, %v9521_v0  ;;  %s15965_s19 = smov (!%p9572_p3, %s8750_s19), 1  ;;  %s9523_s26 = smov 48  }
   0xe   : > { %263 = vst.msk [vmem:[#allocation2 + $0x10] sm:$0xf] %vm14982_vm0, %v9521_v0  ;;  %267 = vst.msk [vmem:[#allocation2 + $0x19c] sm:$0xf] %vm14982_vm0, %v9521_v0  ;;  %s8937_s21 = sshll.u32 %s15965_s19, 8  ;;  %vm14977_vm4 = vcmask 257216  }
   0xf   : > { %268 = vst.msk [vmem:[#allocation2 + $0x1a0] sm:$0xf] %vm14982_vm0, %v9521_v0  ;;  %269 = vst.msk [vmem:[#allocation2 + $0x1a4] sm:$0xf] %vm14982_vm0, %v9521_v0  ;;  %s9632_s24 = scalar_lea.vmem %s14938_s0, %s8937_s21  ;;  %s9524_s27 = smov 8   ;;  %vm14976_vm5 = vcmask 454016  }
  0x10   : > { %270 = vst.msk [vmem:[#allocation2 + $0x1a8] sm:$0xf] %vm14982_vm0, %v9521_v0  ;;  %275 = vst.msk [vmem:[#allocation2 + $0x1c] sm:$0xf] %vm14982_vm0, %v9521_v0  ;;  %v228_v1 = vld [vmem:[%s9632_s24 + $0x10] sm:$0xff]  ;;  %v226_v2 = vld [vmem:[%s9632_s24] sm:$0xff]  ;;  %s14776_s14 = scalar_lea.vmem %s14943_s5, %s8937_s21 }
  0x11   : > { %279 = vst.msk [vmem:[#allocation2 + $0x4c] sm:$0xf] %vm14982_vm0, %v9521_v0  ;;  %281 = vst.msk [vmem:[#allocation2 + $0x64] sm:$0xf] %vm14982_vm0, %v9521_v0  ;;  %v229_v3 = vld [vmem:[%s9632_s24 + $0x18] sm:$0xff]  ;;  %v8941_v4 = vpack.c.bf16 %v228_v1, %v228_v1  ;;  %v8939_v5 = vpack.c.bf16 %v226_v2, %v226_v2  ;;  %v227_v7 = vld [vmem:[%s9632_s24 + $0x8] sm:$0xff] }
  0x12   : > { %283 = vst.msk [vmem:[#allocation2 + $0x7c] sm:$0xf] %vm14982_vm0, %v9521_v0  ;;  %285 = vst.msk [vmem:[#allocation2 + $0x94] sm:$0xf] %vm14982_vm0, %v9521_v0  ;;  %v8942_v6 = vpack.c.bf16 %v229_v3, %v229_v3  ;;  %v230_v8 = vld [vmem:[%s9632_s24 + $0x20] sm:$0xff]  ;;  %v231_v9 = vld [vmem:[%s9632_s24 + $0x28] sm:$0xff]  ;;  %v8940_v12 = vpack.c.bf16 %v227_v7, %v227_v7 }
  0x13   : > { %287 = vst.msk [vmem:[#allocation2 + $0xac] sm:$0xf] %vm14982_vm0, %v9521_v0  ;;  %289 = vst.msk [vmem:[#allocation2 + $0xc4] sm:$0xf] %vm14982_vm0, %v9521_v0  ;;  %v654_v10 = vld [vmem:[#allocation2 + $0x34] sm:$0x8]  ;;  %v8943_v13 = vpack.c.bf16 %v230_v8, %v230_v8  ;;  %v8944_v14 = vpack.c.bf16 %v231_v9, %v231_v9 }
  0x14   : > { %291 = vst.msk [vmem:[#allocation2 + $0xdc] sm:$0xf] %vm14982_vm0, %v9521_v0  ;;  %293 = vst.msk [vmem:[#allocation2 + $0xf4] sm:$0xf] %vm14982_vm0, %v9521_v0  ;;  %v750_v16 = vshrl.u32 %v654_v10, 16  ;;  %v232_v19 = vld [vmem:[%s9632_s24 + $0x30] sm:$0xff] }
  0x15   : > { %295 = vst.msk [vmem:[#allocation2 + $0x10c] sm:$0xf] %vm14982_vm0, %v9521_v0  ;;  %297 = vst.msk [vmem:[#allocation2 + $0x124] sm:$0xf] %vm14982_vm0, %v9521_v0  ;;  %v233_v20 = vld [vmem:[%s9632_s24 + $0x38] sm:$0xff]  ;;  %v234_v21 = vld [vmem:[%s9632_s24 + $0x40] sm:$0xff]  ;;  %v8945_v22 = vpack.c.bf16 %v232_v19, %v232_v19 }
  0x16   : > { %299 = vst.msk [vmem:[#allocation2 + $0x13c] sm:$0xf] %vm14982_vm0, %v9521_v0  ;;  %301 = vst.msk [vmem:[#allocation2 + $0x154] sm:$0xf] %vm14982_vm0, %v9521_v0  ;;  %v8946_v23 = vpack.c.bf16 %v233_v20, %v233_v20  ;;  %v235_v25 = vld [vmem:[%s9632_s24 + $0x48] sm:$0xff]  ;;  %v8947_v26 = vpack.c.bf16 %v234_v21, %v234_v21  ;;  %v9650_v28 = vrot.slane %v750_v16, 11 }
  0x17   : > { %303 = vst.msk [vmem:[#allocation2 + $0x16c] sm:$0xf] %vm14982_vm0, %v9521_v0  ;;  %305 = vst.msk [vmem:[#allocation2 + $0x184] sm:$0xf] %vm14982_vm0, %v9521_v0  ;;  %v651_v11 = vld [vmem:[#allocation2 + $0x1c] sm:$0x8]  ;;  %v8948_v34 = vpack.c.bf16 %v235_v25, %v235_v25 }
  0x18   : > { %310 = vst.msk [vmem:[#allocation2 + $0x28] sm:$0xf] %vm14982_vm0, %v9521_v0  ;;  %312 = vst.msk [vmem:[#allocation2 + $0x40] sm:$0xf] %vm14982_vm0, %v9521_v0  ;;  %v657_v15 = vld [vmem:[#allocation2 + $0x4c] sm:$0x8] }
  0x19   : > { %314 = vst.msk [vmem:[#allocation2 + $0x58] sm:$0xf] %vm14982_vm0, %v9521_v0  ;;  %316 = vst.msk [vmem:[#allocation2 + $0x70] sm:$0xf] %vm14982_vm0, %v9521_v0  ;;  %v728_v17 = vshrl.u32 %v651_v11, 16  ;;  %v772_v18 = vshrl.u32 %v657_v15, 16 }
  0x1a   : > { %318 = vst.msk [vmem:[#allocation2 + $0x88] sm:$0xf] %vm14982_vm0, %v9521_v0  ;;  %320 = vst.msk [vmem:[#allocation2 + $0xa0] sm:$0xf] %vm14982_vm0, %v9521_v0  ;;  %v660_v24 = vld [vmem:[#allocation2 + $0x64] sm:$0x8] }
  0x1b   : > { %322 = vst.msk [vmem:[#allocation2 + $0xb8] sm:$0xf] %vm14982_vm0, %v9521_v0  ;;  %324 = vst.msk [vmem:[#allocation2 + $0xd0] sm:$0xf] %vm14982_vm0, %v9521_v0  ;;  %v663_v27 = vld [vmem:[#allocation2 + $0x7c] sm:$0x8] }
  0x1c   : > { %326 = vst.msk [vmem:[#allocation2 + $0xe8] sm:$0xf] %vm14982_vm0, %v9521_v0  ;;  %328 = vst.msk [vmem:[#allocation2 + $0x100] sm:$0xf] %vm14982_vm0, %v9521_v0  ;;  %v9652_v29 = vrot.slane %v728_v17, 11  ;;  %v9654_v30 = vrot.slane %v772_v18, 11 }
  0x1d   : > { %330 = vst.msk [vmem:[#allocation2 + $0x118] sm:$0xf] %vm14982_vm0, %v9521_v0  ;;  %332 = vst.msk [vmem:[#allocation2 + $0x130] sm:$0xf] %vm14982_vm0, %v9521_v0  ;;  %v794_v31 = vshrl.u32 %v660_v24, 16  ;;  %v236_v32 = vld [vmem:[%s9632_s24 + $0x50] sm:$0xff] }
  0x1e   : > { %334 = vst.msk [vmem:[#allocation2 + $0x148] sm:$0xf] %vm14982_vm0, %v9521_v0  ;;  %336 = vst.msk [vmem:[#allocation2 + $0x160] sm:$0xf] %vm14982_vm0, %v9521_v0  ;;  %v237_v33 = vld [vmem:[%s9632_s24 + $0x58] sm:$0xff]  ;;  %v816_v35 = vshrl.u32 %v663_v27, 16  ;;  %v8949_v36 = vpack.c.bf16 %v236_v32, %v236_v32 }
  0x1f   : > { %338 = vst.msk [vmem:[#allocation2 + $0x178] sm:$0xf] %vm14982_vm0, %v9521_v0  ;;  %340 = vst.msk [vmem:[#allocation2 + $0x190] sm:$0xf] %vm14982_vm0, %v9521_v0  ;;  %v8950_v37 = vpack.c.bf16 %v237_v33, %v237_v33  ;;  %v666_v38 = vld [vmem:[#allocation2 + $0x94] sm:$0x8] }
  0x20   : > { %273 = vst.msk [vmem:[#allocation2 + $0x4] sm:$0xf] %vm14982_vm0, %v9521_v0  ;;  %307 = vst.msk [vmem:[#allocation2 + $0x19c] sm:$0xf] %vm14982_vm0, %v9521_v0  ;;  %v238_v39 = vld [vmem:[%s9632_s24 + $0x60] sm:$0xff]  ;;  %v239_v40 = vld [vmem:[%s9632_s24 + $0x68] sm:$0xff] }
  0x21   : > { %308 = vst.msk [vmem:[#allocation2 + $0x10] sm:$0xf] %vm14982_vm0, %v9521_v0  ;;  %342 = vst.msk [vmem:[#allocation2 + $0x1a8] sm:$0xf] %vm14982_vm0, %v9521_v0  ;;  %v9663_v41 = vrot.slane %v794_v31, 11  ;;  %v838_v42 = vshrl.u32 %v666_v38, 16  ;;  %v8951_v43 = vpack.c.bf16 %v238_v39, %v238_v39  ;;  %v8952_v44 = vpack.c.bf16 %v239_v40, %v239_v40 }
  0x22   : > { %618 = vst.msk [vmem:[#allocation2 + $0x38] sm:$0xf] %vm14982_vm0, %v8941_v4  ;;  %616 = vst.msk [vmem:[#allocation2 + $0x20] sm:$0xf] %vm14982_vm0, %v8939_v5  ;;  %v9665_v45 = vld [vmem:[#allocation2 + $0xac] sm:$0x8] }
  0x23   : > { %619 = vst.msk [vmem:[#allocation2 + $0x3c] sm:$0xf] %vm14982_vm0, %v8942_v6  ;;  %617 = vst.msk [vmem:[#allocation2 + $0x24] sm:$0xf] %vm14982_vm0, %v8940_v12  ;;  %v240_v46 = vld [vmem:[%s9632_s24 + $0x70] sm:$0xff]  ;;  %v241_v47 = vld [vmem:[%s9632_s24 + $0x78] sm:$0xff] }
  0x24   : > { %620 = vst.msk [vmem:[#allocation2 + $0x50] sm:$0xf] %vm14982_vm0, %v8943_v13  ;;  %621 = vst.msk [vmem:[#allocation2 + $0x54] sm:$0xf] %vm14982_vm0, %v8944_v14  ;;  %v9670_v48 = vrot.slane %v816_v35, 11  ;;  %v860_v49 = vshrl.u32 %v9665_v45, 16  ;;  %v8953_v50 = vpack.c.bf16 %v240_v46, %v240_v46  ;;  %v8954_v51 = vpack.c.bf16 %v241_v47, %v241_v47 }
  0x25   : > { %622 = vst.msk [vmem:[#allocation2 + $0x68] sm:$0xf] %vm14982_vm0, %v8945_v22  ;;  %623 = vst.msk [vmem:[#allocation2 + $0x6c] sm:$0xf] %vm14982_vm0, %v8946_v23  ;;  %v9675_v52 = vld [vmem:[#allocation2 + $0xc4] sm:$0x8] }
  0x26   : > { %624 = vst.msk [vmem:[#allocation2 + $0x80] sm:$0xf] %vm14982_vm0, %v8947_v26  ;;  %625 = vst.msk [vmem:[#allocation2 + $0x84] sm:$0xf] %vm14982_vm0, %v8948_v34  ;;  %v242_v53 = vld [vmem:[%s9632_s24 + $0x80] sm:$0xff]  ;;  %v243_v54 = vld [vmem:[%s9632_s24 + $0x88] sm:$0xff] }
  0x27   : > { %626 = vst.msk [vmem:[#allocation2 + $0x98] sm:$0xf] %vm14982_vm0, %v8949_v36  ;;  %627 = vst.msk [vmem:[#allocation2 + $0x9c] sm:$0xf] %vm14982_vm0, %v8950_v37  ;;  %v9679_v55 = vrot.slane %v838_v42, 11  ;;  %v882_v56 = vshrl.u32 %v9675_v52, 16  ;;  %v8955_v57 = vpack.c.bf16 %v242_v53, %v242_v53  ;;  %v8956_v58 = vpack.c.bf16 %v243_v54, %v243_v54 }
  0x28   : > { %628 = vst.msk [vmem:[#allocation2 + $0xb0] sm:$0xf] %vm14982_vm0, %v8951_v43  ;;  %629 = vst.msk [vmem:[#allocation2 + $0xb4] sm:$0xf] %vm14982_vm0, %v8952_v44  ;;  %v244_v59 = vld [vmem:[%s9632_s24 + $0x90] sm:$0xff]  ;;  %v245_v60 = vld [vmem:[%s9632_s24 + $0x98] sm:$0xff] }
  0x29   : > { %v655_v61 = vld [vmem:[#allocation2 + $0x38] sm:$0xf]  ;;  %v652_v62 = vld [vmem:[#allocation2 + $0x20] sm:$0xf]  ;;  %630 = vst.msk [vmem:[#allocation2 + $0xc8] sm:$0xf] %vm14982_vm0, %v8953_v50  ;;  %v8957_v0 = vpack.c.bf16 %v244_v59, %v244_v59  ;;  %v8958_v1 = vpack.c.bf16 %v245_v60, %v245_v60  ;;  %vm9694_vm3 = vmor %vm702_vm1, %vm703_vm2 }
  0x2a   : > { %v656_v63 = vld [vmem:[#allocation2 + $0x3c] sm:$0xf]  ;;  %631 = vst.msk [vmem:[#allocation2 + $0xcc] sm:$0xf] %vm14982_vm0, %v8954_v51  ;;  %v755_v2 = vshrl.u32 %v655_v61, 16  ;;  %v758_v3 = vshll.u32 %v655_v61, 16 }
  0x2b   : > { %v733_v4 = vshrl.u32 %v652_v62, 16  ;;  %v736_v5 = vshll.u32 %v652_v62, 16  ;;  %v653_v6 = vld [vmem:[#allocation2 + $0x24] sm:$0xf]  ;;  %632 = vst.msk [vmem:[#allocation2 + $0xe0] sm:$0xf] %vm14982_vm0, %v8955_v57 }
  0x2c   : > { %633 = vst.msk [vmem:[#allocation2 + $0xe4] sm:$0xf] %vm14982_vm0, %v8956_v58  ;;  %v764_v7 = vshrl.u32 %v656_v63, 16  ;;  %v767_v8 = vshll.u32 %v656_v63, 16  ;;  %v742_v9 = vshrl.u32 %v653_v6, 16  ;;  %v745_v10 = vshll.u32 %v653_v6, 16 }
  0x2d   : > { %v658_v11 = vld [vmem:[#allocation2 + $0x50] sm:$0xf]  ;;  %634 = vst.msk [vmem:[#allocation2 + $0xf8] sm:$0xf] %vm14982_vm0, %v8957_v0  ;;  %635 = vst.msk [vmem:[#allocation2 + $0xfc] sm:$0xf] %vm14982_vm0, %v8958_v1 }
  0x2e   : > { %v757_v12 = vrot.slane %v755_v2, 7  ;;  %v735_v13 = vrot.slane %v733_v4, 7  ;;  %v659_v14 = vld [vmem:[#allocation2 + $0x54] sm:$0xf]  ;;  %v777_v15 = vshrl.u32 %v658_v11, 16  ;;  %v780_v16 = vshll.u32 %v658_v11, 16 }
  0x2f   : > { %v15080_v17 = vmov 0  ;;  %v766_v18 = vrot.slane %v764_v7, 7  ;;  %v744_v19 = vrot.slane %v742_v9, 7  ;;  %v786_v20 = vshrl.u32 %v659_v14, 16  ;;  %v661_v22 = vld [vmem:[#allocation2 + $0x68] sm:$0xf] }
  0x30   : > { %v15081_v17 = vsel %vm9694_vm3, 4294967295, %v15080_v17  ;;  %v789_v21 = vshll.u32 %v659_v14, 16  ;;  %v760_v23 = vor.u32 %v758_v3, %v757_v12  ;;  %v738_v24 = vor.u32 %v736_v5, %v735_v13  ;;  %v662_v27 = vld [vmem:[#allocation2 + $0x6c] sm:$0xf]  ;;  %v664_v39 = vld [vmem:[#allocation2 + $0x80] sm:$0xf] }
  0x31   : > { %15082 = vst [vmem:[#allocation5_spill] sm:$0xff] %v15081_v17  ;;  %v762_v25 = vrot.slane %v757_v12, 4  ;;  %v740_v26 = vrot.slane %v735_v13, 4  ;;  %v769_v31 = vor.u32 %v767_v8, %v766_v18  ;;  %v747_v32 = vor.u32 %v745_v10, %v744_v19  ;;  %v665_v40 = vld [vmem:[#allocation2 + $0x84] sm:$0xf]  ;;  %s9525_s28 = smov 32  }
  0x32   : > { %v779_v33 = vrot.slane %v777_v15, 7  ;;  %v788_v34 = vrot.slane %v786_v20, 7  ;;  %v9701_v35 = vsel %vm9694_vm3, %v9650_v28, %v760_v23  ;;  %v739_v36 = vsel %vm9694_vm3, %v9652_v29, %v738_v24  ;;  %v667_v51 = vld [vmem:[#allocation2 + $0x98] sm:$0xf]  ;;  %v668_v59 = vld [vmem:[#allocation2 + $0x9c] sm:$0xf] }
  0x33   : > { %v799_v37 = vshrl.u32 %v661_v22, 16  ;;  %v808_v38 = vshrl.u32 %v662_v27, 16  ;;  %1147 = vrot.lane.b32.xlu1 %v9701_v35, %s9522_s25  ;;  %1093 = vst.msk [vmem:[#allocation3 + $0x10] sm:$0xf] %vm14982_vm0, %v9701_v35  ;;  %1143 = vrot.lane.b32.xlu0 %v739_v36, %s9522_s25  ;;  %1091 = vst.msk [vmem:[#allocation3 + $0x8] sm:$0xf] %vm14982_vm0, %v739_v36  ;;  %v9714_v28 = vsel %vm9694_vm3, %v762_v25, %v769_v31 }
  0x34   : > { %v748_v29 = vsel %vm9694_vm3, %v740_v26, %v747_v32  ;;  %v784_v42 = vrot.slane %v779_v33, 4  ;;  %v791_v43 = vor.u32 %v789_v21, %v788_v34  ;;  %1094 = vst.msk [vmem:[#allocation3 + $0x14] sm:$0xf] %vm14982_vm0, %v9714_v28  ;;  %v782_v44 = vor.u32 %v780_v16, %v779_v33  ;;  %v670_v4 = vld [vmem:[#allocation2 + $0xb0] sm:$0xf]  ;;  %s9526_s29 = smov 56  }
  0x35   : > { %1092 = vst.msk [vmem:[#allocation3 + $0xc] sm:$0xf] %vm14982_vm0, %v748_v29  ;;  %v801_v46 = vrot.slane %v799_v37, 7  ;;  %v810_v47 = vrot.slane %v808_v38, 7  ;;  %v811_v50 = vshll.u32 %v662_v27, 16  ;;  %v802_v54 = vshll.u32 %v661_v22, 16 }
  0x36   : > { %v9723_v53 = vsel %vm9694_vm3, %v784_v42, %v791_v43  ;;  %v821_v57 = vshrl.u32 %v664_v39, 16  ;;  %v830_v58 = vshrl.u32 %v665_v40, 16  ;;  %v9730_v60 = vsel %vm9694_vm3, %v9654_v30, %v782_v44  ;;  %v671_v8 = vld [vmem:[#allocation2 + $0xb4] sm:$0xf]  ;;  %v673_v18 = vld [vmem:[#allocation2 + $0xc8] sm:$0xf] }
  0x37   : > { %1096 = vst.msk [vmem:[#allocation3 + $0x1c] sm:$0xf] %vm14982_vm0, %v9723_v53  ;;  %v806_v61 = vrot.slane %v801_v46, 4  ;;  %v813_v62 = vor.u32 %v811_v50, %v810_v47  ;;  %v833_v63 = vshll.u32 %v665_v40, 16  ;;  %1149 = vrot.lane.b32.xlu1 %v9714_v28, %s9522_s25  ;;  %1145 = vrot.lane.b32.xlu0 %v748_v29, %s9522_s25  ;;  %1095 = vst.msk [vmem:[#allocation3 + $0x18] sm:$0xf] %vm14982_vm0, %v9730_v60 }
  0x38   : > { %v804_v0 = vor.u32 %v802_v54, %v801_v46  ;;  %v823_v1 = vrot.slane %v821_v57, 7  ;;  %v832_v2 = vrot.slane %v830_v58, 7  ;;  %v824_v3 = vshll.u32 %v664_v39, 16  ;;  %v674_v22 = vld [vmem:[#allocation2 + $0xcc] sm:$0xf]  ;;  %s9527_s30 = smov 16  }
  0x39   : > { %v9739_v30 = vsel %vm9694_vm3, %v806_v61, %v813_v62  ;;  %v843_v5 = vshrl.u32 %v667_v51, 16  ;;  %v852_v6 = vshrl.u32 %v668_v59, 16  ;;  %v855_v7 = vshll.u32 %v668_v59, 16  ;;  %v676_v33 = vld [vmem:[#allocation2 + $0xe0] sm:$0xf]  ;;  %s9528_s6 = smov 40  }
  0x3a   : > { %1098 = vst.msk [vmem:[#allocation3 + $0x24] sm:$0xf] %vm14982_vm0, %v9739_v30  ;;  %v9746_v9 = vsel %vm9694_vm3, %v9663_v41, %v804_v0  ;;  %v828_v10 = vrot.slane %v823_v1, 4  ;;  %v835_v11 = vor.u32 %v833_v63, %v832_v2  ;;  %v826_v12 = vor.u32 %v824_v3, %v823_v1  ;;  %v677_v39 = vld [vmem:[#allocation2 + $0xe4] sm:$0xf]  ;;  %s9529_s17 = smov 64  }
  0x3b   : > { %1097 = vst.msk [vmem:[#allocation3 + $0x20] sm:$0xf] %vm14982_vm0, %v9746_v9  ;;  %v845_v13 = vrot.slane %v843_v5, 7  ;;  %v854_v14 = vrot.slane %v852_v6, 7  ;;  %v846_v15 = vshll.u32 %v667_v51, 16  ;;  %v865_v16 = vshrl.u32 %v670_v4, 16  ;;  %1153 = vrot.lane.b32.xlu1 %v9723_v53, %s9522_s25  ;;  %1151 = vrot.lane.b32.xlu0 %v9730_v60, %s9522_s25 }
  0x3c   : > { %v9756_v41 = vsel %vm9694_vm3, %v828_v10, %v835_v11  ;;  %v9761_v19 = vsel %vm9694_vm3, %v9670_v48, %v826_v12  ;;  %v874_v20 = vshrl.u32 %v671_v8, 16  ;;  %v877_v21 = vshll.u32 %v671_v8, 16  ;;  %v675_v29 = vld [vmem:[#allocation2 + $0xdc] sm:$0x8]  ;;  %v679_v47 = vld [vmem:[#allocation2 + $0xf8] sm:$0xf] }
  0x3d   : > { %1100 = vst.msk [vmem:[#allocation3 + $0x2c] sm:$0xf] %vm14982_vm0, %v9756_v41  ;;  %1099 = vst.msk [vmem:[#allocation3 + $0x28] sm:$0xf] %vm14982_vm0, %v9761_v19  ;;  %v850_v23 = vrot.slane %v845_v13, 4  ;;  %v857_v24 = vor.u32 %v855_v7, %v854_v14  ;;  %v848_v25 = vor.u32 %v846_v15, %v845_v13  ;;  %v867_v26 = vrot.slane %v865_v16, 7 }
  0x3e   : > { %v876_v27 = vrot.slane %v874_v20, 7  ;;  %v8798_v31 = vrot.slane %v860_v49, 11  ;;  %v868_v32 = vshll.u32 %v670_v4, 16  ;;  %v887_v48 = vshrl.u32 %v673_v18, 16  ;;  %v680_v58 = vld [vmem:[#allocation2 + $0xfc] sm:$0xf] }
  0x3f   : > { %v9771_v34 = vsel %vm9694_vm3, %v850_v23, %v857_v24  ;;  %v9776_v36 = vsel %vm9694_vm3, %v9679_v55, %v848_v25  ;;  %v872_v37 = vrot.slane %v867_v26, 4  ;;  %v896_v38 = vshrl.u32 %v674_v22, 16  ;;  %1157 = vrot.lane.b32.xlu1 %v9739_v30, %s9522_s25  ;;  %1155 = vrot.lane.b32.xlu0 %v9746_v9, %s9522_s25  ;;  %v246_v62 = vld [vmem:[%s9632_s24 + $0xa0] sm:$0xff]  ;;  %v678_v3 = vld [vmem:[#allocation2 + $0xf4] sm:$0x8]  ;;  %v247_v8 = vld [vmem:[%s9632_s24 + $0xa8] sm:$0xff] }
  0x40   : > { %1102 = vst.msk [vmem:[#allocation3 + $0x34] sm:$0xf] %vm14982_vm0, %v9771_v34  ;;  %1101 = vst.msk [vmem:[#allocation3 + $0x30] sm:$0xf] %vm14982_vm0, %v9776_v36  ;;  %v879_v45 = vor.u32 %v877_v21, %v876_v27  ;;  %v870_v49 = vor.u32 %v868_v32, %v867_v26  ;;  %v889_v40 = vrot.slane %v887_v48, 7  ;;  %v899_v55 = vshll.u32 %v674_v22, 16 }
  0x41   : > { %v898_v42 = vrot.slane %v896_v38, 7  ;;  %v8799_v43 = vrot.slane %v882_v56, 11  ;;  %v890_v44 = vshll.u32 %v673_v18, 16  ;;  %v909_v46 = vshrl.u32 %v676_v33, 16  ;;  %v248_v10 = vld [vmem:[%s9632_s24 + $0xb0] sm:$0xff]  ;;  %v249_v11 = vld [vmem:[%s9632_s24 + $0xb8] sm:$0xff] }
  0x42   : > { %v9790_v50 = vsel %vm9694_vm3, %v872_v37, %v879_v45  ;;  %v9794_v51 = vsel %vm9694_vm3, %v8798_v31, %v870_v49  ;;  %v894_v54 = vrot.slane %v889_v40, 4  ;;  %v918_v57 = vshrl.u32 %v677_v39, 16  ;;  %v681_v16 = vld [vmem:[#allocation2 + $0x10c] sm:$0x8]  ;;  %v250_v18 = vld [vmem:[%s9632_s24 + $0xc0] sm:$0xff]  ;;  %v253_v37 = vld [vmem:[%s9632_s24 + $0xd8] sm:$0xff] }
  0x43   : > { %1104 = vst.msk [vmem:[#allocation3 + $0x3c] sm:$0xf] %vm14982_vm0, %v9790_v50  ;;  %1103 = vst.msk [vmem:[#allocation3 + $0x38] sm:$0xf] %vm14982_vm0, %v9794_v51  ;;  %v901_v52 = vor.u32 %v899_v55, %v898_v42  ;;  %v892_v56 = vor.u32 %v890_v44, %v889_v40  ;;  %v911_v59 = vrot.slane %v909_v46, 7  ;;  %v921_v61 = vshll.u32 %v677_v39, 16  ;;  %1161 = vrot.lane.b32.xlu1 %v9756_v41, %s9522_s25 }
  0x44   : > { %1159 = vrot.lane.b32.xlu0 %v9761_v19, %s9522_s25  ;;  %v920_v63 = vrot.slane %v918_v57, 7  ;;  %v904_v0 = vshrl.u32 %v675_v29, 16  ;;  %v912_v1 = vshll.u32 %v676_v33, 16  ;;  %v931_v2 = vshrl.u32 %v679_v47, 16  ;;  %v251_v20 = vld [vmem:[%s9632_s24 + $0xc8] sm:$0xff]  ;;  %v252_v33 = vld [vmem:[%s9632_s24 + $0xd0] sm:$0xff] }
  0x45   : > { %v9807_v4 = vsel %vm9694_vm3, %v894_v54, %v901_v52  ;;  %v9811_v5 = vsel %vm9694_vm3, %v8799_v43, %v892_v56  ;;  %v916_v6 = vrot.slane %v911_v59, 4  ;;  %v940_v7 = vshrl.u32 %v680_v58, 16  ;;  %v684_v25 = vld [vmem:[#allocation2 + $0x124] sm:$0x8]  ;;  %v687_v26 = vld [vmem:[#allocation2 + $0x13c] sm:$0x8] }
  0x46   : > { %1106 = vst.msk [vmem:[#allocation3 + $0x44] sm:$0xf] %vm14982_vm0, %v9807_v4  ;;  %1105 = vst.msk [vmem:[#allocation3 + $0x40] sm:$0xf] %vm14982_vm0, %v9811_v5  ;;  %v923_v12 = vor.u32 %v921_v61, %v920_v63  ;;  %v8800_v13 = vrot.slane %v904_v0, 11  ;;  %v914_v14 = vor.u32 %v912_v1, %v911_v59  ;;  %v933_v15 = vrot.slane %v931_v2, 7 }
  0x47   : > { %v942_v21 = vrot.slane %v940_v7, 7  ;;  %v943_v22 = vshll.u32 %v680_v58, 16  ;;  %v926_v23 = vshrl.u32 %v678_v3, 16  ;;  %v934_v24 = vshll.u32 %v679_v47, 16  ;;  %1165 = vrot.lane.b32.xlu1 %v9771_v34, %s9522_s25  ;;  %v690_v38 = vld [vmem:[#allocation2 + $0x154] sm:$0x8] }
  0x48   : > { %1163 = vrot.lane.b32.xlu0 %v9776_v36, %s9522_s25  ;;  %v9828_v27 = vsel %vm9694_vm3, %v916_v6, %v923_v12  ;;  %v9832_v31 = vsel %vm9694_vm3, %v8800_v13, %v914_v14  ;;  %v938_v32 = vrot.slane %v933_v15, 4  ;;  %v8959_v48 = vpack.c.bf16 %v246_v62, %v246_v62  ;;  %v254_v55 = vld [vmem:[%s9632_s24 + $0xe0] sm:$0xff]  ;;  %v255_v29 = vld [vmem:[%s9632_s24 + $0xe8] sm:$0xff]  ;;  %v256_v47 = vld [vmem:[%s9632_s24 + $0xf0] sm:$0xff]  ;;  %s9530_s20 = smov 120  }
  0x49   : > { %1108 = vst.msk [vmem:[#allocation3 + $0x4c] sm:$0xf] %vm14982_vm0, %v9828_v27  ;;  %1107 = vst.msk [vmem:[#allocation3 + $0x48] sm:$0xf] %vm14982_vm0, %v9832_v31  ;;  %v945_v39 = vor.u32 %v943_v22, %v942_v21  ;;  %v8801_v45 = vrot.slane %v926_v23, 11  ;;  %v936_v49 = vor.u32 %v934_v24, %v933_v15  ;;  %v8960_v40 = vpack.c.bf16 %v247_v8, %v247_v8  ;;  %v257_v54 = vld [vmem:[%s9632_s24 + $0xf8] sm:$0xff] }
  0x4a   : > { %v693_v42 = vld [vmem:[#allocation2 + $0x16c] sm:$0x8]  ;;  %636 = vst.msk [vmem:[#allocation2 + $0x110] sm:$0xf] %vm14982_vm0, %v8959_v48  ;;  %v948_v43 = vshrl.u32 %v681_v16, 16  ;;  %v8961_v44 = vpack.c.bf16 %v248_v10, %v248_v10  ;;  %v8962_v46 = vpack.c.bf16 %v249_v11, %v249_v11  ;;  %v8963_v52 = vpack.c.bf16 %v250_v18, %v250_v18 }
  0x4b   : > { %v9847_v57 = vsel %vm9694_vm3, %v938_v32, %v945_v39  ;;  %v9851_v58 = vsel %vm9694_vm3, %v8801_v45, %v936_v49  ;;  %637 = vst.msk [vmem:[#allocation2 + $0x114] sm:$0xf] %vm14982_vm0, %v8960_v40  ;;  %v8964_v56 = vpack.c.bf16 %v251_v20, %v251_v20  ;;  %v648_v59 = vld [vmem:[#allocation2 + $0x4] sm:$0x8]  ;;  %v9854_v61 = vld [vmem:[#allocation2 + $0x8] sm:$0xf]  ;;  %1169 = vrot.lane.b32.xlu1 %v9790_v50, %s9522_s25 }
  0x4c   : > { %1167 = vrot.lane.b32.xlu0 %v9794_v51, %s9522_s25  ;;  %1110 = vst.msk [vmem:[#allocation3 + $0x54] sm:$0xf] %vm14982_vm0, %v9847_v57  ;;  %1109 = vst.msk [vmem:[#allocation3 + $0x50] sm:$0xf] %vm14982_vm0, %v9851_v58  ;;  %v970_v62 = vshrl.u32 %v684_v25, 16  ;;  %v992_v63 = vshrl.u32 %v687_v26, 16  ;;  %v8965_v0 = vpack.c.bf16 %v252_v33, %v252_v33  ;;  %v8966_v2 = vpack.c.bf16 %v253_v37, %v253_v37 }
  0x4d   : > { %638 = vst.msk [vmem:[#allocation2 + $0x128] sm:$0xf] %vm14982_vm0, %v8961_v44  ;;  %639 = vst.msk [vmem:[#allocation2 + $0x12c] sm:$0xf] %vm14982_vm0, %v8962_v46  ;;  %v9866_v1 = vld [vmem:[#allocation2 + $0xc] sm:$0xf]  ;;  %v8967_v6 = vpack.c.bf16 %v254_v55, %v254_v55  ;;  %v8968_v7 = vpack.c.bf16 %v255_v29, %v255_v29  ;;  %v8969_v10 = vpack.c.bf16 %v256_v47, %v256_v47 }
  0x4e   : > { %640 = vst.msk [vmem:[#allocation2 + $0x140] sm:$0xf] %vm14982_vm0, %v8963_v52  ;;  %641 = vst.msk [vmem:[#allocation2 + $0x144] sm:$0xf] %vm14982_vm0, %v8964_v56  ;;  %v1014_v3 = vshrl.u32 %v690_v38, 16  ;;  %v1036_v8 = vshrl.u32 %v693_v42, 16  ;;  %v8970_v11 = vpack.c.bf16 %v257_v54, %v257_v54 }
  0x4f   : > { %642 = vst.msk [vmem:[#allocation2 + $0x158] sm:$0xf] %vm14982_vm0, %v8965_v0  ;;  %v8802_v12 = vrot.slane %v948_v43, 11  ;;  %643 = vst.msk [vmem:[#allocation2 + $0x15c] sm:$0xf] %vm14982_vm0, %v8966_v2  ;;  %v706_v13 = vshrl.u32 %v648_v59, 16  ;;  %1173 = vrot.lane.b32.xlu1 %v9807_v4, %s9522_s25 }
  0x50   : > { %644 = vst.msk [vmem:[#allocation2 + $0x170] sm:$0xf] %vm14982_vm0, %v8967_v6  ;;  %645 = vst.msk [vmem:[#allocation2 + $0x174] sm:$0xf] %vm14982_vm0, %v8968_v7  ;;  %v711_v14 = vshrl.u32 %v9854_v61, 16  ;;  %1171 = vrot.lane.b32.xlu0 %v9811_v5, %s9522_s25  ;;  %v8803_v15 = vrot.slane %v970_v62, 11 }
  0x51   : > { %v9879_v16 = vrot.slane %v992_v63, 11  ;;  %v9881_v18 = vrot.slane %v1014_v3, 11  ;;  %646 = vst.msk [vmem:[#allocation2 + $0x188] sm:$0xf] %vm14982_vm0, %v8969_v10  ;;  %647 = vst.msk [vmem:[#allocation2 + $0x18c] sm:$0xf] %vm14982_vm0, %v8970_v11 }
  0x52   : > { %v720_v20 = vshrl.u32 %v9866_v1, 16  ;;  %v682_v21 = vld [vmem:[#allocation2 + $0x110] sm:$0xf]  ;;  %v9886_v22 = vrot.slane %v1036_v8, 11  ;;  %v9888_v23 = vrot.slane %v706_v13, 11  ;;  %v714_v24 = vshll.u32 %v9854_v61, 16 }
  0x53   : > { %v723_v25 = vshll.u32 %v9866_v1, 16  ;;  %v683_v26 = vld [vmem:[#allocation2 + $0x114] sm:$0xf]  ;;  %v953_v32 = vshrl.u32 %v682_v21, 16  ;;  %v956_v48 = vshll.u32 %v682_v21, 16  ;;  %v9892_v33 = vrot.slane %v711_v14, 7  ;;  %1177 = vrot.lane.b32.xlu1 %v9828_v27, %s9522_s25 }
  0x54   : > { %v9894_v37 = vrot.slane %v720_v20, 7  ;;  %v962_v38 = vshrl.u32 %v683_v26, 16  ;;  %v965_v39 = vshll.u32 %v683_v26, 16  ;;  %v685_v45 = vld [vmem:[#allocation2 + $0x128] sm:$0xf]  ;;  %1175 = vrot.lane.b32.xlu0 %v9832_v31, %s9522_s25  ;;  %vm14974_vm6 = vcmask 126016  }
  0x55   : > { %v686_v49 = vld [vmem:[#allocation2 + $0x12c] sm:$0xf]  ;;  %v955_v40 = vrot.slane %v953_v32, 7  ;;  %v975_v55 = vshrl.u32 %v685_v45, 16  ;;  %v688_v43 = vld [vmem:[#allocation2 + $0x140] sm:$0xf] }
  0x56   : > { %v984_v29 = vshrl.u32 %v686_v49, 16  ;;  %v987_v42 = vshll.u32 %v686_v49, 16  ;;  %v964_v44 = vrot.slane %v962_v38, 7  ;;  %v978_v46 = vshll.u32 %v685_v45, 16  ;;  %v689_v47 = vld [vmem:[#allocation2 + $0x144] sm:$0xf] }
  0x57   : > { %v997_v54 = vshrl.u32 %v688_v43, 16  ;;  %v1000_v52 = vshll.u32 %v688_v43, 16  ;;  %v960_v56 = vrot.slane %v955_v40, 4  ;;  %v958_v59 = vor.u32 %v956_v48, %v955_v40  ;;  %v691_v0 = vld [vmem:[#allocation2 + $0x158] sm:$0xf]  ;;  %1181 = vrot.lane.b32.xlu1 %v9847_v57, %s9522_s25 }
  0x58   : > { %v977_v62 = vrot.slane %v975_v55, 7  ;;  %v986_v63 = vrot.slane %v984_v29, 7  ;;  %v967_v2 = vor.u32 %v965_v39, %v964_v44  ;;  %v1006_v6 = vshrl.u32 %v689_v47, 16  ;;  %v692_v8 = vld [vmem:[#allocation2 + $0x15c] sm:$0xf]  ;;  %1179 = vrot.lane.b32.xlu0 %v9851_v58, %s9522_s25 }
  0x59   : > { %v999_v3 = vrot.slane %v997_v54, 7  ;;  %v1009_v7 = vshll.u32 %v689_v47, 16  ;;  %v9906_v10 = vsel %vm9694_vm3, %v8802_v12, %v958_v59  ;;  %v694_v48 = vld [vmem:[#allocation2 + $0x170] sm:$0xf]  ;;  %v695_v38 = vld [vmem:[#allocation2 + $0x174] sm:$0xf] }
  0x5a   : > { %v982_v11 = vrot.slane %v977_v62, 4  ;;  %v989_v13 = vor.u32 %v987_v42, %v986_v63  ;;  %v980_v14 = vor.u32 %v978_v46, %v977_v62  ;;  %v9910_v20 = vsel %vm9694_vm3, %v960_v56, %v967_v2  ;;  %1111 = vst.msk [vmem:[#allocation3 + $0x58] sm:$0xf] %vm14982_vm0, %v9906_v10  ;;  %v698_v2 = vld [vmem:[#allocation2 + $0x18c] sm:$0xf] }
  0x5b   : > { %v1004_v21 = vrot.slane %v999_v3, 4  ;;  %v1008_v26 = vrot.slane %v1006_v6, 7  ;;  %v1002_v32 = vor.u32 %v1000_v52, %v999_v3  ;;  %1112 = vst.msk [vmem:[#allocation3 + $0x5c] sm:$0xf] %vm14982_vm0, %v9910_v20  ;;  %v1019_v45 = vshrl.u32 %v691_v0, 16  ;;  %1185 = vrot.lane.b32.xlu1 %v9910_v20, %s9522_s25 }
  0x5c   : > { %v9918_v12 = vsel %vm9694_vm3, %v982_v11, %v989_v13  ;;  %v9922_v39 = vsel %vm9694_vm3, %v8803_v15, %v980_v14  ;;  %v1028_v49 = vshrl.u32 %v692_v8, 16  ;;  %v1031_v29 = vshll.u32 %v692_v8, 16  ;;  %1183 = vrot.lane.b32.xlu0 %v9906_v10, %s9522_s25  ;;  %v696_v14 = vld [vmem:[#allocation2 + $0x184] sm:$0x8] }
  0x5d   : > { %1114 = vst.msk [vmem:[#allocation3 + $0x64] sm:$0xf] %vm14982_vm0, %v9918_v12  ;;  %1113 = vst.msk [vmem:[#allocation3 + $0x60] sm:$0xf] %vm14982_vm0, %v9922_v39  ;;  %v1011_v40 = vor.u32 %v1009_v7, %v1008_v26  ;;  %v9931_v55 = vsel %vm9694_vm3, %v9879_v16, %v1002_v32  ;;  %v1022_v42 = vshll.u32 %v691_v0, 16  ;;  %v1021_v15 = vrot.slane %v1019_v45, 7 }
  0x5e   : > { %1115 = vst.msk [vmem:[#allocation3 + $0x68] sm:$0xf] %vm14982_vm0, %v9931_v55  ;;  %v1030_v43 = vrot.slane %v1028_v49, 7  ;;  %v1041_v44 = vshrl.u32 %v694_v48, 16  ;;  %v1050_v46 = vshrl.u32 %v695_v38, 16  ;;  %v1053_v16 = vshll.u32 %v695_v38, 16 }
  0x5f   : > { %v9941_v47 = vsel %vm9694_vm3, %v1004_v21, %v1011_v40  ;;  %v1044_v54 = vshll.u32 %v694_v48, 16  ;;  %v716_v52 = vor.u32 %v714_v24, %v9892_v33  ;;  %v1026_v56 = vrot.slane %v1021_v15, 4  ;;  %v697_v0 = vld [vmem:[#allocation2 + $0x188] sm:$0xf]  ;;  %1189 = vrot.lane.b32.xlu1 %v9918_v12, %s9522_s25 }
  0x60   : > { %1116 = vst.msk [vmem:[#allocation3 + $0x6c] sm:$0xf] %vm14982_vm0, %v9941_v47  ;;  %v1033_v59 = vor.u32 %v1031_v29, %v1030_v43  ;;  %v1024_v62 = vor.u32 %v1022_v42, %v1021_v15  ;;  %v1043_v63 = vrot.slane %v1041_v44, 7  ;;  %v1052_v3 = vrot.slane %v1050_v46, 7  ;;  %1187 = vrot.lane.b32.xlu0 %v9922_v39, %s9522_s25  ;;  %v1423_v15 = vld [vmem:[#allocation2 + $0x8] sm:$0xf] }
  0x61   : > { %v1127_v11 = vshrl.u32 %v697_v0, 16  ;;  %v1136_v13 = vshrl.u32 %v698_v2, 16  ;;  %v718_v26 = vrot.slane %v9892_v33, 4  ;;  %v725_v32 = vor.u32 %v723_v25, %v9894_v37  ;;  %v10081_v46 = vld [vmem:[#allocation2 + $0x24] sm:$0xf] }
  0x62   : > { %v9954_v61 = vsel %vm9694_vm3, %v1026_v56, %v1033_v59  ;;  %v9959_v24 = vsel %vm9694_vm3, %v9881_v18, %v1024_v62  ;;  %v1048_v6 = vrot.slane %v1043_v63, 4  ;;  %v1046_v7 = vor.u32 %v1044_v54, %v1043_v63  ;;  %v10093_v56 = vld [vmem:[#allocation2 + $0x38] sm:$0xf]  ;;  %v10101_v63 = vld [vmem:[#allocation2 + $0x54] sm:$0xf] }
  0x63   : > { %1118 = vst.msk [vmem:[#allocation3 + $0x74] sm:$0xf] %vm14982_vm0, %v9954_v61  ;;  %1117 = vst.msk [vmem:[#allocation3 + $0x70] sm:$0xf] %vm14982_vm0, %v9959_v24  ;;  %v1055_v8 = vor.u32 %v1053_v16, %v1052_v3  ;;  %v717_v18 = vsel %vm9694_vm3, %v9888_v23, %v716_v52  ;;  %1193 = vrot.lane.b32.xlu1 %v9941_v47, %s9522_s25  ;;  %v1122_v1 = vshrl.u32 %v696_v14, 16  ;;  %v1129_v23 = vrot.slane %v1127_v11, 7 }
  0x64   : > { %v9968_v21 = vsel %vm9694_vm3, %v9886_v22, %v1046_v7  ;;  %1089 = vst.msk [vmem:[#allocation3] sm:$0xf] %vm14982_vm0, %v717_v18  ;;  %1191 = vrot.lane.b32.xlu0 %v9931_v55, %s9522_s25  ;;  %v726_v22 = vsel %vm9694_vm3, %v718_v26, %v725_v32  ;;  %v1138_v25 = vrot.slane %v1136_v13, 7  ;;  %v1139_v33 = vshll.u32 %v698_v2, 16  ;;  %v10091_v52 = vld [vmem:[#allocation2 + $0x3c] sm:$0xf] }
  0x65   : > { %v9979_v48 = vsel %vm9694_vm3, %v1048_v6, %v1055_v8  ;;  %1119 = vst.msk [vmem:[#allocation3 + $0x78] sm:$0xf] %vm14982_vm0, %v9968_v21  ;;  %v1130_v37 = vshll.u32 %v697_v0, 16  ;;  %1090 = vst.msk [vmem:[#allocation3 + $0x4] sm:$0xf] %vm14982_vm0, %v726_v22  ;;  %v1134_v38 = vrot.slane %v1129_v23, 4 }
  0x66   : > { %1120 = vst.msk [vmem:[#allocation3 + $0x7c] sm:$0xf] %vm14982_vm0, %v9979_v48  ;;  %v1141_v45 = vor.u32 %v1139_v33, %v1138_v25  ;;  %v8807_v49 = vrot.slane %v1122_v1, 11  ;;  %v10103_v0 = vld [vmem:[#allocation2 + $0x50] sm:$0xf]  ;;  %vm14973_vm7 = vcmask 322816  }
  0x67   : > { %1197 = vrot.lane.b32.xlu1 %v9954_v61, %s9522_s25  ;;  %v1132_v40 = vor.u32 %v1130_v37, %v1129_v23  ;;  %v10121_v8 = vld [vmem:[#allocation2 + $0x84] sm:$0xf]  ;;  %v10123_v11 = vld [vmem:[#allocation2 + $0x80] sm:$0xf]  ;;  %v10133_v18 = vld [vmem:[#allocation2 + $0x98] sm:$0xf] }
  0x68   : > { %1195 = vrot.lane.b32.xlu0 %v9959_v24, %s9522_s25  ;;  %v1142_v29 = vsel %vm9694_vm3, %v1134_v38, %v1141_v45  ;;  %v10143_v1 = vld [vmem:[#allocation2 + $0xb0] sm:$0xf]  ;;  %v10151_v25 = vld [vmem:[#allocation2 + $0xcc] sm:$0xf]  ;;  %v10153_v33 = vld [vmem:[#allocation2 + $0xc8] sm:$0xf] }
  0x69   : > { %v1133_v42 = vsel %vm9694_vm3, %v8807_v49, %v1132_v40  ;;  %v10161_v45 = vld [vmem:[#allocation2 + $0xe4] sm:$0xf]  ;;  %v10163_v49 = vld [vmem:[#allocation2 + $0xe0] sm:$0xf]  ;;  %vm1936_vm8 = vsmask.f32 3328 }
  0x6a   : > { %vm1937_vm9 = vsmask.f32 7440  ;;  %vm14970_vm11 = vcmask 519616   ;;  %vm14969_vm12 = vcmask 1043456   ;;  %vm14965_vm13 = vcmask 191616  }
  0x6b   : > { %1201 = vrot.lane.b32.xlu1 %v9979_v48, %s9522_s25  ;;  %vm10432_vm10 = vmor %vm1936_vm8, %vm1937_vm9  ;;  %vm14960_vm14 = vcmask 388416   ;;  %vm14959_vm15 = vcmask 585216   ;;  %vm14958_vm1 = vcmask 588800   ;;  %vm15027_vm2 = vcmask 7168  }
  0x6c   : > { %1199 = vrot.lane.b32.xlu0 %v9968_v21, %s9522_s25  ;;  %vm14983_vm8 = vcmask 64512  }
  0x6f   : > { %1205 = vrot.lane.b32.xlu1 %v1142_v29, %s9522_s25 }
  0x70   : > { %1203 = vrot.lane.b32.xlu0 %v1133_v42, %s9522_s25 }
  0x73   : > { %1296 = vrot.lane.b32.xlu1 %v9714_v28, %s9523_s26  ;;  %v701_v28 = vld [vmem:[#allocation2 + $0x1a4] sm:$0xf] }
  0x74   : > { %1294 = vrot.lane.b32.xlu0 %v9701_v35, %s9523_s26  ;;  %v700_v35 = vld [vmem:[#allocation2 + $0x1a0] sm:$0xf] }
  0x77   : > { %1300 = vrot.lane.b32.xlu1 %v9723_v53, %s9523_s26  ;;  %v1278_v53 = vshrl.u32 %v700_v35, 16 }
  0x78   : > { %1298 = vrot.lane.b32.xlu0 %v9730_v60, %s9523_s26  ;;  %v1287_v60 = vshrl.u32 %v701_v28, 16 }
  0x7b   : > { %1304 = vrot.lane.b32.xlu1 %v9739_v30, %s9523_s26  ;;  %v699_v30 = vld [vmem:[#allocation2 + $0x19c] sm:$0x8] }
  0x7c   : > { %1302 = vrot.lane.b32.xlu0 %v9746_v9, %s9523_s26  ;;  %v1280_v9 = vrot.slane %v1278_v53, 7 }
  0x7f   : > { %1308 = vrot.lane.b32.xlu1 %v9756_v41, %s9523_s26  ;;  %v1289_v41 = vrot.slane %v1287_v60, 7  ;;  %v10181_v60 = vld [vmem:[#allocation2 + $0x114] sm:$0xf] }
  0x80   : > { %1306 = vrot.lane.b32.xlu0 %v9761_v19, %s9523_s26  ;;  %v1290_v19 = vshll.u32 %v701_v28, 16 }
  0x83   : > { %1312 = vrot.lane.b32.xlu1 %v9771_v34, %s9523_s26  ;;  %v1273_v34 = vshrl.u32 %v699_v30, 16  ;;  %v10183_v30 = vld [vmem:[#allocation2 + $0x110] sm:$0xf] }
  0x84   : > { %1310 = vrot.lane.b32.xlu0 %v9776_v36, %s9523_s26  ;;  %v1281_v36 = vshll.u32 %v700_v35, 16  ;;  %v10173_v35 = vld [vmem:[#allocation2 + $0xf8] sm:$0xf] }
  0x87   : > { %1316 = vrot.lane.b32.xlu1 %v9790_v50, %s9523_s26 }
  0x88   : > { %1314 = vrot.lane.b32.xlu0 %v9794_v51, %s9523_s26 }
  0x8b   : > { %1320 = vrot.lane.b32.xlu1 %v9807_v4, %s9523_s26  ;;  %v1285_v4 = vrot.slane %v1280_v9, 4 }
  0x8c   : > { %1318 = vrot.lane.b32.xlu0 %v9811_v5, %s9523_s26  ;;  %v1292_v5 = vor.u32 %v1290_v19, %v1289_v41  ;;  %v10191_v19 = vld [vmem:[#allocation2 + $0x12c] sm:$0xf] }
  0x8f   : > { %1324 = vrot.lane.b32.xlu1 %v9828_v27, %s9523_s26  ;;  %v8808_v27 = vrot.slane %v1273_v34, 11  ;;  %v10193_v34 = vld [vmem:[#allocation2 + $0x128] sm:$0xf] }
  0x90   : > { %1322 = vrot.lane.b32.xlu0 %v9832_v31, %s9523_s26  ;;  %v1283_v31 = vor.u32 %v1281_v36, %v1280_v9 }
  0x93   : > { %1328 = vrot.lane.b32.xlu1 %v9847_v57, %s9523_s26 }
  0x94   : > { %1326 = vrot.lane.b32.xlu0 %v9851_v58, %s9523_s26 }
  0x97   : > { %1332 = vrot.lane.b32.xlu1 %v9910_v20, %s9523_s26  ;;  %v1284_v20 = vsel %vm9694_vm3, %v8808_v27, %v1283_v31  ;;  %v10211_v31 = vld [vmem:[#allocation2 + $0x15c] sm:$0xf] }
  0x98   : > { %1330 = vrot.lane.b32.xlu0 %v9906_v10, %s9523_s26  ;;  %v1293_v10 = vsel %vm9694_vm3, %v1285_v4, %v1292_v5  ;;  %v10203_v4 = vld [vmem:[#allocation2 + $0x140] sm:$0xf] }
  0x9b   : > { %1336 = vrot.lane.b32.xlu1 %v9918_v12, %s9523_s26 }
  0x9c   : > { %1334 = vrot.lane.b32.xlu0 %v9922_v39, %s9523_s26 }
  0x9f   : > { %1340 = vrot.lane.b32.xlu1 %v9941_v47, %s9523_s26  ;;  %v10083_v47 = vld [vmem:[#allocation2 + $0x20] sm:$0xf] }
  0xa0   : > { %1338 = vrot.lane.b32.xlu0 %v9931_v55, %s9523_s26  ;;  %v1424_v55 = vld [vmem:[#allocation2 + $0xc] sm:$0xf] }
  0xa3   : > { %1344 = vrot.lane.b32.xlu1 %v9954_v61, %s9523_s26  ;;  %v10111_v61 = vld [vmem:[#allocation2 + $0x6c] sm:$0xf] }
  0xa4   : > { %1342 = vrot.lane.b32.xlu0 %v9959_v24, %s9523_s26  ;;  %v10113_v24 = vld [vmem:[#allocation2 + $0x68] sm:$0xf] }
  0xa5   : > { %v1148_v50 = vpop.permute.xlu1 %1147  ;;  %v1144_v51 = vpop.permute.xlu0 %1143 }
  0xa6   : > { %1242 = vst.msk [vmem:[#allocation3 + $0x8] sm:$0xf] %vm14977_vm4, %v1148_v50  ;;  %1240 = vst.msk [vmem:[#allocation3] sm:$0xf] %vm14977_vm4, %v1144_v51  ;;  %v10201_v51 = vld [vmem:[#allocation2 + $0x144] sm:$0xf] }
  0xa7   : > { %1348 = vrot.lane.b32.xlu1 %v9979_v48, %s9523_s26  ;;  %v10141_v48 = vld [vmem:[#allocation2 + $0xb4] sm:$0xf] }
  0xa8   : > { %1346 = vrot.lane.b32.xlu0 %v9968_v21, %s9523_s26  ;;  %v10131_v21 = vld [vmem:[#allocation2 + $0x9c] sm:$0xf] }
  0xa9   : > { %v1150_v57 = vpop.permute.xlu1 %1149  ;;  %v1146_v58 = vpop.permute.xlu0 %1145 }
  0xaa   : > { %1243 = vst.msk [vmem:[#allocation3 + $0xc] sm:$0xf] %vm14977_vm4, %v1150_v57  ;;  %1241 = vst.msk [vmem:[#allocation3 + $0x4] sm:$0xf] %vm14977_vm4, %v1146_v58  ;;  %v10213_v57 = vld [vmem:[#allocation2 + $0x158] sm:$0xf] }
  0xab   : > { %1352 = vrot.lane.b32.xlu1 %v1142_v29, %s9523_s26 }
  0xac   : > { %1350 = vrot.lane.b32.xlu0 %v1133_v42, %s9523_s26  ;;  %v10171_v42 = vld [vmem:[#allocation2 + $0xfc] sm:$0xf] }
  0xad   : > { %v1154_v12 = vpop.permute.xlu1 %1153  ;;  %v1152_v39 = vpop.permute.xlu0 %1151 }
  0xae   : > { %1245 = vst.msk [vmem:[#allocation3 + $0x14] sm:$0xf] %vm14977_vm4, %v1154_v12  ;;  %1244 = vst.msk [vmem:[#allocation3 + $0x10] sm:$0xf] %vm14977_vm4, %v1152_v39  ;;  %v10223_v12 = vld [vmem:[#allocation2 + $0x170] sm:$0xf] }
  0xaf   : > { %1356 = vrot.lane.b32.xlu1 %v1293_v10, %s9523_s26 }
  0xb0   : > { %1354 = vrot.lane.b32.xlu0 %v1284_v20, %s9523_s26  ;;  %v10221_v20 = vld [vmem:[#allocation2 + $0x174] sm:$0xf] }
  0xb1   : > { %v1158_v43 = vpop.permute.xlu1 %1157  ;;  %v1156_v44 = vpop.permute.xlu0 %1155 }
  0xb2   : > { %1247 = vst.msk [vmem:[#allocation3 + $0x1c] sm:$0xf] %vm14977_vm4, %v1158_v43  ;;  %1246 = vst.msk [vmem:[#allocation3 + $0x18] sm:$0xf] %vm14977_vm4, %v1156_v44 }
  0xb3   : > { %1493 = vrot.lane.b32.xlu1 %v1424_v55, %s9524_s27 }
  0xb4   : > { %1491 = vrot.lane.b32.xlu0 %v1423_v15, %s9524_s27 }
  0xb5   : > { %v1162_v16 = vpop.permute.xlu1 %1161 }
  0xb6   : > { %v1160_v54 = vpop.permute.xlu0 %1159  ;;  %1249 = vst.msk [vmem:[#allocation3 + $0x24] sm:$0xf] %vm14977_vm4, %v1162_v16 }
  0xb7   : > { %1248 = vst.msk [vmem:[#allocation3 + $0x20] sm:$0xf] %vm14977_vm4, %v1160_v54  ;;  %1497 = vrot.lane.b32.xlu1 %v10081_v46, %s9524_s27 }
  0xb8   : > { %1495 = vrot.lane.b32.xlu0 %v10083_v47, %s9524_s27 }
  0xb9   : > { %v1166_v59 = vpop.permute.xlu1 %1165 }
  0xba   : > { %v1164_v62 = vpop.permute.xlu0 %1163  ;;  %1251 = vst.msk [vmem:[#allocation3 + $0x2c] sm:$0xf] %vm14977_vm4, %v1166_v59 }
  0xbb   : > { %1250 = vst.msk [vmem:[#allocation3 + $0x28] sm:$0xf] %vm14977_vm4, %v1164_v62  ;;  %1501 = vrot.lane.b32.xlu1 %v10091_v52, %s9524_s27 }
  0xbc   : > { %1499 = vrot.lane.b32.xlu0 %v10093_v56, %s9524_s27 }
  0xbd   : > { %v1170_v2 = vpop.permute.xlu1 %1169 }
  0xbe   : > { %v1168_v3 = vpop.permute.xlu0 %1167  ;;  %1253 = vst.msk [vmem:[#allocation3 + $0x34] sm:$0xf] %vm14977_vm4, %v1170_v2 }
  0xbf   : > { %1252 = vst.msk [vmem:[#allocation3 + $0x30] sm:$0xf] %vm14977_vm4, %v1168_v3  ;;  %1505 = vrot.lane.b32.xlu1 %v10101_v63, %s9524_s27 }
  0xc0   : > { %1503 = vrot.lane.b32.xlu0 %v10103_v0, %s9524_s27 }
  0xc1   : > { %v1174_v6 = vpop.permute.xlu1 %1173 }
  0xc2   : > { %v1172_v7 = vpop.permute.xlu0 %1171  ;;  %1255 = vst.msk [vmem:[#allocation3 + $0x3c] sm:$0xf] %vm14977_vm4, %v1174_v6 }
  0xc3   : > { %1254 = vst.msk [vmem:[#allocation3 + $0x38] sm:$0xf] %vm14977_vm4, %v1172_v7  ;;  %1509 = vrot.lane.b32.xlu1 %v10111_v61, %s9524_s27 }
  0xc4   : > { %1507 = vrot.lane.b32.xlu0 %v10113_v24, %s9524_s27 }
  0xc5   : > { %v1178_v13 = vpop.permute.xlu1 %1177 }
  0xc6   : > { %v1176_v14 = vpop.permute.xlu0 %1175  ;;  %1257 = vst.msk [vmem:[#allocation3 + $0x44] sm:$0xf] %vm14977_vm4, %v1178_v13 }
  0xc7   : > { %1256 = vst.msk [vmem:[#allocation3 + $0x40] sm:$0xf] %vm14977_vm4, %v1176_v14  ;;  %1513 = vrot.lane.b32.xlu1 %v10121_v8, %s9524_s27 }
  0xc8   : > { %1511 = vrot.lane.b32.xlu0 %v10123_v11, %s9524_s27 }
  0xc9   : > { %v1182_v26 = vpop.permute.xlu1 %1181 }
  0xca   : > { %v1180_v32 = vpop.permute.xlu0 %1179  ;;  %1259 = vst.msk [vmem:[#allocation3 + $0x4c] sm:$0xf] %vm14977_vm4, %v1182_v26 }
  0xcb   : > { %1258 = vst.msk [vmem:[#allocation3 + $0x48] sm:$0xf] %vm14977_vm4, %v1180_v32  ;;  %1517 = vrot.lane.b32.xlu1 %v10131_v21, %s9524_s27 }
  0xcc   : > { %1515 = vrot.lane.b32.xlu0 %v10133_v18, %s9524_s27 }
  0xcd   : > { %v1186_v22 = vpop.permute.xlu1 %1185 }
  0xce   : > { %v1184_v23 = vpop.permute.xlu0 %1183  ;;  %1261 = vst.msk [vmem:[#allocation3 + $0x54] sm:$0xf] %vm14977_vm4, %v1186_v22 }
  0xcf   : > { %1260 = vst.msk [vmem:[#allocation3 + $0x50] sm:$0xf] %vm14977_vm4, %v1184_v23  ;;  %1521 = vrot.lane.b32.xlu1 %v10141_v48, %s9524_s27 }
  0xd0   : > { %1519 = vrot.lane.b32.xlu0 %v10143_v1, %s9524_s27 }
  0xd1   : > { %v1190_v37 = vpop.permute.xlu1 %1189 }
  0xd2   : > { %v1188_v38 = vpop.permute.xlu0 %1187  ;;  %1263 = vst.msk [vmem:[#allocation3 + $0x5c] sm:$0xf] %vm14977_vm4, %v1190_v37 }
  0xd3   : > { %1262 = vst.msk [vmem:[#allocation3 + $0x58] sm:$0xf] %vm14977_vm4, %v1188_v38  ;;  %1525 = vrot.lane.b32.xlu1 %v10151_v25, %s9524_s27 }
  0xd4   : > { %1523 = vrot.lane.b32.xlu0 %v10153_v33, %s9524_s27 }
  0xd5   : > { %v1194_v40 = vpop.permute.xlu1 %1193 }
  0xd6   : > { %v1192_v29 = vpop.permute.xlu0 %1191  ;;  %1265 = vst.msk [vmem:[#allocation3 + $0x64] sm:$0xf] %vm14977_vm4, %v1194_v40 }
  0xd7   : > { %1264 = vst.msk [vmem:[#allocation3 + $0x60] sm:$0xf] %vm14977_vm4, %v1192_v29  ;;  %1529 = vrot.lane.b32.xlu1 %v10161_v45, %s9524_s27 }
  0xd8   : > { %1527 = vrot.lane.b32.xlu0 %v10163_v49, %s9524_s27 }
  0xd9   : > { %v1198_v28 = vpop.permute.xlu1 %1197 }
  0xda   : > { %v1196_v53 = vpop.permute.xlu0 %1195  ;;  %1267 = vst.msk [vmem:[#allocation3 + $0x6c] sm:$0xf] %vm14977_vm4, %v1198_v28 }
  0xdb   : > { %1266 = vst.msk [vmem:[#allocation3 + $0x68] sm:$0xf] %vm14977_vm4, %v1196_v53  ;;  %1533 = vrot.lane.b32.xlu1 %v10171_v42, %s9524_s27 }
  0xdc   : > { %1531 = vrot.lane.b32.xlu0 %v10173_v35, %s9524_s27 }
  0xdd   : > { %v1202_v9 = vpop.permute.xlu1 %1201 }
  0xde   : > { %v1200_v41 = vpop.permute.xlu0 %1199  ;;  %1269 = vst.msk [vmem:[#allocation3 + $0x74] sm:$0xf] %vm14977_vm4, %v1202_v9 }
  0xdf   : > { %1268 = vst.msk [vmem:[#allocation3 + $0x70] sm:$0xf] %vm14977_vm4, %v1200_v41  ;;  %1537 = vrot.lane.b32.xlu1 %v10181_v60, %s9524_s27 }
  0xe0   : > { %1535 = vrot.lane.b32.xlu0 %v10183_v30, %s9524_s27 }
  0xe1   : > { %v1206_v36 = vpop.permute.xlu1 %1205 }
  0xe2   : > { %v1204_v50 = vpop.permute.xlu0 %1203  ;;  %1271 = vst.msk [vmem:[#allocation3 + $0x7c] sm:$0xf] %vm14977_vm4, %v1206_v36 }
  0xe3   : > { %1270 = vst.msk [vmem:[#allocation3 + $0x78] sm:$0xf] %vm14977_vm4, %v1204_v50  ;;  %1541 = vrot.lane.b32.xlu1 %v10191_v19, %s9524_s27 }
  0xe4   : > { %1539 = vrot.lane.b32.xlu0 %v10193_v34, %s9524_s27 }
  0xe5   : > { %v1297_v5 = vpop.permute.xlu1 %1296 }
  0xe6   : > { %v1295_v27 = vpop.permute.xlu0 %1294  ;;  %1392 = vst.msk [vmem:[#allocation3 + $0x4] sm:$0xf] %vm14976_vm5, %v1297_v5 }
  0xe7   : > { %1391 = vst.msk [vmem:[#allocation3] sm:$0xf] %vm14976_vm5, %v1295_v27  ;;  %1545 = vrot.lane.b32.xlu1 %v10201_v51, %s9524_s27  ;;  %v10321_v27 = vld [vmem:[#allocation2 + $0x18c] sm:$0xf] }
  0xe8   : > { %1543 = vrot.lane.b32.xlu0 %v10203_v4, %s9524_s27 }
  0xe9   : > { %v1301_v58 = vpop.permute.xlu1 %1300 }
  0xea   : > { %v1299_v10 = vpop.permute.xlu0 %1298  ;;  %1394 = vst.msk [vmem:[#allocation3 + $0xc] sm:$0xf] %vm14976_vm5, %v1301_v58  ;;  %v10323_v58 = vld [vmem:[#allocation2 + $0x188] sm:$0xf] }
  0xeb   : > { %1393 = vst.msk [vmem:[#allocation3 + $0x8] sm:$0xf] %vm14976_vm5, %v1299_v10  ;;  %1549 = vrot.lane.b32.xlu1 %v10211_v31, %s9524_s27 }
  0xec   : > { %1547 = vrot.lane.b32.xlu0 %v10213_v57, %s9524_s27 }
  0xed   : > { %v1305_v39 = vpop.permute.xlu1 %1304 }
  0xee   : > { %v1303_v55 = vpop.permute.xlu0 %1302  ;;  %1396 = vst.msk [vmem:[#allocation3 + $0x14] sm:$0xf] %vm14976_vm5, %v1305_v39 }
  0xef   : > { %1395 = vst.msk [vmem:[#allocation3 + $0x10] sm:$0xf] %vm14976_vm5, %v1303_v55  ;;  %1553 = vrot.lane.b32.xlu1 %v10221_v20, %s9524_s27 }
  0xf0   : > { %1551 = vrot.lane.b32.xlu0 %v10223_v12, %s9524_s27 }
  0xf1   : > { %v1309_v15 = vpop.permute.xlu1 %1308 }
  0xf2   : > { %v1307_v43 = vpop.permute.xlu0 %1306  ;;  %1398 = vst.msk [vmem:[#allocation3 + $0x1c] sm:$0xf] %vm14976_vm5, %v1309_v15 }
  0xf3   : > { %1397 = vst.msk [vmem:[#allocation3 + $0x18] sm:$0xf] %vm14976_vm5, %v1307_v43  ;;  %1624 = vrot.lane.b32.xlu1 %v10081_v46, %s9525_s28 }
  0xf4   : > { %1622 = vrot.lane.b32.xlu0 %v10083_v47, %s9525_s28 }
  0xf5   : > { %v1313_v44 = vpop.permute.xlu1 %1312 }
  0xf6   : > { %v1311_v16 = vpop.permute.xlu0 %1310  ;;  %1400 = vst.msk [vmem:[#allocation3 + $0x24] sm:$0xf] %vm14976_vm5, %v1313_v44 }
  0xf7   : > { %1399 = vst.msk [vmem:[#allocation3 + $0x20] sm:$0xf] %vm14976_vm5, %v1311_v16  ;;  %1628 = vrot.lane.b32.xlu1 %v10091_v52, %s9525_s28 }
  0xf8   : > { %1626 = vrot.lane.b32.xlu0 %v10093_v56, %s9525_s28 }
  0xf9   : > { %v1317_v54 = vpop.permute.xlu1 %1316 }
  0xfa   : > { %v1315_v59 = vpop.permute.xlu0 %1314  ;;  %1402 = vst.msk [vmem:[#allocation3 + $0x2c] sm:$0xf] %vm14976_vm5, %v1317_v54 }
  0xfb   : > { %1401 = vst.msk [vmem:[#allocation3 + $0x28] sm:$0xf] %vm14976_vm5, %v1315_v59  ;;  %1632 = vrot.lane.b32.xlu1 %v10101_v63, %s9525_s28  ;;  %v1886_v59 = vld [vmem:[#allocation2 + $0x24] sm:$0xf] }
  0xfc   : > { %1630 = vrot.lane.b32.xlu0 %v10103_v0, %s9525_s28 }
  0xfd   : > { %v1321_v46 = vpop.permute.xlu1 %1320 }
  0xfe   : > { %v1319_v47 = vpop.permute.xlu0 %1318  ;;  %1404 = vst.msk [vmem:[#allocation3 + $0x34] sm:$0xf] %vm14976_vm5, %v1321_v46  ;;  %v1885_v46 = vld [vmem:[#allocation2 + $0x20] sm:$0xf] }
  0xff   : > { %1403 = vst.msk [vmem:[#allocation3 + $0x30] sm:$0xf] %vm14976_vm5, %v1319_v47  ;;  %1636 = vrot.lane.b32.xlu1 %v10111_v61, %s9525_s28 }
 0x100   : > { %1634 = vrot.lane.b32.xlu0 %v10113_v24, %s9525_s28 }
 0x101   : > { %v1325_v62 = vpop.permute.xlu1 %1324 }
 0x102   : > { %v1323_v2 = vpop.permute.xlu0 %1322  ;;  %1406 = vst.msk [vmem:[#allocation3 + $0x3c] sm:$0xf] %vm14976_vm5, %v1325_v62  ;;  %v1889_v62 = vld [vmem:[#allocation2 + $0x3c] sm:$0xf] }
 0x103   : > { %1405 = vst.msk [vmem:[#allocation3 + $0x38] sm:$0xf] %vm14976_vm5, %v1323_v2  ;;  %1640 = vrot.lane.b32.xlu1 %v10121_v8, %s9525_s28 }
 0x104   : > { %1638 = vrot.lane.b32.xlu0 %v10123_v11, %s9525_s28 }
 0x105   : > { %v1329_v3 = vpop.permute.xlu1 %1328 }
 0x106   : > { %v1327_v6 = vpop.permute.xlu0 %1326  ;;  %1408 = vst.msk [vmem:[#allocation3 + $0x44] sm:$0xf] %vm14976_vm5, %v1329_v3 }
 0x107   : > { %1407 = vst.msk [vmem:[#allocation3 + $0x40] sm:$0xf] %vm14976_vm5, %v1327_v6  ;;  %1644 = vrot.lane.b32.xlu1 %v10131_v21, %s9525_s28 }
 0x108   : > { %1642 = vrot.lane.b32.xlu0 %v10133_v18, %s9525_s28 }
 0x109   : > { %v1333_v7 = vpop.permute.xlu1 %1332 }
 0x10a   : > { %v1331_v13 = vpop.permute.xlu0 %1330  ;;  %1410 = vst.msk [vmem:[#allocation3 + $0x4c] sm:$0xf] %vm14976_vm5, %v1333_v7  ;;  %v1888_v7 = vld [vmem:[#allocation2 + $0x38] sm:$0xf] }
 0x10b   : > { %1409 = vst.msk [vmem:[#allocation3 + $0x48] sm:$0xf] %vm14976_vm5, %v1331_v13  ;;  %1648 = vrot.lane.b32.xlu1 %v10141_v48, %s9525_s28  ;;  %v1964_v13 = vshrl.u32 %v1885_v46, 16 }
 0x10c   : > { %1646 = vrot.lane.b32.xlu0 %v10143_v1, %s9525_s28 }
 0x10d   : > { %v1337_v14 = vpop.permute.xlu1 %1336 }
 0x10e   : > { %v1335_v26 = vpop.permute.xlu0 %1334  ;;  %1412 = vst.msk [vmem:[#allocation3 + $0x54] sm:$0xf] %vm14976_vm5, %v1337_v14  ;;  %v1967_v14 = vshll.u32 %v1885_v46, 16  ;;  %v1894_v46 = vld [vmem:[#allocation2 + $0x68] sm:$0xf] }
 0x10f   : > { %1411 = vst.msk [vmem:[#allocation3 + $0x50] sm:$0xf] %vm14976_vm5, %v1335_v26  ;;  %1652 = vrot.lane.b32.xlu1 %v10151_v25, %s9525_s28  ;;  %v1997_v26 = vshll.u32 %v1889_v62, 16 }
 0x110   : > { %1650 = vrot.lane.b32.xlu0 %v10153_v33, %s9525_s28 }
 0x111   : > { %v1341_v32 = vpop.permute.xlu1 %1340 }
 0x112   : > { %v1339_v22 = vpop.permute.xlu0 %1338  ;;  %1414 = vst.msk [vmem:[#allocation3 + $0x5c] sm:$0xf] %vm14976_vm5, %v1341_v32  ;;  %v2001_v32 = vshrl.u32 %v1889_v62, 16 }
 0x113   : > { %1413 = vst.msk [vmem:[#allocation3 + $0x58] sm:$0xf] %vm14976_vm5, %v1339_v22  ;;  %1656 = vrot.lane.b32.xlu1 %v10161_v45, %s9525_s28 }
 0x114   : > { %1654 = vrot.lane.b32.xlu0 %v10163_v49, %s9525_s28 }
 0x115   : > { %v1345_v23 = vpop.permute.xlu1 %1344 }
 0x116   : > { %v1343_v37 = vpop.permute.xlu0 %1342  ;;  %1416 = vst.msk [vmem:[#allocation3 + $0x64] sm:$0xf] %vm14976_vm5, %v1345_v23 }
 0x117   : > { %1415 = vst.msk [vmem:[#allocation3 + $0x60] sm:$0xf] %vm14976_vm5, %v1343_v37  ;;  %1660 = vrot.lane.b32.xlu1 %v10171_v42, %s9525_s28  ;;  %v1988_v37 = vshrl.u32 %v1888_v7, 16 }
 0x118   : > { %1658 = vrot.lane.b32.xlu0 %v10173_v35, %s9525_s28 }
 0x119   : > { %v1349_v38 = vpop.permute.xlu1 %1348 }
 0x11a   : > { %v1347_v40 = vpop.permute.xlu0 %1346  ;;  %1418 = vst.msk [vmem:[#allocation3 + $0x6c] sm:$0xf] %vm14976_vm5, %v1349_v38  ;;  %v1991_v38 = vshll.u32 %v1888_v7, 16  ;;  %v1893_v7 = vld [vmem:[#allocation2 + $0x58] sm:$0x1] }
 0x11b   : > { %1417 = vst.msk [vmem:[#allocation3 + $0x68] sm:$0xf] %vm14976_vm5, %v1347_v40  ;;  %1664 = vrot.lane.b32.xlu1 %v10181_v60, %s9525_s28 }
 0x11c   : > { %1662 = vrot.lane.b32.xlu0 %v10183_v30, %s9525_s28 }
 0x11d   : > { %v1353_v29 = vpop.permute.xlu1 %1352 }
 0x11e   : > { %v1351_v28 = vpop.permute.xlu0 %1350  ;;  %1420 = vst.msk [vmem:[#allocation3 + $0x74] sm:$0xf] %vm14976_vm5, %v1353_v29 }
 0x11f   : > { %1419 = vst.msk [vmem:[#allocation3 + $0x70] sm:$0xf] %vm14976_vm5, %v1351_v28  ;;  %1668 = vrot.lane.b32.xlu1 %v10191_v19, %s9525_s28  ;;  %v1884_v28 = vld [vmem:[#allocation2 + $0x10] sm:$0x1] }
 0x120   : > { %1666 = vrot.lane.b32.xlu0 %v10193_v34, %s9525_s28 }
 0x121   : > { %v1357_v53 = vpop.permute.xlu1 %1356 }
 0x122   : > { %v1355_v9 = vpop.permute.xlu0 %1354  ;;  %1422 = vst.msk [vmem:[#allocation3 + $0x7c] sm:$0xf] %vm14976_vm5, %v1357_v53 }
 0x123   : > { %1421 = vst.msk [vmem:[#allocation3 + $0x78] sm:$0xf] %vm14976_vm5, %v1355_v9  ;;  %1672 = vrot.lane.b32.xlu1 %v10201_v51, %s9525_s28 }
 0x124   : > { %1670 = vrot.lane.b32.xlu0 %v10203_v4, %s9525_s28 }
 0x125   : > { %v1494_v41 = vpop.permute.xlu1 %1493 }
 0x126   : > { %v1492_v36 = vpop.permute.xlu0 %1491  ;;  %1589 = vst.msk [vmem:[#allocation3 + $0x4] sm:$0xf] %vm14974_vm6, %v1494_v41  ;;  %v1966_v41 = vrot.slane %v1964_v13, 4 }
 0x127   : > { %1588 = vst.msk [vmem:[#allocation3] sm:$0xf] %vm14974_vm6, %v1492_v36  ;;  %1676 = vrot.lane.b32.xlu1 %v10211_v31, %s9525_s28  ;;  %v1969_v36 = vrot.slane %v1967_v14, 5 }
 0x128   : > { %1674 = vrot.lane.b32.xlu0 %v10213_v57, %s9525_s28 }
 0x129   : > { %v1498_v50 = vpop.permute.xlu1 %1497 }
 0x12a   : > { %v1496_v5 = vpop.permute.xlu0 %1495  ;;  %1591 = vst.msk [vmem:[#allocation3 + $0xc] sm:$0xf] %vm14974_vm6, %v1498_v50  ;;  %v1887_v50 = vld [vmem:[#allocation2 + $0x28] sm:$0x1] }
 0x12b   : > { %1590 = vst.msk [vmem:[#allocation3 + $0x8] sm:$0xf] %vm14974_vm6, %v1496_v5  ;;  %1680 = vrot.lane.b32.xlu1 %v10221_v20, %s9525_s28  ;;  %v10413_v5 = vrot.slane %v1997_v26, 5  ;;  %v2036_v26 = vshrl.u32 %v1894_v46, 16 }
 0x12c   : > { %1678 = vrot.lane.b32.xlu0 %v10223_v12, %s9525_s28 }
 0x12d   : > { %v1502_v10 = vpop.permute.xlu1 %1501 }
 0x12e   : > { %v1500_v39 = vpop.permute.xlu0 %1499  ;;  %1593 = vst.msk [vmem:[#allocation3 + $0x14] sm:$0xf] %vm14974_vm6, %v1502_v10  ;;  %v2003_v10 = vrot.slane %v2001_v32, 4  ;;  %v2039_v32 = vshll.u32 %v1894_v46, 16  ;;  %v1902_v46 = vld [vmem:[#allocation2 + $0xa0] sm:$0x1] }
 0x12f   : > { %1592 = vst.msk [vmem:[#allocation3 + $0x10] sm:$0xf] %vm14974_vm6, %v1500_v39  ;;  %1684 = vrot.lane.b32.xlu1 %v10321_v27, %s9525_s28 }
 0x130   : > { %1682 = vrot.lane.b32.xlu0 %v10323_v58, %s9525_s28 }
 0x131   : > { %v1506_v55 = vpop.permute.xlu1 %1505 }
 0x132   : > { %v1504_v15 = vpop.permute.xlu0 %1503  ;;  %1595 = vst.msk [vmem:[#allocation3 + $0x1c] sm:$0xf] %vm14974_vm6, %v1506_v55 }
 0x133   : > { %1594 = vst.msk [vmem:[#allocation3 + $0x18] sm:$0xf] %vm14974_vm6, %v1504_v15  ;;  %1755 = vrot.lane.b32.xlu1 %v10091_v52, %s9526_s29  ;;  %v1890_v15 = vld [vmem:[#allocation2 + $0x40] sm:$0x1] }
 0x134   : > { %1753 = vrot.lane.b32.xlu0 %v10093_v56, %s9526_s29 }
 0x135   : > { %v1510_v43 = vpop.permute.xlu1 %1509 }
 0x136   : > { %v1508_v44 = vpop.permute.xlu0 %1507  ;;  %1597 = vst.msk [vmem:[#allocation3 + $0x24] sm:$0xf] %vm14974_vm6, %v1510_v43  ;;  %v1990_v43 = vrot.slane %v1988_v37, 4  ;;  %v1898_v37 = vld [vmem:[#allocation2 + $0x84] sm:$0xf] }
 0x137   : > { %1596 = vst.msk [vmem:[#allocation3 + $0x20] sm:$0xf] %vm14974_vm6, %v1508_v44  ;;  %1759 = vrot.lane.b32.xlu1 %v10101_v63, %s9526_s29  ;;  %v1993_v44 = vrot.slane %v1991_v38, 5 }
 0x138   : > { %1757 = vrot.lane.b32.xlu0 %v10103_v0, %s9526_s29 }
 0x139   : > { %v1514_v16 = vpop.permute.xlu1 %1513 }
 0x13a   : > { %v1512_v54 = vpop.permute.xlu0 %1511  ;;  %1599 = vst.msk [vmem:[#allocation3 + $0x2c] sm:$0xf] %vm14974_vm6, %v1514_v16  ;;  %v1892_v16 = vld [vmem:[#allocation2 + $0x54] sm:$0xf] }
 0x13b   : > { %1598 = vst.msk [vmem:[#allocation3 + $0x28] sm:$0xf] %vm14974_vm6, %v1512_v54  ;;  %1763 = vrot.lane.b32.xlu1 %v10111_v61, %s9526_s29 }
 0x13c   : > { %1761 = vrot.lane.b32.xlu0 %v10113_v24, %s9526_s29 }
 0x13d   : > { %v1518_v52 = vpop.permute.xlu1 %1517 }
 0x13e   : > { %v1516_v56 = vpop.permute.xlu0 %1515  ;;  %1601 = vst.msk [vmem:[#allocation3 + $0x34] sm:$0xf] %vm14974_vm6, %v1518_v52  ;;  %v1891_v52 = vld [vmem:[#allocation2 + $0x50] sm:$0xf] }
 0x13f   : > { %1600 = vst.msk [vmem:[#allocation3 + $0x30] sm:$0xf] %vm14974_vm6, %v1516_v56  ;;  %1767 = vrot.lane.b32.xlu1 %v10121_v8, %s9526_s29 }
 0x140   : > { %1765 = vrot.lane.b32.xlu0 %v10123_v11, %s9526_s29 }
 0x141   : > { %v1522_v63 = vpop.permute.xlu1 %1521 }
 0x142   : > { %v1520_v0 = vpop.permute.xlu0 %1519  ;;  %1603 = vst.msk [vmem:[#allocation3 + $0x3c] sm:$0xf] %vm14974_vm6, %v1522_v63  ;;  %v1983_v63 = vshll.u32 %v1887_v50, 16 }
 0x143   : > { %1602 = vst.msk [vmem:[#allocation3 + $0x38] sm:$0xf] %vm14974_vm6, %v1520_v0  ;;  %1771 = vrot.lane.b32.xlu1 %v10131_v21, %s9526_s29  ;;  %v1970_v0 = vor.u32 %v1969_v36, %v1966_v41 }
 0x144   : > { %1769 = vrot.lane.b32.xlu0 %v10133_v18, %s9526_s29 }
 0x145   : > { %v1526_v61 = vpop.permute.xlu1 %1525 }
 0x146   : > { %v1524_v24 = vpop.permute.xlu0 %1523  ;;  %1605 = vst.msk [vmem:[#allocation3 + $0x44] sm:$0xf] %vm14974_vm6, %v1526_v61  ;;  %v2004_v61 = vor.u32 %v2003_v10, %v10413_v5 }
 0x147   : > { %1604 = vst.msk [vmem:[#allocation3 + $0x40] sm:$0xf] %vm14974_vm6, %v1524_v24  ;;  %1775 = vrot.lane.b32.xlu1 %v10141_v48, %s9526_s29  ;;  %v2007_v24 = vshll.u32 %v1890_v15, 16 }
 0x148   : > { %1773 = vrot.lane.b32.xlu0 %v10143_v1, %s9526_s29  ;;  %v2005_v62 = vrot.slane %v2004_v61, 4 }
 0x149   : > { %v1530_v8 = vpop.permute.xlu1 %1529 }
 0x14a   : > { %v1528_v11 = vpop.permute.xlu0 %1527  ;;  %1607 = vst.msk [vmem:[#allocation3 + $0x4c] sm:$0xf] %vm14974_vm6, %v1530_v8  ;;  %v2021_v8 = vshll.u32 %v1892_v16, 16 }
 0x14b   : > { %1606 = vst.msk [vmem:[#allocation3 + $0x48] sm:$0xf] %vm14974_vm6, %v1528_v11  ;;  %1779 = vrot.lane.b32.xlu1 %v10151_v25, %s9526_s29  ;;  %v2025_v11 = vshrl.u32 %v1892_v16, 16  ;;  %v2069_v16 = vshll.u32 %v1898_v37, 16 }
 0x14c   : > { %1777 = vrot.lane.b32.xlu0 %v10153_v33, %s9526_s29 }
 0x14d   : > { %v1534_v21 = vpop.permute.xlu1 %1533 }
 0x14e   : > { %v1532_v18 = vpop.permute.xlu0 %1531  ;;  %1609 = vst.msk [vmem:[#allocation3 + $0x54] sm:$0xf] %vm14974_vm6, %v1534_v21 }
 0x14f   : > { %1608 = vst.msk [vmem:[#allocation3 + $0x50] sm:$0xf] %vm14974_vm6, %v1532_v18  ;;  %1783 = vrot.lane.b32.xlu1 %v10161_v45, %s9526_s29 }
 0x150   : > { %1781 = vrot.lane.b32.xlu0 %v10163_v49, %s9526_s29 }
 0x151   : > { %v1538_v48 = vpop.permute.xlu1 %1537 }
 0x152   : > { %v1536_v1 = vpop.permute.xlu0 %1535  ;;  %1611 = vst.msk [vmem:[#allocation3 + $0x5c] sm:$0xf] %vm14974_vm6, %v1538_v48  ;;  %v1994_v48 = vor.u32 %v1993_v44, %v1990_v43  ;;  %v2038_v43 = vrot.slane %v2036_v26, 4  ;;  %v2041_v44 = vrot.slane %v2039_v32, 5 }
 0x153   : > { %1610 = vst.msk [vmem:[#allocation3 + $0x58] sm:$0xf] %vm14974_vm6, %v1536_v1  ;;  %1787 = vrot.lane.b32.xlu1 %v10171_v42, %s9526_s29  ;;  %v1883_v42 = vld [vmem:[#allocation2 + $0xc] sm:$0xf]  ;;  %v2012_v1 = vshrl.u32 %v1891_v52, 16 }
 0x154   : > { %1785 = vrot.lane.b32.xlu0 %v10173_v35, %s9526_s29  ;;  %v1882_v35 = vld [vmem:[#allocation2 + $0x8] sm:$0xf]  ;;  %v1953_v2 = vshrl.u32 %v1883_v42, 16 }
 0x155   : > { %v1542_v25 = vpop.permute.xlu1 %1541  ;;  %v1940_v3 = vshrl.u32 %v1882_v35, 16  ;;  %v1943_v6 = vshll.u32 %v1882_v35, 16  ;;  %v1985_v35 = vrot.slane %v1983_v63, 5 }
 0x156   : > { %v1540_v33 = vpop.permute.xlu0 %1539  ;;  %1613 = vst.msk [vmem:[#allocation3 + $0x64] sm:$0xf] %vm14974_vm6, %v1542_v25  ;;  %v2015_v25 = vshll.u32 %v1891_v52, 16 }
 0x157   : > { %1612 = vst.msk [vmem:[#allocation3 + $0x60] sm:$0xf] %vm14974_vm6, %v1540_v33  ;;  %1791 = vrot.lane.b32.xlu1 %v10181_v60, %s9526_s29  ;;  %v1942_v29 = vrot.slane %v1940_v3, 4 }
 0x158   : > { %1789 = vrot.lane.b32.xlu0 %v10183_v30, %s9526_s29  ;;  %v1949_v30 = vshll.u32 %v1883_v42, 16 }
 0x159   : > { %v1546_v45 = vpop.permute.xlu1 %1545 }
 0x15a   : > { %v1544_v49 = vpop.permute.xlu0 %1543  ;;  %1615 = vst.msk [vmem:[#allocation3 + $0x6c] sm:$0xf] %vm14974_vm6, %v1546_v45  ;;  %v10405_v40 = vrot.slane %v1949_v30, 5  ;;  %v1895_v45 = vld [vmem:[#allocation2 + $0x6c] sm:$0xf]  ;;  %v2009_v30 = vrot.slane %v2007_v24, 5 }
 0x15b   : > { %1614 = vst.msk [vmem:[#allocation3 + $0x68] sm:$0xf] %vm14974_vm6, %v1544_v49  ;;  %1795 = vrot.lane.b32.xlu1 %v10191_v19, %s9526_s29  ;;  %v1973_v19 = vshll.u32 %v1886_v59, 16  ;;  %v2045_v13 = vshll.u32 %v1895_v45, 16  ;;  %v2049_v14 = vshrl.u32 %v1895_v45, 16 }
 0x15c   : > { %1793 = vrot.lane.b32.xlu0 %v10193_v34, %s9526_s29  ;;  %v1977_v34 = vshrl.u32 %v1886_v59, 16  ;;  %v1971_v59 = vrot.slane %v1970_v0, 4  ;;  %v1899_v45 = vld [vmem:[#allocation2 + $0x88] sm:$0x1] }
 0x15d   : > { %v1550_v60 = vpop.permute.xlu1 %1549  ;;  %v10411_v53 = vrot.slane %v1973_v19, 5  ;;  %v2014_v19 = vrot.slane %v2012_v1, 4  ;;  %v2051_v15 = vrot.slane %v2049_v14, 4  ;;  %v1903_v1 = vld [vmem:[#allocation2 + $0xb0] sm:$0xf] }
 0x15e   : > { %v1548_v47 = vpop.permute.xlu0 %1547  ;;  %1617 = vst.msk [vmem:[#allocation3 + $0x74] sm:$0xf] %vm14974_vm6, %v1550_v60  ;;  %v1979_v9 = vrot.slane %v1977_v34, 4  ;;  %v1457_v60 = vld [vmem:[#allocation2 + $0x1a0] sm:$0xf]  ;;  %v2017_v34 = vrot.slane %v2015_v25, 5 }
 0x15f   : > { %1616 = vst.msk [vmem:[#allocation3 + $0x70] sm:$0xf] %vm14974_vm6, %v1548_v47  ;;  %1799 = vrot.lane.b32.xlu1 %v10201_v51, %s9526_s29  ;;  %v1955_v51 = vrot.slane %v1953_v2, 4  ;;  %v15083_v47 = vmov 0  ;;  %v10436_v2 = vrot.slane %v2021_v8, 5 }
 0x160   : > { %1797 = vrot.lane.b32.xlu0 %v10203_v4, %s9526_s29  ;;  %v1945_v4 = vrot.slane %v1943_v6, 5  ;;  %v1980_v56 = vor.u32 %v1979_v9, %v10411_v53  ;;  %v15084_v47 = vsel %vm10432_vm10, 4294967295, %v15083_v47  ;;  %v1901_v9 = vld [vmem:[#allocation2 + $0x9c] sm:$0xf]  ;;  %v2018_v10 = vor.u32 %v2017_v34, %v2014_v19 }
 0x161   : > { %v1554_v22 = vpop.permute.xlu1 %1553  ;;  %15085 = vst [vmem:[#allocation6_spill] sm:$0xff] %v15084_v47  ;;  %v2093_v52 = vshll.u32 %v1901_v9, 16  ;;  %v2097_v63 = vshrl.u32 %v1901_v9, 16  ;;  %v2103_v9 = vshll.u32 %v1902_v46, 16  ;;  %v349_v47 = vlaneseq }
 0x162   : > { %v1552_v23 = vpop.permute.xlu0 %1551  ;;  %1619 = vst.msk [vmem:[#allocation3 + $0x7c] sm:$0xf] %vm14974_vm6, %v1554_v22  ;;  %v1946_v54 = vor.u32 %v1945_v4, %v1942_v29  ;;  %v1981_v42 = vrot.slane %v1980_v56, 4  ;;  %v10458_v29 = vsel %vm10432_vm10, %v2005_v62, %v2009_v30  ;;  %v2031_v4 = vshll.u32 %v1893_v7, 16  ;;  %v1905_v7 = vld [vmem:[#allocation2 + $0xb8] sm:$0x1] }
 0x163   : > { %1618 = vst.msk [vmem:[#allocation3 + $0x78] sm:$0xf] %vm14974_vm6, %v1552_v23  ;;  %1803 = vrot.lane.b32.xlu1 %v10211_v31, %s9526_s29  ;;  %v1956_v31 = vor.u32 %v1955_v51, %v10405_v40  ;;  %v10454_v51 = vsel %vm10432_vm10, %v1971_v59, %v10411_v53  ;;  %v10466_v53 = vrot.slane %v2045_v13, 5  ;;  %v2019_v25 = vrot.slane %v2018_v10, 4 }
 0x164   : > { %1801 = vrot.lane.b32.xlu0 %v10213_v57, %s9526_s29  ;;  %v1959_v57 = vshll.u32 %v1884_v28, 16  ;;  %v1947_v49 = vrot.slane %v1946_v54, 4  ;;  %v10449_v38 = vsel %vm10432_vm10, %v1981_v42, %v1985_v35  ;;  %v1897_v28 = vld [vmem:[#allocation2 + $0x80] sm:$0xf]  ;;  %v2033_v56 = vrot.slane %v2031_v4, 5 }
 0x165   : > { %v1625_v39 = vpop.permute.xlu1 %1624  ;;  %v2063_v54 = vshll.u32 %v1897_v28, 16  ;;  %v10481_v59 = vrot.slane %v2093_v52, 5  ;;  %v2111_v13 = vshll.u32 %v1903_v1, 16  ;;  %v10494_v14 = vsel %vm10432_vm10, %v2019_v25, %v10436_v2 }
 0x166   : > { %v1623_v55 = vpop.permute.xlu0 %1622  ;;  %1720 = vst.msk [vmem:[#allocation3 + $0x4] sm:$0xf] %vm14973_vm7, %v1625_v39  ;;  %v1961_v33 = vrot.slane %v1959_v57, 5  ;;  %v1952_v23 = vsel %vm10432_vm10, %v1947_v49, %v10405_v40  ;;  %v1896_v39 = vld [vmem:[#allocation2 + $0x70] sm:$0x1]  ;;  %v2060_v57 = vshrl.u32 %v1897_v28, 16 }
 0x167   : > { %1719 = vst.msk [vmem:[#allocation3] sm:$0xf] %vm14973_vm7, %v1623_v55  ;;  %1807 = vrot.lane.b32.xlu1 %v10221_v20, %s9526_s29  ;;  %v1458_v20 = vld [vmem:[#allocation2 + $0x1a4] sm:$0xf]  ;;  %v1900_v55 = vld [vmem:[#allocation2 + $0x98] sm:$0xf] }
 0x168   : > { %1805 = vrot.lane.b32.xlu0 %v10223_v12, %s9526_s29  ;;  %v1957_v12 = vrot.slane %v1956_v31, 4  ;;  %v1904_v31 = vld [vmem:[#allocation2 + $0xb4] sm:$0xf]  ;;  %v2084_v0 = vshrl.u32 %v1900_v55, 16  ;;  %v2087_v61 = vshll.u32 %v1900_v55, 16  ;;  %v2062_v42 = vrot.slane %v2060_v57, 4 }
 0x169   : > { %v1629_v21 = vpop.permute.xlu1 %1628  ;;  %v2065_v35 = vrot.slane %v2063_v54, 5 }
 0x16a   : > { %v1627_v18 = vpop.permute.xlu0 %1626  ;;  %1722 = vst.msk [vmem:[#allocation3 + $0xc] sm:$0xf] %vm14973_vm7, %v1629_v21  ;;  %v1962_v22 = vsel %vm10432_vm10, %v1957_v12, %v1961_v33  ;;  %v2055_v21 = vshll.u32 %v1896_v39, 16  ;;  %v2042_v12 = vor.u32 %v2041_v44, %v2038_v43  ;;  %v10475_v33 = vrot.slane %v2069_v16, 5 }
 0x16b   : > { %1721 = vst.msk [vmem:[#allocation3 + $0x8] sm:$0xf] %vm14973_vm7, %v1627_v18  ;;  %1811 = vrot.lane.b32.xlu1 %v10321_v27, %s9526_s29  ;;  %v2027_v27 = vrot.slane %v2025_v11, 4  ;;  %v2117_v18 = vshll.u32 %v1904_v31, 16  ;;  %v2086_v62 = vrot.slane %v2084_v0, 4  ;;  %v2089_v30 = vrot.slane %v2087_v61, 5 }
 0x16c   : > { %1809 = vrot.lane.b32.xlu0 %v10323_v58, %s9526_s29  ;;  %v1995_v58 = vrot.slane %v1994_v48, 4  ;;  %v2121_v48 = vshrl.u32 %v1904_v31, 16  ;;  %v2057_v32 = vrot.slane %v2055_v21, 5  ;;  %v2066_v28 = vor.u32 %v2065_v35, %v2062_v42  ;;  %v1910_v0 = vld [vmem:[#allocation2 + $0xe4] sm:$0xf] }
 0x16d   : > { %v1633_v3 = vpop.permute.xlu1 %1632  ;;  %v2028_v50 = vor.u32 %v2027_v27, %v10436_v2  ;;  %v2108_v27 = vshrl.u32 %v1903_v1, 16  ;;  %v10487_v19 = vrot.slane %v2117_v18, 5  ;;  %v2090_v2 = vor.u32 %v2089_v30, %v2086_v62 }
 0x16e   : > { %v1631_v6 = vpop.permute.xlu0 %1630  ;;  %1724 = vst.msk [vmem:[#allocation3 + $0x14] sm:$0xf] %vm14973_vm7, %v1633_v3  ;;  %v10463_v40 = vsel %vm10432_vm10, %v1995_v58, %v10413_v5  ;;  %v2073_v5 = vshrl.u32 %v1898_v37, 16  ;;  %v2123_v34 = vrot.slane %v2121_v48, 4  ;;  %v2043_v37 = vrot.slane %v2042_v12, 4 }
 0x16f   : > { %1723 = vst.msk [vmem:[#allocation3 + $0x10] sm:$0xf] %vm14973_vm7, %v1631_v6  ;;  %1815 = vrot.lane.b32.xlu1 %v1458_v20, %s9526_s29  ;;  %v2029_v11 = vrot.slane %v2028_v50, 4  ;;  %v2052_v20 = vor.u32 %v2051_v15, %v10466_v53  ;;  %v2127_v50 = vshll.u32 %v1905_v7, 16  ;;  %v2110_v10 = vrot.slane %v2108_v27, 4 }
 0x170   : > { %1813 = vrot.lane.b32.xlu0 %v1457_v60, %s9526_s29  ;;  %v2075_v49 = vrot.slane %v2073_v5, 4  ;;  %v2099_v60 = vrot.slane %v2097_v63, 4  ;;  %v2124_v15 = vor.u32 %v2123_v34, %v10487_v19  ;;  %v2113_v43 = vrot.slane %v2111_v13, 5  ;;  %v1909_v12 = vld [vmem:[#allocation2 + $0xe0] sm:$0xf] }
 0x171   : > { %v1637_v41 = vpop.permute.xlu1 %1636  ;;  %v10485_v58 = vsel %vm10432_vm10, %v2029_v11, %v2033_v56  ;;  %v2053_v26 = vrot.slane %v2052_v20, 4  ;;  %v10516_v54 = vsel %vm10432_vm10, %v2043_v37, %v10466_v53  ;;  %v2067_v63 = vrot.slane %v2066_v28, 4  ;;  %v1908_v53 = vld [vmem:[#allocation2 + $0xd0] sm:$0x1] }
 0x172   : > { %v1635_v36 = vpop.permute.xlu0 %1634  ;;  %1726 = vst.msk [vmem:[#allocation3 + $0x1c] sm:$0xf] %vm14973_vm7, %v1637_v41  ;;  %v2076_v4 = vor.u32 %v2075_v49, %v10475_v33  ;;  %v1906_v41 = vld [vmem:[#allocation2 + $0xc8] sm:$0xf]  ;;  %v2129_v11 = vrot.slane %v2127_v50, 5  ;;  %v2125_v48 = vrot.slane %v2124_v15, 4  ;;  %v2114_v1 = vor.u32 %v2113_v43, %v2110_v10 }
 0x173   : > { %1725 = vst.msk [vmem:[#allocation3 + $0x18] sm:$0xf] %vm14973_vm7, %v1635_v36  ;;  %2325 = vrot.lane.b32.xlu1 %v1962_v22, %s9527_s30  ;;  %v2079_v22 = vshll.u32 %v1899_v45, 16  ;;  %v2100_v36 = vor.u32 %v2099_v60, %v10481_v59  ;;  %v10507_v31 = vsel %vm10432_vm10, %v2053_v26, %v2057_v32  ;;  %v2132_v5 = vshrl.u32 %v1906_v41, 16 }
 0x174   : > { %2323 = vrot.lane.b32.xlu0 %v1952_v23, %s9527_s30  ;;  %v1907_v23 = vld [vmem:[#allocation2 + $0xcc] sm:$0xf]  ;;  %v2135_v57 = vshll.u32 %v1906_v41, 16  ;;  %v2077_v52 = vrot.slane %v2076_v4, 4  ;;  %v2165_v42 = vshll.u32 %v1910_v0, 16  ;;  %v2169_v35 = vshrl.u32 %v1910_v0, 16 }
 0x175   : > { %v1641_v24 = vpop.permute.xlu1 %1640  ;;  %v2141_v44 = vshll.u32 %v1907_v23, 16  ;;  %v2145_v16 = vshrl.u32 %v1907_v23, 16  ;;  %v2081_v56 = vrot.slane %v2079_v22, 5  ;;  %v2101_v61 = vrot.slane %v2100_v36, 4  ;;  %v1916_v22 = vld [vmem:[#allocation2 + $0x114] sm:$0xf] }
 0x176   : > { %v1639_v8 = vpop.permute.xlu0 %1638  ;;  %1728 = vst.msk [vmem:[#allocation3 + $0x24] sm:$0xf] %vm14973_vm7, %v1641_v24  ;;  %v2105_v24 = vrot.slane %v2103_v9, 5  ;;  %v2134_v45 = vrot.slane %v2132_v5, 4  ;;  %v2137_v49 = vrot.slane %v2135_v57, 5  ;;  %v10533_v60 = vsel %vm10432_vm10, %v2067_v63, %v10475_v33 }
 0x177   : > { %1727 = vst.msk [vmem:[#allocation3 + $0x20] sm:$0xf] %vm14973_vm7, %v1639_v8  ;;  %2329 = vrot.lane.b32.xlu1 %v10449_v38, %s9527_s30  ;;  %v2091_v8 = vrot.slane %v2090_v2, 4  ;;  %v10518_v25 = vrot.slane %v2141_v44, 5  ;;  %v2147_v20 = vrot.slane %v2145_v16, 4  ;;  %v10528_v46 = vsel %vm10432_vm10, %v2077_v52, %v2081_v56 }
 0x178   : > { %2327 = vrot.lane.b32.xlu0 %v10454_v51, %s9527_s30  ;;  %v10537_v62 = vsel %vm10432_vm10, %v2101_v61, %v2105_v24  ;;  %v2156_v30 = vshrl.u32 %v1909_v12, 16  ;;  %v2159_v27 = vshll.u32 %v1909_v12, 16  ;;  %v10546_v26 = vsel %vm10432_vm10, %v2125_v48, %v2129_v11  ;;  %v1915_v9 = vld [vmem:[#allocation2 + $0x110] sm:$0xf]  ;;  %v1919_v56 = vld [vmem:[#allocation2 + $0x12c] sm:$0xf] }
 0x179   : > { %v1645_v3 = vpop.permute.xlu1 %1644  ;;  %v10542_v13 = vsel %vm10432_vm10, %v2091_v8, %v10481_v59  ;;  %v2148_v33 = vor.u32 %v2147_v20, %v10518_v25  ;;  %v2151_v32 = vshll.u32 %v1908_v53, 16  ;;  %v2115_v23 = vrot.slane %v2114_v1, 4  ;;  %v1911_v59 = vld [vmem:[#allocation2 + $0xe8] sm:$0x1]  ;;  %v1914_v20 = vld [vmem:[#allocation2 + $0x100] sm:$0x1] }
 0x17a   : > { %v1643_v6 = vpop.permute.xlu0 %1642  ;;  %1730 = vst.msk [vmem:[#allocation3 + $0x2c] sm:$0xf] %vm14973_vm7, %v1645_v3  ;;  %v1913_v3 = vld [vmem:[#allocation2 + $0xfc] sm:$0xf]  ;;  %v2138_v37 = vor.u32 %v2137_v49, %v2134_v45  ;;  %v10551_v4 = vrot.slane %v2165_v42, 5  ;;  %v2171_v28 = vrot.slane %v2169_v35, 4 }
 0x17b   : > { %1729 = vst.msk [vmem:[#allocation3 + $0x28] sm:$0xf] %vm14973_vm7, %v1643_v6  ;;  %2333 = vrot.lane.b32.xlu1 %v10458_v29, %s9527_s30  ;;  %v1912_v6 = vld [vmem:[#allocation2 + $0xf8] sm:$0xf]  ;;  %v2189_v41 = vshll.u32 %v1913_v3, 16  ;;  %v2193_v36 = vshrl.u32 %v1913_v3, 16  ;;  %v10562_v63 = vsel %vm10432_vm10, %v2115_v23, %v10487_v19 }
 0x17c   : > { %2331 = vrot.lane.b32.xlu0 %v10463_v40, %s9527_s30  ;;  %v2180_v2 = vshrl.u32 %v1912_v6, 16  ;;  %v2183_v50 = vshll.u32 %v1912_v6, 16  ;;  %v2158_v10 = vrot.slane %v2156_v30, 4  ;;  %v2217_v15 = vshrl.u32 %v1916_v22, 16  ;;  %v1918_v8 = vld [vmem:[#allocation2 + $0x128] sm:$0xf] }
 0x17d   : > { %v1649_v39 = vpop.permute.xlu1 %1648  ;;  %v2149_v16 = vrot.slane %v2148_v33, 4  ;;  %v2153_v5 = vrot.slane %v2151_v32, 5  ;;  %v2204_v57 = vshrl.u32 %v1915_v9, 16  ;;  %v2207_v52 = vshll.u32 %v1915_v9, 16  ;;  %v1917_v42 = vld [vmem:[#allocation2 + $0x118] sm:$0x1] }
 0x17e   : > { %v1647_v55 = vpop.permute.xlu0 %1646  ;;  %1732 = vst.msk [vmem:[#allocation3 + $0x34] sm:$0xf] %vm14973_vm7, %v1649_v39  ;;  %v2161_v39 = vrot.slane %v2159_v27, 5  ;;  %v2139_v0 = vrot.slane %v2138_v37, 4  ;;  %v2172_v61 = vor.u32 %v2171_v28, %v10551_v4  ;;  %v2175_v24 = vshll.u32 %v1911_v59, 16 }
 0x17f   : > { %1731 = vst.msk [vmem:[#allocation3 + $0x30] sm:$0xf] %vm14973_vm7, %v1647_v55  ;;  %2337 = vrot.lane.b32.xlu1 %v10485_v58, %s9527_s30  ;;  %v2213_v55 = vshll.u32 %v1916_v22, 16  ;;  %v10569_v11 = vrot.slane %v2189_v41, 5  ;;  %v2185_v48 = vrot.slane %v2183_v50, 5  ;;  %v2219_v12 = vrot.slane %v2217_v15, 4 }
 0x180   : > { %2335 = vrot.lane.b32.xlu0 %v10494_v14, %s9527_s30  ;;  %v2162_v1 = vor.u32 %v2161_v39, %v2158_v10  ;;  %v2237_v53 = vshll.u32 %v1919_v56, 16  ;;  %v2206_v35 = vrot.slane %v2204_v57, 4  ;;  %v2209_v30 = vrot.slane %v2207_v52, 5  ;;  %v1922_v32 = vld [vmem:[#allocation2 + $0x144] sm:$0xf] }
 0x181   : > { %v1653_v21 = vpop.permute.xlu1 %1652  ;;  %v10571_v19 = vrot.slane %v2213_v55, 5  ;;  %v2241_v27 = vshrl.u32 %v1919_v56, 16  ;;  %v2228_v3 = vshrl.u32 %v1918_v8, 16  ;;  %v10577_v6 = vsel %vm10432_vm10, %v2149_v16, %v2153_v5  ;;  %v1921_v9 = vld [vmem:[#allocation2 + $0x140] sm:$0xf] }
 0x182   : > { %v1651_v18 = vpop.permute.xlu0 %1650  ;;  %1734 = vst.msk [vmem:[#allocation3 + $0x3c] sm:$0xf] %vm14973_vm7, %v1653_v21  ;;  %v2195_v21 = vrot.slane %v2193_v36, 4  ;;  %v2231_v33 = vshll.u32 %v1918_v8, 16  ;;  %v2173_v22 = vrot.slane %v2172_v61, 4  ;;  %v2199_v37 = vshll.u32 %v1914_v20, 16 }
 0x183   : > { %1733 = vst.msk [vmem:[#allocation3 + $0x38] sm:$0xf] %vm14973_vm7, %v1651_v18  ;;  %2341 = vrot.lane.b32.xlu1 %v10507_v31, %s9527_s30  ;;  %v2182_v18 = vrot.slane %v2180_v2, 4  ;;  %v2163_v59 = vrot.slane %v2162_v1, 4  ;;  %v2220_v41 = vor.u32 %v2219_v12, %v10571_v19  ;;  %v10590_v36 = vrot.slane %v2237_v53, 5 }
 0x184   : > { %2339 = vrot.lane.b32.xlu0 %v10516_v54, %s9527_s30  ;;  %v2196_v23 = vor.u32 %v2195_v21, %v10569_v11  ;;  %v2210_v10 = vor.u32 %v2209_v30, %v2206_v35  ;;  %v2243_v39 = vrot.slane %v2241_v27, 4  ;;  %v2230_v55 = vrot.slane %v2228_v3, 4  ;;  %v1923_v27 = vld [vmem:[#allocation2 + $0x148] sm:$0x1] }
 0x185   : > { %v1657_v7 = vpop.permute.xlu1 %1656  ;;  %v2186_v28 = vor.u32 %v2185_v48, %v2182_v18  ;;  %v2261_v15 = vshll.u32 %v1922_v32, 16  ;;  %v2265_v16 = vshrl.u32 %v1922_v32, 16  ;;  %v2252_v5 = vshrl.u32 %v1921_v9, 16  ;;  %v1925_v18 = vld [vmem:[#allocation2 + $0x15c] sm:$0xf] }
 0x186   : > { %v1655_v34 = vpop.permute.xlu0 %1654  ;;  %1736 = vst.msk [vmem:[#allocation3 + $0x44] sm:$0xf] %vm14973_vm7, %v1657_v7  ;;  %v10582_v7 = vsel %vm10432_vm10, %v2139_v0, %v10518_v25  ;;  %v2223_v25 = vshll.u32 %v1917_v42, 16  ;;  %v2255_v57 = vshll.u32 %v1921_v9, 16  ;;  %v2197_v52 = vrot.slane %v2196_v23, 4 }
 0x187   : > { %1735 = vst.msk [vmem:[#allocation3 + $0x40] sm:$0xf] %vm14973_vm7, %v1655_v34  ;;  %2345 = vrot.lane.b32.xlu1 %v10528_v46, %s9527_s30  ;;  %v2177_v34 = vrot.slane %v2175_v24, 5  ;;  %v2201_v56 = vrot.slane %v2199_v37, 5  ;;  %v2187_v0 = vrot.slane %v2186_v28, 4  ;;  %v10605_v24 = vsel %vm10432_vm10, %v2163_v59, %v10551_v4 }
 0x188   : > { %2343 = vrot.lane.b32.xlu0 %v10533_v60, %s9527_s30  ;;  %v2221_v8 = vrot.slane %v2220_v41, 4  ;;  %v2225_v21 = vrot.slane %v2223_v25, 5  ;;  %v1924_v48 = vld [vmem:[#allocation2 + $0x158] sm:$0xf]  ;;  %v2211_v12 = vrot.slane %v2210_v10, 4  ;;  %v2244_v53 = vor.u32 %v2243_v39, %v10590_v36 }
 0x189   : > { %v1661_v43 = vpop.permute.xlu1 %1660  ;;  %v10600_v61 = vsel %vm10432_vm10, %v2173_v22, %v2177_v34  ;;  %v2267_v35 = vrot.slane %v2265_v16, 4  ;;  %v2254_v4 = vrot.slane %v2252_v5, 4  ;;  %v2257_v30 = vrot.slane %v2255_v57, 5  ;;  %v1926_v16 = vld [vmem:[#allocation2 + $0x160] sm:$0x1] }
 0x18a   : > { %v1659_v44 = vpop.permute.xlu0 %1658  ;;  %1738 = vst.msk [vmem:[#allocation3 + $0x4c] sm:$0xf] %vm14973_vm7, %v1661_v43  ;;  %v1920_v43 = vld [vmem:[#allocation2 + $0x130] sm:$0x1]  ;;  %v2285_v3 = vshll.u32 %v1925_v18, 16  ;;  %v2289_v34 = vshrl.u32 %v1925_v18, 16  ;;  %v10618_v22 = vsel %vm10432_vm10, %v2197_v52, %v2201_v56  ;;  %v10623_v23 = vsel %vm10432_vm10, %v2187_v0, %v10569_v11 }
 0x18b   : > { %1737 = vst.msk [vmem:[#allocation3 + $0x48] sm:$0xf] %vm14973_vm7, %v1659_v44  ;;  %2349 = vrot.lane.b32.xlu1 %v10537_v62, %s9527_s30  ;;  %v2233_v44 = vrot.slane %v2231_v33, 5  ;;  %v2276_v33 = vshrl.u32 %v1924_v48, 16  ;;  %v2279_v32 = vshll.u32 %v1924_v48, 16  ;;  %v10627_v9 = vsel %vm10432_vm10, %v2221_v8, %v2225_v21 }
 0x18c   : > { %2347 = vrot.lane.b32.xlu0 %v10542_v13, %s9527_s30  ;;  %v10632_v59 = vsel %vm10432_vm10, %v2211_v12, %v10571_v19  ;;  %v2245_v41 = vrot.slane %v2244_v53, 4  ;;  %v2271_v39 = vshll.u32 %v1923_v27, 16  ;;  %v2287_v19 = vrot.slane %v2285_v3, 5 }
 0x18d   : > { %v1665_v45 = vpop.permute.xlu1 %1664  ;;  %v2234_v42 = vor.u32 %v2233_v44, %v2230_v55  ;;  %v2258_v55 = vor.u32 %v2257_v30, %v2254_v4  ;;  %v2281_v44 = vrot.slane %v2279_v32, 5  ;;  %v2295_v53 = vshll.u32 %v1926_v16, 16 }
 0x18e   : > { %v1663_v49 = vpop.permute.xlu0 %1662  ;;  %1740 = vst.msk [vmem:[#allocation3 + $0x54] sm:$0xf] %vm14973_vm7, %v1665_v45  ;;  %v2247_v45 = vshll.u32 %v1920_v43, 16  ;;  %v2278_v43 = vrot.slane %v2276_v33, 4 }
 0x18f   : > { %1739 = vst.msk [vmem:[#allocation3 + $0x50] sm:$0xf] %vm14973_vm7, %v1663_v49  ;;  %2353 = vrot.lane.b32.xlu1 %v10546_v26, %s9527_s30  ;;  %v10608_v49 = vrot.slane %v2261_v15, 5  ;;  %v2235_v11 = vrot.slane %v2234_v42, 4  ;;  %v2291_v15 = vrot.slane %v2289_v34, 4 }
 0x190   : > { %2351 = vrot.lane.b32.xlu0 %v10562_v63, %s9527_s30  ;;  %v2249_v25 = vrot.slane %v2247_v45, 5  ;;  %v2282_v45 = vor.u32 %v2281_v44, %v2278_v43 }
 0x191   : > { %v1669_v2 = vpop.permute.xlu1 %1668  ;;  %v2268_v10 = vor.u32 %v2267_v35, %v10608_v49  ;;  %v10650_v18 = vsel %vm10432_vm10, %v2235_v11, %v10590_v36  ;;  %v2292_v12 = vor.u32 %v2291_v15, %v2287_v19  ;;  %v1929_v36 = vld [vmem:[#allocation2 + $0x178] sm:$0x1] }
 0x192   : > { %v1667_v50 = vpop.permute.xlu0 %1666  ;;  %1742 = vst.msk [vmem:[#allocation3 + $0x5c] sm:$0xf] %vm14973_vm7, %v1669_v2  ;;  %v1928_v2 = vld [vmem:[#allocation2 + $0x174] sm:$0xf]  ;;  %v10645_v21 = vsel %vm10432_vm10, %v2245_v41, %v2249_v25  ;;  %v2319_v25 = vshll.u32 %v1929_v36, 16 }
 0x193   : > { %1741 = vst.msk [vmem:[#allocation3 + $0x58] sm:$0xf] %vm14973_vm7, %v1667_v50  ;;  %2357 = vrot.lane.b32.xlu1 %v10577_v6, %s9527_s30  ;;  %v1927_v50 = vld [vmem:[#allocation2 + $0x170] sm:$0xf]  ;;  %v2309_v5 = vshll.u32 %v1928_v2, 16  ;;  %v2313_v57 = vshrl.u32 %v1928_v2, 16 }
 0x194   : > { %2355 = vrot.lane.b32.xlu0 %v10582_v7, %s9527_s30  ;;  %v2300_v52 = vshrl.u32 %v1927_v50, 16  ;;  %v2303_v56 = vshll.u32 %v1927_v50, 16  ;;  %v2269_v48 = vrot.slane %v2268_v10, 4  ;;  %v2293_v32 = vrot.slane %v2292_v12, 4 }
 0x195   : > { %v1673_v1 = vpop.permute.xlu1 %1672  ;;  %v2311_v42 = vrot.slane %v2309_v5, 5  ;;  %v2315_v35 = vrot.slane %v2313_v57, 4 }
 0x196   : > { %v1671_v20 = vpop.permute.xlu0 %1670  ;;  %1744 = vst.msk [vmem:[#allocation3 + $0x64] sm:$0xf] %vm14973_vm7, %v1673_v1  ;;  %v2273_v1 = vrot.slane %v2271_v39, 5  ;;  %v2302_v4 = vrot.slane %v2300_v52, 4  ;;  %v2305_v30 = vrot.slane %v2303_v56, 5 }
 0x197   : > { %1743 = vst.msk [vmem:[#allocation3 + $0x60] sm:$0xf] %vm14973_vm7, %v1671_v20  ;;  %2361 = vrot.lane.b32.xlu1 %v10600_v61, %s9527_s30  ;;  %v2259_v20 = vrot.slane %v2258_v55, 4  ;;  %v2316_v41 = vor.u32 %v2315_v35, %v2311_v42  ;;  %v2321_v55 = vrot.slane %v2319_v25, 5  ;;  %v1930_v25 = vld [vmem:[#allocation2 + $0x188] sm:$0xf] }
 0x198   : > { %2359 = vrot.lane.b32.xlu0 %v10605_v24, %s9527_s30  ;;  %v10664_v34 = vsel %vm10432_vm10, %v2269_v48, %v2273_v1  ;;  %v2306_v2 = vor.u32 %v2305_v30, %v2302_v4 }
 0x199   : > { %v1677_v37 = vpop.permute.xlu1 %1676  ;;  %v10669_v33 = vsel %vm10432_vm10, %v2259_v20, %v10608_v49  ;;  %v2317_v39 = vrot.slane %v2316_v41, 4  ;;  %v1931_v41 = vld [vmem:[#allocation2 + $0x18c] sm:$0xf] }
 0x19a   : > { %v1675_v28 = vpop.permute.xlu0 %1674  ;;  %1746 = vst.msk [vmem:[#allocation3 + $0x6c] sm:$0xf] %vm14973_vm7, %v1677_v37  ;;  %v2297_v37 = vrot.slane %v2295_v53, 5  ;;  %v2307_v15 = vrot.slane %v2306_v2, 4  ;;  %v2462_v2 = vshll.u32 %v1931_v41, 16 }
 0x19b   : > { %1745 = vst.msk [vmem:[#allocation3 + $0x68] sm:$0xf] %vm14973_vm7, %v1675_v28  ;;  %2365 = vrot.lane.b32.xlu1 %v10618_v22, %s9527_s30  ;;  %v2283_v28 = vrot.slane %v2282_v45, 4  ;;  %v10693_v16 = vsel %vm10432_vm10, %v2317_v39, %v2321_v55  ;;  %v2456_v39 = vshll.u32 %v1930_v25, 16 }
 0x19c   : > { %2363 = vrot.lane.b32.xlu0 %v10623_v23, %s9527_s30  ;;  %v10679_v49 = vsel %vm10432_vm10, %v2293_v32, %v2297_v37 }
 0x19d   : > { %v1681_v0 = vpop.permute.xlu1 %1680  ;;  %v10683_v10 = vsel %vm10432_vm10, %v2283_v28, %v2287_v19  ;;  %v10697_v19 = vsel %vm10432_vm10, %v2307_v15, %v2311_v42 }
 0x19e   : > { %v1679_v8 = vpop.permute.xlu0 %1678  ;;  %1748 = vst.msk [vmem:[#allocation3 + $0x74] sm:$0xf] %vm14973_vm7, %v1681_v0 }
 0x19f   : > { %1747 = vst.msk [vmem:[#allocation3 + $0x70] sm:$0xf] %vm14973_vm7, %v1679_v8  ;;  %2369 = vrot.lane.b32.xlu1 %v10627_v9, %s9527_s30 }
 0x1a0   : > { %2367 = vrot.lane.b32.xlu0 %v10632_v59, %s9527_s30 }
 0x1a1   : > { %v1685_v27 = vpop.permute.xlu1 %1684 }
 0x1a2   : > { %v1683_v3 = vpop.permute.xlu0 %1682  ;;  %1750 = vst.msk [vmem:[#allocation3 + $0x7c] sm:$0xf] %vm14973_vm7, %v1685_v27 }
 0x1a3   : > { %1749 = vst.msk [vmem:[#allocation3 + $0x78] sm:$0xf] %vm14973_vm7, %v1683_v3  ;;  %2373 = vrot.lane.b32.xlu1 %v10645_v21, %s9527_s30 }
 0x1a4   : > { %2371 = vrot.lane.b32.xlu0 %v10650_v18, %s9527_s30 }
 0x1a5   : > { %v1756_v50 = vpop.permute.xlu1 %1755 }
 0x1a6   : > { %v1754_v11 = vpop.permute.xlu0 %1753  ;;  %1851 = vst.msk [vmem:[#allocation3 + $0x4] sm:$0xf] %vm14970_vm11, %v1756_v50  ;;  %v2466_v50 = vshrl.u32 %v1931_v41, 16  ;;  %v9156_v41 = vld [vmem:[%s14939_s1] sm:$0xff]  }
 0x1a7   : > { %1850 = vst.msk [vmem:[#allocation3] sm:$0xf] %vm14970_vm11, %v1754_v11  ;;  %2377 = vrot.lane.b32.xlu1 %v10664_v34, %s9527_s30  ;;  %v2453_v11 = vshrl.u32 %v1930_v25, 16 }
 0x1a8   : > { %2375 = vrot.lane.b32.xlu0 %v10669_v33, %s9527_s30 }
 0x1a9   : > { %v1760_v43 = vpop.permute.xlu1 %1759 }
 0x1aa   : > { %v1758_v44 = vpop.permute.xlu0 %1757  ;;  %1853 = vst.msk [vmem:[#allocation3 + $0xc] sm:$0xf] %vm14970_vm11, %v1760_v43  ;;  %v9152_v43 = vld [vmem:[%s14939_s1 + $0x20] ss:$0 sps:$4 sm:$0xff]  }
 0x1ab   : > { %1852 = vst.msk [vmem:[#allocation3 + $0x8] sm:$0xf] %vm14970_vm11, %v1758_v44  ;;  %2381 = vrot.lane.b32.xlu1 %v10679_v49, %s9527_s30  ;;  %v2948_v44 = vsel %vm14969_vm12, %v9152_v43, 0  ;;  %9129 = vmatprep.subr.msk.bf16.mxu0 %vm14969_vm12, %v9152_v43  ;;  %v1933_v43 = vld [vmem:[#allocation2 + $0x1a0] sm:$0xf] }
 0x1ac   : > { %2379 = vrot.lane.b32.xlu0 %v10683_v10, %s9527_s30  ;;  %9046 = vmatpush3.bf16.msra.mxu0 %v2948_v44  ;;  %v2609_v44 = vshll.u32 %v1933_v43, 16 }
 0x1ad   : > { %v1764_v5 = vpop.permute.xlu1 %1763 }
 0x1ae   : > { %v1762_v57 = vpop.permute.xlu0 %1761  ;;  %1855 = vst.msk [vmem:[#allocation3 + $0x14] sm:$0xf] %vm14970_vm11, %v1764_v5  ;;  %v2464_v5 = vrot.slane %v2462_v2, 5 }
 0x1af   : > { %1854 = vst.msk [vmem:[#allocation3 + $0x10] sm:$0xf] %vm14970_vm11, %v1762_v57  ;;  %2385 = vrot.lane.b32.xlu1 %v10693_v16, %s9527_s30  ;;  %v2468_v57 = vrot.slane %v2466_v50, 4 }
 0x1b0   : > { %2383 = vrot.lane.b32.xlu0 %v10697_v19, %s9527_s30 }
 0x1b1   : > { %v1768_v52 = vpop.permute.xlu1 %1767 }
 0x1b2   : > { %v1766_v56 = vpop.permute.xlu0 %1765  ;;  %1857 = vst.msk [vmem:[#allocation3 + $0x1c] sm:$0xf] %vm14970_vm11, %v1768_v52  ;;  %v2455_v52 = vrot.slane %v2453_v11, 4 }
 0x1b3   : > { %1856 = vst.msk [vmem:[#allocation3 + $0x18] sm:$0xf] %vm14970_vm11, %v1766_v56  ;;  %2478 = vrot.lane.b32.xlu1 %v10449_v38, %s9528_s6  ;;  %v2458_v56 = vrot.slane %v2456_v39, 5 }
 0x1b4   : > { %2476 = vrot.lane.b32.xlu0 %v10454_v51, %s9528_s6 }
 0x1b5   : > { %v1772_v0 = vpop.permute.xlu1 %1771 }
 0x1b6   : > { %v1770_v8 = vpop.permute.xlu0 %1769  ;;  %1859 = vst.msk [vmem:[#allocation3 + $0x24] sm:$0xf] %vm14970_vm11, %v1772_v0 }
 0x1b7   : > { %1858 = vst.msk [vmem:[#allocation3 + $0x20] sm:$0xf] %vm14970_vm11, %v1770_v8  ;;  %2482 = vrot.lane.b32.xlu1 %v10458_v29, %s9528_s6 }
 0x1b8   : > { %2480 = vrot.lane.b32.xlu0 %v10463_v40, %s9528_s6 }
 0x1b9   : > { %v1776_v48 = vpop.permute.xlu1 %1775 }
 0x1ba   : > { %v1774_v1 = vpop.permute.xlu0 %1773  ;;  %1861 = vst.msk [vmem:[#allocation3 + $0x2c] sm:$0xf] %vm14970_vm11, %v1776_v48  ;;  %v1932_v48 = vld [vmem:[#allocation2 + $0x190] sm:$0x1] }
 0x1bb   : > { %1860 = vst.msk [vmem:[#allocation3 + $0x28] sm:$0xf] %vm14970_vm11, %v1774_v1  ;;  %2486 = vrot.lane.b32.xlu1 %v10485_v58, %s9528_s6  ;;  %v9153_v1 = vld [vmem:[%s14939_s1 + $0x18] sm:$0xff]  }
 0x1bc   : > { %2484 = vrot.lane.b32.xlu0 %v10494_v14, %s9528_s6  ;;  %9047 = vmatprep.subr.bf16.mxu0 %v9153_v1 }
 0x1bd   : > { %v1780_v38 = vpop.permute.xlu1 %1779  ;;  %9048 = vmatpush3.bf16.msra.mxu0 %v9153_v1 }
 0x1be   : > { %v1778_v51 = vpop.permute.xlu0 %1777  ;;  %1863 = vst.msk [vmem:[#allocation3 + $0x34] sm:$0xf] %vm14970_vm11, %v1780_v38  ;;  %v2469_v38 = vor.u32 %v2468_v57, %v2464_v5 }
 0x1bf   : > { %1862 = vst.msk [vmem:[#allocation3 + $0x30] sm:$0xf] %vm14970_vm11, %v1778_v51  ;;  %2490 = vrot.lane.b32.xlu1 %v10507_v31, %s9528_s6  ;;  %v2472_v51 = vshll.u32 %v1932_v48, 16 }
 0x1c0   : > { %2488 = vrot.lane.b32.xlu0 %v10516_v54, %s9528_s6 }
 0x1c1   : > { %v1784_v20 = vpop.permute.xlu1 %1783 }
 0x1c2   : > { %v1782_v12 = vpop.permute.xlu0 %1781  ;;  %1865 = vst.msk [vmem:[#allocation3 + $0x3c] sm:$0xf] %vm14970_vm11, %v1784_v20  ;;  %v2459_v20 = vor.u32 %v2458_v56, %v2455_v52 }
 0x1c3   : > { %1864 = vst.msk [vmem:[#allocation3 + $0x38] sm:$0xf] %vm14970_vm11, %v1782_v12  ;;  %2494 = vrot.lane.b32.xlu1 %v10528_v46, %s9528_s6 }
 0x1c4   : > { %2492 = vrot.lane.b32.xlu0 %v10533_v60, %s9528_s6 }
 0x1c5   : > { %v1788_v53 = vpop.permute.xlu1 %1787 }
 0x1c6   : > { %v1786_v45 = vpop.permute.xlu0 %1785  ;;  %1867 = vst.msk [vmem:[#allocation3 + $0x44] sm:$0xf] %vm14970_vm11, %v1788_v53 }
 0x1c7   : > { %1866 = vst.msk [vmem:[#allocation3 + $0x40] sm:$0xf] %vm14970_vm11, %v1786_v45  ;;  %2498 = vrot.lane.b32.xlu1 %v10537_v62, %s9528_s6  ;;  %v9154_v45 = vld [vmem:[%s14939_s1 + $0x10] sm:$0xff]  }
 0x1c8   : > { %2496 = vrot.lane.b32.xlu0 %v10542_v13, %s9528_s6  ;;  %9049 = vmatprep.subr.bf16.mxu0 %v9154_v45 }
 0x1c9   : > { %v1792_v42 = vpop.permute.xlu1 %1791  ;;  %9050 = vmatpush3.bf16.msra.mxu0 %v9154_v45 }
 0x1ca   : > { %v1790_v35 = vpop.permute.xlu0 %1789  ;;  %1869 = vst.msk [vmem:[#allocation3 + $0x4c] sm:$0xf] %vm14970_vm11, %v1792_v42  ;;  %v2470_v42 = vrot.slane %v2469_v38, 4 }
 0x1cb   : > { %1868 = vst.msk [vmem:[#allocation3 + $0x48] sm:$0xf] %vm14970_vm11, %v1790_v35  ;;  %2502 = vrot.lane.b32.xlu1 %v10546_v26, %s9528_s6  ;;  %v2474_v35 = vrot.slane %v2472_v51, 5 }
 0x1cc   : > { %2500 = vrot.lane.b32.xlu0 %v10562_v63, %s9528_s6 }
 0x1cd   : > { %v1796_v4 = vpop.permute.xlu1 %1795 }
 0x1ce   : > { %v1794_v30 = vpop.permute.xlu0 %1793  ;;  %1871 = vst.msk [vmem:[#allocation3 + $0x54] sm:$0xf] %vm14970_vm11, %v1796_v4  ;;  %v2460_v4 = vrot.slane %v2459_v20, 4 }
 0x1cf   : > { %1870 = vst.msk [vmem:[#allocation3 + $0x50] sm:$0xf] %vm14970_vm11, %v1794_v30  ;;  %2506 = vrot.lane.b32.xlu1 %v10577_v6, %s9528_s6 }
 0x1d0   : > { %2504 = vrot.lane.b32.xlu0 %v10582_v7, %s9528_s6 }
 0x1d1   : > { %v1800_v27 = vpop.permute.xlu1 %1799 }
 0x1d2   : > { %v1798_v3 = vpop.permute.xlu0 %1797  ;;  %1873 = vst.msk [vmem:[#allocation3 + $0x5c] sm:$0xf] %vm14970_vm11, %v1800_v27 }
 0x1d3   : > { %1872 = vst.msk [vmem:[#allocation3 + $0x58] sm:$0xf] %vm14970_vm11, %v1798_v3  ;;  %2510 = vrot.lane.b32.xlu1 %v10600_v61, %s9528_s6  ;;  %v9155_v3 = vld [vmem:[%s14939_s1 + $0x8] sm:$0xff]  }
 0x1d4   : > { %2508 = vrot.lane.b32.xlu0 %v10605_v24, %s9528_s6  ;;  %9051 = vmatprep.subr.bf16.mxu0 %v9155_v3 }
 0x1d5   : > { %v1804_v36 = vpop.permute.xlu1 %1803  ;;  %9052 = vmatpush3.bf16.msra.mxu0 %v9155_v3 }
 0x1d6   : > { %v1802_v32 = vpop.permute.xlu0 %1801  ;;  %1875 = vst.msk [vmem:[#allocation3 + $0x64] sm:$0xf] %vm14970_vm11, %v1804_v36  ;;  %v10811_v36 = vsel %vm10432_vm10, %v2470_v42, %v2474_v35  ;;  %9053 = vmatprep.subr.bf16.mxu0 %v9156_v41 }
 0x1d7   : > { %1874 = vst.msk [vmem:[#allocation3 + $0x60] sm:$0xf] %vm14970_vm11, %v1802_v32  ;;  %2514 = vrot.lane.b32.xlu1 %v10618_v22, %s9528_s6  ;;  %v10815_v32 = vsel %vm10432_vm10, %v2460_v4, %v2464_v5 }
 0x1d8   : > { %2512 = vrot.lane.b32.xlu0 %v10623_v23, %s9528_s6 }
 0x1d9   : > { %v1808_v37 = vpop.permute.xlu1 %1807  ;;  %9054 = vmatpush3.bf16.msra.mxu0 %v9156_v41 }
 0x1da   : > { %v1806_v28 = vpop.permute.xlu0 %1805  ;;  %1877 = vst.msk [vmem:[#allocation3 + $0x6c] sm:$0xf] %vm14970_vm11, %v1808_v37 }
 0x1db   : > { %1876 = vst.msk [vmem:[#allocation3 + $0x68] sm:$0xf] %vm14970_vm11, %v1806_v28  ;;  %2518 = vrot.lane.b32.xlu1 %v10627_v9, %s9528_s6 }
 0x1dc   : > { %2516 = vrot.lane.b32.xlu0 %v10632_v59, %s9528_s6 }
 0x1dd   : > { %v1812_v55 = vpop.permute.xlu1 %1811 }
 0x1de   : > { %v1810_v15 = vpop.permute.xlu0 %1809  ;;  %1879 = vst.msk [vmem:[#allocation3 + $0x74] sm:$0xf] %vm14970_vm11, %v1812_v55 }
 0x1df   : > { %1878 = vst.msk [vmem:[#allocation3 + $0x70] sm:$0xf] %vm14970_vm11, %v1810_v15  ;;  %2522 = vrot.lane.b32.xlu1 %v10645_v21, %s9528_s6  ;;  %v1934_v15 = vld [vmem:[#allocation2 + $0x1a4] sm:$0xf] }
 0x1e0   : > { %2520 = vrot.lane.b32.xlu0 %v10650_v18, %s9528_s6 }
 0x1e1   : > { %v1816_v0 = vpop.permute.xlu1 %1815 }
 0x1e2   : > { %v1814_v8 = vpop.permute.xlu0 %1813  ;;  %1881 = vst.msk [vmem:[#allocation3 + $0x7c] sm:$0xf] %vm14970_vm11, %v1816_v0 }
 0x1e3   : > { %1880 = vst.msk [vmem:[#allocation3 + $0x78] sm:$0xf] %vm14970_vm11, %v1814_v8  ;;  %2526 = vrot.lane.b32.xlu1 %v10664_v34, %s9528_s6  ;;  %v1935_v8 = vld [vmem:[#allocation2 + $0x1a8] sm:$0x1] }
 0x1e4   : > { %2524 = vrot.lane.b32.xlu0 %v10669_v33, %s9528_s6 }
 0x1e5   : > { %v2326_v12 = vpop.permute.xlu1 %2325 }
 0x1e6   : > { %v2324_v53 = vpop.permute.xlu0 %2323  ;;  %2421 = vst.msk [vmem:[#allocation3 + $0x4] sm:$0xf] %vm14965_vm13, %v2326_v12 }
 0x1e7   : > { %2420 = vst.msk [vmem:[#allocation3] sm:$0xf] %vm14965_vm13, %v2324_v53  ;;  %2530 = vrot.lane.b32.xlu1 %v10679_v49, %s9528_s6 }
 0x1e8   : > { %2528 = vrot.lane.b32.xlu0 %v10683_v10, %s9528_s6 }
 0x1e9   : > { %v2330_v30 = vpop.permute.xlu1 %2329 }
 0x1ea   : > { %v2328_v27 = vpop.permute.xlu0 %2327  ;;  %2423 = vst.msk [vmem:[#allocation3 + $0xc] sm:$0xf] %vm14965_vm13, %v2330_v30 }
 0x1eb   : > { %2422 = vst.msk [vmem:[#allocation3 + $0x8] sm:$0xf] %vm14965_vm13, %v2328_v27  ;;  %2534 = vrot.lane.b32.xlu1 %v10693_v16, %s9528_s6 }
 0x1ec   : > { %2532 = vrot.lane.b32.xlu0 %v10697_v19, %s9528_s6 }
 0x1ed   : > { %v2334_v37 = vpop.permute.xlu1 %2333 }
 0x1ee   : > { %v2332_v28 = vpop.permute.xlu0 %2331  ;;  %2425 = vst.msk [vmem:[#allocation3 + $0x14] sm:$0xf] %vm14965_vm13, %v2334_v37 }
 0x1ef   : > { %2424 = vst.msk [vmem:[#allocation3 + $0x10] sm:$0xf] %vm14965_vm13, %v2332_v28  ;;  %2538 = vrot.lane.b32.xlu1 %v10811_v36, %s9528_s6 }
 0x1f0   : > { %2536 = vrot.lane.b32.xlu0 %v10815_v32, %s9528_s6 }
 0x1f1   : > { %v2338_v25 = vpop.permute.xlu1 %2337 }
 0x1f2   : > { %v2336_v2 = vpop.permute.xlu0 %2335  ;;  %2427 = vst.msk [vmem:[#allocation3 + $0x1c] sm:$0xf] %vm14965_vm13, %v2338_v25 }
 0x1f3   : > { %2426 = vst.msk [vmem:[#allocation3 + $0x18] sm:$0xf] %vm14965_vm13, %v2336_v2  ;;  %2631 = vrot.lane.b32.xlu1 %v10458_v29, %s9529_s17 }
 0x1f4   : > { %2629 = vrot.lane.b32.xlu0 %v10463_v40, %s9529_s17 }
 0x1f5   : > { %v2342_v50 = vpop.permute.xlu1 %2341 }
 0x1f6   : > { %v2340_v11 = vpop.permute.xlu0 %2339  ;;  %2429 = vst.msk [vmem:[#allocation3 + $0x24] sm:$0xf] %vm14965_vm13, %v2342_v50 }
 0x1f7   : > { %2428 = vst.msk [vmem:[#allocation3 + $0x20] sm:$0xf] %vm14965_vm13, %v2340_v11  ;;  %2635 = vrot.lane.b32.xlu1 %v10485_v58, %s9529_s17 }
 0x1f8   : > { %2633 = vrot.lane.b32.xlu0 %v10494_v14, %s9529_s17 }
 0x1f9   : > { %v2346_v39 = vpop.permute.xlu1 %2345 }
 0x1fa   : > { %v2344_v55 = vpop.permute.xlu0 %2343  ;;  %2431 = vst.msk [vmem:[#allocation3 + $0x2c] sm:$0xf] %vm14965_vm13, %v2346_v39 }
 0x1fb   : > { %2430 = vst.msk [vmem:[#allocation3 + $0x28] sm:$0xf] %vm14965_vm13, %v2344_v55  ;;  %2639 = vrot.lane.b32.xlu1 %v10507_v31, %s9529_s17 }
 0x1fc   : > { %2637 = vrot.lane.b32.xlu0 %v10516_v54, %s9529_s17 }
 0x1fd   : > { %v2350_v29 = vpop.permute.xlu1 %2349 }
 0x1fe   : > { %v2348_v40 = vpop.permute.xlu0 %2347  ;;  %2433 = vst.msk [vmem:[#allocation3 + $0x34] sm:$0xf] %vm14965_vm13, %v2350_v29 }
 0x1ff   : > { %2432 = vst.msk [vmem:[#allocation3 + $0x30] sm:$0xf] %vm14965_vm13, %v2348_v40  ;;  %2643 = vrot.lane.b32.xlu1 %v10528_v46, %s9529_s17 }
 0x200   : > { %2641 = vrot.lane.b32.xlu0 %v10533_v60, %s9529_s17 }
 0x201   : > { %v2354_v58 = vpop.permute.xlu1 %2353 }
 0x202   : > { %v2352_v14 = vpop.permute.xlu0 %2351  ;;  %2435 = vst.msk [vmem:[#allocation3 + $0x3c] sm:$0xf] %vm14965_vm13, %v2354_v58 }
 0x203   : > { %2434 = vst.msk [vmem:[#allocation3 + $0x38] sm:$0xf] %vm14965_vm13, %v2352_v14  ;;  %2647 = vrot.lane.b32.xlu1 %v10537_v62, %s9529_s17 }
 0x204   : > { %2645 = vrot.lane.b32.xlu0 %v10542_v13, %s9529_s17 }
 0x205   : > { %v2358_v31 = vpop.permute.xlu1 %2357 }
 0x206   : > { %v2356_v54 = vpop.permute.xlu0 %2355  ;;  %2437 = vst.msk [vmem:[#allocation3 + $0x44] sm:$0xf] %vm14965_vm13, %v2358_v31 }
 0x207   : > { %2436 = vst.msk [vmem:[#allocation3 + $0x40] sm:$0xf] %vm14965_vm13, %v2356_v54  ;;  %2651 = vrot.lane.b32.xlu1 %v10546_v26, %s9529_s17  ;;  %v4734_v54 = vld [vmem:[#allocation2 + $0x8] sm:$0xf] }
 0x208   : > { %2649 = vrot.lane.b32.xlu0 %v10562_v63, %s9529_s17 }
 0x209   : > { %v2362_v46 = vpop.permute.xlu1 %2361 }
 0x20a   : > { %v2360_v60 = vpop.permute.xlu0 %2359  ;;  %2439 = vst.msk [vmem:[#allocation3 + $0x4c] sm:$0xf] %vm14965_vm13, %v2362_v46  ;;  %v4735_v46 = vld [vmem:[#allocation2 + $0xc] sm:$0xf] }
 0x20b   : > { %2438 = vst.msk [vmem:[#allocation3 + $0x48] sm:$0xf] %vm14965_vm13, %v2360_v60  ;;  %2655 = vrot.lane.b32.xlu1 %v10577_v6, %s9529_s17 }
 0x20c   : > { %2653 = vrot.lane.b32.xlu0 %v10582_v7, %s9529_s17 }
 0x20d   : > { %v2366_v62 = vpop.permute.xlu1 %2365 }
 0x20e   : > { %v2364_v13 = vpop.permute.xlu0 %2363  ;;  %2441 = vst.msk [vmem:[#allocation3 + $0x54] sm:$0xf] %vm14965_vm13, %v2366_v62 }
 0x20f   : > { %2440 = vst.msk [vmem:[#allocation3 + $0x50] sm:$0xf] %vm14965_vm13, %v2364_v13  ;;  %2659 = vrot.lane.b32.xlu1 %v10600_v61, %s9529_s17  ;;  %v4793_v13 = vshrl.u32 %v4734_v54, 16 }
 0x210   : > { %2657 = vrot.lane.b32.xlu0 %v10605_v24, %s9529_s17 }
 0x211   : > { %v2370_v26 = vpop.permute.xlu1 %2369 }
 0x212   : > { %v2368_v63 = vpop.permute.xlu0 %2367  ;;  %2443 = vst.msk [vmem:[#allocation3 + $0x5c] sm:$0xf] %vm14965_vm13, %v2370_v26  ;;  %v4802_v26 = vshrl.u32 %v4735_v46, 16 }
 0x213   : > { %2442 = vst.msk [vmem:[#allocation3 + $0x58] sm:$0xf] %vm14965_vm13, %v2368_v63  ;;  %2663 = vrot.lane.b32.xlu1 %v10618_v22, %s9529_s17  ;;  %v2615_v22 = vshll.u32 %v1934_v15, 16  ;;  %v4733_v63 = vld [vmem:[#allocation2 + $0x4] sm:$0x8] }
 0x214   : > { %2661 = vrot.lane.b32.xlu0 %v10623_v23, %s9529_s17  ;;  %v2619_v23 = vshrl.u32 %v1934_v15, 16  ;;  %v4804_v15 = vrot.slane %v4802_v26, 7 }
 0x215   : > { %v2374_v6 = vpop.permute.xlu1 %2373 }
 0x216   : > { %v2372_v7 = vpop.permute.xlu0 %2371  ;;  %2445 = vst.msk [vmem:[#allocation3 + $0x64] sm:$0xf] %vm14965_vm13, %v2374_v6  ;;  %v2621_v57 = vrot.slane %v2619_v23, 4 }
 0x217   : > { %2444 = vst.msk [vmem:[#allocation3 + $0x60] sm:$0xf] %vm14965_vm13, %v2372_v7  ;;  %2667 = vrot.lane.b32.xlu1 %v10627_v9, %s9529_s17  ;;  %v2606_v9 = vshrl.u32 %v1933_v43, 16  ;;  %v4788_v43 = vshrl.u32 %v4733_v63, 16 }
 0x218   : > { %2665 = vrot.lane.b32.xlu0 %v10632_v59, %s9529_s17 }
 0x219   : > { %v2378_v61 = vpop.permute.xlu1 %2377  ;;  %v2608_v52 = vrot.slane %v2606_v9, 4 }
 0x21a   : > { %v2376_v24 = vpop.permute.xlu0 %2375  ;;  %2447 = vst.msk [vmem:[#allocation3 + $0x6c] sm:$0xf] %vm14965_vm13, %v2378_v61  ;;  %v4805_v61 = vshll.u32 %v4735_v46, 16 }
 0x21b   : > { %2446 = vst.msk [vmem:[#allocation3 + $0x68] sm:$0xf] %vm14965_vm13, %v2376_v24  ;;  %2671 = vrot.lane.b32.xlu1 %v10645_v21, %s9529_s17  ;;  %v2617_v21 = vrot.slane %v2615_v22, 5  ;;  %v4795_v24 = vrot.slane %v4793_v13, 7  ;;  %v4796_v22 = vshll.u32 %v4734_v54, 16 }
 0x21c   : > { %2669 = vrot.lane.b32.xlu0 %v10650_v18, %s9529_s17  ;;  %v2611_v18 = vrot.slane %v2609_v44, 5 }
 0x21d   : > { %v2382_v5 = vpop.permute.xlu1 %2381  ;;  %v4800_v44 = vrot.slane %v4795_v24, 4 }
 0x21e   : > { %v2380_v59 = vpop.permute.xlu0 %2379  ;;  %2449 = vst.msk [vmem:[#allocation3 + $0x74] sm:$0xf] %vm14965_vm13, %v2382_v5  ;;  %v2612_v48 = vor.u32 %v2611_v18, %v2608_v52  ;;  %v4807_v5 = vor.u32 %v4805_v61, %v4804_v15 }
 0x21f   : > { %2448 = vst.msk [vmem:[#allocation3 + $0x70] sm:$0xf] %vm14965_vm13, %v2380_v59  ;;  %2675 = vrot.lane.b32.xlu1 %v10664_v34, %s9529_s17  ;;  %v2622_v34 = vor.u32 %v2621_v57, %v2617_v21  ;;  %v8879_v59 = vrot.slane %v4788_v43, 11 }
 0x220   : > { %2673 = vrot.lane.b32.xlu0 %v10669_v33, %s9529_s17  ;;  %v2625_v33 = vshll.u32 %v1935_v8, 16  ;;  %v2613_v20 = vrot.slane %v2612_v48, 4  ;;  %v4808_v18 = vsel %vm9694_vm3, %v4800_v44, %v4807_v5 }
 0x221   : > { %v2386_v56 = vpop.permute.xlu1 %2385 }
 0x222   : > { %v2384_v0 = vpop.permute.xlu0 %2383  ;;  %2451 = vst.msk [vmem:[#allocation3 + $0x7c] sm:$0xf] %vm14965_vm13, %v2386_v56  ;;  %v2627_v51 = vrot.slane %v2625_v33, 5 }
 0x223   : > { %2450 = vst.msk [vmem:[#allocation3 + $0x78] sm:$0xf] %vm14965_vm13, %v2384_v0  ;;  %2679 = vrot.lane.b32.xlu1 %v10679_v49, %s9529_s17  ;;  %v2623_v49 = vrot.slane %v2622_v34, 4 }
 0x224   : > { %2677 = vrot.lane.b32.xlu0 %v10683_v10, %s9529_s17 }
 0x225   : > { %v2479_v1 = vpop.permute.xlu1 %2478 }
 0x226   : > { %v2477_v38 = vpop.permute.xlu0 %2476  ;;  %2574 = vst.msk [vmem:[#allocation3 + $0x4] sm:$0xf] %vm14960_vm14, %v2479_v1 }
 0x227   : > { %2573 = vst.msk [vmem:[#allocation3] sm:$0xf] %vm14960_vm14, %v2477_v38  ;;  %2683 = vrot.lane.b32.xlu1 %v10693_v16, %s9529_s17  ;;  %v2628_v16 = vsel %vm10432_vm10, %v2623_v49, %v2627_v51 }
 0x228   : > { %2681 = vrot.lane.b32.xlu0 %v10697_v19, %s9529_s17  ;;  %v2618_v19 = vsel %vm10432_vm10, %v2613_v20, %v2617_v21  ;;  %v4798_v21 = vor.u32 %v4796_v22, %v4795_v24 }
 0x229   : > { %v2483_v10 = vpop.permute.xlu1 %2482 }
 0x22a   : > { %v2481_v12 = vpop.permute.xlu0 %2480  ;;  %2576 = vst.msk [vmem:[#allocation3 + $0xc] sm:$0xf] %vm14960_vm14, %v2483_v10  ;;  %v4799_v56 = vsel %vm9694_vm3, %v8879_v59, %v4798_v21 }
 0x22b   : > { %2575 = vst.msk [vmem:[#allocation3 + $0x8] sm:$0xf] %vm14960_vm14, %v2481_v12  ;;  %2687 = vrot.lane.b32.xlu1 %v10811_v36, %s9529_s17 }
 0x22c   : > { %2685 = vrot.lane.b32.xlu0 %v10815_v32, %s9529_s17 }
 0x22d   : > { %v2487_v53 = vpop.permute.xlu1 %2486 }
 0x22e   : > { %v2485_v45 = vpop.permute.xlu0 %2484  ;;  %2578 = vst.msk [vmem:[#allocation3 + $0x14] sm:$0xf] %vm14960_vm14, %v2487_v53 }
 0x22f   : > { %2577 = vst.msk [vmem:[#allocation3 + $0x10] sm:$0xf] %vm14960_vm14, %v2485_v45  ;;  %2691 = vrot.lane.b32.xlu1 %v2628_v16, %s9529_s17 }
 0x230   : > { %2689 = vrot.lane.b32.xlu0 %v2618_v19, %s9529_s17 }
 0x231   : > { %v2491_v42 = vpop.permute.xlu1 %2490 }
 0x232   : > { %v2489_v35 = vpop.permute.xlu0 %2488  ;;  %2580 = vst.msk [vmem:[#allocation3 + $0x1c] sm:$0xf] %vm14960_vm14, %v2491_v42 }
 0x233   : > { %2579 = vst.msk [vmem:[#allocation3 + $0x18] sm:$0xf] %vm14960_vm14, %v2489_v35 }
 0x235   : > { %v2495_v4 = vpop.permute.xlu1 %2494 }
 0x236   : > { %v2493_v30 = vpop.permute.xlu0 %2492  ;;  %2582 = vst.msk [vmem:[#allocation3 + $0x24] sm:$0xf] %vm14960_vm14, %v2495_v4 }
 0x237   : > { %2581 = vst.msk [vmem:[#allocation3 + $0x20] sm:$0xf] %vm14960_vm14, %v2493_v30 }
 0x239   : > { %v2499_v27 = vpop.permute.xlu1 %2498 }
 0x23a   : > { %v2497_v3 = vpop.permute.xlu0 %2496  ;;  %2584 = vst.msk [vmem:[#allocation3 + $0x2c] sm:$0xf] %vm14960_vm14, %v2499_v27 }
 0x23b   : > { %2583 = vst.msk [vmem:[#allocation3 + $0x28] sm:$0xf] %vm14960_vm14, %v2497_v3 }
 0x23d   : > { %v2503_v36 = vpop.permute.xlu1 %2502 }
 0x23e   : > { %v2501_v32 = vpop.permute.xlu0 %2500  ;;  %2586 = vst.msk [vmem:[#allocation3 + $0x34] sm:$0xf] %vm14960_vm14, %v2503_v36 }
 0x23f   : > { %2585 = vst.msk [vmem:[#allocation3 + $0x30] sm:$0xf] %vm14960_vm14, %v2501_v32 }
 0x241   : > { %v2507_v37 = vpop.permute.xlu1 %2506 }
 0x242   : > { %v2505_v28 = vpop.permute.xlu0 %2504  ;;  %2588 = vst.msk [vmem:[#allocation3 + $0x3c] sm:$0xf] %vm14960_vm14, %v2507_v37 }
 0x243   : > { %2587 = vst.msk [vmem:[#allocation3 + $0x38] sm:$0xf] %vm14960_vm14, %v2505_v28 }
 0x245   : > { %v2511_v41 = vpop.permute.xlu1 %2510 }
 0x246   : > { %v2509_v25 = vpop.permute.xlu0 %2508  ;;  %2590 = vst.msk [vmem:[#allocation3 + $0x44] sm:$0xf] %vm14960_vm14, %v2511_v41 }
 0x247   : > { %2589 = vst.msk [vmem:[#allocation3 + $0x40] sm:$0xf] %vm14960_vm14, %v2509_v25 }
 0x249   : > { %v2515_v2 = vpop.permute.xlu1 %2514 }
 0x24a   : > { %v2513_v50 = vpop.permute.xlu0 %2512  ;;  %2592 = vst.msk [vmem:[#allocation3 + $0x4c] sm:$0xf] %vm14960_vm14, %v2515_v2 }
 0x24b   : > { %2591 = vst.msk [vmem:[#allocation3 + $0x48] sm:$0xf] %vm14960_vm14, %v2513_v50 }
 0x24d   : > { %v2519_v11 = vpop.permute.xlu1 %2518 }
 0x24e   : > { %v2517_v39 = vpop.permute.xlu0 %2516  ;;  %2594 = vst.msk [vmem:[#allocation3 + $0x54] sm:$0xf] %vm14960_vm14, %v2519_v11 }
 0x24f   : > { %2593 = vst.msk [vmem:[#allocation3 + $0x50] sm:$0xf] %vm14960_vm14, %v2517_v39 }
 0x251   : > { %v2523_v55 = vpop.permute.xlu1 %2522 }
 0x252   : > { %v2521_v29 = vpop.permute.xlu0 %2520  ;;  %2596 = vst.msk [vmem:[#allocation3 + $0x5c] sm:$0xf] %vm14960_vm14, %v2523_v55 }
 0x253   : > { %2595 = vst.msk [vmem:[#allocation3 + $0x58] sm:$0xf] %vm14960_vm14, %v2521_v29 }
 0x255   : > { %v2527_v40 = vpop.permute.xlu1 %2526 }
 0x256   : > { %v2525_v58 = vpop.permute.xlu0 %2524  ;;  %2598 = vst.msk [vmem:[#allocation3 + $0x64] sm:$0xf] %vm14960_vm14, %v2527_v40 }
 0x257   : > { %2597 = vst.msk [vmem:[#allocation3 + $0x60] sm:$0xf] %vm14960_vm14, %v2525_v58 }
 0x259   : > { %v2531_v14 = vpop.permute.xlu1 %2530 }
 0x25a   : > { %v2529_v31 = vpop.permute.xlu0 %2528  ;;  %2600 = vst.msk [vmem:[#allocation3 + $0x6c] sm:$0xf] %vm14960_vm14, %v2531_v14 }
 0x25b   : > { %2599 = vst.msk [vmem:[#allocation3 + $0x68] sm:$0xf] %vm14960_vm14, %v2529_v31 }
 0x25d   : > { %v2535_v60 = vpop.permute.xlu1 %2534 }
 0x25e   : > { %v2533_v62 = vpop.permute.xlu0 %2532  ;;  %2602 = vst.msk [vmem:[#allocation3 + $0x74] sm:$0xf] %vm14960_vm14, %v2535_v60 }
 0x25f   : > { %2601 = vst.msk [vmem:[#allocation3 + $0x70] sm:$0xf] %vm14960_vm14, %v2533_v62 }
 0x261   : > { %v2539_v6 = vpop.permute.xlu1 %2538 }
 0x262   : > { %v2537_v7 = vpop.permute.xlu0 %2536  ;;  %2604 = vst.msk [vmem:[#allocation3 + $0x7c] sm:$0xf] %vm14960_vm14, %v2539_v6 }
 0x263   : > { %2603 = vst.msk [vmem:[#allocation3 + $0x78] sm:$0xf] %vm14960_vm14, %v2537_v7 }
 0x265   : > { %v2632_v23 = vpop.permute.xlu1 %2631 }
 0x266   : > { %v2630_v9 = vpop.permute.xlu0 %2629  ;;  %2727 = vst.msk [vmem:[#allocation3 + $0x4] sm:$0xf] %vm14959_vm15, %v2632_v23 }
 0x267   : > { %2726 = vst.msk [vmem:[#allocation3] sm:$0xf] %vm14959_vm15, %v2630_v9 }
 0x269   : > { %v2636_v57 = vpop.permute.xlu1 %2635 }
 0x26a   : > { %v2634_v52 = vpop.permute.xlu0 %2633  ;;  %2729 = vst.msk [vmem:[#allocation3 + $0xc] sm:$0xf] %vm14959_vm15, %v2636_v57 }
 0x26b   : > { %2728 = vst.msk [vmem:[#allocation3 + $0x8] sm:$0xf] %vm14959_vm15, %v2634_v52 }
 0x26d   : > { %v2759_v0 = vld [vmem:[#allocation3 + $0x4] sm:$0xf]  ;;  %v2640_v34 = vpop.permute.xlu1 %2639 }
 0x26e   : > { %v2758_v8 = vld [vmem:[#allocation3] sm:$0xf]  ;;  %v2638_v33 = vpop.permute.xlu0 %2637  ;;  %5172 = vst.msk [vmem:[#allocation3 + $0x4] sm:$0xf] %vm14982_vm0, %v4808_v18 }
 0x26f   : > { %5171 = vst.msk [vmem:[#allocation3] sm:$0xf] %vm14982_vm0, %v4799_v56  ;;  %v8809_v48 = vcombine.low %v2758_v8, %v2759_v0 }
 0x270   : > { %2731 = vst.msk [vmem:[#allocation3 + $0x14] sm:$0xf] %vm14959_vm15, %v2640_v34  ;;  %2730 = vst.msk [vmem:[#allocation3 + $0x10] sm:$0xf] %vm14959_vm15, %v2638_v33 }
 0x271   : > { %9055 = vmatprep.mubr.msk.bf16.mxu0 %vm14958_vm1, %v8809_v48  ;;  %v2644_v1 = vpop.permute.xlu1 %2643 }
 0x272   : > { %v2642_v38 = vpop.permute.xlu0 %2641  ;;  %v9157_v49 = vld [vmem:[#allocation3 + $0x8] sm:$0xff]   ;;  %2733 = vst.msk [vmem:[#allocation3 + $0x1c] sm:$0xf] %vm14959_vm15, %v2644_v1 }
 0x273   : > { %2732 = vst.msk [vmem:[#allocation3 + $0x18] sm:$0xf] %vm14959_vm15, %v2642_v38  ;;  %9056 = vmatmul.mubr.msk.bf16.vlgmr.msra.gmra.mxu0 %vm14958_vm1, %v9157_v49 }
 0x275   : > { %v2648_v51 = vpop.permute.xlu1 %2647 }
 0x276   : > { %v2646_v20 = vpop.permute.xlu0 %2645  ;;  %2735 = vst.msk [vmem:[#allocation3 + $0x24] sm:$0xf] %vm14959_vm15, %v2648_v51 }
 0x277   : > { %v9158_v10 = vld [vmem:[#allocation3 + $0x10] sm:$0xff]   ;;  %2734 = vst.msk [vmem:[#allocation3 + $0x20] sm:$0xf] %vm14959_vm15, %v2646_v20 }
 0x278   : > { %9059 = vmatprep.mubr.msk.bf16.mxu0 %vm14958_vm1, %v9158_v10 }
 0x279   : > { %v2652_v12 = vpop.permute.xlu1 %2651 }
 0x27a   : > { %v2650_v16 = vpop.permute.xlu0 %2649  ;;  %v9159_v19 = vld [vmem:[#allocation3 + $0x18] sm:$0xff]   ;;  %2737 = vst.msk [vmem:[#allocation3 + $0x2c] sm:$0xf] %vm14959_vm15, %v2652_v12 }
 0x27b   : > { %2736 = vst.msk [vmem:[#allocation3 + $0x28] sm:$0xf] %vm14959_vm15, %v2650_v16  ;;  %9060 = vmatmul.mubr.msk.bf16.gmra.mxu0 %vm14958_vm1, %v9159_v19  ;;  %v9531_v19 = vmov 0.0  }
 0x27c   : > { %346 = vst.msk [vmem:[#allocation4 + $0x8] sm:$0xff] %vm15027_vm2, %v9531_v19  ;;  %345 = vst.msk [vmem:[#allocation4] sm:$0xff] %vm15027_vm2, %v9531_v19 }
 0x27d   : > { %v2656_v53 = vpop.permute.xlu1 %2655  ;;  %347 = vst.msk [vmem:[#allocation4 + $0x110] sm:$0xff] %vm15027_vm2, %v9531_v19  ;;  %348 = vst.msk [vmem:[#allocation4 + $0x118] sm:$0xff] %vm15027_vm2, %v9531_v19  ;;  %v9459_v19 = vld [vmem:[%s9632_s24 + $0x58] sm:$0xff] }
 0x27e   : > { %v2654_v45 = vpop.permute.xlu0 %2653  ;;  %v9160_v42 = vld [vmem:[#allocation3 + $0x20] sm:$0xff]   ;;  %2739 = vst.msk [vmem:[#allocation3 + $0x34] sm:$0xf] %vm14959_vm15, %v2656_v53 }
 0x27f   : > { %2738 = vst.msk [vmem:[#allocation3 + $0x30] sm:$0xf] %vm14959_vm15, %v2654_v45  ;;  %9063 = vmatprep.mubr.msk.bf16.mxu0 %vm14958_vm1, %v9160_v42 }
 0x281   : > { %v2660_v35 = vpop.permute.xlu1 %2659 }
 0x282   : > { %v2658_v4 = vpop.permute.xlu0 %2657  ;;  %v9161_v30 = vld [vmem:[#allocation3 + $0x28] sm:$0xff]   ;;  %2741 = vst.msk [vmem:[#allocation3 + $0x3c] sm:$0xf] %vm14959_vm15, %v2660_v35  ;;  %v9449_v35 = vld [vmem:[%s9632_s24] sm:$0xff] }
 0x283   : > { %2740 = vst.msk [vmem:[#allocation3 + $0x38] sm:$0xf] %vm14959_vm15, %v2658_v4  ;;  %9064 = vmatmul.mubr.msk.bf16.gmra.mxu0 %vm14958_vm1, %v9161_v30  ;;  %v3271_v4 = vmul.f32 %v9449_v35, %v9449_v35  ;;  %v3282_v35 = vmul.f32 %v9459_v19, %v9459_v19  ;;  %v9469_v19 = vld [vmem:[%s9632_s24 + $0xa8] sm:$0xff] }
 0x285   : > { %v2664_v27 = vpop.permute.xlu1 %2663  ;;  %v3304_v30 = vsel %vm14983_vm8, %v3271_v4, 0.0 }
 0x286   : > { %v2662_v3 = vpop.permute.xlu0 %2661  ;;  %v9162_v36 = vld [vmem:[#allocation3 + $0x30] sm:$0xff]   ;;  %2743 = vst.msk [vmem:[#allocation3 + $0x44] sm:$0xf] %vm14959_vm15, %v2664_v27  ;;  %v9450_v27 = vld [vmem:[%s9632_s24 + $0x10] sm:$0xff] }
 0x287   : > { %2742 = vst.msk [vmem:[#allocation3 + $0x40] sm:$0xf] %vm14959_vm15, %v2662_v3  ;;  %9067 = vmatprep.mubr.msk.bf16.mxu0 %vm14958_vm1, %v9162_v36  ;;  %v3273_v3 = vmul.f32 %v9450_v27, %v9450_v27 }
 0x289   : > { %v2668_v32 = vpop.permute.xlu1 %2667  ;;  %v3310_v36 = vsel %vm14983_vm8, %v3273_v3, 0.0  ;;  %v3337_v3 = vsel %vm14983_vm8, %v3282_v35, 0.0  ;;  %v3292_v35 = vmul.f32 %v9469_v19, %v9469_v19  ;;  %v9478_v19 = vld [vmem:[%s9632_s24 + $0xe0] sm:$0xff] }
 0x28a   : > { %v2666_v37 = vpop.permute.xlu0 %2665  ;;  %v9163_v28 = vld [vmem:[#allocation3 + $0x38] sm:$0xff]   ;;  %2745 = vst.msk [vmem:[#allocation3 + $0x4c] sm:$0xf] %vm14959_vm15, %v2668_v32  ;;  %v9451_v32 = vld [vmem:[%s9632_s24 + $0x18] sm:$0xff] }
 0x28b   : > { %2744 = vst.msk [vmem:[#allocation3 + $0x48] sm:$0xf] %vm14959_vm15, %v2666_v37  ;;  %9068 = vmatmul.mubr.msk.bf16.gmra.mxu0 %vm14958_vm1, %v9163_v28  ;;  %v3274_v37 = vmul.f32 %v9451_v32, %v9451_v32  ;;  %v9452_v28 = vld [vmem:[%s9632_s24 + $0x8] sm:$0xff] }
 0x28d   : > { %v2672_v41 = vpop.permute.xlu1 %2671 }
 0x28e   : > { %v2670_v25 = vpop.permute.xlu0 %2669  ;;  %v9164_v2 = vld [vmem:[#allocation3 + $0x40] sm:$0xff]   ;;  %2747 = vst.msk [vmem:[#allocation3 + $0x54] sm:$0xf] %vm14959_vm15, %v2672_v41  ;;  %v3272_v41 = vmul.f32 %v9452_v28, %v9452_v28  ;;  %v9462_v28 = vld [vmem:[%s9632_s24 + $0x60] sm:$0xff] }
 0x28f   : > { %2746 = vst.msk [vmem:[#allocation3 + $0x50] sm:$0xf] %vm14959_vm15, %v2670_v25  ;;  %9071 = vmatprep.mubr.msk.bf16.mxu0 %vm14958_vm1, %v9164_v2  ;;  %v3313_v25 = vsel %vm14983_vm8, %v3274_v37, 0.0  ;;  %v9453_v2 = vld [vmem:[%s9632_s24 + $0x28] sm:$0xff] }
 0x291   : > { %v2676_v50 = vpop.permute.xlu1 %2675 }
 0x292   : > { %v2674_v11 = vpop.permute.xlu0 %2673  ;;  %v9165_v39 = vld [vmem:[#allocation3 + $0x48] sm:$0xff]   ;;  %2749 = vst.msk [vmem:[#allocation3 + $0x5c] sm:$0xf] %vm14959_vm15, %v2676_v50  ;;  %v3276_v50 = vmul.f32 %v9453_v2, %v9453_v2 }
 0x293   : > { %2748 = vst.msk [vmem:[#allocation3 + $0x58] sm:$0xf] %vm14959_vm15, %v2674_v11  ;;  %9072 = vmatmul.mubr.msk.bf16.gmra.mxu0 %vm14958_vm1, %v9165_v39  ;;  %v3307_v11 = vsel %vm14983_vm8, %v3272_v41, 0.0  ;;  %v9454_v39 = vld [vmem:[%s9632_s24 + $0x20] sm:$0xff]  ;;  %v3283_v41 = vmul.f32 %v9462_v28, %v9462_v28  ;;  %v9463_v2 = vld [vmem:[%s9632_s24 + $0x78] sm:$0xff]  ;;  %v9472_v28 = vld [vmem:[%s9632_s24 + $0xb0] sm:$0xff] }
 0x295   : > { %v2680_v55 = vpop.permute.xlu1 %2679 }
 0x296   : > { %v2678_v29 = vpop.permute.xlu0 %2677  ;;  %v9166_v40 = vld [vmem:[#allocation3 + $0x50] sm:$0xff]   ;;  %2751 = vst.msk [vmem:[#allocation3 + $0x64] sm:$0xf] %vm14959_vm15, %v2680_v55  ;;  %v3275_v55 = vmul.f32 %v9454_v39, %v9454_v39  ;;  %v9464_v39 = vld [vmem:[%s9632_s24 + $0x70] sm:$0xff] }
 0x297   : > { %2750 = vst.msk [vmem:[#allocation3 + $0x60] sm:$0xf] %vm14959_vm15, %v2678_v29  ;;  %9075 = vmatprep.mubr.msk.bf16.mxu0 %vm14958_vm1, %v9166_v40  ;;  %v3319_v29 = vsel %vm14983_vm8, %v3276_v50, 0.0  ;;  %v9455_v40 = vld [vmem:[%s9632_s24 + $0x38] sm:$0xff]  ;;  %v3286_v50 = vmul.f32 %v9463_v2, %v9463_v2 }
 0x299   : > { %v2684_v58 = vpop.permute.xlu1 %2683 }
 0x29a   : > { %v2682_v14 = vpop.permute.xlu0 %2681  ;;  %v9167_v31 = vld [vmem:[#allocation3 + $0x58] sm:$0xff]   ;;  %2753 = vst.msk [vmem:[#allocation3 + $0x6c] sm:$0xf] %vm14959_vm15, %v2684_v58  ;;  %v3278_v58 = vmul.f32 %v9455_v40, %v9455_v40 }
 0x29b   : > { %2752 = vst.msk [vmem:[#allocation3 + $0x68] sm:$0xf] %vm14959_vm15, %v2682_v14  ;;  %9076 = vmatmul.mubr.msk.bf16.gmra.mxu0 %vm14958_vm1, %v9167_v31  ;;  %v3316_v14 = vsel %vm14983_vm8, %v3275_v55, 0.0  ;;  %v9456_v31 = vld [vmem:[%s9632_s24 + $0x30] sm:$0xff]  ;;  %v3285_v55 = vmul.f32 %v9464_v39, %v9464_v39  ;;  %v9465_v40 = vld [vmem:[%s9632_s24 + $0x88] sm:$0xff] }
 0x29d   : > { %v2688_v54 = vpop.permute.xlu1 %2687 }
 0x29e   : > { %v2686_v46 = vpop.permute.xlu0 %2685  ;;  %v9168_v60 = vld [vmem:[#allocation3 + $0x60] sm:$0xff]   ;;  %2755 = vst.msk [vmem:[#allocation3 + $0x74] sm:$0xf] %vm14959_vm15, %v2688_v54  ;;  %v3277_v54 = vmul.f32 %v9456_v31, %v9456_v31  ;;  %v9466_v31 = vld [vmem:[%s9632_s24 + $0x80] sm:$0xff] }
 0x29f   : > { %2754 = vst.msk [vmem:[#allocation3 + $0x70] sm:$0xf] %vm14959_vm15, %v2686_v46  ;;  %9079 = vmatprep.mubr.msk.bf16.mxu0 %vm14958_vm1, %v9168_v60  ;;  %v3325_v46 = vsel %vm14983_vm8, %v3278_v58, 0.0  ;;  %v9457_v60 = vld [vmem:[%s9632_s24 + $0x48] sm:$0xff]  ;;  %v3288_v58 = vmul.f32 %v9465_v40, %v9465_v40 }
 0x2a1   : > { %v2692_v62 = vpop.permute.xlu1 %2691 }
 0x2a2   : > { %v2690_v13 = vpop.permute.xlu0 %2689  ;;  %v9169_v26 = vld [vmem:[#allocation3 + $0x68] sm:$0xff]   ;;  %2757 = vst.msk [vmem:[#allocation3 + $0x7c] sm:$0xf] %vm14959_vm15, %v2692_v62  ;;  %v3280_v62 = vmul.f32 %v9457_v60, %v9457_v60 }
 0x2a3   : > { %2756 = vst.msk [vmem:[#allocation3 + $0x78] sm:$0xf] %vm14959_vm15, %v2690_v13  ;;  %9080 = vmatmul.mubr.msk.bf16.gmra.mxu0 %vm14958_vm1, %v9169_v26  ;;  %v3322_v13 = vsel %vm14983_vm8, %v3277_v54, 0.0  ;;  %v9458_v26 = vld [vmem:[%s9632_s24 + $0x40] sm:$0xff]  ;;  %v3287_v54 = vmul.f32 %v9466_v31, %v9466_v31  ;;  %v9467_v60 = vld [vmem:[%s9632_s24 + $0x98] sm:$0xff] }
 0x2a6   : > { %v9170_v63 = vld [vmem:[#allocation3 + $0x70] sm:$0xff]  }
 0x2a7   : > { %9083 = vmatprep.mubr.msk.bf16.mxu0 %vm14958_vm1, %v9170_v63  ;;  %v3279_v63 = vmul.f32 %v9458_v26, %v9458_v26  ;;  %v9468_v26 = vld [vmem:[%s9632_s24 + $0x90] sm:$0xff] }
 0x2a9   : > { %v3328_v4 = vsel %vm14983_vm8, %v3279_v63, 0.0  ;;  %v3289_v63 = vmul.f32 %v9468_v26, %v9468_v26  ;;  %v9477_v26 = vld [vmem:[%s9632_s24 + $0xe8] sm:$0xff] }
 0x2aa   : > { %v9171_v6 = vld [vmem:[#allocation3 + $0x78] sm:$0xff]  }
 0x2ab   : > { %9084 = vmatmul.mubr.msk.bf16.gmra.mxu0 %vm14958_vm1, %v9171_v6  ;;  %v3331_v6 = vsel %vm14983_vm8, %v3280_v62, 0.0  ;;  %v3290_v62 = vmul.f32 %v9467_v60, %v9467_v60 }
 0x333   : > { %v11004_v7 = vpop.f32.mrf.mxu0 }
 0x335   : > { %v11006_v61 = vpop.f32.mrf.mxu0 }
 0x336   : > { %3143 = vrot.lane.b32.xlu0 %v11006_v61, %s9530_s20 }
 0x337   : > { %v11010_v24 = vpop.f32.mrf.mxu0 }
 0x339   : > { %v11012_v15 = vpop.f32.mrf.mxu0 }
 0x33a   : > { %3147 = vrot.lane.b32.xlu0 %v11004_v7, %s9530_s20  ;;  %3145 = vrot.lane.b32.xlu1 %v11012_v15, %s9530_s20 }
 0x33b   : > { %v11018_v43 = vpop.f32.mrf.mxu0 }
 0x33d   : > { %v11020_v22 = vpop.f32.mrf.mxu0 }
 0x33e   : > { %3149 = vrot.lane.b32.xlu1 %v11010_v24, %s9530_s20  ;;  %3151 = vrot.lane.b32.xlu0 %v11020_v22, %s9530_s20 }
 0x33f   : > { %v11026_v23 = vpop.f32.mrf.mxu0 }
 0x340   : > { %15086 = vst [vmem:[#allocation7_spill] sm:$0xff] %v11026_v23 }
 0x341   : > { %v11028_v9 = vpop.f32.mrf.mxu0 }
 0x342   : > { %3155 = vrot.lane.b32.xlu0 %v11018_v43, %s9530_s20  ;;  %3153 = vrot.lane.b32.xlu1 %v11028_v9, %s9530_s20 }
 0x343   : > { %v11034_v44 = vpop.f32.mrf.mxu0 }
 0x344   : > { %15087 = vst [vmem:[#allocation8_spill] sm:$0xff] %v11034_v44 }
 0x345   : > { %v11036_v5 = vpop.f32.mrf.mxu0 }
 0x346   : > { %15088 = vst [vmem:[#allocation9_spill] sm:$0xff] %v11036_v5  ;;  %3157 = vrot.lane.b32.xlu1 %v11026_v23, %s9530_s20  ;;  %3159 = vrot.lane.b32.xlu0 %v11036_v5, %s9530_s20 }
 0x347   : > { %v11042_v59 = vpop.f32.mrf.mxu0 }
 0x348   : > { %15089 = vst [vmem:[#allocation10_spill] sm:$0xff] %v11042_v59 }
 0x349   : > { %v11044_v21 = vpop.f32.mrf.mxu0 }
 0x34a   : > { %15090 = vst [vmem:[#allocation11_spill] sm:$0xff] %v11044_v21  ;;  %3163 = vrot.lane.b32.xlu0 %v11034_v44, %s9530_s20  ;;  %3161 = vrot.lane.b32.xlu1 %v11044_v21, %s9530_s20 }
 0x34b   : > { %v11050_v57 = vpop.f32.mrf.mxu0 }
 0x34c   : > { %15091 = vst [vmem:[#allocation12_spill] sm:$0xff] %v11050_v57 }
 0x34d   : > { %v11052_v52 = vpop.f32.mrf.mxu0 }
 0x34e   : > { %15092 = vst [vmem:[#allocation13_spill] sm:$0xff] %v11052_v52  ;;  %3165 = vrot.lane.b32.xlu1 %v11042_v59, %s9530_s20  ;;  %3167 = vrot.lane.b32.xlu0 %v11052_v52, %s9530_s20 }
 0x34f   : > { %v11058_v18 = vpop.f32.mrf.mxu0 }
 0x350   : > { %15093 = vst [vmem:[#allocation14_spill] sm:$0xff] %v11058_v18 }
 0x351   : > { %v11060_v56 = vpop.f32.mrf.mxu0 }
 0x352   : > { %15094 = vst [vmem:[#allocation15_spill] sm:$0xff] %v11060_v56  ;;  %3171 = vrot.lane.b32.xlu0 %v11050_v57, %s9530_s20  ;;  %3169 = vrot.lane.b32.xlu1 %v11060_v56, %s9530_s20  ;;  %v3657_v56 = vld [vmem:[#allocation4 + $0x8] sm:$0xff] }
 0x353   : > { %v11066_v0 = vpop.f32.mrf.mxu0 }
 0x354   : > { %15095 = vst [vmem:[#allocation16_spill] sm:$0xff] %v11066_v0 }
 0x355   : > { %v11068_v8 = vpop.f32.mrf.mxu0 }
 0x356   : > { %15096 = vst [vmem:[#allocation17_spill] sm:$0xff] %v11068_v8  ;;  %3173 = vrot.lane.b32.xlu1 %v11058_v18, %s9530_s20  ;;  %3175 = vrot.lane.b32.xlu0 %v11068_v8, %s9530_s20 }
 0x357   : > { %v11074_v34 = vpop.f32.mrf.mxu0 }
 0x358   : > { %15097 = vst [vmem:[#allocation18_spill] sm:$0xff] %v11074_v34 }
 0x359   : > { %v11076_v33 = vpop.f32.mrf.mxu0 }
 0x35a   : > { %15098 = vst [vmem:[#allocation19_spill] sm:$0xff] %v11076_v33  ;;  %3179 = vrot.lane.b32.xlu0 %v11066_v0, %s9530_s20  ;;  %3177 = vrot.lane.b32.xlu1 %v11076_v33, %s9530_s20 }
 0x35b   : > { %v11082_v48 = vpop.f32.mrf.mxu0 }
 0x35c   : > { %15099 = vst [vmem:[#allocation20_spill] sm:$0xff] %v11082_v48 }
 0x35d   : > { %v11084_v1 = vpop.f32.mrf.mxu0 }
 0x35e   : > { %15100 = vst [vmem:[#allocation21_spill] sm:$0xff] %v11084_v1  ;;  %3181 = vrot.lane.b32.xlu1 %v11074_v34, %s9530_s20  ;;  %3183 = vrot.lane.b32.xlu0 %v11084_v1, %s9530_s20 }
 0x35f   : > { %v11090_v38 = vpop.f32.mrf.mxu0 }
 0x360   : > { %15101 = vst [vmem:[#allocation22_spill] sm:$0xff] %v11090_v38 }
 0x361   : > { %v11092_v49 = vpop.f32.mrf.mxu0 }
 0x362   : > { %15102 = vst [vmem:[#allocation23_spill] sm:$0xff] %v11092_v49  ;;  %3187 = vrot.lane.b32.xlu0 %v11082_v48, %s9530_s20  ;;  %3185 = vrot.lane.b32.xlu1 %v11092_v49, %s9530_s20 }
 0x363   : > { %v11098_v51 = vpop.f32.mrf.mxu0 }
 0x364   : > { %15103 = vst [vmem:[#allocation24_spill] sm:$0xff] %v11098_v51 }
 0x365   : > { %v11100_v20 = vpop.f32.mrf.mxu0 }
 0x366   : > { %15104 = vst [vmem:[#allocation25_spill] sm:$0xff] %v11100_v20  ;;  %3189 = vrot.lane.b32.xlu1 %v11090_v38, %s9530_s20  ;;  %3191 = vrot.lane.b32.xlu0 %v11100_v20, %s9530_s20 }
 0x367   : > { %v11106_v10 = vpop.f32.mrf.mxu0 }
 0x368   : > { %15105 = vst [vmem:[#allocation26_spill] sm:$0xff] %v11106_v10 }
 0x369   : > { %v11108_v12 = vpop.f32.mrf.mxu0 }
 0x36a   : > { %15106 = vst [vmem:[#allocation27_spill] sm:$0xff] %v11108_v12  ;;  %3195 = vrot.lane.b32.xlu0 %v11098_v51, %s9530_s20  ;;  %3193 = vrot.lane.b32.xlu1 %v11108_v12, %s9530_s20 }
 0x36b   : > { %v11114_v16 = vpop.f32.mrf.mxu0 }
 0x36c   : > { %15107 = vst [vmem:[#allocation28_spill] sm:$0xff] %v11114_v16 }
 0x36d   : > { %v11120_v53 = vpop.f32.mrf.mxu0 }
 0x36e   : > { %15108 = vst [vmem:[#allocation29_spill] sm:$0xff] %v11120_v53  ;;  %3197 = vrot.lane.b32.xlu1 %v11106_v10, %s9530_s20  ;;  %3199 = vrot.lane.b32.xlu0 %v11120_v53, %s9530_s20 }
 0x36f   : > { %v11126_v45 = vpop.f32.mrf.mxu0 }
 0x370   : > { %15109 = vst [vmem:[#allocation30_spill] sm:$0xff] %v11126_v45 }
 0x371   : > { %v11128_v42 = vpop.f32.mrf.mxu0 }
 0x372   : > { %15110 = vst [vmem:[#allocation31_spill] sm:$0xff] %v11128_v42  ;;  %3203 = vrot.lane.b32.xlu0 %v11114_v16, %s9530_s20  ;;  %3201 = vrot.lane.b32.xlu1 %v11128_v42, %s9530_s20  ;;  %v11263_v42 = vshrl.u32 %v349_v47, 7 }
 0x374   : > { %v382_v53 = vand.u32 15, %v11263_v42  ;;  %v353_v47 = vadd.s32 24, %v11263_v42  ;;  %v356_v20 = vadd.s32 48, %v11263_v42  ;;  %v359_v34 = vadd.s32 72, %v11263_v42 }
 0x375   : > { %v11424_v59 = vadd.s32 144, %v11263_v42 }
 0x376   : > { %3205 = vrot.lane.b32.xlu1 %v11126_v45, %s9530_s20  ;;  %vm11274_vm9 = vcmp.eq.s32.totalorder %v382_v53, 0  ;;  %v385_v53 = vand.u32 15, %v353_v47  ;;  %v358_v47 = vadd.s32 64, %v11263_v42 }
 0x377   : > { %v400_v21 = vand.u32 15, %v11424_v59 }
 0x378   : > { %vm11305_vm13 = vcmp.eq.s32.totalorder %v385_v53, 15  ;;  %v362_v53 = vadd.s32 96, %v11263_v42 }
 0x391   : > { %3305 = vadd.xlane.f32.xlu0 %v3304_v30  ;;  %v9460_v30 = vld [vmem:[%s9632_s24 + $0x50] sm:$0xff] }
 0x392   : > { %v3281_v27 = vmul.f32 %v9460_v30, %v9460_v30  ;;  %v9470_v30 = vld [vmem:[%s9632_s24 + $0xa0] sm:$0xff] }
 0x394   : > { %v3334_v37 = vsel %vm14983_vm8, %v3281_v27, 0.0  ;;  %v3291_v27 = vmul.f32 %v9470_v30, %v9470_v30 }
 0x395   : > { %3311 = vadd.xlane.f32.xlu0 %v3310_v36  ;;  %v9461_v36 = vld [vmem:[%s9632_s24 + $0x68] sm:$0xff] }
 0x396   : > { %v3284_v32 = vmul.f32 %v9461_v36, %v9461_v36  ;;  %v9471_v36 = vld [vmem:[%s9632_s24 + $0xb8] sm:$0xff] }
 0x399   : > { %3314 = vadd.xlane.f32.xlu0 %v3313_v25  ;;  %v3343_v25 = vsel %vm14983_vm8, %v3284_v32, 0.0  ;;  %v3294_v32 = vmul.f32 %v9471_v36, %v9471_v36 }
 0x39a   : > { %3308 = vadd.xlane.f32.xlu1 %v3307_v11  ;;  %v3340_v11 = vsel %vm14983_vm8, %v3283_v41, 0.0  ;;  %v3293_v41 = vmul.f32 %v9472_v28, %v9472_v28 }
 0x39b   : > { %v3373_v2 = vsel %vm14983_vm8, %v3294_v32, 0.0 }
 0x39c   : > { %v3370_v39 = vsel %vm14983_vm8, %v3293_v41, 0.0 }
 0x39d   : > { %3320 = vadd.xlane.f32.xlu0 %v3319_v29  ;;  %v3349_v29 = vsel %vm14983_vm8, %v3286_v50, 0.0  ;;  %v9473_v50 = vld [vmem:[%s9632_s24 + $0xc8] sm:$0xff] }
 0x39e   : > { %3317 = vadd.xlane.f32.xlu1 %v3316_v14  ;;  %v3346_v14 = vsel %vm14983_vm8, %v3285_v55, 0.0  ;;  %v9474_v55 = vld [vmem:[%s9632_s24 + $0xc0] sm:$0xff] }
 0x3a1   : > { %3326 = vadd.xlane.f32.xlu0 %v3325_v46  ;;  %v3355_v46 = vsel %vm14983_vm8, %v3288_v58, 0.0 }
 0x3a2   : > { %3323 = vadd.xlane.f32.xlu1 %v3322_v13  ;;  %v3352_v13 = vsel %vm14983_vm8, %v3287_v54, 0.0 }
 0x3a5   : > { %3332 = vadd.xlane.f32.xlu0 %v3331_v6  ;;  %v3361_v6 = vsel %vm14983_vm8, %v3290_v62, 0.0 }
 0x3a6   : > { %3329 = vadd.xlane.f32.xlu1 %v3328_v4  ;;  %v3358_v4 = vsel %vm14983_vm8, %v3289_v63, 0.0  ;;  %v3300_v63 = vmul.f32 %v9477_v26, %v9477_v26 }
 0x3a8   : > { %v3391_v30 = vsel %vm14983_vm8, %v3300_v63, 0.0 }
 0x3a9   : > { %3338 = vadd.xlane.f32.xlu0 %v3337_v3  ;;  %v3367_v3 = vsel %vm14983_vm8, %v3292_v35, 0.0  ;;  %v3299_v35 = vmul.f32 %v9478_v19, %v9478_v19 }
 0x3aa   : > { %3335 = vadd.xlane.f32.xlu1 %v3334_v37  ;;  %v3364_v37 = vsel %vm14983_vm8, %v3291_v27, 0.0  ;;  %v9479_v27 = vld [vmem:[%s9632_s24 + $0xf8] sm:$0xff] }
 0x3ab   : > { %v3388_v32 = vsel %vm14983_vm8, %v3299_v35, 0.0 }
 0x3ac   : > { %v11194_v62 = vpop.permute.xlu1 %3145 }
 0x3ad   : > { %3344 = vadd.xlane.f32.xlu0 %v3343_v25  ;;  %v11182_v25 = vpop.permute.xlu0 %3143 }
 0x3ae   : > { %3341 = vadd.xlane.f32.xlu1 %v3340_v11  ;;  %v3296_v11 = vmul.f32 %v9473_v50, %v9473_v50 }
 0x3b0   : > { %v3379_v58 = vsel %vm14983_vm8, %v3296_v11, 0.0  ;;  %v11204_v36 = vpop.permute.xlu1 %3149 }
 0x3b1   : > { %3350 = vadd.xlane.f32.xlu0 %v3349_v29  ;;  %v3295_v29 = vmul.f32 %v9474_v55, %v9474_v55  ;;  %v11188_v40 = vpop.permute.xlu0 %3147 }
 0x3b2   : > { %3347 = vadd.xlane.f32.xlu1 %v3346_v14  ;;  %v9475_v14 = vld [vmem:[%s9632_s24 + $0xd8] sm:$0xff] }
 0x3b3   : > { %v3298_v31 = vmul.f32 %v9475_v14, %v9475_v14  ;;  %v3376_v54 = vsel %vm14983_vm8, %v3295_v29, 0.0 }
 0x3b4   : > { %v11212_v11 = vpop.permute.xlu1 %3153 }
 0x3b5   : > { %3356 = vadd.xlane.f32.xlu0 %v3355_v46  ;;  %v9476_v46 = vld [vmem:[%s9632_s24 + $0xd0] sm:$0xff] }
 0x3b6   : > { %3353 = vadd.xlane.f32.xlu1 %v3352_v13  ;;  %v3297_v60 = vmul.f32 %v9476_v46, %v9476_v46  ;;  %v3385_v13 = vsel %vm14983_vm8, %v3298_v31, 0.0 }
 0x3b8   : > { %v11216_v55 = vpop.permute.xlu1 %3157 }
 0x3b9   : > { %3362 = vadd.xlane.f32.xlu0 %v3361_v6  ;;  %v3382_v6 = vsel %vm14983_vm8, %v3297_v60, 0.0  ;;  %15112 = vst [vmem:[#allocation33_spill] sm:$0xff] %v11216_v55 }
 0x3ba   : > { %3359 = vadd.xlane.f32.xlu1 %v3358_v4  ;;  %v11200_v4 = vpop.permute.xlu0 %3151 }
 0x3bd   : > { %3368 = vadd.xlane.f32.xlu0 %v3367_v3  ;;  %v3302_v3 = vmul.f32 %v9479_v27, %v9479_v27 }
 0x3be   : > { %3365 = vadd.xlane.f32.xlu1 %v3364_v37  ;;  %v9480_v37 = vld [vmem:[%s9632_s24 + $0xf0] sm:$0xff]  ;;  %v11208_v41 = vpop.permute.xlu0 %3155 }
 0x3bf   : > { %v3301_v28 = vmul.f32 %v9480_v37, %v9480_v37 }
 0x3c1   : > { %3374 = vadd.xlane.f32.xlu0 %v3373_v2  ;;  %v3397_v2 = vsel %vm14983_vm8, %v3302_v3, 0.0  ;;  %v3394_v50 = vsel %vm14983_vm8, %v3301_v28, 0.0 }
 0x3c2   : > { %3371 = vadd.xlane.f32.xlu1 %v3370_v39  ;;  %v11214_v39 = vpop.permute.xlu0 %3159 }
 0x3c3   : > { %15111 = vst [vmem:[#allocation32_spill] sm:$0xff] %v11214_v39 }
 0x3c5   : > { %3380 = vadd.xlane.f32.xlu0 %v3379_v58  ;;  %v11220_v58 = vpop.permute.xlu1 %3161 }
 0x3c6   : > { %3377 = vadd.xlane.f32.xlu1 %v3376_v54  ;;  %v11218_v29 = vpop.permute.xlu0 %3163  ;;  %15114 = vst [vmem:[#allocation35_spill] sm:$0xff] %v11220_v58 }
 0x3c7   : > { %15113 = vst [vmem:[#allocation34_spill] sm:$0xff] %v11218_v29 }
 0x3c9   : > { %3386 = vadd.xlane.f32.xlu0 %v3385_v13  ;;  %v11224_v31 = vpop.permute.xlu1 %3165 }
 0x3ca   : > { %3383 = vadd.xlane.f32.xlu1 %v3382_v6  ;;  %v11222_v14 = vpop.permute.xlu0 %3167  ;;  %15116 = vst [vmem:[#allocation37_spill] sm:$0xff] %v11224_v31 }
 0x3cb   : > { %15115 = vst [vmem:[#allocation36_spill] sm:$0xff] %v11222_v14 }
 0x3cd   : > { %3392 = vadd.xlane.f32.xlu0 %v3391_v30  ;;  %v11228_v46 = vpop.permute.xlu1 %3169 }
 0x3ce   : > { %3389 = vadd.xlane.f32.xlu1 %v3388_v32  ;;  %v11226_v54 = vpop.permute.xlu0 %3171  ;;  %15118 = vst [vmem:[#allocation39_spill] sm:$0xff] %v11228_v46 }
 0x3cf   : > { %15117 = vst [vmem:[#allocation38_spill] sm:$0xff] %v11226_v54 }
 0x3d1   : > { %3398 = vadd.xlane.f32.xlu0 %v3397_v2  ;;  %v11232_v13 = vpop.permute.xlu1 %3173 }
 0x3d2   : > { %3395 = vadd.xlane.f32.xlu1 %v3394_v50  ;;  %v11230_v60 = vpop.permute.xlu0 %3175  ;;  %15120 = vst [vmem:[#allocation41_spill] sm:$0xff] %v11232_v13  ;;  %v15151_v13 = vmov 0 }
 0x3d3   : > { %15119 = vst [vmem:[#allocation40_spill] sm:$0xff] %v11230_v60 }
 0x3d5   : > { %v11236_v63 = vpop.permute.xlu1 %3177 }
 0x3d6   : > { %v11234_v26 = vpop.permute.xlu0 %3179  ;;  %15122 = vst [vmem:[#allocation43_spill] sm:$0xff] %v11236_v63 }
 0x3d7   : > { %15121 = vst [vmem:[#allocation42_spill] sm:$0xff] %v11234_v26 }
 0x3d9   : > { %v11240_v19 = vpop.permute.xlu1 %3181 }
 0x3da   : > { %v11238_v6 = vpop.permute.xlu0 %3183  ;;  %15124 = vst [vmem:[#allocation45_spill] sm:$0xff] %v11240_v19 }
 0x3db   : > { %15123 = vst [vmem:[#allocation44_spill] sm:$0xff] %v11238_v6  ;;  %v15148_v6 = vmov 0 }
 0x3dc   : > { %v15149_v6 = vsel %vm11305_vm13, 4294967295, %v15148_v6 }
 0x3dd   : > { %v11244_v30 = vpop.permute.xlu1 %3185  ;;  %15150 = vst [vmem:[#allocation61_spill] sm:$0xff] %v15149_v6 }
 0x3de   : > { %v11242_v35 = vpop.permute.xlu0 %3187  ;;  %15126 = vst [vmem:[#allocation47_spill] sm:$0xff] %v11244_v30 }
 0x3df   : > { %15125 = vst [vmem:[#allocation46_spill] sm:$0xff] %v11242_v35 }
 0x3e1   : > { %v11248_v3 = vpop.permute.xlu1 %3189 }
 0x3e2   : > { %v11246_v27 = vpop.permute.xlu0 %3191  ;;  %15128 = vst [vmem:[#allocation49_spill] sm:$0xff] %v11248_v3  ;;  %v355_v3 = vadd.s32 40, %v11263_v42 }
 0x3e3   : > { %15127 = vst [vmem:[#allocation48_spill] sm:$0xff] %v11246_v27 }
 0x3e5   : > { %v11252_v37 = vpop.permute.xlu1 %3193 }
 0x3e6   : > { %v11250_v32 = vpop.permute.xlu0 %3195  ;;  %15130 = vst [vmem:[#allocation51_spill] sm:$0xff] %v11252_v37  ;;  %v15136_v37 = vmov 0 }
 0x3e7   : > { %15129 = vst [vmem:[#allocation50_spill] sm:$0xff] %v11250_v32  ;;  %v15137_v37 = vsel %vm11274_vm9, 4294967295, %v15136_v37 }
 0x3e8   : > { %15138 = vst [vmem:[#allocation57_spill] sm:$0xff] %v15137_v37  ;;  %v388_v37 = vand.u32 15, %v356_v20  ;;  %v11315_v20 = vadd.s32 88, %v11263_v42 }
 0x3e9   : > { %v11256_v2 = vpop.permute.xlu1 %3197 }
 0x3ea   : > { %v11254_v28 = vpop.permute.xlu0 %3199  ;;  %15132 = vst [vmem:[#allocation53_spill] sm:$0xff] %v11256_v2  ;;  %v351_v2 = vadd.s32 8, %v11263_v42  ;;  %vm11326_vm12 = vcmp.eq.s32.totalorder %v388_v37, 0 }
 0x3eb   : > { %15131 = vst [vmem:[#allocation52_spill] sm:$0xff] %v11254_v28  ;;  %v352_v28 = vadd.s32 16, %v11263_v42  ;;  %v15152_v13 = vsel %vm11326_vm12, 4294967295, %v15151_v13 }
 0x3ec   : > { %v383_v32 = vand.u32 15, %v351_v2  ;;  %v15142_v2 = vmov 0  ;;  %15153 = vst [vmem:[#allocation62_spill] sm:$0xff] %v15152_v13 }
 0x3ed   : > { %v11260_v17 = vpop.permute.xlu1 %3201  ;;  %v384_v51 = vand.u32 15, %v352_v28  ;;  %v15139_v28 = vmov 0 }
 0x3ee   : > { %v11258_v50 = vpop.permute.xlu0 %3203  ;;  %15134 = vst [vmem:[#allocation55_spill] sm:$0xff] %v11260_v17  ;;  %vm11292_vm15 = vcmp.eq.s32.totalorder %v383_v32, 15 }
 0x3ef   : > { %15133 = vst [vmem:[#allocation54_spill] sm:$0xff] %v11258_v50  ;;  %v354_v50 = vadd.s32 32, %v11263_v42  ;;  %vm11287_vm1 = vcmp.eq.s32.totalorder %v384_v51, 0  ;;  %v15143_v2 = vsel %vm11292_vm15, 4294967295, %v15142_v2  ;;  %v357_v51 = vadd.s32 56, %v11263_v42 }
 0x3f0   : > { %v15140_v28 = vsel %vm11287_vm1, 4294967295, %v15139_v28  ;;  %15144 = vst [vmem:[#allocation59_spill] sm:$0xff] %v15143_v2 }
 0x3f1   : > { %v11265_v10 = vpop.permute.xlu1 %3205  ;;  %v386_v38 = vand.u32 15, %v354_v50  ;;  %15141 = vst [vmem:[#allocation58_spill] sm:$0xff] %v15140_v28  ;;  %v15145_v50 = vmov 0  ;;  %v15154_v28 = vmov 0  ;;  %v389_v8 = vand.u32 15, %v357_v51 }
 0x3f2   : > { %15135 = vst [vmem:[#allocation56_spill] sm:$0xff] %v11265_v10 }
 0x3f3   : > { %vm11296_vm14 = vcmp.eq.s32.totalorder %v386_v38, 0  ;;  %vm11370_vm6 = vcmp.eq.s32.totalorder %v389_v8, 15  ;;  %v15163_v8 = vmov 0 }
 0x3f4   : > { %v15146_v50 = vsel %vm11296_vm14, 4294967295, %v15145_v50 }
 0x3f5   : > { %15147 = vst [vmem:[#allocation60_spill] sm:$0xff] %v15146_v50  ;;  %v15166_v50 = vmov 0 }
 0x41a   : > { %v3306_v45 = vpop.xlane.xlu0 %3305 }
 0x41b   : > { %3400 = vst.msk [vmem:[#allocation4 + $0x10] sm:$0xff] %vm15027_vm2, %v3306_v45 }
 0x41e   : > { %v3312_v16 = vpop.xlane.xlu0 %3311 }
 0x41f   : > { %3402 = vst.msk [vmem:[#allocation4 + $0x20] sm:$0xff] %vm15027_vm2, %v3312_v16 }
 0x422   : > { %v3315_v12 = vpop.xlane.xlu0 %3314  ;;  %v3432_v10 = vld [vmem:[#allocation4 + $0xf] sm:$0xff] }
 0x423   : > { %3403 = vst.msk [vmem:[#allocation4 + $0x28] sm:$0xff] %vm15027_vm2, %v3315_v12  ;;  %v3309_v17 = vpop.xlane.xlu1 %3308  ;;  %v3464_v49 = vsel %vm11274_vm9, 0.0, %v3432_v10  ;;  %v387_v10 = vand.u32 15, %v355_v3 }
 0x424   : > { %3401 = vst.msk [vmem:[#allocation4 + $0x18] sm:$0xff] %vm15027_vm2, %v3309_v17  ;;  %v3560_v48 = vadd.f32 %v3464_v49, %v3306_v45  ;;  %v360_v49 = vadd.s32 80, %v11263_v42 }
 0x425   : > { %vm11330_vm11 = vcmp.eq.s32.totalorder %v387_v10, 15 }
 0x426   : > { %v11281_v27 = vpop.xlane.xlu0 %3320  ;;  %v15155_v28 = vsel %vm11330_vm11, 4294967295, %v15154_v28 }
 0x427   : > { %3405 = vst.msk [vmem:[#allocation4 + $0x38] sm:$0xff] %vm15027_vm2, %v11281_v27  ;;  %v3318_v30 = vpop.xlane.xlu1 %3317  ;;  %15156 = vst [vmem:[#allocation63_spill] sm:$0xff] %v15155_v28 }
 0x428   : > { %3404 = vst.msk [vmem:[#allocation4 + $0x30] sm:$0xff] %vm15027_vm2, %v3318_v30 }
 0x42a   : > { %v11300_v35 = vpop.xlane.xlu0 %3326  ;;  %v3435_v45 = vld [vmem:[#allocation4 + $0x27] sm:$0xff] }
 0x42b   : > { %v3433_v19 = vld [vmem:[#allocation4 + $0x17] sm:$0xff]  ;;  %v3434_v32 = vld [vmem:[#allocation4 + $0x1f] sm:$0xff]  ;;  %3407 = vst.msk [vmem:[#allocation4 + $0x48] sm:$0xff] %vm15027_vm2, %v11300_v35  ;;  %v11311_v38 = vpop.xlane.xlu1 %3323 }
 0x42c   : > { %v3496_v1 = vld [vmem:[#allocation4 + $0x11] sm:$0xff]  ;;  %v3466_v3 = vsel %vm11287_vm1, 0.0, %v3434_v32  ;;  %v3497_v33 = vld [vmem:[#allocation4 + $0x19] sm:$0xff]  ;;  %v3561_v63 = vadd.f32 %v3433_v19, %v3309_v17  ;;  %3406 = vst.msk [vmem:[#allocation4 + $0x40] sm:$0xff] %vm15027_vm2, %v11311_v38  ;;  %v3498_v17 = vld [vmem:[#allocation4 + $0x21] sm:$0xff] }
 0x42d   : > { %v11322_v0 = vadd.f32 %v3560_v48, %v3496_v1  ;;  %v3529_v26 = vsel %vm11292_vm15, 0.0, %v3497_v33  ;;  %v3562_v18 = vadd.f32 %v3466_v3, %v3312_v16  ;;  %v390_v48 = vand.u32 15, %v358_v47 }
 0x42e   : > { %v11334_v19 = vadd.f32 %v3561_v63, %v3529_v26  ;;  %v11336_v32 = vpop.xlane.xlu0 %3332  ;;  %v391_v1 = vand.u32 15, %v359_v34  ;;  %v3563_v33 = vadd.f32 %v3435_v45, %v3315_v12  ;;  %v392_v26 = vand.u32 15, %v360_v49 }
 0x42f   : > { %3624 = vst.msk [vmem:[#allocation4 + $0x10] sm:$0xff] %vm15027_vm2, %v11322_v0  ;;  %v11340_v16 = vadd.f32 %v3562_v18, %v3498_v17  ;;  %v3436_v37 = vld [vmem:[#allocation4 + $0x2f] sm:$0xff]  ;;  %3409 = vst.msk [vmem:[#allocation4 + $0x58] sm:$0xff] %vm15027_vm2, %v11336_v32  ;;  %v11344_v10 = vpop.xlane.xlu1 %3329  ;;  %v393_v63 = vand.u32 15, %v11315_v20  ;;  %v3437_v34 = vld [vmem:[#allocation4 + $0x37] sm:$0xff]  ;;  %v394_v12 = vand.u32 15, %v362_v53 }
 0x430   : > { %v3499_v3 = vld [vmem:[#allocation4 + $0x29] sm:$0xff]  ;;  %3625 = vst.msk [vmem:[#allocation4 + $0x18] sm:$0xff] %vm15027_vm2, %v11334_v19  ;;  %v3468_v51 = vsel %vm11296_vm14, 0.0, %v3436_v37  ;;  %3408 = vst.msk [vmem:[#allocation4 + $0x50] sm:$0xff] %vm15027_vm2, %v11344_v10  ;;  %v11356_v47 = vadd.s32 104, %v11263_v42  ;;  %v364_v45 = vadd.s32 112, %v11263_v42 }
 0x431   : > { %v3531_v18 = vsel %vm11305_vm13, 0.0, %v3499_v3  ;;  %3626 = vst.msk [vmem:[#allocation4 + $0x20] sm:$0xff] %vm15027_vm2, %v11340_v16  ;;  %v3564_v49 = vadd.f32 %v3468_v51, %v3318_v30  ;;  %v11364_v17 = vadd.s32 120, %v11263_v42  ;;  %v3500_v37 = vld [vmem:[#allocation4 + $0x31] sm:$0xff]  ;;  %vm11366_vm7 = vcmp.eq.s32.totalorder %v390_v48, 0 }
 0x432   : > { %v11360_v20 = vadd.f32 %v3563_v33, %v3531_v18  ;;  %v15157_v3 = vmov 0  ;;  %v15160_v53 = vmov 0  ;;  %v11374_v6 = vpop.xlane.xlu0 %3338  ;;  %v11377_v30 = vadd.s32 128, %v11263_v42 }
 0x433   : > { %v15158_v3 = vsel %vm11366_vm7, 4294967295, %v15157_v3  ;;  %v15161_v53 = vsel %vm11370_vm6, 4294967295, %v15160_v53  ;;  %v3565_v33 = vadd.f32 %v3437_v34, %v11281_v27  ;;  %v11380_v51 = vadd.f32 %v3564_v49, %v3500_v37  ;;  %v3438_v48 = vld [vmem:[#allocation4 + $0x3f] sm:$0xff]  ;;  %3411 = vst.msk [vmem:[#allocation4 + $0x68] sm:$0xff] %vm15027_vm2, %v11374_v6  ;;  %v11394_v2 = vpop.xlane.xlu1 %3335  ;;  %v3439_v34 = vld [vmem:[#allocation4 + $0x47] sm:$0xff] }
 0x434   : > { %15159 = vst [vmem:[#allocation64_spill] sm:$0xff] %v15158_v3  ;;  %15162 = vst [vmem:[#allocation65_spill] sm:$0xff] %v15161_v53  ;;  %v3501_v18 = vld [vmem:[#allocation4 + $0x39] sm:$0xff]  ;;  %vm11386_vm5 = vcmp.eq.s32.totalorder %v392_v26, 0  ;;  %vm11390_vm4 = vcmp.eq.s32.totalorder %v391_v1, 15  ;;  %v3470_v49 = vsel %vm11326_vm12, 0.0, %v3438_v48 }
 0x435   : > { %3627 = vst.msk [vmem:[#allocation4 + $0x28] sm:$0xff] %vm15027_vm2, %v11360_v20  ;;  %v15164_v8 = vsel %vm11386_vm5, 4294967295, %v15163_v8  ;;  %v15167_v50 = vsel %vm11390_vm4, 4294967295, %v15166_v50  ;;  %v3656_v27 = vld [vmem:[#allocation4] sm:$0xff]  ;;  %v3533_v60 = vsel %vm11330_vm11, 0.0, %v3501_v18  ;;  %3410 = vst.msk [vmem:[#allocation4 + $0x60] sm:$0xff] %vm15027_vm2, %v11394_v2  ;;  %v3566_v46 = vadd.f32 %v3470_v49, %v11311_v38 }
 0x436   : > { %15165 = vst [vmem:[#allocation66_spill] sm:$0xff] %v15164_v8  ;;  %15168 = vst [vmem:[#allocation67_spill] sm:$0xff] %v15167_v50  ;;  %v3502_v37 = vld [vmem:[#allocation4 + $0x41] sm:$0xff]  ;;  %v395_v26 = vand.u32 15, %v11356_v47  ;;  %v11404_v1 = vadd.s32 136, %v11263_v42  ;;  %v11409_v13 = vadd.f32 %v3565_v33, %v3533_v60  ;;  %vm11411_vm0 = vcmp.eq.s32.totalorder %v394_v12, 0  ;;  %v11420_v57 = vpop.xlane.xlu0 %3344 }
 0x437   : > { %3628 = vst.msk [vmem:[#allocation4 + $0x30] sm:$0xff] %vm15027_vm2, %v11380_v51  ;;  %v15169_v48 = vmov 0  ;;  %vm11415_vm8 = vcmp.eq.s32.totalorder %v393_v63, 15  ;;  %v15172_v18 = vmov 0  ;;  %v396_v47 = vand.u32 15, %v364_v45  ;;  %v3440_v45 = vld [vmem:[#allocation4 + $0x4f] sm:$0xff] }
 0x438   : > { %v15170_v48 = vsel %vm11411_vm0, 4294967295, %v15169_v48  ;;  %v15173_v18 = vsel %vm11415_vm8, 4294967295, %v15172_v18  ;;  %v397_v28 = vand.u32 15, %v11364_v17  ;;  %v398_v54 = vand.u32 15, %v11377_v30  ;;  %3629 = vst.msk [vmem:[#allocation4 + $0x38] sm:$0xff] %vm15027_vm2, %v11409_v13  ;;  %v3441_v17 = vld [vmem:[#allocation4 + $0x57] sm:$0xff]  ;;  %v11439_v30 = vpop.xlane.xlu1 %3341 }
 0x439   : > { %15171 = vst [vmem:[#allocation68_spill] sm:$0xff] %v15170_v48  ;;  %15174 = vst [vmem:[#allocation69_spill] sm:$0xff] %v15173_v18  ;;  %v11427_v60 = vadd.s32 152, %v11263_v42  ;;  %v11430_v38 = vadd.s32 160, %v11263_v42  ;;  %v3567_v63 = vadd.f32 %v3439_v34, %v11300_v35  ;;  %v11433_v12 = vadd.f32 %v3566_v46, %v3502_v37  ;;  %v3503_v33 = vld [vmem:[#allocation4 + $0x49] sm:$0xff]  ;;  %v3660_v46 = vld [vmem:[#allocation4 + $0x20] sm:$0xff] }
 0x43a   : > { %3413 = vst.msk [vmem:[#allocation4 + $0x78] sm:$0xff] %vm15027_vm2, %v11420_v57  ;;  %v11442_v49 = vadd.s32 168, %v11263_v42  ;;  %v3692_v31 = vadd.f32 %v3656_v27, %v11322_v0  ;;  %v3693_v35 = vadd.f32 %v3657_v56, %v11334_v19  ;;  %v3472_v34 = vsel %vm11366_vm7, 0.0, %v3440_v45  ;;  %v3504_v37 = vld [vmem:[#allocation4 + $0x51] sm:$0xff]  ;;  %3412 = vst.msk [vmem:[#allocation4 + $0x70] sm:$0xff] %vm15027_vm2, %v11439_v30  ;;  %v11467_v3 = vpop.xlane.xlu0 %3350 }
 0x43b   : > { %v3535_v52 = vsel %vm11370_vm6, 0.0, %v3503_v33  ;;  %3630 = vst.msk [vmem:[#allocation4 + $0x40] sm:$0xff] %vm15027_vm2, %v11433_v12  ;;  %v3568_v0 = vadd.f32 %v3472_v34, %v11344_v10  ;;  %v3569_v56 = vadd.f32 %v3441_v17, %v11336_v32  ;;  %vm11459_vm11 = vcmp.eq.s32.totalorder %v396_v47, 0  ;;  %v3658_v53 = vld [vmem:[#allocation4 + $0x10] sm:$0xff]  ;;  %v3659_v14 = vld [vmem:[#allocation4 + $0x18] sm:$0xff]  ;;  %3415 = vst.msk [vmem:[#allocation4 + $0x88] sm:$0xff] %vm15027_vm2, %v11467_v3 }
 0x43c   : > { %v11457_v19 = vadd.f32 %v3567_v63, %v3535_v52  ;;  %v15175_v27 = vmov 0  ;;  %vm11463_vm7 = vcmp.eq.s32.totalorder %v395_v26, 15  ;;  %v15178_v45 = vmov 0  ;;  %v3661_v47 = vld [vmem:[#allocation4 + $0x28] sm:$0xff]  ;;  %v3505_v17 = vld [vmem:[#allocation4 + $0x59] sm:$0xff]  ;;  %v11481_v59 = vpop.xlane.xlu1 %3347 }
 0x43d   : > { %v15176_v27 = vsel %vm11459_vm11, 4294967295, %v15175_v27  ;;  %v15179_v45 = vsel %vm11463_vm7, 4294967295, %v15178_v45  ;;  %v3724_v33 = vadd.f32 %v3692_v31, %v3660_v46  ;;  %v11473_v32 = vadd.s32 176, %v11263_v42  ;;  %v3442_v31 = vld [vmem:[#allocation4 + $0x5f] sm:$0xff]  ;;  %v3443_v26 = vld [vmem:[#allocation4 + $0x67] sm:$0xff]  ;;  %3414 = vst.msk [vmem:[#allocation4 + $0x80] sm:$0xff] %vm15027_vm2, %v11481_v59 }
 0x43e   : > { %15177 = vst [vmem:[#allocation70_spill] sm:$0xff] %v15176_v27  ;;  %15180 = vst [vmem:[#allocation71_spill] sm:$0xff] %v15179_v45  ;;  %v11475_v63 = vadd.f32 %v3568_v0, %v3504_v37  ;;  %v3725_v52 = vadd.f32 %v3693_v35, %v3661_v47  ;;  %v3662_v58 = vld [vmem:[#allocation4 + $0x30] sm:$0xff]  ;;  %v3474_v37 = vsel %vm11386_vm5, 0.0, %v3442_v31  ;;  %v3506_v0 = vld [vmem:[#allocation4 + $0x61] sm:$0xff]  ;;  %v3537_v44 = vsel %vm11390_vm4, 0.0, %v3505_v17 }
 0x43f   : > { %3631 = vst.msk [vmem:[#allocation4 + $0x48] sm:$0xff] %vm15027_vm2, %v11457_v19  ;;  %v3756_v10 = vadd.f32 1e-06, %v3724_v33  ;;  %v3694_v29 = vadd.f32 %v3658_v53, %v11340_v16  ;;  %v3695_v5 = vadd.f32 %v3659_v14, %v11360_v20  ;;  %v3570_v35 = vadd.f32 %v3474_v37, %v11394_v2  ;;  %v11506_v16 = vpop.xlane.xlu0 %3356 }
 0x440   : > { %3632 = vst.msk [vmem:[#allocation4 + $0x50] sm:$0xff] %vm15027_vm2, %v11475_v63  ;;  %v3571_v33 = vadd.f32 %v3443_v26, %v11374_v6  ;;  %v11496_v34 = vadd.f32 %v3569_v56, %v3537_v44  ;;  %vm11498_vm5 = vcmp.eq.s32.totalorder %v398_v54, 0  ;;  %v15181_v31 = vmov 0  ;;  %v3663_v44 = vld [vmem:[#allocation4 + $0x38] sm:$0xff]  ;;  %3417 = vst.msk [vmem:[#allocation4 + $0x98] sm:$0xff] %vm15027_vm2, %v11506_v16  ;;  %v11519_v26 = vpop.xlane.xlu1 %3353 }
 0x441   : > { %v15182_v31 = vsel %vm11498_vm5, 4294967295, %v15181_v31  ;;  %vm11502_vm4 = vcmp.eq.s32.totalorder %v397_v28, 15  ;;  %v15184_v17 = vmov 0  ;;  %9193 = vrsqrt.f32 %v3756_v10  ;;  %v3444_v28 = vld [vmem:[#allocation4 + $0x6f] sm:$0xff]  ;;  %v3445_v56 = vld [vmem:[#allocation4 + $0x77] sm:$0xff]  ;;  %3416 = vst.msk [vmem:[#allocation4 + $0x90] sm:$0xff] %vm15027_vm2, %v11519_v26 }
 0x442   : > { %15183 = vst [vmem:[#allocation72_spill] sm:$0xff] %v15182_v31  ;;  %v15185_v17 = vsel %vm11502_vm4, 4294967295, %v15184_v17  ;;  %v3757_v20 = vadd.f32 1e-06, %v3725_v52  ;;  %v11510_v2 = vadd.s32 184, %v11263_v42  ;;  %v3726_v6 = vadd.f32 %v3694_v29, %v3662_v58  ;;  %3633 = vst.msk [vmem:[#allocation4 + $0x58] sm:$0xff] %vm15027_vm2, %v11496_v34 }
 0x443   : > { %15186 = vst [vmem:[#allocation73_spill] sm:$0xff] %v15185_v17  ;;  %v3696_v54 = vadd.f32 %v3660_v46, %v11380_v51  ;;  %v11513_v53 = vadd.f32 %v3570_v35, %v3506_v0  ;;  %v3507_v10 = vld [vmem:[#allocation4 + $0x69] sm:$0xff]  ;;  %v11522_v52 = vadd.s32 192, %v11263_v42  ;;  %v3727_v29 = vadd.f32 %v3695_v5, %v3663_v44  ;;  %v11524_v37 = vld [vmem:[#allocation4 + $0x40] sm:$0xff]  ;;  %v3508_v46 = vld [vmem:[#allocation4 + $0x71] sm:$0xff] }
 0x444   : > { %v3476_v51 = vsel %vm11411_vm0, 0.0, %v3444_v28  ;;  %v3539_v0 = vsel %vm11415_vm8, 0.0, %v3507_v10  ;;  %9195 = vrsqrt.f32 %v3757_v20  ;;  %v3697_v35 = vadd.f32 %v3661_v47, %v11409_v13  ;;  %v11549_v47 = vpop.xlane.xlu0 %3362  ;;  %v3510_v48 = vld [vmem:[#allocation4 + $0x81] sm:$0xff] }
 0x445   : > { %3634 = vst.msk [vmem:[#allocation4 + $0x60] sm:$0xff] %vm15027_vm2, %v11513_v53  ;;  %v3572_v5 = vadd.f32 %v3476_v51, %v11439_v30  ;;  %v3573_v14 = vadd.f32 %v3445_v56, %v11420_v57  ;;  %v11537_v50 = vadd.f32 %v3571_v33, %v3539_v0  ;;  %vm11539_vm0 = vcmp.eq.s32.totalorder %v400_v21, 0  ;;  %v3509_v51 = vld [vmem:[#allocation4 + $0x79] sm:$0xff]  ;;  %3419 = vst.msk [vmem:[#allocation4 + $0xa8] sm:$0xff] %vm15027_vm2, %v11549_v47  ;;  %v11566_v0 = vpop.xlane.xlu1 %3359 }
 0x446   : > { %v15187_v28 = vmov 0  ;;  %v15190_v10 = vand.u32 15, %v11404_v1  ;;  %v15191_v18 = vmov 0  ;;  %v3758_v13 = vadd.f32 1e-06, %v3726_v6  ;;  %v11558_v33 = vld [vmem:[#allocation4 + $0x48] sm:$0xff] }
 0x447   : > { %v15188_v28 = vsel %vm11539_vm0, 4294967295, %v15187_v28  ;;  %v11552_v20 = vadd.s32 200, %v11263_v42  ;;  %v11555_v57 = vadd.s32 208, %v11263_v42  ;;  %v3759_v30 = vadd.f32 1e-06, %v3727_v29  ;;  %3635 = vst.msk [vmem:[#allocation4 + $0x68] sm:$0xff] %vm15027_vm2, %v11537_v50 }
 0x448   : > { %15189 = vst [vmem:[#allocation74_spill] sm:$0xff] %v15188_v28  ;;  %vm11545_vm8 = vcmp.eq.s32.totalorder %v15190_v10, 15  ;;  %v3728_v21 = vadd.f32 %v3696_v54, %v11524_v37  ;;  %v11560_v56 = vadd.f32 %v3572_v5, %v3508_v46  ;;  %v3446_v1 = vld [vmem:[#allocation4 + $0x7f] sm:$0xff]  ;;  %v3447_v6 = vld [vmem:[#allocation4 + $0x87] sm:$0xff]  ;;  %9197 = vrsqrt.f32 %v3758_v13  ;;  %v3666_v5 = vld [vmem:[#allocation4 + $0x50] sm:$0xff] }
 0x449   : > { %v15192_v18 = vsel %vm11545_vm8, 4294967295, %v15191_v18  ;;  %v11569_v29 = vadd.s32 216, %v11263_v42  ;;  %v3729_v54 = vadd.f32 %v3697_v35, %v11558_v33  ;;  %v3698_v46 = vadd.f32 %v3662_v58, %v11433_v12  ;;  %3418 = vst.msk [vmem:[#allocation4 + $0xa0] sm:$0xff] %vm15027_vm2, %v11566_v0 }
 0x44a   : > { %15193 = vst [vmem:[#allocation75_spill] sm:$0xff] %v15192_v18  ;;  %v3478_v10 = vsel %vm11459_vm11, 0.0, %v3446_v1  ;;  %v3541_v8 = vsel %vm11463_vm7, 0.0, %v3509_v51  ;;  %v3575_v39 = vadd.f32 %v3447_v6, %v11467_v3  ;;  %3636 = vst.msk [vmem:[#allocation4 + $0x70] sm:$0xff] %vm15027_vm2, %v11560_v56  ;;  %v15194_v58 = vand.u32 15, %v11430_v38  ;;  %v11597_v51 = vpop.xlane.xlu0 %3368  ;;  %v11602_v38 = vld [vmem:[#allocation4 + $0x58] sm:$0xff] }
 0x44b   : > { %v3574_v35 = vadd.f32 %v3478_v10, %v11481_v59  ;;  %v11583_v13 = vadd.f32 %v3573_v14, %v3541_v8  ;;  %v15195_v12 = vmov 0  ;;  %v15198_v1 = vand.u32 15, %v11427_v60  ;;  %v3448_v60 = vld [vmem:[#allocation4 + $0x8f] sm:$0xff]  ;;  %3421 = vst.msk [vmem:[#allocation4 + $0xb8] sm:$0xff] %vm15027_vm2, %v11597_v51 }
 0x44c   : > { %vm11587_vm6 = vcmp.eq.s32.totalorder %v15194_v58, 0  ;;  %v15199_v3 = vmov 0  ;;  %9199 = vrsqrt.f32 %v3759_v30  ;;  %v3760_v6 = vadd.f32 1e-06, %v3728_v21  ;;  %v3511_v30 = vld [vmem:[#allocation4 + $0x89] sm:$0xff]  ;;  %v11611_v21 = vpop.xlane.xlu1 %3365  ;;  %v3668_v31 = vld [vmem:[#allocation4 + $0x60] sm:$0xff] }
 0x44d   : > { %v15196_v12 = vsel %vm11587_vm6, 4294967295, %v15195_v12  ;;  %vm11593_vm7 = vcmp.eq.s32.totalorder %v15198_v1, 15  ;;  %v11600_v59 = vadd.s32 224, %v11263_v42  ;;  %v3761_v8 = vadd.f32 1e-06, %v3729_v54  ;;  %3637 = vst.msk [vmem:[#allocation4 + $0x78] sm:$0xff] %vm15027_vm2, %v11583_v13 }
 0x44e   : > { %15197 = vst [vmem:[#allocation76_spill] sm:$0xff] %v15196_v12  ;;  %v15200_v3 = vsel %vm11593_vm7, 4294967295, %v15199_v3  ;;  %v3730_v14 = vadd.f32 %v3698_v46, %v3666_v5  ;;  %v3699_v10 = vadd.f32 %v3663_v44, %v11457_v19  ;;  %v11605_v58 = vadd.f32 %v3574_v35, %v3510_v48  ;;  %v3449_v1 = vld [vmem:[#allocation4 + $0x97] sm:$0xff]  ;;  %3420 = vst.msk [vmem:[#allocation4 + $0xb0] sm:$0xff] %vm15027_vm2, %v11611_v21 }
 0x44f   : > { %15201 = vst [vmem:[#allocation77_spill] sm:$0xff] %v15200_v3  ;;  %v405_v54 = vand.u32 15, %v11510_v2  ;;  %v406_v46 = vand.u32 15, %v11522_v52  ;;  %v3480_v48 = vsel %vm11498_vm5, 0.0, %v3448_v60  ;;  %v3512_v19 = vld [vmem:[#allocation4 + $0x91] sm:$0xff]  ;;  %v3543_v44 = vsel %vm11502_vm4, 0.0, %v3511_v30 }
 0x450   : > { %v3731_v27 = vadd.f32 %v3699_v10, %v11602_v38  ;;  %3638 = vst.msk [vmem:[#allocation4 + $0x80] sm:$0xff] %vm15027_vm2, %v11605_v58  ;;  %v3576_v2 = vadd.f32 %v3480_v48, %v11519_v26  ;;  %v3577_v52 = vadd.f32 %v3449_v1, %v11506_v16  ;;  %v11628_v45 = vadd.f32 %v3575_v39, %v3543_v44  ;;  %v9194_v10 = vpop.eup %9193  ;;  %v11642_v26 = vpop.xlane.xlu0 %3374 }
 0x451   : > { %v15202_v60 = vand.u32 15, %v11473_v32  ;;  %v15203_v30 = vmov 0  ;;  %v15206_v17 = vand.u32 15, %v11442_v49  ;;  %v15207_v35 = vmov 0  ;;  %v3450_v49 = vld [vmem:[#allocation4 + $0x9f] sm:$0xff]  ;;  %3423 = vst.msk [vmem:[#allocation4 + $0xc8] sm:$0xff] %vm15027_vm2, %v11642_v26  ;;  %v11653_v44 = vpop.xlane.xlu1 %3371 }
 0x452   : > { %9201 = vrsqrt.f32 %v3760_v6  ;;  %v3762_v32 = vadd.f32 1e-06, %v3730_v14  ;;  %v3702_v1 = vadd.f32 %v3666_v5, %v11513_v53  ;;  %v11647_v48 = vadd.f32 %v3576_v2, %v3512_v19  ;;  %3639 = vst.msk [vmem:[#allocation4 + $0x88] sm:$0xff] %vm15027_vm2, %v11628_v45  ;;  %v3513_v6 = vld [vmem:[#allocation4 + $0x99] sm:$0xff]  ;;  %v11660_v5 = vld [vmem:[#allocation4 + $0x70] sm:$0xff]  ;;  %v3514_v14 = vld [vmem:[#allocation4 + $0xa1] sm:$0xff] }
 0x453   : > { %vm11632_vm5 = vcmp.eq.s32.totalorder %v15202_v60, 0  ;;  %vm11638_vm4 = vcmp.eq.s32.totalorder %v15206_v17, 15  ;;  %9203 = vrsqrt.f32 %v3761_v8  ;;  %v3451_v17 = vld [vmem:[#allocation4 + $0xa7] sm:$0xff]  ;;  %v3820_v60 = vmul.f32 11.785113, %v9194_v10  ;;  %3422 = vst.msk [vmem:[#allocation4 + $0xc0] sm:$0xff] %vm15027_vm2, %v11653_v44  ;;  %v9196_v10 = vpop.eup %9195 }
 0x454   : > { %v15204_v30 = vsel %vm11632_vm5, 4294967295, %v15203_v30  ;;  %v15208_v35 = vsel %vm11638_vm4, 4294967295, %v15207_v35  ;;  %v11656_v39 = vadd.s32 232, %v11263_v42  ;;  %v3700_v53 = vadd.f32 %v11524_v37, %v11475_v63  ;;  %3640 = vst.msk [vmem:[#allocation4 + $0x90] sm:$0xff] %vm15027_vm2, %v11647_v48  ;;  %v11683_v18 = vpop.xlane.xlu0 %3380 }
 0x455   : > { %15205 = vst [vmem:[#allocation78_spill] sm:$0xff] %v15204_v30  ;;  %15209 = vst [vmem:[#allocation79_spill] sm:$0xff] %v15208_v35  ;;  %v3482_v8 = vsel %vm11539_vm0, 0.0, %v3450_v49  ;;  %v3545_v19 = vsel %vm11545_vm8, 0.0, %v3513_v6  ;;  %v3763_v2 = vadd.f32 1e-06, %v3731_v27  ;;  %v3579_v63 = vadd.f32 %v3451_v17, %v11549_v47  ;;  %3918 = vperm.xlu1 %9150, %v3820_v60   ;;  %v11699_v60 = vpop.xlane.xlu1 %3377 }
 0x456   : > { %v3578_v16 = vadd.f32 %v3482_v8, %v11566_v0  ;;  %v11672_v37 = vadd.f32 %v3577_v52, %v3545_v19  ;;  %vm11674_vm0 = vcmp.eq.s32.totalorder %v406_v46, 0  ;;  %v15210_v49 = vmov 0  ;;  %v11691_v46 = vld [vmem:[#allocation4 + $0x68] sm:$0xff]  ;;  %v3453_v17 = vld [vmem:[#allocation4 + $0xb7] sm:$0xff]  ;;  %3425 = vst.msk [vmem:[#allocation4 + $0xd8] sm:$0xff] %vm15027_vm2, %v11683_v18  ;;  %3424 = vst.msk [vmem:[#allocation4 + $0xd0] sm:$0xff] %vm15027_vm2, %v11699_v60 }
 0x457   : > { %v15211_v49 = vsel %vm11674_vm0, 4294967295, %v15210_v49  ;;  %vm11678_vm8 = vcmp.eq.s32.totalorder %v405_v54, 15  ;;  %v15213_v6 = vmov 0  ;;  %v3734_v27 = vadd.f32 %v3702_v1, %v11660_v5  ;;  %v3452_v54 = vld [vmem:[#allocation4 + $0xaf] sm:$0xff] }
 0x458   : > { %15212 = vst [vmem:[#allocation80_spill] sm:$0xff] %v15211_v49  ;;  %v15214_v6 = vsel %vm11678_vm8, 4294967295, %v15213_v6  ;;  %v3821_v28 = vmul.f32 11.785113, %v9196_v10  ;;  %v11686_v0 = vadd.s32 248, %v11263_v42  ;;  %v11689_v47 = vadd.s32 240, %v11263_v42 }
 0x459   : > { %15215 = vst [vmem:[#allocation81_spill] sm:$0xff] %v15214_v6  ;;  %9205 = vrsqrt.f32 %v3762_v32  ;;  %v11693_v52 = vadd.f32 %v3578_v16, %v3514_v14  ;;  %3641 = vst.msk [vmem:[#allocation4 + $0x98] sm:$0xff] %vm15027_vm2, %v11672_v37  ;;  %v3515_v1 = vld [vmem:[#allocation4 + $0xa9] sm:$0xff]  ;;  %v3766_v8 = vadd.f32 1e-06, %v3734_v27  ;;  %v3732_v19 = vadd.f32 %v3700_v53, %v3668_v31  ;;  %v9198_v32 = vpop.eup %9197  ;;  %v11704_v14 = vld [vmem:[#allocation4 + $0x80] sm:$0xff] }
 0x45a   : > { %v3701_v42 = vadd.f32 %v11558_v33, %v11496_v34  ;;  %v3704_v16 = vadd.f32 %v3668_v31, %v11560_v56  ;;  %v3484_v10 = vsel %vm11587_vm6, 0.0, %v3452_v54  ;;  %v3516_v23 = vld [vmem:[#allocation4 + $0xb1] sm:$0xff]  ;;  %v3547_v55 = vsel %vm11593_vm7, 0.0, %v3515_v1  ;;  %3923 = vperm.xlu0 %9151, %v3821_v28   ;;  %v9200_v54 = vpop.eup %9199  ;;  %v11730_v1 = vpop.xlane.xlu0 %3386 }
 0x45b   : > { %9207 = vrsqrt.f32 %v3763_v2  ;;  %3642 = vst.msk [vmem:[#allocation4 + $0xa0] sm:$0xff] %vm15027_vm2, %v11693_v52  ;;  %v3580_v34 = vadd.f32 %v3484_v10, %v11611_v21  ;;  %v3581_v31 = vadd.f32 %v3453_v17, %v11597_v51  ;;  %v11716_v33 = vadd.f32 %v3579_v63, %v3547_v55  ;;  %v11735_v21 = vld [vmem:[#allocation4 + $0x78] sm:$0xff]  ;;  %v3455_v17 = vld [vmem:[#allocation4 + $0xc7] sm:$0xff]  ;;  %3427 = vst.msk [vmem:[#allocation4 + $0xe8] sm:$0xff] %vm15027_vm2, %v11730_v1 }
 0x45c   : > { %v3822_v56 = vmul.f32 11.785113, %v9198_v32  ;;  %v15216_v53 = vand.u32 15, %v11555_v57  ;;  %v15217_v27 = vmov 0  ;;  %v15220_v28 = vand.u32 15, %v11552_v20  ;;  %v3454_v20 = vld [vmem:[#allocation4 + $0xbf] sm:$0xff] }
 0x45d   : > { %v15221_v2 = vmov 0  ;;  %v411_v51 = vand.u32 15, %v11656_v39  ;;  %9209 = vrsqrt.f32 %v3766_v8  ;;  %v3736_v55 = vadd.f32 %v3704_v16, %v11704_v14  ;;  %3643 = vst.msk [vmem:[#allocation4 + $0xa8] sm:$0xff] %vm15027_vm2, %v11716_v33  ;;  %v3517_v32 = vld [vmem:[#allocation4 + $0xb9] sm:$0xff]  ;;  %v11743_v39 = vpop.xlane.xlu1 %3383  ;;  %v3674_v10 = vld [vmem:[#allocation4 + $0x90] sm:$0xff] }
 0x45e   : > { %vm11720_vm6 = vcmp.eq.s32.totalorder %v15216_v53, 0  ;;  %vm11726_vm7 = vcmp.eq.s32.totalorder %v15220_v28, 15  ;;  %v3733_v57 = vadd.f32 %v3701_v42, %v11691_v46  ;;  %v11737_v63 = vadd.f32 %v3580_v34, %v3516_v23  ;;  %3928 = vperm.xlu1 %9150, %v3822_v56   ;;  %v3518_v53 = vld [vmem:[#allocation4 + $0xc1] sm:$0xff]  ;;  %3426 = vst.msk [vmem:[#allocation4 + $0xe0] sm:$0xff] %vm15027_vm2, %v11743_v39  ;;  %v11774_v35 = vpop.xlane.xlu0 %3392 }
 0x45f   : > { %v15218_v27 = vsel %vm11720_vm6, 4294967295, %v15217_v27  ;;  %v15222_v2 = vsel %vm11726_vm7, 4294967295, %v15221_v2  ;;  %v412_v8 = vand.u32 15, %v11689_v47  ;;  %v3764_v16 = vadd.f32 1e-06, %v3732_v19  ;;  %3429 = vst.msk [vmem:[#allocation4 + $0xf8] sm:$0xff] %vm15027_vm2, %v11774_v35 }
 0x460   : > { %15219 = vst [vmem:[#allocation82_spill] sm:$0xff] %v15218_v27  ;;  %15223 = vst [vmem:[#allocation83_spill] sm:$0xff] %v15222_v2  ;;  %v3703_v42 = vadd.f32 %v11602_v38, %v11537_v50  ;;  %v3706_v23 = vadd.f32 %v11660_v5, %v11605_v58  ;;  %v3486_v34 = vsel %vm11632_vm5, 0.0, %v3454_v20  ;;  %v3549_v56 = vsel %vm11638_vm4, 0.0, %v3517_v32  ;;  %v9202_v32 = vpop.eup %9201 }
 0x461   : > { %v3768_v28 = vadd.f32 1e-06, %v3736_v55  ;;  %3644 = vst.msk [vmem:[#allocation4 + $0xb0] sm:$0xff] %vm15027_vm2, %v11737_v63  ;;  %v3582_v50 = vadd.f32 %v3486_v34, %v11653_v44  ;;  %v3583_v38 = vadd.f32 %v3455_v17, %v11642_v26  ;;  %v11760_v58 = vadd.f32 %v3581_v31, %v3549_v56  ;;  %v3457_v34 = vld [vmem:[#allocation4 + $0xd7] sm:$0xff]  ;;  %v3519_v56 = vld [vmem:[#allocation4 + $0xc9] sm:$0xff] }
 0x462   : > { %v3823_v5 = vmul.f32 11.785113, %v9200_v54  ;;  %v15224_v47 = vand.u32 15, %v11600_v59  ;;  %v15225_v19 = vmov 0  ;;  %v15228_v20 = vand.u32 15, %v11569_v29  ;;  %v11777_v54 = vld [vmem:[#allocation4 + $0x88] sm:$0xff]  ;;  %v9204_v59 = vpop.eup %9203 }
 0x463   : > { %v15229_v55 = vmov 0  ;;  %9211 = vrsqrt.f32 %v3768_v28  ;;  %v3738_v44 = vadd.f32 %v3706_v23, %v3674_v10  ;;  %v3765_v31 = vadd.f32 1e-06, %v3733_v57  ;;  %3645 = vst.msk [vmem:[#allocation4 + $0xb8] sm:$0xff] %vm15027_vm2, %v11760_v58  ;;  %v3456_v29 = vld [vmem:[#allocation4 + $0xcf] sm:$0xff]  ;;  %v3676_v28 = vld [vmem:[#allocation4 + $0xa0] sm:$0xff] }
 0x464   : > { %vm11764_vm5 = vcmp.eq.s32.totalorder %v15224_v47, 0  ;;  %vm11770_vm4 = vcmp.eq.s32.totalorder %v15228_v20, 15  ;;  %v11779_v17 = vadd.f32 %v3582_v50, %v3518_v53  ;;  %3933 = vperm.xlu1 %9150, %v3823_v5   ;;  %v11785_v47 = vpop.xlane.xlu1 %3389  ;;  %9213 = vrsqrt.f32 %v3764_v16  ;;  %v3520_v20 = vld [vmem:[#allocation4 + $0xd1] sm:$0xff] }
 0x465   : > { %v15226_v19 = vsel %vm11764_vm5, 4294967295, %v15225_v19  ;;  %v15230_v55 = vsel %vm11770_vm4, 4294967295, %v15229_v55  ;;  %v3735_v57 = vadd.f32 %v3703_v42, %v11735_v21  ;;  %v3705_v23 = vadd.f32 %v11691_v46, %v11583_v13  ;;  %3428 = vst.msk [vmem:[#allocation4 + $0xf0] sm:$0xff] %vm15027_vm2, %v11785_v47 }
 0x466   : > { %15227 = vst [vmem:[#allocation84_spill] sm:$0xff] %v15226_v19  ;;  %15231 = vst [vmem:[#allocation85_spill] sm:$0xff] %v15230_v55  ;;  %v3708_v53 = vadd.f32 %v11704_v14, %v11647_v48  ;;  %v3488_v50 = vsel %vm11674_vm0, 0.0, %v3456_v29  ;;  %v3551_v5 = vsel %vm11678_vm8, 0.0, %v3519_v56  ;;  %v3770_v16 = vadd.f32 1e-06, %v3738_v44  ;;  %v11812_v56 = vpop.xlane.xlu0 %3398 }
 0x467   : > { %3646 = vst.msk [vmem:[#allocation4 + $0xc0] sm:$0xff] %vm15027_vm2, %v11779_v17  ;;  %v3584_v13 = vadd.f32 %v3488_v50, %v11699_v60  ;;  %v3585_v46 = vadd.f32 %v3457_v34, %v11683_v18  ;;  %v11802_v48 = vadd.f32 %v3583_v38, %v3551_v5  ;;  %v3824_v14 = vmul.f32 11.785113, %v9202_v32  ;;  %v11815_v50 = vld [vmem:[#allocation4 + $0x98] sm:$0xff]  ;;  %v9206_v18 = vpop.eup %9205  ;;  %v3459_v32 = vld [vmem:[#allocation4 + $0xe7] sm:$0xff]  ;;  %3431 = vst.msk [vmem:[#allocation4 + $0x108] sm:$0xff] %vm15027_vm2, %v11812_v56 }
 0x468   : > { %vm11804_vm11 = vcmp.eq.s32.totalorder %v412_v8, 0  ;;  %v15232_v42 = vmov 0  ;;  %vm11808_vm0 = vcmp.eq.s32.totalorder %v411_v51, 15  ;;  %v15235_v29 = vmov 0  ;;  %v3458_v51 = vld [vmem:[#allocation4 + $0xdf] sm:$0xff] }
 0x469   : > { %v15233_v42 = vsel %vm11804_vm11, 4294967295, %v15232_v42  ;;  %v15236_v29 = vsel %vm11808_vm0, 4294967295, %v15235_v29  ;;  %v3825_v44 = vmul.f32 11.785113, %v9204_v59  ;;  %9215 = vrsqrt.f32 %v3770_v16  ;;  %3647 = vst.msk [vmem:[#allocation4 + $0xc8] sm:$0xff] %vm15027_vm2, %v11802_v48  ;;  %v3521_v34 = vld [vmem:[#allocation4 + $0xd9] sm:$0xff]  ;;  %3938 = vperm.xlu1 %9150, %v3824_v14   ;;  %v11824_v59 = vpop.xlane.xlu1 %3395 }
 0x46a   : > { %15234 = vst [vmem:[#allocation86_spill] sm:$0xff] %v15233_v42  ;;  %15237 = vst [vmem:[#allocation87_spill] sm:$0xff] %v15236_v29  ;;  %v3740_v26 = vadd.f32 %v3708_v53, %v3676_v28  ;;  %v3737_v60 = vadd.f32 %v3705_v23, %v11777_v54  ;;  %v3710_v38 = vadd.f32 %v3674_v10, %v11693_v52  ;;  %9217 = vrsqrt.f32 %v3765_v31  ;;  %v3678_v53 = vld [vmem:[#allocation4 + $0xb0] sm:$0xff]  ;;  %v3522_v10 = vld [vmem:[#allocation4 + $0xe1] sm:$0xff] }
 0x46b   : > { %v11818_v8 = vadd.f32 %v3584_v13, %v3520_v20  ;;  %v3767_v23 = vadd.f32 1e-06, %v3735_v57  ;;  %v3490_v52 = vsel %vm11720_vm6, 0.0, %v3458_v51  ;;  %v3553_v20 = vsel %vm11726_vm7, 0.0, %v3521_v34  ;;  %3430 = vst.msk [vmem:[#allocation4 + $0x100] sm:$0xff] %vm15027_vm2, %v11824_v59  ;;  %v9208_v13 = vpop.eup %9207 }
 0x46c   : > { %v3772_v5 = vadd.f32 1e-06, %v3740_v26  ;;  %v3707_v16 = vadd.f32 %v11735_v21, %v11628_v45  ;;  %v3586_v31 = vadd.f32 %v3490_v52, %v11743_v39  ;;  %v3587_v57 = vadd.f32 %v3459_v32, %v11730_v1  ;;  %v11841_v26 = vld [vmem:[#allocation4 + $0xa8] sm:$0xff]  ;;  %v9210_v6 = vpop.eup %9209  ;;  %v3461_v39 = vld [vmem:[#allocation4 + $0xf7] sm:$0xff] }
 0x46d   : > { %3648 = vst.msk [vmem:[#allocation4 + $0xd0] sm:$0xff] %vm15027_vm2, %v11818_v8  ;;  %v11838_v14 = vadd.f32 %v3585_v46, %v3553_v20  ;;  %v3742_v51 = vadd.f32 %v3710_v38, %v3678_v53  ;;  %v3826_v2 = vmul.f32 11.785113, %v9206_v18  ;;  %v3769_v34 = vadd.f32 1e-06, %v3737_v60  ;;  %v3460_v21 = vld [vmem:[#allocation4 + $0xef] sm:$0xff]  ;;  %3943 = vperm.xlu1 %9150, %v3825_v44  }
 0x46e   : > { %9219 = vrsqrt.f32 %v3772_v5  ;;  %v3739_v27 = vadd.f32 %v3707_v16, %v11815_v50  ;;  %v11843_v45 = vadd.f32 %v3586_v31, %v3522_v10  ;;  %v3523_v52 = vld [vmem:[#allocation4 + $0xe9] sm:$0xff]  ;;  %v15238_v1 = vand.u32 15, %v11686_v0  ;;  %v3680_v32 = vld [vmem:[#allocation4 + $0xc0] sm:$0xff]  ;;  %v3524_v20 = vld [vmem:[#allocation4 + $0xf1] sm:$0xff] }
 0x46f   : > { %3649 = vst.msk [vmem:[#allocation4 + $0xd8] sm:$0xff] %vm15027_vm2, %v11838_v14  ;;  %v15239_v46 = vmov 0  ;;  %v3774_v60 = vadd.f32 1e-06, %v3742_v51  ;;  %v3709_v18 = vadd.f32 %v11777_v54, %v11672_v37  ;;  %v3712_v38 = vadd.f32 %v3676_v28, %v11737_v63  ;;  %v3527_v37 = vld [vmem:[#allocation4 + $0x109] sm:$0xff] }
 0x470   : > { %vm11849_vm7 = vcmp.eq.s32.totalorder %v15238_v1, 15  ;;  %v3492_v10 = vsel %vm11764_vm5, 0.0, %v3460_v21  ;;  %v3555_v5 = vsel %vm11770_vm4, 0.0, %v3523_v52  ;;  %v3830_v0 = vmul.f32 11.785113, %v9210_v6  ;;  %3650 = vst.msk [vmem:[#allocation4 + $0xe0] sm:$0xff] %vm15027_vm2, %v11843_v45  ;;  %v9212_v51 = vpop.eup %9211 }
 0x471   : > { %v15240_v46 = vsel %vm11849_vm7, 4294967295, %v15239_v46  ;;  %v3588_v44 = vadd.f32 %v3492_v10, %v11785_v47  ;;  %v3589_v16 = vadd.f32 %v3461_v39, %v11774_v35  ;;  %v11864_v31 = vadd.f32 %v3587_v57, %v3555_v5  ;;  %3948 = vperm.xlu1 %9150, %v3826_v2   ;;  %v9214_v39 = vpop.eup %9213  ;;  %v3679_v10 = vld [vmem:[#allocation4 + $0xb8] sm:$0xff] }
 0x472   : > { %15241 = vst [vmem:[#allocation88_spill] sm:$0xff] %v15240_v46  ;;  %9221 = vrsqrt.f32 %v3767_v23  ;;  %3968 = vperm.xlu0 %9151, %v3830_v0   ;;  %v3827_v63 = vmul.f32 11.785113, %v9208_v13  ;;  %v3744_v54 = vadd.f32 %v3712_v38, %v3680_v32  ;;  %v3771_v28 = vadd.f32 1e-06, %v3739_v27  ;;  %v3462_v47 = vld [vmem:[#allocation4 + $0xff] sm:$0xff] }
 0x473   : > { %9223 = vrsqrt.f32 %v3774_v60  ;;  %v3714_v21 = vadd.f32 %v3678_v53, %v11779_v17  ;;  %v11867_v6 = vadd.f32 %v3588_v44, %v3524_v20  ;;  %3651 = vst.msk [vmem:[#allocation4 + $0xe8] sm:$0xff] %vm15027_vm2, %v11864_v31  ;;  %v3559_v35 = vsel %vm11849_vm7, 0.0, %v3527_v37  ;;  %v3463_v57 = vld [vmem:[#allocation4 + $0x107] sm:$0xff]  ;;  %v3525_v23 = vld [vmem:[#allocation4 + $0xf9] sm:$0xff] }
 0x474   : > { %v3741_v13 = vadd.f32 %v3709_v18, %v11841_v26  ;;  %v3682_v52 = vld [vmem:[#allocation4 + $0xd0] sm:$0xff]  ;;  %v3494_v27 = vsel %vm11804_vm11, 0.0, %v3462_v47  ;;  %v3526_v17 = vld [vmem:[#allocation4 + $0x101] sm:$0xff]  ;;  %v3557_v53 = vsel %vm11808_vm0, 0.0, %v3525_v23  ;;  %v3591_v1 = vadd.f32 %v3463_v57, %v11812_v56 }
 0x475   : > { %v3832_v60 = vmul.f32 11.785113, %v9212_v51  ;;  %3652 = vst.msk [vmem:[#allocation4 + $0xf0] sm:$0xff] %vm15027_vm2, %v11867_v6  ;;  %v3590_v38 = vadd.f32 %v3494_v27, %v11824_v59  ;;  %v11882_v2 = vadd.f32 %v3589_v16, %v3557_v53  ;;  %9225 = vrsqrt.f32 %v3769_v34  ;;  %3953 = vperm.xlu1 %9150, %v3827_v63  }
 0x476   : > { %v3776_v18 = vadd.f32 1e-06, %v3744_v54  ;;  %v11884_v20 = vadd.f32 %v3591_v1, %v3559_v35  ;;  %v3746_v5 = vadd.f32 %v3714_v21, %v3682_v52  ;;  %v3711_v0 = vadd.f32 %v11815_v50, %v11716_v33  ;;  %v9216_v44 = vpop.eup %9215  ;;  %v3683_v53 = vld [vmem:[#allocation4 + $0xd8] sm:$0xff] }
 0x477   : > { %3978 = vperm.xlu0 %9151, %v3832_v60   ;;  %v3716_v56 = vadd.f32 %v3680_v32, %v11818_v8  ;;  %v3622_v37 = vadd.f32 %v3590_v38, %v3526_v17  ;;  %3653 = vst.msk [vmem:[#allocation4 + $0xf8] sm:$0xff] %vm15027_vm2, %v11882_v2  ;;  %v3773_v59 = vadd.f32 1e-06, %v3741_v13  ;;  %v9218_v34 = vpop.eup %9217  ;;  %v3684_v16 = vld [vmem:[#allocation4 + $0xe0] sm:$0xff]  ;;  %v3834_v54 = vmul.f32 11.785113, %v9216_v44 }
 0x478   : > { %9227 = vrsqrt.f32 %v3776_v18  ;;  %3655 = vst.msk [vmem:[#allocation4 + $0x108] sm:$0xff] %vm15027_vm2, %v11884_v20  ;;  %v3778_v51 = vadd.f32 1e-06, %v3746_v5  ;;  %v3743_v21 = vadd.f32 %v3711_v0, %v3679_v10  ;;  %v3828_v33 = vmul.f32 11.785113, %v9214_v39  ;;  %v3681_v8 = vld [vmem:[#allocation4 + $0xc8] sm:$0xff] }
 0x479   : > { %3654 = vst.msk [vmem:[#allocation4 + $0x100] sm:$0xff] %vm15027_vm2, %v3622_v37  ;;  %9229 = vrsqrt.f32 %v3771_v28  ;;  %v3748_v50 = vadd.f32 %v3716_v56, %v3684_v16  ;;  %v3713_v32 = vadd.f32 %v11841_v26, %v11760_v58  ;;  %v3718_v35 = vadd.f32 %v3682_v52, %v11843_v45  ;;  %v3690_v60 = vld [vmem:[#allocation4 + $0x110] sm:$0xff] }
 0x47a   : > { %9231 = vrsqrt.f32 %v3778_v51  ;;  %3958 = vperm.xlu1 %9150, %v3828_v33   ;;  %v3775_v13 = vadd.f32 1e-06, %v3743_v21  ;;  %v3829_v39 = vmul.f32 11.785113, %v9218_v34  ;;  %v3715_v58 = vadd.f32 %v3679_v10, %v11802_v48 }
 0x47b   : > { %3988 = vperm.xlu0 %9151, %v3834_v54   ;;  %v9220_v63 = vpop.eup %9219  ;;  %v3780_v47 = vadd.f32 1e-06, %v3748_v50  ;;  %9233 = vrsqrt.f32 %v3773_v59  ;;  %v3745_v27 = vadd.f32 %v3713_v32, %v3681_v8  ;;  %v3720_v45 = vadd.f32 %v3684_v16, %v11867_v6  ;;  %v3685_v59 = vld [vmem:[#allocation4 + $0xe8] sm:$0xff] }
 0x47c   : > { %v3686_v57 = vld [vmem:[#allocation4 + $0xf0] sm:$0xff]  ;;  %v3836_v23 = vmul.f32 11.785113, %v9220_v63  ;;  %v3747_v0 = vadd.f32 %v3715_v58, %v3683_v53  ;;  %v3717_v54 = vadd.f32 %v3681_v8, %v11838_v14  ;;  %v3721_v14 = vadd.f32 %v3685_v59, %v11882_v2 }
 0x47d   : > { %v3722_v17 = vadd.f32 %v3686_v57, %v3622_v37  ;;  %9235 = vrsqrt.f32 %v3780_v47  ;;  %v3750_v28 = vadd.f32 %v3718_v35, %v3686_v57  ;;  %v3777_v18 = vadd.f32 1e-06, %v3745_v27 }
 0x47e   : > { %3963 = vperm.xlu1 %9150, %v3829_v39   ;;  %9237 = vrsqrt.f32 %v3775_v13  ;;  %v3779_v6 = vadd.f32 1e-06, %v3747_v0  ;;  %v3749_v16 = vadd.f32 %v3717_v54, %v3685_v59  ;;  %v3687_v32 = vld [vmem:[#allocation4 + $0xf8] sm:$0xff]  ;;  %v3719_v35 = vadd.f32 %v3683_v53, %v11864_v31 }
 0x47f   : > { %v9222_v1 = vpop.eup %9221  ;;  %3998 = vperm.xlu0 %9151, %v3836_v23   ;;  %v3782_v52 = vadd.f32 1e-06, %v3750_v28  ;;  %v3754_v44 = vadd.f32 %v3722_v17, %v3690_v60  ;;  %v3689_v17 = vld [vmem:[#allocation4 + $0x108] sm:$0xff]  ;;  %v3723_v28 = vadd.f32 %v3687_v32, %v11884_v20  ;;  %vm15242_vm2 = vcmask 64512  }
 0x480   : > { %v9224_v26 = vpop.eup %9223  ;;  %v3688_v5 = vld [vmem:[#allocation4 + $0x100] sm:$0xff]  ;;  %v3831_v56 = vmul.f32 11.785113, %v9222_v1  ;;  %v3781_v23 = vadd.f32 1e-06, %v3749_v16  ;;  %v3751_v13 = vadd.f32 %v3719_v35, %v3687_v32  ;;  %v3753_v53 = vadd.f32 %v3721_v14, %v3689_v17  ;;  %vm15243_vm7 = vmmov %vm15242_vm2 }
 0x481   : > { %v3838_v38 = vmul.f32 11.785113, %v9224_v26  ;;  %9239 = vrsqrt.f32 %v3782_v52  ;;  %v3752_v37 = vadd.f32 %v3720_v45, %v3688_v5  ;;  %v3786_v51 = vadd.f32 1e-06, %v3754_v44  ;;  %v3691_v26 = vld [vmem:[#allocation4 + $0x118] sm:$0xff]  ;;  %vm15306_vm0 = vmmov %vm15242_vm2 }
 0x482   : > { %v9226_v34 = vpop.eup %9225  ;;  %3973 = vperm.xlu1 %9150, %v3831_v56   ;;  %9241 = vrsqrt.f32 %v3777_v18  ;;  %v3783_v31 = vadd.f32 1e-06, %v3751_v13  ;;  %v3755_v18 = vadd.f32 %v3723_v28, %v3691_v26  ;;  %v3240_v32 = vmax.f32 %v11012_v15, %v11194_v62  ;;  %vm15307_vm11 = vmmov %vm15306_vm0 }
 0x483   : > { %4008 = vperm.xlu0 %9151, %v3838_v38   ;;  %v3784_v48 = vadd.f32 1e-06, %v3752_v37  ;;  %v3833_v21 = vmul.f32 11.785113, %v9226_v34  ;;  %v3785_v38 = vadd.f32 1e-06, %v3753_v53  ;;  %v3241_v35 = vmax.f32 %v11004_v7, %v11188_v40 }
 0x484   : > { %v3787_v56 = vadd.f32 1e-06, %v3755_v18  ;;  %v3243_v7 = vmax.f32 %v11020_v22, %v11200_v4  ;;  %v3244_v28 = vmax.f32 %v11028_v9, %v11212_v11  ;;  %v3245_v22 = vmax.f32 %v11018_v43, %v11208_v41  ;;  %v15245_v11 = vld [vmem:[#allocation33_spill] sm:$0xff] }
 0x485   : > { %v9228_v10 = vpop.eup %9227  ;;  %9243 = vrsqrt.f32 %v3784_v48  ;;  %vm15575_vm4 = vcmask 585216  }
 0x486   : > { %v3840_v33 = vmul.f32 11.785113, %v9228_v10  ;;  %v9230_v50 = vpop.eup %9229  ;;  %3983 = vperm.xlu1 %9150, %v3833_v21   ;;  %9245 = vrsqrt.f32 %v3779_v6  ;;  %v3857_v4 = vand.u32 2147483647, %v3244_v28  ;;  %v3858_v9 = vand.u32 2147483647, %v3245_v22  ;;  %vm15577_vm5 = vmmov %vm15575_vm4 }
 0x487   : > { %v9232_v63 = vpop.eup %9231  ;;  %9247 = vrsqrt.f32 %v3786_v51  ;;  %v3835_v57 = vmul.f32 11.785113, %v9230_v50  ;;  %v3239_v50 = vmax.f32 %v11006_v61, %v11182_v25 }
 0x488   : > { %4018 = vperm.xlu0 %9151, %v3840_v33   ;;  %v3842_v47 = vmul.f32 11.785113, %v9232_v63  ;;  %v9234_v8 = vpop.eup %9233  ;;  %9249 = vrsqrt.f32 %v3781_v23  ;;  %v3242_v23 = vmax.f32 %v11010_v24, %v11204_v36  ;;  %v3856_v36 = vand.u32 2147483647, %v3243_v7 }
 0x489   : > { %v3837_v60 = vmul.f32 11.785113, %v9234_v8  ;;  %9251 = vrsqrt.f32 %v3783_v31  ;;  %v3852_v63 = vand.u32 2147483647, %v3239_v50 }
 0x48a   : > { %v9236_v27 = vpop.eup %9235  ;;  %3993 = vperm.xlu1 %9150, %v3835_v57   ;;  %9253 = vrsqrt.f32 %v3785_v38  ;;  %v3854_v57 = vand.u32 2147483647, %v3241_v35  ;;  %v3855_v15 = vand.u32 2147483647, %v3242_v23  ;;  %v3888_v26 = vmul.f32 %v3856_v36, %v3243_v7 }
 0x48b   : > { %v3844_v39 = vmul.f32 11.785113, %v9236_v27  ;;  %v9238_v1 = vpop.eup %9237  ;;  %9255 = vrsqrt.f32 %v3787_v56  ;;  %v3884_v14 = vmul.f32 %v3852_v63, %v3239_v50 }
 0x48c   : > { %4028 = vperm.xlu0 %9151, %v3842_v47   ;;  %v3839_v52 = vmul.f32 11.785113, %v9238_v1  ;;  %v3853_v47 = vand.u32 2147483647, %v3240_v32  ;;  %v3886_v40 = vmul.f32 %v3854_v57, %v3241_v35  ;;  %v15255_v57 = vld [vmem:[#allocation13_spill] sm:$0xff] }
 0x48e   : > { %v9240_v58 = vpop.eup %9239  ;;  %4003 = vperm.xlu1 %9150, %v3837_v60   ;;  %v3885_v27 = vmul.f32 %v3853_v47, %v3240_v32  ;;  %v3887_v60 = vmul.f32 %v3855_v15, %v3242_v23 }
 0x48f   : > { %v3846_v2 = vmul.f32 11.785113, %v9240_v58  ;;  %v9242_v45 = vpop.eup %9241 }
 0x490   : > { %4038 = vperm.xlu0 %9151, %v3844_v39   ;;  %v3841_v44 = vmul.f32 11.785113, %v9242_v45 }
 0x492   : > { %v9244_v5 = vpop.eup %9243  ;;  %4013 = vperm.xlu1 %9150, %v3839_v52   ;;  %v15246_v52 = vld [vmem:[#allocation7_spill] sm:$0xff] }
 0x493   : > { %v3848_v0 = vmul.f32 11.785113, %v9244_v5  ;;  %v9246_v20 = vpop.eup %9245  ;;  %v3246_v38 = vmax.f32 %v15246_v52, %v15245_v11  ;;  %v3889_v5 = vmul.f32 %v3857_v4, %v3244_v28 }
 0x494   : > { %4048 = vperm.xlu0 %9151, %v3846_v2   ;;  %v9248_v37 = vpop.eup %9247  ;;  %v3843_v59 = vmul.f32 11.785113, %v9246_v20  ;;  %v15247_v20 = vld [vmem:[#allocation32_spill] sm:$0xff] }
 0x495   : > { %v3850_v34 = vmul.f32 11.785113, %v9248_v37  ;;  %v9250_v54 = vpop.eup %9249  ;;  %v3859_v41 = vand.u32 2147483647, %v3246_v38 }
 0x496   : > { %4023 = vperm.xlu1 %9150, %v3841_v44   ;;  %v3845_v48 = vmul.f32 11.785113, %v9250_v54  ;;  %v9252_v10 = vpop.eup %9251  ;;  %v15248_v44 = vld [vmem:[#allocation9_spill] sm:$0xff] }
 0x497   : > { %v3847_v6 = vmul.f32 11.785113, %v9252_v10  ;;  %v9254_v16 = vpop.eup %9253  ;;  %v3247_v56 = vmax.f32 %v15248_v44, %v15247_v20  ;;  %v15251_v10 = vld [vmem:[#allocation8_spill] sm:$0xff]  ;;  %v3891_v35 = vmul.f32 %v3859_v41, %v3246_v38  ;;  %v15264_v20 = vld [vmem:[#allocation17_spill] sm:$0xff] }
 0x498   : > { %4058 = vperm.xlu0 %9151, %v3848_v0   ;;  %v3849_v51 = vmul.f32 11.785113, %v9254_v16  ;;  %v9256_v21 = vpop.eup %9255  ;;  %v15263_v41 = vld [vmem:[#allocation40_spill] sm:$0xff] }
 0x499   : > { %v3851_v33 = vmul.f32 11.785113, %v9256_v21  ;;  %v15252_v21 = vld [vmem:[#allocation35_spill] sm:$0xff]  ;;  %v3255_v44 = vmax.f32 %v15264_v20, %v15263_v41 }
 0x49a   : > { %4033 = vperm.xlu1 %9150, %v3843_v59  }
 0x49c   : > { %4068 = vperm.xlu0 %9151, %v3850_v34   ;;  %v3890_v34 = vmul.f32 %v3858_v9, %v3245_v22 }
 0x49e   : > { %4043 = vperm.xlu1 %9150, %v3845_v48   ;;  %v15250_v48 = vld [vmem:[#allocation34_spill] sm:$0xff] }
 0x4a2   : > { %4053 = vperm.xlu1 %9150, %v3847_v6   ;;  %v3249_v6 = vmax.f32 %v15251_v10, %v15250_v48 }
 0x4a6   : > { %4063 = vperm.xlu1 %9150, %v3849_v51   ;;  %v3860_v51 = vand.u32 2147483647, %v3247_v56 }
 0x4aa   : > { %4073 = vperm.xlu1 %9150, %v3851_v33   ;;  %v15253_v33 = vld [vmem:[#allocation11_spill] sm:$0xff] }
 0x4ab   : > { %v3248_v50 = vmax.f32 %v15253_v33, %v15252_v21 }
 0x4ad   : > { %v3861_v7 = vand.u32 2147483647, %v3248_v50 }
 0x4d0   : > { %v3919_v8 = vpop.permute.xlu1 %3918 }
 0x4d1   : > { %v11911_v13 = vmul.f32 %v3919_v8, %v3884_v14  ;;  %v3862_v14 = vand.u32 2147483647, %v3249_v6  ;;  %v15254_v8 = vld [vmem:[#allocation36_spill] sm:$0xff] }
 0x4d2   : > { %v3251_v23 = vmax.f32 %v15255_v57, %v15254_v8 }
 0x4d3   : > { %v4109_v61 = vsel %vm15242_vm2, %v11911_v13, 0.0  ;;  %v3894_v22 = vmul.f32 %v3862_v14, %v3249_v6 }
 0x4d4   : > { %4110 = vadd.xlane.f32.xlu0 %v4109_v61  ;;  %v15257_v61 = vld [vmem:[#allocation10_spill] sm:$0xff]  ;;  %v3864_v28 = vand.u32 2147483647, %v3251_v23 }
 0x4d5   : > { %v3924_v17 = vpop.permute.xlu0 %3923 }
 0x4d6   : > { %v11915_v25 = vmul.f32 %v3924_v17, %v3885_v27  ;;  %v15256_v17 = vld [vmem:[#allocation37_spill] sm:$0xff] }
 0x4d7   : > { %v3250_v15 = vmax.f32 %v15257_v61, %v15256_v17  ;;  %v15271_v17 = vld [vmem:[#allocation19_spill] sm:$0xff] }
 0x4d8   : > { %v4112_v39 = vsel %vm15243_vm7, %v11915_v25, 0.0  ;;  %vm15244_vm7 = vmmov %vm15242_vm2 }
 0x4d9   : > { %v3929_v62 = vpop.permute.xlu1 %3928  ;;  %4113 = vadd.xlane.f32.xlu1 %v4112_v39  ;;  %v3892_v39 = vmul.f32 %v3860_v51, %v3247_v56  ;;  %v3896_v56 = vmul.f32 %v3864_v28, %v3251_v23 }
 0x4da   : > { %v11921_v24 = vmul.f32 %v3929_v62, %v3886_v40 }
 0x4dc   : > { %v4115_v1 = vsel %vm15242_vm2, %v11921_v24, 0.0 }
 0x4dd   : > { %4116 = vadd.xlane.f32.xlu0 %v4115_v1  ;;  %v15259_v1 = vld [vmem:[#allocation38_spill] sm:$0xff] }
 0x4df   : > { %v3934_v31 = vpop.permute.xlu1 %3933 }
 0x4e0   : > { %v11927_v53 = vmul.f32 %v3934_v31, %v3887_v60  ;;  %v15260_v60 = vld [vmem:[#allocation12_spill] sm:$0xff] }
 0x4e1   : > { %v3253_v31 = vmax.f32 %v15260_v60, %v15259_v1  ;;  %v15273_v60 = vld [vmem:[#allocation44_spill] sm:$0xff] }
 0x4e2   : > { %v4118_v58 = vsel %vm15244_vm7, %v11927_v53, 0.0  ;;  %vm15249_vm7 = vmmov %vm15242_vm2 }
 0x4e3   : > { %4119 = vadd.xlane.f32.xlu0 %v4118_v58  ;;  %v3863_v58 = vand.u32 2147483647, %v3250_v15 }
 0x4e4   : > { %v3939_v2 = vpop.permute.xlu1 %3938 }
 0x4e5   : > { %v11933_v45 = vmul.f32 %v3939_v2, %v3888_v26  ;;  %v15261_v26 = vld [vmem:[#allocation39_spill] sm:$0xff]  ;;  %v3895_v10 = vmul.f32 %v3863_v58, %v3250_v15 }
 0x4e6   : > { %v15262_v2 = vld [vmem:[#allocation15_spill] sm:$0xff] }
 0x4e7   : > { %v4121_v18 = vsel %vm15242_vm2, %v11933_v45, 0.0  ;;  %v3252_v9 = vmax.f32 %v15262_v2, %v15261_v26 }
 0x4e8   : > { %4122 = vadd.xlane.f32.xlu1 %v4121_v18  ;;  %v3944_v0 = vpop.permute.xlu1 %3943  ;;  %v3893_v18 = vmul.f32 %v3861_v7, %v3248_v50 }
 0x4e9   : > { %v11939_v43 = vmul.f32 %v3944_v0, %v3889_v5  ;;  %v3866_v0 = vand.u32 2147483647, %v3253_v31 }
 0x4eb   : > { %v4124_v59 = vsel %vm15249_vm7, %v11939_v43, 0.0  ;;  %vm15258_vm7 = vmmov %vm15242_vm2  ;;  %v3898_v8 = vmul.f32 %v3866_v0, %v3253_v31  ;;  %v15274_v31 = vld [vmem:[#allocation21_spill] sm:$0xff] }
 0x4ec   : > { %4125 = vadd.xlane.f32.xlu0 %v4124_v59  ;;  %v3949_v54 = vpop.permute.xlu1 %3948 }
 0x4ed   : > { %v3969_v37 = vpop.permute.xlu0 %3968  ;;  %v11947_v16 = vmul.f32 %v3949_v54, %v3890_v34  ;;  %v15265_v34 = vld [vmem:[#allocation41_spill] sm:$0xff]  ;;  %v15266_v54 = vld [vmem:[#allocation14_spill] sm:$0xff] }
 0x4ee   : > { %v11967_v11 = vmul.f32 %v3969_v37, %v3894_v22  ;;  %v3254_v48 = vmax.f32 %v15266_v54, %v15265_v34  ;;  %v3865_v37 = vand.u32 2147483647, %v3252_v9  ;;  %v3259_v22 = vmax.f32 %v15274_v31, %v15273_v60  ;;  %v15278_v34 = vld [vmem:[#allocation46_spill] sm:$0xff]  ;;  %v15279_v54 = vld [vmem:[#allocation20_spill] sm:$0xff] }
 0x4ef   : > { %v4127_v63 = vsel %vm15242_vm2, %v11947_v16, 0.0 }
 0x4f0   : > { %4128 = vadd.xlane.f32.xlu1 %v4127_v63  ;;  %v3954_v47 = vpop.permute.xlu1 %3953  ;;  %v3868_v63 = vand.u32 2147483647, %v3255_v44  ;;  %v3867_v23 = vand.u32 2147483647, %v3254_v48 }
 0x4f1   : > { %v11955_v27 = vmul.f32 %v3954_v47, %v3891_v35  ;;  %v15268_v35 = vld [vmem:[#allocation42_spill] sm:$0xff]  ;;  %v15269_v47 = vld [vmem:[#allocation16_spill] sm:$0xff] }
 0x4f2   : > { %v3979_v32 = vpop.permute.xlu0 %3978  ;;  %v3257_v14 = vmax.f32 %v15269_v47, %v15268_v35  ;;  %v3900_v58 = vmul.f32 %v3868_v63, %v3255_v44  ;;  %v3899_v2 = vmul.f32 %v3867_v23, %v3254_v48  ;;  %v3872_v44 = vand.u32 2147483647, %v3259_v22 }
 0x4f3   : > { %v4130_v62 = vsel %vm15258_vm7, %v11955_v27, 0.0  ;;  %v11977_v6 = vmul.f32 %v3979_v32, %v3896_v56  ;;  %vm15267_vm7 = vmmov %vm15242_vm2  ;;  %v15270_v32 = vld [vmem:[#allocation43_spill] sm:$0xff] }
 0x4f4   : > { %4131 = vadd.xlane.f32.xlu0 %v4130_v62  ;;  %v4139_v21 = vsel %vm15267_vm7, %v11967_v11, 0.0  ;;  %v3256_v61 = vmax.f32 %v15271_v17, %v15270_v32  ;;  %vm15272_vm7 = vmmov %vm15242_vm2  ;;  %v3870_v1 = vand.u32 2147483647, %v3257_v14  ;;  %v15284_v17 = vld [vmem:[#allocation25_spill] sm:$0xff] }
 0x4f5   : > { %v3959_v36 = vpop.permute.xlu1 %3958  ;;  %v4145_v7 = vsel %vm15272_vm7, %v11977_v6, 0.0  ;;  %vm15277_vm7 = vmmov %vm15242_vm2 }
 0x4f6   : > { %v3989_v40 = vpop.permute.xlu0 %3988  ;;  %v11963_v4 = vmul.f32 %v3959_v36, %v3892_v39  ;;  %v3897_v39 = vmul.f32 %v3865_v37, %v3252_v9  ;;  %v3902_v48 = vmul.f32 %v3870_v1, %v3257_v14  ;;  %v15283_v14 = vld [vmem:[#allocation48_spill] sm:$0xff] }
 0x4f7   : > { %v11989_v15 = vmul.f32 %v3989_v40, %v3898_v8  ;;  %v3869_v40 = vand.u32 2147483647, %v3256_v61 }
 0x4f8   : > { %v4133_v38 = vsel %vm15242_vm2, %v11963_v4, 0.0 }
 0x4f9   : > { %4134 = vadd.xlane.f32.xlu1 %v4133_v38  ;;  %v3964_v5 = vpop.permute.xlu1 %3963  ;;  %v15275_v38 = vld [vmem:[#allocation45_spill] sm:$0xff]  ;;  %v4151_v9 = vsel %vm15277_vm7, %v11989_v15, 0.0  ;;  %vm15282_vm7 = vmmov %vm15242_vm2 }
 0x4fa   : > { %v3999_v52 = vpop.permute.xlu0 %3998  ;;  %v11973_v59 = vmul.f32 %v3964_v5, %v3893_v18  ;;  %v15276_v18 = vld [vmem:[#allocation18_spill] sm:$0xff] }
 0x4fb   : > { %v3258_v5 = vmax.f32 %v15276_v18, %v15275_v38  ;;  %v12001_v0 = vmul.f32 %v3999_v52, %v3900_v58  ;;  %v15281_v52 = vld [vmem:[#allocation23_spill] sm:$0xff]  ;;  %v15288_v18 = vld [vmem:[#allocation50_spill] sm:$0xff] }
 0x4fc   : > { %v4136_v33 = vsel %vm15242_vm2, %v11973_v59, 0.0 }
 0x4fd   : > { %4140 = vadd.xlane.f32.xlu1 %v4139_v21  ;;  %4137 = vadd.xlane.f32.xlu0 %v4136_v33  ;;  %v3974_v50 = vpop.permute.xlu1 %3973  ;;  %v15280_v21 = vld [vmem:[#allocation47_spill] sm:$0xff]  ;;  %v3871_v63 = vand.u32 2147483647, %v3258_v5  ;;  %v4157_v47 = vsel %vm15282_vm7, %v12001_v0, 0.0  ;;  %vm15287_vm7 = vmmov %vm15242_vm2 }
 0x4fe   : > { %v4009_v51 = vpop.permute.xlu0 %4008  ;;  %v11985_v57 = vmul.f32 %v3974_v50, %v3895_v10  ;;  %v3261_v10 = vmax.f32 %v15279_v54, %v15278_v34  ;;  %v3260_v33 = vmax.f32 %v15281_v52, %v15280_v21  ;;  %v3901_v50 = vmul.f32 %v3869_v40, %v3256_v61  ;;  %v15290_v54 = vld [vmem:[#allocation51_spill] sm:$0xff] }
 0x4ff   : > { %v12013_v35 = vmul.f32 %v4009_v51, %v3902_v48  ;;  %v15286_v51 = vld [vmem:[#allocation22_spill] sm:$0xff]  ;;  %v15291_v48 = vld [vmem:[#allocation27_spill] sm:$0xff] }
 0x500   : > { %v4142_v62 = vsel %vm15242_vm2, %v11985_v57, 0.0  ;;  %v3874_v32 = vand.u32 2147483647, %v3261_v10  ;;  %v3873_v61 = vand.u32 2147483647, %v3260_v33  ;;  %v3264_v21 = vmax.f32 %v15291_v48, %v15290_v54 }
 0x501   : > { %4146 = vadd.xlane.f32.xlu1 %v4145_v7  ;;  %4143 = vadd.xlane.f32.xlu0 %v4142_v62  ;;  %v3984_v28 = vpop.permute.xlu1 %3983  ;;  %v3263_v7 = vmax.f32 %v15284_v17, %v15283_v14  ;;  %v3904_v62 = vmul.f32 %v3872_v44, %v3259_v22  ;;  %v4163_v58 = vsel %vm15287_vm7, %v12013_v35, 0.0  ;;  %vm15292_vm7 = vmmov %vm15242_vm2  ;;  %v15295_v17 = vld [vmem:[#allocation53_spill] sm:$0xff] }
 0x502   : > { %v11997_v26 = vmul.f32 %v3984_v28, %v3897_v39  ;;  %v15285_v28 = vld [vmem:[#allocation49_spill] sm:$0xff] }
 0x503   : > { %v4019_v36 = vpop.permute.xlu0 %4018  ;;  %v3262_v1 = vmax.f32 %v15286_v51, %v15285_v28  ;;  %v3876_v22 = vand.u32 2147483647, %v3263_v7  ;;  %v3877_v28 = vand.u32 2147483647, %v3264_v21 }
 0x504   : > { %v4148_v41 = vsel %vm15242_vm2, %v11997_v26, 0.0  ;;  %v12025_v31 = vmul.f32 %v4019_v36, %v3904_v62  ;;  %v3905_v36 = vmul.f32 %v3873_v61, %v3260_v33 }
 0x505   : > { %4152 = vadd.xlane.f32.xlu1 %v4151_v9  ;;  %4149 = vadd.xlane.f32.xlu0 %v4148_v41  ;;  %v3994_v56 = vpop.permute.xlu1 %3993  ;;  %v15289_v9 = vld [vmem:[#allocation24_spill] sm:$0xff]  ;;  %v3875_v34 = vand.u32 2147483647, %v3262_v1  ;;  %v3908_v33 = vmul.f32 %v3876_v22, %v3263_v7  ;;  %v15298_v7 = vld [vmem:[#allocation54_spill] sm:$0xff] }
 0x506   : > { %v12009_v37 = vmul.f32 %v3994_v56, %v3899_v2  ;;  %v3903_v2 = vmul.f32 %v3871_v63, %v3258_v5  ;;  %v3265_v41 = vmax.f32 %v15289_v9, %v15288_v18  ;;  %v3906_v56 = vmul.f32 %v3874_v32, %v3261_v10  ;;  %v15299_v22 = vld [vmem:[#allocation28_spill] sm:$0xff] }
 0x507   : > { %v4029_v20 = vpop.permute.xlu0 %4028  ;;  %v4169_v5 = vsel %vm15292_vm7, %v12025_v31, 0.0  ;;  %v3907_v61 = vmul.f32 %v3875_v34, %v3262_v1  ;;  %vm15297_vm7 = vmmov %vm15242_vm2  ;;  %v3269_v18 = vmax.f32 %v15299_v22, %v15298_v7  ;;  %v15300_v34 = vld [vmem:[#allocation55_spill] sm:$0xff] }
 0x508   : > { %v4154_v8 = vsel %vm15242_vm2, %v12009_v37, 0.0  ;;  %v12037_v52 = vmul.f32 %v4029_v20, %v3906_v56  ;;  %v3878_v10 = vand.u32 2147483647, %v3265_v41  ;;  %v15296_v20 = vld [vmem:[#allocation26_spill] sm:$0xff] }
 0x509   : > { %4158 = vadd.xlane.f32.xlu1 %v4157_v47  ;;  %4155 = vadd.xlane.f32.xlu0 %v4154_v8  ;;  %v4004_v23 = vpop.permute.xlu1 %4003  ;;  %v15293_v8 = vld [vmem:[#allocation52_spill] sm:$0xff]  ;;  %v3266_v62 = vmax.f32 %v15296_v20, %v15295_v17 }
 0x50a   : > { %v12021_v39 = vmul.f32 %v4004_v23, %v3901_v50  ;;  %v15294_v23 = vld [vmem:[#allocation29_spill] sm:$0xff]  ;;  %v3910_v9 = vmul.f32 %v3878_v10, %v3265_v41  ;;  %v3882_v41 = vand.u32 2147483647, %v3269_v18  ;;  %v15303_v20 = vld [vmem:[#allocation56_spill] sm:$0xff] }
 0x50b   : > { %v4039_v60 = vpop.permute.xlu0 %4038  ;;  %v3267_v32 = vmax.f32 %v15294_v23, %v15293_v8  ;;  %v3879_v1 = vand.u32 2147483647, %v3266_v62 }
 0x50c   : > { %v4160_v40 = vsel %vm15242_vm2, %v12021_v39, 0.0  ;;  %v12049_v51 = vmul.f32 %v4039_v60, %v3908_v33  ;;  %v15301_v60 = vld [vmem:[#allocation31_spill] sm:$0xff] }
 0x50d   : > { %4164 = vadd.xlane.f32.xlu1 %v4163_v58  ;;  %4161 = vadd.xlane.f32.xlu0 %v4160_v40  ;;  %v4014_v38 = vpop.permute.xlu1 %4013  ;;  %v4175_v58 = vsel %vm15297_vm7, %v12037_v52, 0.0  ;;  %vm15302_vm7 = vmmov %vm15242_vm2  ;;  %v3911_v17 = vmul.f32 %v3879_v1, %v3266_v62 }
 0x50e   : > { %v12033_v44 = vmul.f32 %v4014_v38, %v3903_v2  ;;  %v3880_v38 = vand.u32 2147483647, %v3267_v32 }
 0x50f   : > { %v4049_v63 = vpop.permute.xlu0 %4048 }
 0x510   : > { %v4166_v50 = vsel %vm15242_vm2, %v12033_v44, 0.0  ;;  %v12061_v48 = vmul.f32 %v4049_v63, %v3910_v9  ;;  %v3912_v10 = vmul.f32 %v3880_v38, %v3267_v32  ;;  %v3914_v32 = vmul.f32 %v3882_v41, %v3269_v18 }
 0x511   : > { %4170 = vadd.xlane.f32.xlu1 %v4169_v5  ;;  %4167 = vadd.xlane.f32.xlu0 %v4166_v50  ;;  %v4024_v47 = vpop.permute.xlu1 %4023  ;;  %v4181_v5 = vsel %vm15302_vm7, %v12049_v51, 0.0  ;;  %vm15305_vm7 = vmmov %vm15242_vm2 }
 0x512   : > { %v12045_v14 = vmul.f32 %v4024_v47, %v3905_v36  ;;  %v3268_v36 = vmax.f32 %v15301_v60, %v15300_v34  ;;  %v3909_v47 = vmul.f32 %v3877_v28, %v3264_v21 }
 0x513   : > { %v4059_v54 = vpop.permute.xlu0 %4058 }
 0x514   : > { %v4172_v40 = vsel %vm15242_vm2, %v12045_v14, 0.0  ;;  %v3881_v33 = vand.u32 2147483647, %v3268_v36 }
 0x515   : > { %4176 = vadd.xlane.f32.xlu1 %v4175_v58  ;;  %4173 = vadd.xlane.f32.xlu0 %v4172_v40  ;;  %v4034_v2 = vpop.permute.xlu1 %4033  ;;  %v12071_v58 = vmul.f32 %v4059_v54, %v3912_v10  ;;  %v4187_v40 = vsel %vm15305_vm7, %v12061_v48, 0.0  ;;  %vm15308_vm7 = vmmov %vm15306_vm0 }
 0x516   : > { %v12057_v56 = vmul.f32 %v4034_v2, %v3907_v61  ;;  %v15304_v61 = vld [vmem:[#allocation30_spill] sm:$0xff]  ;;  %v3913_v7 = vmul.f32 %v3881_v33, %v3268_v36 }
 0x517   : > { %v3270_v63 = vmax.f32 %v15304_v61, %v15303_v20  ;;  %v4069_v28 = vpop.permute.xlu0 %4068  ;;  %v4193_v9 = vsel %vm15306_vm0, %v12071_v58, 0.0 }
 0x518   : > { %v4178_v50 = vsel %vm15242_vm2, %v12057_v56, 0.0  ;;  %v12079_v22 = vmul.f32 %v4069_v28, %v3914_v32 }
 0x519   : > { %4182 = vadd.xlane.f32.xlu1 %v4181_v5  ;;  %4179 = vadd.xlane.f32.xlu0 %v4178_v50  ;;  %v4044_v8 = vpop.permute.xlu1 %4043  ;;  %v3883_v62 = vand.u32 2147483647, %v3270_v63 }
 0x51a   : > { %v12067_v23 = vmul.f32 %v4044_v8, %v3909_v47  ;;  %v4199_v18 = vsel %vm15308_vm7, %v12079_v22, 0.0  ;;  %vm15311_vm7 = vmmov %vm15306_vm0 }
 0x51b   : > { %v3915_v54 = vmul.f32 %v3883_v62, %v3270_v63 }
 0x51c   : > { %v4184_v21 = vsel %vm15242_vm2, %v12067_v23, 0.0  ;;  %vm15309_vm2 = vmmov %vm15306_vm0 }
 0x51d   : > { %4188 = vadd.xlane.f32.xlu1 %v4187_v40  ;;  %4185 = vadd.xlane.f32.xlu0 %v4184_v21  ;;  %v4054_v2 = vpop.permute.xlu1 %4053 }
 0x51e   : > { %v12077_v38 = vmul.f32 %v4054_v2, %v3911_v17 }
 0x520   : > { %v4190_v1 = vsel %vm15307_vm11, %v12077_v38, 0.0  ;;  %vm15310_vm11 = vmmov %vm15306_vm0 }
 0x521   : > { %4194 = vadd.xlane.f32.xlu1 %v4193_v9  ;;  %4191 = vadd.xlane.f32.xlu0 %v4190_v1  ;;  %v4064_v34 = vpop.permute.xlu1 %4063 }
 0x522   : > { %v12085_v60 = vmul.f32 %v4064_v34, %v3913_v7 }
 0x524   : > { %v4196_v36 = vsel %vm15309_vm2, %v12085_v60, 0.0  ;;  %vm15312_vm2 = vmmov %vm15306_vm0 }
 0x525   : > { %4200 = vadd.xlane.f32.xlu1 %v4199_v18  ;;  %4197 = vadd.xlane.f32.xlu0 %v4196_v36  ;;  %v4074_v5 = vpop.permute.xlu1 %4073 }
 0x526   : > { %v12091_v50 = vmul.f32 %v4074_v5, %v3915_v54 }
 0x528   : > { %v4202_v47 = vsel %vm15306_vm0, %v12091_v50, 0.0 }
 0x529   : > { %4203 = vadd.xlane.f32.xlu0 %v4202_v47 }
 0x55d   : > { %v4111_v8 = vpop.xlane.xlu0 %4110 }
 0x55e   : > { %v4206_v41 = vmul.f32 0.125, %v4111_v8 }
 0x560   : > { %v12096_v10 = vsub.f32 %v11911_v13, %v4206_v41 }
 0x562   : > { %v4114_v33 = vpop.xlane.xlu1 %4113  ;;  %v4270_v20 = vmul.f32 %v12096_v10, %v12096_v10 }
 0x563   : > { %v4207_v17 = vmul.f32 0.125, %v4114_v33 }
 0x564   : > { %v4302_v21 = vsel %vm15310_vm11, %v4270_v20, 0.0  ;;  %vm15313_vm11 = vmmov %vm15306_vm0 }
 0x565   : > { %v12101_v61 = vsub.f32 %v11915_v25, %v4207_v17  ;;  %4303 = vadd.xlane.f32.xlu1 %v4302_v21 }
 0x566   : > { %v4117_v63 = vpop.xlane.xlu0 %4116 }
 0x567   : > { %v4208_v40 = vmul.f32 0.125, %v4117_v63  ;;  %v4271_v28 = vmul.f32 %v12101_v61, %v12101_v61 }
 0x569   : > { %v12107_v2 = vsub.f32 %v11921_v24, %v4208_v40  ;;  %v4305_v32 = vsel %vm15311_vm7, %v4271_v28, 0.0  ;;  %vm15314_vm7 = vmmov %vm15306_vm0 }
 0x56a   : > { %4306 = vadd.xlane.f32.xlu0 %v4305_v32 }
 0x56b   : > { %v4272_v25 = vmul.f32 %v12107_v2, %v12107_v2 }
 0x56c   : > { %v4120_v13 = vpop.xlane.xlu0 %4119 }
 0x56d   : > { %v4209_v7 = vmul.f32 0.125, %v4120_v13  ;;  %v4308_v9 = vsel %vm15312_vm2, %v4272_v25, 0.0  ;;  %vm15315_vm2 = vmmov %vm15306_vm0 }
 0x56e   : > { %4309 = vadd.xlane.f32.xlu1 %v4308_v9 }
 0x56f   : > { %v12113_v62 = vsub.f32 %v11927_v53, %v4209_v7 }
 0x571   : > { %v4123_v1 = vpop.xlane.xlu1 %4122  ;;  %v4273_v24 = vmul.f32 %v12113_v62, %v12113_v62 }
 0x572   : > { %v4210_v34 = vmul.f32 0.125, %v4123_v1 }
 0x573   : > { %v4311_v36 = vsel %vm15306_vm0, %v4273_v24, 0.0 }
 0x574   : > { %v12119_v18 = vsub.f32 %v11933_v45, %v4210_v34  ;;  %4312 = vadd.xlane.f32.xlu0 %v4311_v36 }
 0x575   : > { %v4126_v54 = vpop.xlane.xlu0 %4125 }
 0x576   : > { %v4211_v5 = vmul.f32 0.125, %v4126_v54  ;;  %v4274_v53 = vmul.f32 %v12119_v18, %v12119_v18 }
 0x578   : > { %v12125_v47 = vsub.f32 %v11939_v43, %v4211_v5  ;;  %v4314_v8 = vsel %vm15313_vm11, %v4274_v53, 0.0  ;;  %vm15316_vm11 = vmmov %vm15306_vm0 }
 0x579   : > { %4315 = vadd.xlane.f32.xlu1 %v4314_v8  ;;  %v4129_v41 = vpop.xlane.xlu1 %4128 }
 0x57a   : > { %v4212_v33 = vmul.f32 0.125, %v4129_v41  ;;  %v4275_v45 = vmul.f32 %v12125_v47, %v12125_v47 }
 0x57c   : > { %v12131_v17 = vsub.f32 %v11947_v16, %v4212_v33  ;;  %v4317_v20 = vsel %vm15314_vm7, %v4275_v45, 0.0  ;;  %vm15317_vm7 = vmmov %vm15306_vm0 }
 0x57d   : > { %v4132_v63 = vpop.xlane.xlu0 %4131  ;;  %4318 = vadd.xlane.f32.xlu0 %v4317_v20 }
 0x57e   : > { %v4213_v40 = vmul.f32 0.125, %v4132_v63  ;;  %v4276_v43 = vmul.f32 %v12131_v17, %v12131_v17 }
 0x580   : > { %v12137_v21 = vsub.f32 %v11955_v27, %v4213_v40  ;;  %v4320_v28 = vsel %vm15315_vm2, %v4276_v43, 0.0  ;;  %vm15318_vm2 = vmmov %vm15306_vm0 }
 0x581   : > { %4321 = vadd.xlane.f32.xlu1 %v4320_v28 }
 0x582   : > { %v4135_v13 = vpop.xlane.xlu1 %4134  ;;  %v4277_v16 = vmul.f32 %v12137_v21, %v12137_v21 }
 0x583   : > { %v4214_v32 = vmul.f32 0.125, %v4135_v13 }
 0x584   : > { %v4323_v25 = vsel %vm15306_vm0, %v4277_v16, 0.0 }
 0x585   : > { %v12143_v7 = vsub.f32 %v11963_v4, %v4214_v32  ;;  %4324 = vadd.xlane.f32.xlu0 %v4323_v25 }
 0x586   : > { %v4138_v9 = vpop.xlane.xlu0 %4137  ;;  %v4141_v1 = vpop.xlane.xlu1 %4140 }
 0x587   : > { %v4215_v34 = vmul.f32 0.125, %v4138_v9  ;;  %v4216_v24 = vmul.f32 0.125, %v4141_v1  ;;  %v4278_v27 = vmul.f32 %v12143_v7, %v12143_v7 }
 0x589   : > { %v12149_v36 = vsub.f32 %v11973_v59, %v4215_v34  ;;  %v12152_v54 = vsub.f32 %v11967_v11, %v4216_v24  ;;  %v4326_v5 = vsel %vm15316_vm11, %v4278_v27, 0.0  ;;  %vm15319_vm11 = vmmov %vm15306_vm0 }
 0x58a   : > { %v4144_v4 = vpop.xlane.xlu0 %4143  ;;  %4327 = vadd.xlane.f32.xlu1 %v4326_v5  ;;  %v4147_v53 = vpop.xlane.xlu1 %4146 }
 0x58b   : > { %v4217_v8 = vmul.f32 0.125, %v4144_v4  ;;  %v4218_v41 = vmul.f32 0.125, %v4147_v53  ;;  %v4279_v33 = vmul.f32 %v12149_v36, %v12149_v36  ;;  %v4280_v45 = vmul.f32 %v12152_v54, %v12152_v54 }
 0x58d   : > { %v12160_v20 = vsub.f32 %v11985_v57, %v4217_v8  ;;  %v12163_v59 = vsub.f32 %v11977_v6, %v4218_v41  ;;  %v4329_v11 = vsel %vm15317_vm7, %v4279_v33, 0.0  ;;  %v4332_v63 = vsel %vm15318_vm2, %v4280_v45, 0.0  ;;  %vm15320_vm7 = vmmov %vm15306_vm0 }
 0x58e   : > { %v4150_v40 = vpop.xlane.xlu0 %4149  ;;  %4330 = vadd.xlane.f32.xlu0 %v4329_v11  ;;  %4333 = vadd.xlane.f32.xlu1 %v4332_v63  ;;  %v4153_v43 = vpop.xlane.xlu1 %4152  ;;  %vm15321_vm2 = vmmov %vm15306_vm0 }
 0x58f   : > { %v4219_v28 = vmul.f32 0.125, %v4150_v40  ;;  %v4220_v13 = vmul.f32 0.125, %v4153_v43  ;;  %v4281_v32 = vmul.f32 %v12160_v20, %v12160_v20  ;;  %v4282_v57 = vmul.f32 %v12163_v59, %v12163_v59 }
 0x591   : > { %v12172_v16 = vsub.f32 %v11997_v26, %v4219_v28  ;;  %v12175_v6 = vsub.f32 %v11989_v15, %v4220_v13  ;;  %v4335_v25 = vsel %vm15306_vm0, %v4281_v32, 0.0  ;;  %v4338_v9 = vsel %vm15319_vm11, %v4282_v57, 0.0  ;;  %vm15322_vm11 = vmmov %vm15306_vm0 }
 0x592   : > { %v4156_v1 = vpop.xlane.xlu0 %4155  ;;  %4336 = vadd.xlane.f32.xlu0 %v4335_v25  ;;  %4339 = vadd.xlane.f32.xlu1 %v4338_v9  ;;  %v4159_v34 = vpop.xlane.xlu1 %4158 }
 0x593   : > { %v4221_v24 = vmul.f32 0.125, %v4156_v1  ;;  %v4222_v27 = vmul.f32 0.125, %v4159_v34  ;;  %v4283_v5 = vmul.f32 %v12172_v16, %v12172_v16  ;;  %v4284_v26 = vmul.f32 %v12175_v6, %v12175_v6 }
 0x595   : > { %v12184_v4 = vsub.f32 %v12009_v37, %v4221_v24  ;;  %v12187_v15 = vsub.f32 %v12001_v0, %v4222_v27  ;;  %v4341_v53 = vsel %vm15320_vm7, %v4283_v5, 0.0  ;;  %v4344_v8 = vsel %vm15321_vm2, %v4284_v26, 0.0  ;;  %vm15323_vm7 = vmmov %vm15306_vm0 }
 0x596   : > { %v4162_v41 = vpop.xlane.xlu0 %4161  ;;  %4342 = vadd.xlane.f32.xlu0 %v4341_v53  ;;  %4345 = vadd.xlane.f32.xlu1 %v4344_v8  ;;  %v4165_v33 = vpop.xlane.xlu1 %4164  ;;  %vm15324_vm2 = vmmov %vm15306_vm0 }
 0x597   : > { %v4223_v45 = vmul.f32 0.125, %v4162_v41  ;;  %v4224_v11 = vmul.f32 0.125, %v4165_v33  ;;  %v4285_v63 = vmul.f32 %v12184_v4, %v12184_v4  ;;  %v4286_v37 = vmul.f32 %v12187_v15, %v12187_v15 }
 0x599   : > { %v12196_v40 = vsub.f32 %v12021_v39, %v4223_v45  ;;  %v12199_v0 = vsub.f32 %v12013_v35, %v4224_v11  ;;  %v4347_v43 = vsel %vm15306_vm0, %v4285_v63, 0.0  ;;  %v4350_v28 = vsel %vm15322_vm11, %v4286_v37, 0.0  ;;  %vm15325_vm11 = vmmov %vm15306_vm0 }
 0x59a   : > { %v4168_v13 = vpop.xlane.xlu0 %4167  ;;  %4348 = vadd.xlane.f32.xlu0 %v4347_v43  ;;  %4351 = vadd.xlane.f32.xlu1 %v4350_v28  ;;  %v4171_v32 = vpop.xlane.xlu1 %4170 }
 0x59b   : > { %v4225_v57 = vmul.f32 0.125, %v4168_v13  ;;  %v4226_v25 = vmul.f32 0.125, %v4171_v32  ;;  %v4287_v9 = vmul.f32 %v12196_v40, %v12196_v40  ;;  %v4288_v39 = vmul.f32 %v12199_v0, %v12199_v0 }
 0x59d   : > { %v12208_v1 = vsub.f32 %v12033_v44, %v4225_v57  ;;  %v12211_v35 = vsub.f32 %v12025_v31, %v4226_v25  ;;  %v4353_v34 = vsel %vm15323_vm7, %v4287_v9, 0.0  ;;  %v4356_v24 = vsel %vm15324_vm2, %v4288_v39, 0.0  ;;  %vm15326_vm7 = vmmov %vm15306_vm0 }
 0x59e   : > { %v4174_v27 = vpop.xlane.xlu0 %4173  ;;  %4354 = vadd.xlane.f32.xlu0 %v4353_v34  ;;  %4357 = vadd.xlane.f32.xlu1 %v4356_v24  ;;  %v4177_v5 = vpop.xlane.xlu1 %4176  ;;  %vm15327_vm2 = vmmov %vm15306_vm0 }
 0x59f   : > { %v4227_v26 = vmul.f32 0.125, %v4174_v27  ;;  %v4228_v53 = vmul.f32 0.125, %v4177_v5  ;;  %v4289_v8 = vmul.f32 %v12208_v1, %v12208_v1  ;;  %v4290_v44 = vmul.f32 %v12211_v35, %v12211_v35 }
 0x5a1   : > { %v12220_v41 = vsub.f32 %v12045_v14, %v4227_v26  ;;  %v12223_v31 = vsub.f32 %v12037_v52, %v4228_v53  ;;  %v4359_v33 = vsel %vm15306_vm0, %v4289_v8, 0.0  ;;  %v4362_v45 = vsel %vm15325_vm11, %v4290_v44, 0.0  ;;  %vm15328_vm11 = vmmov %vm15306_vm0 }
 0x5a2   : > { %v4180_v11 = vpop.xlane.xlu0 %4179  ;;  %4360 = vadd.xlane.f32.xlu0 %v4359_v33  ;;  %4363 = vadd.xlane.f32.xlu1 %v4362_v45  ;;  %v4183_v63 = vpop.xlane.xlu1 %4182 }
 0x5a3   : > { %v4229_v37 = vmul.f32 0.125, %v4180_v11  ;;  %v4230_v43 = vmul.f32 0.125, %v4183_v63  ;;  %v4291_v28 = vmul.f32 %v12220_v41, %v12220_v41  ;;  %v4292_v14 = vmul.f32 %v12223_v31, %v12223_v31 }
 0x5a5   : > { %v12232_v13 = vsub.f32 %v12057_v56, %v4229_v37  ;;  %v12235_v52 = vsub.f32 %v12049_v51, %v4230_v43  ;;  %v4365_v32 = vsel %vm15326_vm7, %v4291_v28, 0.0  ;;  %v4368_v57 = vsel %vm15327_vm2, %v4292_v14, 0.0  ;;  %vm15329_vm7 = vmmov %vm15306_vm0 }
 0x5a6   : > { %v4186_v25 = vpop.xlane.xlu0 %4185  ;;  %4366 = vadd.xlane.f32.xlu0 %v4365_v32  ;;  %4369 = vadd.xlane.f32.xlu1 %v4368_v57  ;;  %v4189_v9 = vpop.xlane.xlu1 %4188  ;;  %vm15330_vm2 = vmmov %vm15306_vm0 }
 0x5a7   : > { %v4231_v39 = vmul.f32 0.125, %v4186_v25  ;;  %v4232_v34 = vmul.f32 0.125, %v4189_v9  ;;  %v4293_v24 = vmul.f32 %v12232_v13, %v12232_v13  ;;  %v4294_v56 = vmul.f32 %v12235_v52, %v12235_v52 }
 0x5a9   : > { %v12244_v27 = vsub.f32 %v12067_v23, %v4231_v39  ;;  %v12247_v51 = vsub.f32 %v12061_v48, %v4232_v34  ;;  %v4371_v5 = vsel %vm15306_vm0, %v4293_v24, 0.0  ;;  %v4374_v26 = vsel %vm15328_vm11, %v4294_v56, 0.0  ;;  %vm15331_vm11 = vmmov %vm15306_vm0 }
 0x5aa   : > { %v4192_v53 = vpop.xlane.xlu0 %4191  ;;  %4372 = vadd.xlane.f32.xlu0 %v4371_v5  ;;  %4375 = vadd.xlane.f32.xlu1 %v4374_v26  ;;  %v4195_v8 = vpop.xlane.xlu1 %4194 }
 0x5ab   : > { %v4233_v44 = vmul.f32 0.125, %v4192_v53  ;;  %v4234_v33 = vmul.f32 0.125, %v4195_v8  ;;  %v4295_v45 = vmul.f32 %v12244_v27, %v12244_v27  ;;  %v4296_v23 = vmul.f32 %v12247_v51, %v12247_v51 }
 0x5ad   : > { %v12256_v11 = vsub.f32 %v12077_v38, %v4233_v44  ;;  %v12259_v48 = vsub.f32 %v12071_v58, %v4234_v33  ;;  %v4377_v63 = vsel %vm15329_vm7, %v4295_v45, 0.0  ;;  %v4380_v37 = vsel %vm15330_vm2, %v4296_v23, 0.0  ;;  %vm15332_vm7 = vmmov %vm15306_vm0 }
 0x5ae   : > { %v4198_v43 = vpop.xlane.xlu0 %4197  ;;  %4378 = vadd.xlane.f32.xlu0 %v4377_v63  ;;  %4381 = vadd.xlane.f32.xlu1 %v4380_v37  ;;  %v4201_v28 = vpop.xlane.xlu1 %4200  ;;  %vm15333_vm2 = vmmov %vm15306_vm0 }
 0x5af   : > { %v4235_v14 = vmul.f32 0.125, %v4198_v43  ;;  %v4236_v32 = vmul.f32 0.125, %v4201_v28  ;;  %v4297_v57 = vmul.f32 %v12256_v11, %v12256_v11  ;;  %v4298_v38 = vmul.f32 %v12259_v48, %v12259_v48 }
 0x5b1   : > { %v12268_v25 = vsub.f32 %v12085_v60, %v4235_v14  ;;  %v12271_v58 = vsub.f32 %v12079_v22, %v4236_v32  ;;  %v4383_v9 = vsel %vm15306_vm0, %v4297_v57, 0.0  ;;  %v4386_v39 = vsel %vm15331_vm11, %v4298_v38, 0.0 }
 0x5b2   : > { %v4204_v34 = vpop.xlane.xlu0 %4203  ;;  %4384 = vadd.xlane.f32.xlu0 %v4383_v9  ;;  %4387 = vadd.xlane.f32.xlu1 %v4386_v39  ;;  %vm15336_vm11 = vcmask 60416  }
 0x5b3   : > { %v4237_v24 = vmul.f32 0.125, %v4204_v34  ;;  %v4299_v56 = vmul.f32 %v12268_v25, %v12268_v25  ;;  %v4300_v5 = vmul.f32 %v12271_v58, %v12271_v58 }
 0x5b5   : > { %v12280_v60 = vsub.f32 %v12091_v50, %v4237_v24  ;;  %v4389_v22 = vsel %vm15332_vm7, %v4299_v56, 0.0  ;;  %v4392_v26 = vsel %vm15333_vm2, %v4300_v5, 0.0  ;;  %v12290_v24 = vld [vmem:[%s14941_s3] ss:$0 sm:$0xff]  ;;  %vm15338_vm7 = vmmov %vm15336_vm11 }
 0x5b6   : > { %4390 = vadd.xlane.f32.xlu0 %v4389_v22  ;;  %4393 = vadd.xlane.f32.xlu1 %v4392_v26  ;;  %v4736_v26 = vld [vmem:[#allocation2 + $0x1c] sm:$0x8]  ;;  %vm15339_vm2 = vmmov %vm15338_vm7 }
 0x5b7   : > { %v4301_v53 = vmul.f32 %v12280_v60, %v12280_v60 }
 0x5b9   : > { %v4395_v8 = vsel %vm15306_vm0, %v4301_v53, 0.0  ;;  %v4739_v53 = vld [vmem:[#allocation2 + $0x34] sm:$0x8]  ;;  %vm15341_vm0 = vmmov %vm15339_vm2 }
 0x5ba   : > { %4396 = vadd.xlane.f32.xlu0 %v4395_v8  ;;  %v4742_v8 = vld [vmem:[#allocation2 + $0x4c] sm:$0x8] }
 0x5ee   : > { %v4304_v44 = vpop.xlane.xlu1 %4303 }
 0x5ef   : > { %v4398_v33 = vmul.f32 0.125, %v4304_v44 }
 0x5f1   : > { %v4430_v45 = vadd.f32 1e-05, %v4398_v33 }
 0x5f3   : > { %v4307_v23 = vpop.xlane.xlu0 %4306  ;;  %9257 = vrsqrt.f32 %v4430_v45 }
 0x5f4   : > { %v4399_v63 = vmul.f32 0.125, %v4307_v23 }
 0x5f6   : > { %v4431_v50 = vadd.f32 1e-05, %v4399_v63 }
 0x5f7   : > { %v4310_v37 = vpop.xlane.xlu1 %4309 }
 0x5f8   : > { %v4400_v43 = vmul.f32 0.125, %v4310_v37  ;;  %9259 = vrsqrt.f32 %v4431_v50  ;;  %v4810_v50 = vshrl.u32 %v4736_v26, 16  ;;  %v4832_v37 = vshrl.u32 %v4739_v53, 16 }
 0x5fa   : > { %v4432_v28 = vadd.f32 1e-05, %v4400_v43  ;;  %v12306_v26 = vrot.slane %v4810_v50, 11  ;;  %v12308_v53 = vrot.slane %v4832_v37, 11 }
 0x5fc   : > { %9261 = vrsqrt.f32 %v4432_v28  ;;  %v4854_v28 = vshrl.u32 %v4742_v8, 16  ;;  %v4760_v8 = vld [vmem:[#allocation2 + $0xdc] sm:$0x8] }
 0x5fd   : > { %v4313_v14 = vpop.xlane.xlu0 %4312 }
 0x5fe   : > { %v4401_v32 = vmul.f32 0.125, %v4313_v14 }
 0x600   : > { %v4433_v57 = vadd.f32 1e-05, %v4401_v32  ;;  %v9258_v34 = vpop.eup %9257 }
 0x601   : > { %v4494_v5 = vmul.f32 %v9258_v34, %v12096_v10  ;;  %v4754_v34 = vld [vmem:[#allocation2 + $0xac] sm:$0x8] }
 0x602   : > { %v4316_v38 = vpop.xlane.xlu1 %4315  ;;  %9263 = vrsqrt.f32 %v4433_v57  ;;  %v4745_v57 = vld [vmem:[#allocation2 + $0x64] sm:$0x8]  ;;  %v4942_v29 = vshrl.u32 %v4754_v34, 16 }
 0x603   : > { %v4402_v9 = vmul.f32 0.125, %v4316_v38  ;;  %v12294_v33 = vmul.f32 %v12290_v24, %v4494_v5  ;;  %v4748_v38 = vld [vmem:[#allocation2 + $0x7c] sm:$0x8] }
 0x605   : > { %v4434_v39 = vadd.f32 1e-05, %v4402_v9  ;;  %v9260_v44 = vpop.eup %9259  ;;  %15334 = vst [vmem:[#allocation33_spill] sm:$0xff] %v12294_v33  ;;  %v8971_v43 = vpack.c.bf16 %v12294_v33, %v12294_v33  ;;  %v4751_v9 = vld [vmem:[#allocation2 + $0x94] sm:$0x8] }
 0x606   : > { %v4319_v56 = vpop.xlane.xlu0 %4318  ;;  %v4495_v23 = vmul.f32 %v9260_v44, %v12101_v61  ;;  %v4763_v44 = vld [vmem:[#allocation2 + $0xf4] sm:$0x8]  ;;  %v4920_v46 = vshrl.u32 %v4751_v9, 16 }
 0x607   : > { %9265 = vrsqrt.f32 %v4434_v39  ;;  %v4403_v22 = vmul.f32 0.125, %v4319_v56  ;;  %4701 = vst.msk [vmem:[#allocation2 + $0x20] sm:$0xf] %vm15336_vm11, %v8971_v43  ;;  %v4757_v56 = vld [vmem:[#allocation2 + $0xc4] sm:$0x8]  ;;  %vm15343_vm11 = vmmov %vm15341_vm0 }
 0x608   : > { %v12300_v32 = vmul.f32 %v12290_v24, %v4495_v23  ;;  %v4769_v43 = vld [vmem:[#allocation2 + $0x124] sm:$0x8]  ;;  %v4964_v50 = vshrl.u32 %v4757_v56, 16 }
 0x609   : > { %v4435_v45 = vadd.f32 1e-05, %v4403_v22  ;;  %v9262_v14 = vpop.eup %9261  ;;  %v5052_v49 = vshrl.u32 %v4769_v43, 16  ;;  %v12336_v43 = vld [vmem:[#allocation2 + $0x13c] sm:$0x8] }
 0x60a   : > { %v4322_v63 = vpop.xlane.xlu1 %4321  ;;  %15335 = vst [vmem:[#allocation7_spill] sm:$0xff] %v12300_v32  ;;  %v4496_v61 = vmul.f32 %v9262_v14, %v12107_v2  ;;  %v8972_v5 = vpack.c.bf16 %v12300_v32, %v12300_v32  ;;  %v4766_v2 = vld [vmem:[#allocation2 + $0x10c] sm:$0x8]  ;;  %v4898_v14 = vshrl.u32 %v4748_v38, 16 }
 0x60b   : > { %9267 = vrsqrt.f32 %v4435_v45  ;;  %v4404_v10 = vmul.f32 0.125, %v4322_v63  ;;  %v4876_v63 = vshrl.u32 %v4745_v57, 16  ;;  %v5008_v57 = vshrl.u32 %v4763_v44, 16 }
 0x60c   : > { %v12311_v45 = vmul.f32 %v12290_v24, %v4496_v61  ;;  %4702 = vst.msk [vmem:[#allocation2 + $0x24] sm:$0xf] %vm15338_vm7, %v8972_v5  ;;  %v12317_v61 = vrot.slane %v4854_v28, 11  ;;  %v5030_v19 = vshrl.u32 %v4766_v2, 16  ;;  %v12327_v28 = vrot.slane %v4920_v46, 11  ;;  %vm15345_vm7 = vmmov %vm15341_vm0 }
 0x60d   : > { %v4436_v39 = vadd.f32 1e-05, %v4404_v10  ;;  %v12323_v34 = vrot.slane %v4876_v63, 11 }
 0x60e   : > { %v4325_v22 = vpop.xlane.xlu0 %4324  ;;  %15337 = vst [vmem:[#allocation32_spill] sm:$0xff] %v12311_v45  ;;  %v8973_v37 = vpack.c.bf16 %v12311_v45, %v12311_v45  ;;  %v4737_v5 = vld [vmem:[#allocation2 + $0x20] sm:$0xf]  ;;  %v12342_v46 = vrot.slane %v5030_v19, 11 }
 0x60f   : > { %9269 = vrsqrt.f32 %v4436_v39  ;;  %v4405_v23 = vmul.f32 0.125, %v4325_v22  ;;  %v9264_v10 = vpop.eup %9263  ;;  %v4986_v22 = vshrl.u32 %v4760_v8, 16  ;;  %v12331_v8 = vrot.slane %v4964_v50, 11 }
 0x610   : > { %v4497_v42 = vmul.f32 %v9264_v10, %v12113_v62  ;;  %4703 = vst.msk [vmem:[#allocation2 + $0x38] sm:$0xf] %vm15339_vm2, %v8973_v37  ;;  %v12325_v62 = vrot.slane %v4898_v14, 11  ;;  %v12340_v14 = vrot.slane %v5008_v57, 11  ;;  %v4818_v3 = vshll.u32 %v4737_v5, 16  ;;  %vm15346_vm2 = vmmov %vm15341_vm0 }
 0x611   : > { %v4437_v55 = vadd.f32 1e-05, %v4405_v23  ;;  %v12329_v23 = vrot.slane %v4942_v29, 11  ;;  %v12338_v37 = vrot.slane %v4986_v22, 11  ;;  %v12344_v29 = vrot.slane %v5052_v49, 11 }
 0x612   : > { %v12321_v38 = vmul.f32 %v12290_v24, %v4497_v42  ;;  %v5074_v57 = vshrl.u32 %v12336_v43, 16 }
 0x613   : > { %v4328_v39 = vpop.xlane.xlu1 %4327  ;;  %9271 = vrsqrt.f32 %v4437_v55  ;;  %v4815_v55 = vshrl.u32 %v4737_v5, 16 }
 0x614   : > { %15340 = vst [vmem:[#allocation9_spill] sm:$0xff] %v12321_v38  ;;  %v4406_v9 = vmul.f32 0.125, %v4328_v39  ;;  %v9266_v56 = vpop.eup %9265  ;;  %v8974_v44 = vpack.c.bf16 %v12321_v38, %v12321_v38 }
 0x615   : > { %v4498_v42 = vmul.f32 %v9266_v56, %v12119_v18  ;;  %v4817_v30 = vrot.slane %v4815_v55, 7 }
 0x616   : > { %v4438_v2 = vadd.f32 1e-05, %v4406_v9  ;;  %4704 = vst.msk [vmem:[#allocation2 + $0x3c] sm:$0xf] %vm15341_vm0, %v8974_v44  ;;  %v4738_v9 = vld [vmem:[#allocation2 + $0x24] sm:$0xf] }
 0x617   : > { %v4331_v63 = vpop.xlane.xlu0 %4330  ;;  %v4334_v10 = vpop.xlane.xlu1 %4333  ;;  %v12348_v50 = vmul.f32 %v12290_v24, %v4498_v42  ;;  %v4824_v22 = vshrl.u32 %v4738_v9, 16  ;;  %v4820_v38 = vor.u32 %v4818_v3, %v4817_v30  ;;  %v4740_v45 = vld [vmem:[#allocation2 + $0x38] sm:$0xf] }
 0x618   : > { %9273 = vrsqrt.f32 %v4438_v2  ;;  %v4407_v18 = vmul.f32 0.125, %v4331_v63  ;;  %v4408_v39 = vmul.f32 0.125, %v4334_v10  ;;  %v9268_v56 = vpop.eup %9267  ;;  %v4822_v2 = vrot.slane %v4817_v30, 4 }
 0x619   : > { %15342 = vst [vmem:[#allocation34_spill] sm:$0xff] %v12348_v50  ;;  %v8975_v19 = vpack.c.bf16 %v12348_v50, %v12348_v50  ;;  %v4499_v49 = vmul.f32 %v9268_v56, %v12125_v47  ;;  %v4826_v63 = vrot.slane %v4824_v22, 7  ;;  %v4827_v10 = vshll.u32 %v4738_v9, 16  ;;  %v4775_v50 = vld [vmem:[#allocation2 + $0x154] sm:$0x8] }
 0x61a   : > { %v4439_v12 = vadd.f32 1e-05, %v4407_v18  ;;  %v4440_v44 = vadd.f32 1e-05, %v4408_v39  ;;  %v4821_v18 = vsel %vm9694_vm3, %v12306_v26, %v4820_v38  ;;  %v4837_v30 = vshrl.u32 %v4740_v45, 16 }
 0x61b   : > { %v4337_v32 = vpop.xlane.xlu0 %4336  ;;  %v4340_v42 = vpop.xlane.xlu1 %4339  ;;  %4705 = vst.msk [vmem:[#allocation2 + $0x50] sm:$0xf] %vm15343_vm11, %v8975_v19  ;;  %v12356_v5 = vmul.f32 %v12290_v24, %v4499_v49  ;;  %v4829_v3 = vor.u32 %v4827_v10, %v4826_v63  ;;  %5225 = vrot.lane.b32.xlu1 %v4821_v18, %s9522_s25  ;;  %v4840_v26 = vshll.u32 %v4740_v45, 16  ;;  %vm15347_vm11 = vmmov %vm15341_vm0  ;;  %v12904_v47 = vld [vmem:[#allocation2 + $0x24] sm:$0xf] }
 0x61c   : > { %9275 = vrsqrt.f32 %v4439_v12  ;;  %v4409_v55 = vmul.f32 0.125, %v4337_v32  ;;  %v4410_v43 = vmul.f32 0.125, %v4340_v42  ;;  %v9270_v33 = vpop.eup %9269  ;;  %5173 = vst.msk [vmem:[#allocation3 + $0x8] sm:$0xf] %vm15345_vm7, %v4821_v18  ;;  %v4839_v49 = vrot.slane %v4837_v30, 7  ;;  %vm15348_vm7 = vmmov %vm15341_vm0 }
 0x61d   : > { %9277 = vrsqrt.f32 %v4440_v44  ;;  %v8976_v39 = vpack.c.bf16 %v12356_v5, %v12356_v5  ;;  %v4500_v9 = vmul.f32 %v9270_v33, %v12131_v17  ;;  %v4830_v19 = vsel %vm9694_vm3, %v4822_v2, %v4829_v3  ;;  %v4741_v38 = vld [vmem:[#allocation2 + $0x3c] sm:$0xf] }
 0x61e   : > { %v4441_v56 = vadd.f32 1e-05, %v4409_v55  ;;  %v4442_v22 = vadd.f32 1e-05, %v4410_v43  ;;  %v5096_v44 = vshrl.u32 %v4775_v50, 16  ;;  %5227 = vrot.lane.b32.xlu0 %v4830_v19, %s9522_s25  ;;  %v4842_v10 = vor.u32 %v4840_v26, %v4839_v49 }
 0x61f   : > { %v4343_v12 = vpop.xlane.xlu0 %4342  ;;  %v4346_v32 = vpop.xlane.xlu1 %4345  ;;  %4706 = vst.msk [vmem:[#allocation2 + $0x54] sm:$0xf] %vm15346_vm2, %v8976_v39  ;;  %v12370_v42 = vmul.f32 %v12290_v24, %v4500_v9  ;;  %v4846_v2 = vshrl.u32 %v4741_v38, 16  ;;  %v12374_v55 = vrot.slane %v5074_v57, 11  ;;  %v4844_v26 = vrot.slane %v4839_v49, 4  ;;  %vm15349_vm2 = vmmov %vm15341_vm0 }
 0x620   : > { %9279 = vrsqrt.f32 %v4441_v56  ;;  %v4411_v17 = vmul.f32 0.125, %v4343_v12  ;;  %v4412_v33 = vmul.f32 0.125, %v4346_v32  ;;  %5174 = vst.msk [vmem:[#allocation3 + $0xc] sm:$0xf] %vm15341_vm0, %v4830_v19  ;;  %v9272_v63 = vpop.eup %9271  ;;  %v12382_v30 = vsel %vm9694_vm3, %v12308_v53, %v4842_v10  ;;  %v12394_v32 = vld [vmem:[#allocation2 + $0x16c] sm:$0x8] }
 0x621   : > { %9281 = vrsqrt.f32 %v4442_v22  ;;  %v8977_v45 = vpack.c.bf16 %v12370_v42, %v12370_v42  ;;  %v4501_v50 = vmul.f32 %v9272_v63, %v12137_v21  ;;  %v4848_v9 = vrot.slane %v4846_v2, 7  ;;  %5229 = vrot.lane.b32.xlu1 %v12382_v30, %s9522_s25  ;;  %5175 = vst.msk [vmem:[#allocation3 + $0x10] sm:$0xf] %vm15348_vm7, %v12382_v30  ;;  %vm15351_vm7 = vmmov %vm15341_vm0 }
 0x622   : > { %v4443_v43 = vadd.f32 1e-05, %v4411_v17  ;;  %v4444_v18 = vadd.f32 1e-05, %v4412_v33  ;;  %v4849_v56 = vshll.u32 %v4741_v38, 16  ;;  %v12384_v12 = vrot.slane %v5096_v44, 11 }
 0x623   : > { %v4349_v3 = vpop.xlane.xlu0 %4348  ;;  %v4352_v39 = vpop.xlane.xlu1 %4351  ;;  %v4743_v22 = vld [vmem:[#allocation2 + $0x50] sm:$0xf]  ;;  %4707 = vst.msk [vmem:[#allocation2 + $0x68] sm:$0xf] %vm15347_vm11, %v8977_v45  ;;  %v12388_v57 = vmul.f32 %v12290_v24, %v4501_v50  ;;  %vm15350_vm11 = vmmov %vm15341_vm0 }
 0x624   : > { %9283 = vrsqrt.f32 %v4443_v43  ;;  %v4413_v21 = vmul.f32 0.125, %v4349_v3  ;;  %v4414_v53 = vmul.f32 0.125, %v4352_v39  ;;  %v4851_v38 = vor.u32 %v4849_v56, %v4848_v9 }
 0x625   : > { %v9274_v19 = vpop.eup %9273  ;;  %9285 = vrsqrt.f32 %v4444_v18  ;;  %v4859_v44 = vshrl.u32 %v4743_v22, 16  ;;  %v8978_v17 = vpack.c.bf16 %v12388_v57, %v12388_v57  ;;  %v4862_v3 = vshll.u32 %v4743_v22, 16 }
 0x626   : > { %v4502_v33 = vmul.f32 %v9274_v19, %v12143_v7  ;;  %v4445_v63 = vadd.f32 1e-05, %v4413_v21  ;;  %v4446_v10 = vadd.f32 1e-05, %v4414_v53  ;;  %v12401_v45 = vsel %vm9694_vm3, %v4844_v26, %v4851_v38  ;;  %v4744_v39 = vld [vmem:[#allocation2 + $0x54] sm:$0xf] }
 0x627   : > { %v4355_v2 = vpop.xlane.xlu0 %4354  ;;  %v4358_v50 = vpop.xlane.xlu1 %4357  ;;  %v4861_v43 = vrot.slane %v4859_v44, 7  ;;  %4708 = vst.msk [vmem:[#allocation2 + $0x6c] sm:$0xf] %vm15349_vm2, %v8978_v17  ;;  %5231 = vrot.lane.b32.xlu1 %v12401_v45, %s9522_s25  ;;  %v4868_v53 = vshrl.u32 %v4744_v39, 16  ;;  %vm15353_vm2 = vmmov %vm15341_vm0 }
 0x628   : > { %v12406_v18 = vmul.f32 %v12290_v24, %v4502_v33  ;;  %9287 = vrsqrt.f32 %v4445_v63  ;;  %v4415_v7 = vmul.f32 0.125, %v4355_v2  ;;  %5176 = vst.msk [vmem:[#allocation3 + $0x14] sm:$0xf] %vm15341_vm0, %v12401_v45  ;;  %v4416_v9 = vmul.f32 0.125, %v4358_v50 }
 0x629   : > { %v9276_v56 = vpop.eup %9275  ;;  %9289 = vrsqrt.f32 %v4446_v10  ;;  %v4864_v22 = vor.u32 %v4862_v3, %v4861_v43  ;;  %v4866_v21 = vrot.slane %v4861_v43, 4  ;;  %v4870_v50 = vrot.slane %v4868_v53, 7 }
 0x62a   : > { %v9278_v19 = vpop.eup %9277  ;;  %v8979_v26 = vpack.c.bf16 %v12406_v18, %v12406_v18  ;;  %v4503_v38 = vmul.f32 %v9276_v56, %v12149_v36  ;;  %v4447_v44 = vadd.f32 1e-05, %v4415_v7  ;;  %v4448_v17 = vadd.f32 1e-05, %v4416_v9  ;;  %v4746_v3 = vld [vmem:[#allocation2 + $0x68] sm:$0xf] }
 0x62b   : > { %v4504_v33 = vmul.f32 %v9278_v19, %v12152_v54  ;;  %v4361_v63 = vpop.xlane.xlu0 %4360  ;;  %v12419_v2 = vsel %vm9694_vm3, %v12317_v61, %v4864_v22  ;;  %v4364_v10 = vpop.xlane.xlu1 %4363  ;;  %v4871_v43 = vshll.u32 %v4744_v39, 16  ;;  %v4881_v9 = vshrl.u32 %v4746_v3, 16 }
 0x62c   : > { %4709 = vst.msk [vmem:[#allocation2 + $0x80] sm:$0xf] %vm15350_vm11, %v8979_v26  ;;  %v12423_v49 = vmul.f32 %v12290_v24, %v4503_v38  ;;  %9291 = vrsqrt.f32 %v4447_v44  ;;  %v4417_v36 = vmul.f32 0.125, %v4361_v63  ;;  %5233 = vrot.lane.b32.xlu0 %v12419_v2, %s9522_s25  ;;  %v4418_v54 = vmul.f32 0.125, %v4364_v10  ;;  %vm15354_vm11 = vmmov %vm15341_vm0 }
 0x62d   : > { %5177 = vst.msk [vmem:[#allocation3 + $0x18] sm:$0xf] %vm15351_vm7, %v12419_v2  ;;  %v9280_v61 = vpop.eup %9279  ;;  %v12430_v7 = vmul.f32 %v12290_v24, %v4504_v33  ;;  %9293 = vrsqrt.f32 %v4448_v17  ;;  %v4873_v39 = vor.u32 %v4871_v43, %v4870_v50  ;;  %v12442_v10 = vrot.slane %v4881_v9, 7  ;;  %vm15355_vm7 = vmmov %vm15341_vm0 }
 0x62e   : > { %v9282_v56 = vpop.eup %9281  ;;  %v8980_v22 = vpack.c.bf16 %v12423_v49, %v12423_v49  ;;  %v4505_v53 = vmul.f32 %v9280_v61, %v12160_v20  ;;  %v4449_v19 = vadd.f32 1e-05, %v4417_v36  ;;  %v4450_v26 = vadd.f32 1e-05, %v4418_v54  ;;  %v4747_v43 = vld [vmem:[#allocation2 + $0x6c] sm:$0xf] }
 0x62f   : > { %15352 = vst [vmem:[#allocation8_spill] sm:$0xff] %v12430_v7  ;;  %v8981_v38 = vpack.c.bf16 %v12430_v7, %v12430_v7  ;;  %v4506_v44 = vmul.f32 %v9282_v56, %v12163_v59  ;;  %v4367_v63 = vpop.xlane.xlu0 %4366  ;;  %v12440_v33 = vsel %vm9694_vm3, %v4866_v21, %v4873_v39  ;;  %v4370_v17 = vpop.xlane.xlu1 %4369  ;;  %v4884_v54 = vshll.u32 %v4746_v3, 16 }
 0x630   : > { %4710 = vst.msk [vmem:[#allocation2 + $0x84] sm:$0xf] %vm15353_vm2, %v8980_v22  ;;  %v12446_v50 = vmul.f32 %v12290_v24, %v4505_v53  ;;  %9295 = vrsqrt.f32 %v4449_v19  ;;  %v4419_v20 = vmul.f32 0.125, %v4367_v63  ;;  %5235 = vrot.lane.b32.xlu1 %v12440_v33, %s9522_s25  ;;  %v4420_v59 = vmul.f32 0.125, %v4370_v17  ;;  %vm15356_vm2 = vmmov %vm15341_vm0 }
 0x631   : > { %5178 = vst.msk [vmem:[#allocation3 + $0x1c] sm:$0xf] %vm15341_vm0, %v12440_v33  ;;  %v9284_v21 = vpop.eup %9283  ;;  %v12454_v36 = vmul.f32 %v12290_v24, %v4506_v44  ;;  %9297 = vrsqrt.f32 %v4450_v26  ;;  %v4888_v61 = vrot.slane %v12442_v10, 4  ;;  %v4886_v44 = vor.u32 %v4884_v54, %v12442_v10 }
 0x632   : > { %4711 = vst.msk [vmem:[#allocation2 + $0x98] sm:$0xf] %vm15354_vm11, %v8981_v38  ;;  %v9286_v39 = vpop.eup %9285  ;;  %v8982_v9 = vpack.c.bf16 %v12446_v50, %v12446_v50  ;;  %v4507_v56 = vmul.f32 %v9284_v21, %v12172_v16  ;;  %v4451_v22 = vadd.f32 1e-05, %v4419_v20  ;;  %v4452_v53 = vadd.f32 1e-05, %v4420_v59  ;;  %vm15357_vm11 = vmmov %vm15341_vm0 }
 0x633   : > { %v8983_v19 = vpack.c.bf16 %v12454_v36, %v12454_v36  ;;  %v4508_v38 = vmul.f32 %v9286_v39, %v12175_v6  ;;  %v4373_v63 = vpop.xlane.xlu0 %4372  ;;  %v4376_v26 = vpop.xlane.xlu1 %4375  ;;  %v4890_v3 = vshrl.u32 %v4747_v43, 16  ;;  %v4749_v20 = vld [vmem:[#allocation2 + $0x80] sm:$0xf]  ;;  %v12475_v6 = vsel %vm9694_vm3, %v12323_v34, %v4886_v44 }
 0x634   : > { %4712 = vst.msk [vmem:[#allocation2 + $0x9c] sm:$0xf] %vm15355_vm7, %v8982_v9  ;;  %v12466_v17 = vmul.f32 %v12290_v24, %v4507_v56  ;;  %9299 = vrsqrt.f32 %v4451_v22  ;;  %v4421_v7 = vmul.f32 0.125, %v4373_v63  ;;  %v4422_v16 = vmul.f32 0.125, %v4376_v26  ;;  %5237 = vrot.lane.b32.xlu0 %v12475_v6, %s9522_s25  ;;  %vm15358_vm7 = vmmov %vm15341_vm0 }
 0x635   : > { %v9288_v59 = vpop.eup %9287  ;;  %4713 = vst.msk [vmem:[#allocation2 + $0xb0] sm:$0xf] %vm15356_vm2, %v8983_v19  ;;  %v12470_v21 = vmul.f32 %v12290_v24, %v4508_v38  ;;  %9301 = vrsqrt.f32 %v4452_v53  ;;  %v4892_v10 = vrot.slane %v4890_v3, 7  ;;  %v4893_v38 = vshll.u32 %v4747_v43, 16  ;;  %vm15360_vm2 = vmmov %vm15341_vm0 }
 0x636   : > { %v9290_v54 = vpop.eup %9289  ;;  %v8984_v39 = vpack.c.bf16 %v12466_v17, %v12466_v17  ;;  %v4509_v9 = vmul.f32 %v9288_v59, %v12184_v4  ;;  %v4453_v56 = vadd.f32 1e-05, %v4421_v7  ;;  %5179 = vst.msk [vmem:[#allocation3 + $0x20] sm:$0xf] %vm15341_vm0, %v12475_v6  ;;  %v4454_v22 = vadd.f32 1e-05, %v4422_v16 }
 0x637   : > { %v8985_v53 = vpack.c.bf16 %v12470_v21, %v12470_v21  ;;  %v4510_v34 = vmul.f32 %v9290_v54, %v12187_v15  ;;  %v4379_v19 = vpop.xlane.xlu0 %4378  ;;  %v4382_v63 = vpop.xlane.xlu1 %4381  ;;  %v4903_v44 = vshrl.u32 %v4749_v20, 16  ;;  %v4895_v15 = vor.u32 %v4893_v38, %v4892_v10 }
 0x638   : > { %4714 = vst.msk [vmem:[#allocation2 + $0xb4] sm:$0xf] %vm15357_vm11, %v8984_v39  ;;  %v12489_v4 = vmul.f32 %v12290_v24, %v4509_v9  ;;  %9303 = vrsqrt.f32 %v4453_v56  ;;  %v4423_v7 = vmul.f32 0.125, %v4379_v19  ;;  %v4424_v26 = vmul.f32 0.125, %v4382_v63  ;;  %vm15361_vm11 = vmmov %vm15341_vm0 }
 0x639   : > { %v9292_v3 = vpop.eup %9291  ;;  %4715 = vst.msk [vmem:[#allocation2 + $0xc8] sm:$0xf] %vm15358_vm7, %v8985_v53  ;;  %v12493_v16 = vmul.f32 %v12290_v24, %v4510_v34  ;;  %9305 = vrsqrt.f32 %v4454_v22  ;;  %v12495_v59 = vrot.slane %v4903_v44, 7  ;;  %v12505_v34 = vsel %vm9694_vm3, %v4888_v61, %v4895_v15  ;;  %v4750_v44 = vld [vmem:[#allocation2 + $0x84] sm:$0xf]  ;;  %vm15363_vm7 = vmmov %vm15341_vm0 }
 0x63a   : > { %v9294_v43 = vpop.eup %9293  ;;  %v8986_v54 = vpack.c.bf16 %v12489_v4, %v12489_v4  ;;  %v4511_v39 = vmul.f32 %v9292_v3, %v12196_v40  ;;  %v4455_v9 = vadd.f32 1e-05, %v4423_v7  ;;  %v4456_v56 = vadd.f32 1e-05, %v4424_v26  ;;  %5239 = vrot.lane.b32.xlu1 %v12505_v34, %s9522_s25  ;;  %5180 = vst.msk [vmem:[#allocation3 + $0x24] sm:$0xf] %vm15341_vm0, %v12505_v34 }
 0x63b   : > { %15359 = vst [vmem:[#allocation35_spill] sm:$0xff] %v12493_v16  ;;  %v8987_v19 = vpack.c.bf16 %v12493_v16, %v12493_v16  ;;  %v4512_v53 = vmul.f32 %v9294_v43, %v12199_v0  ;;  %v4385_v10 = vpop.xlane.xlu0 %4384  ;;  %v4906_v22 = vshll.u32 %v4749_v20, 16  ;;  %v4388_v38 = vpop.xlane.xlu1 %4387  ;;  %v4910_v26 = vrot.slane %v12495_v59, 4  ;;  %v4753_v16 = vld [vmem:[#allocation2 + $0x9c] sm:$0xf] }
 0x63c   : > { %4716 = vst.msk [vmem:[#allocation2 + $0xcc] sm:$0xf] %vm15360_vm2, %v8986_v54  ;;  %v12509_v63 = vmul.f32 %v12290_v24, %v4511_v39  ;;  %9307 = vrsqrt.f32 %v4455_v9  ;;  %v4425_v40 = vmul.f32 0.125, %v4385_v10  ;;  %v4426_v0 = vmul.f32 0.125, %v4388_v38  ;;  %v4752_v9 = vld [vmem:[#allocation2 + $0x98] sm:$0xf]  ;;  %vm15365_vm2 = vmmov %vm15341_vm0 }
 0x63d   : > { %v9296_v61 = vpop.eup %9295  ;;  %4717 = vst.msk [vmem:[#allocation2 + $0xe0] sm:$0xf] %vm15361_vm11, %v8987_v19  ;;  %v12517_v20 = vmul.f32 %v12290_v24, %v4512_v53  ;;  %9309 = vrsqrt.f32 %v4456_v56  ;;  %v4908_v7 = vor.u32 %v4906_v22, %v12495_v59  ;;  %v4912_v10 = vshrl.u32 %v4750_v44, 16  ;;  %vm15366_vm11 = vmmov %vm15341_vm0 }
 0x63e   : > { %v9298_v3 = vpop.eup %9297  ;;  %v8988_v15 = vpack.c.bf16 %v12509_v63, %v12509_v63  ;;  %v4513_v43 = vmul.f32 %v9296_v61, %v12208_v1  ;;  %v4457_v54 = vadd.f32 1e-05, %v4425_v40  ;;  %v4458_v39 = vadd.f32 1e-05, %v4426_v0 }
 0x63f   : > { %15362 = vst [vmem:[#allocation11_spill] sm:$0xff] %v12517_v20  ;;  %v8989_v19 = vpack.c.bf16 %v12517_v20, %v12517_v20  ;;  %v4514_v53 = vmul.f32 %v9298_v3, %v12211_v35  ;;  %v12530_v56 = vsel %vm9694_vm3, %v12325_v62, %v4908_v7  ;;  %v4391_v59 = vpop.xlane.xlu0 %4390  ;;  %v4915_v35 = vshll.u32 %v4750_v44, 16  ;;  %v4394_v61 = vpop.xlane.xlu1 %4393 }
 0x640   : > { %4718 = vst.msk [vmem:[#allocation2 + $0xe4] sm:$0xf] %vm15363_vm7, %v8988_v15  ;;  %v12534_v22 = vmul.f32 %v12290_v24, %v4513_v43  ;;  %9311 = vrsqrt.f32 %v4457_v54  ;;  %5241 = vrot.lane.b32.xlu0 %v12530_v56, %s9522_s25  ;;  %v4427_v1 = vmul.f32 0.125, %v4391_v59  ;;  %v4914_v40 = vrot.slane %v4912_v10, 7  ;;  %vm15367_vm7 = vmmov %vm15341_vm0 }
 0x641   : > { %5181 = vst.msk [vmem:[#allocation3 + $0x28] sm:$0xf] %vm15365_vm2, %v12530_v56  ;;  %v9300_v38 = vpop.eup %9299  ;;  %v12542_v62 = vmul.f32 %v12290_v24, %v4514_v53  ;;  %9313 = vrsqrt.f32 %v4458_v39  ;;  %v4925_v0 = vshrl.u32 %v4752_v9, 16  ;;  %v4928_v54 = vshll.u32 %v4752_v9, 16  ;;  %vm15369_vm2 = vmmov %vm15341_vm0 }
 0x642   : > { %15364 = vst [vmem:[#allocation36_spill] sm:$0xff] %v12534_v22  ;;  %4719 = vst.msk [vmem:[#allocation2 + $0xf8] sm:$0xf] %vm15341_vm0, %v8989_v19  ;;  %v9302_v7 = vpop.eup %9301  ;;  %v8990_v3 = vpack.c.bf16 %v12534_v22, %v12534_v22  ;;  %v4515_v15 = vmul.f32 %v9300_v38, %v12220_v41  ;;  %v4459_v43 = vadd.f32 1e-05, %v4427_v1  ;;  %v4917_v59 = vor.u32 %v4915_v35, %v4914_v40 }
 0x643   : > { %v8991_v44 = vpack.c.bf16 %v12542_v62, %v12542_v62  ;;  %v4516_v19 = vmul.f32 %v9302_v7, %v12223_v31  ;;  %v4927_v53 = vrot.slane %v4925_v0, 7  ;;  %v4397_v20 = vpop.xlane.xlu0 %4396  ;;  %v4428_v10 = vmul.f32 0.125, %v4394_v61  ;;  %v4755_v38 = vld [vmem:[#allocation2 + $0xb0] sm:$0xf] }
 0x644   : > { %4720 = vst.msk [vmem:[#allocation2 + $0xfc] sm:$0xf] %vm15366_vm11, %v8990_v3  ;;  %v12552_v39 = vmul.f32 %v12290_v24, %v4515_v15  ;;  %9315 = vrsqrt.f32 %v4459_v43  ;;  %v4429_v22 = vmul.f32 0.125, %v4397_v20  ;;  %v12560_v31 = vsel %vm9694_vm3, %v4910_v26, %v4917_v59  ;;  %vm15370_vm11 = vmmov %vm15341_vm0 }
 0x645   : > { %v9304_v41 = vpop.eup %9303  ;;  %4721 = vst.msk [vmem:[#allocation2 + $0x110] sm:$0xf] %vm15367_vm7, %v8991_v44  ;;  %v12556_v9 = vmul.f32 %v12290_v24, %v4516_v19  ;;  %v4930_v1 = vor.u32 %v4928_v54, %v4927_v53  ;;  %v4932_v35 = vrot.slane %v4927_v53, 4  ;;  %5243 = vrot.lane.b32.xlu1 %v12560_v31, %s9522_s25  ;;  %v4460_v61 = vadd.f32 1e-05, %v4428_v10  ;;  %vm15371_vm7 = vmmov %vm15341_vm0 }
 0x646   : > { %v9306_v40 = vpop.eup %9305  ;;  %v8992_v0 = vpack.c.bf16 %v12552_v39, %v12552_v39  ;;  %v4517_v20 = vmul.f32 %v9304_v41, %v12232_v13  ;;  %5182 = vst.msk [vmem:[#allocation3 + $0x2c] sm:$0xf] %vm15369_vm2, %v12560_v31  ;;  %v4461_v7 = vadd.f32 1e-05, %v4429_v22  ;;  %v4934_v43 = vshrl.u32 %v4753_v16, 16  ;;  %vm15373_vm2 = vmmov %vm15341_vm0 }
 0x647   : > { %15368 = vst [vmem:[#allocation13_spill] sm:$0xff] %v12556_v9  ;;  %v8993_v26 = vpack.c.bf16 %v12556_v9, %v12556_v9  ;;  %v4518_v3 = vmul.f32 %v9306_v40, %v12235_v52  ;;  %v12575_v15 = vsel %vm9694_vm3, %v12327_v28, %v4930_v1  ;;  %v4756_v13 = vld [vmem:[#allocation2 + $0xb4] sm:$0xf]  ;;  %9317 = vrsqrt.f32 %v4460_v61  ;;  %v4759_v9 = vld [vmem:[#allocation2 + $0xcc] sm:$0xf] }
 0x648   : > { %4722 = vst.msk [vmem:[#allocation2 + $0x114] sm:$0xf] %vm15341_vm0, %v8992_v0  ;;  %v12579_v54 = vmul.f32 %v12290_v24, %v4517_v20  ;;  %5245 = vrot.lane.b32.xlu0 %v12575_v15, %s9522_s25  ;;  %v4937_v52 = vshll.u32 %v4753_v16, 16  ;;  %v4947_v22 = vshrl.u32 %v4755_v38, 16  ;;  %9319 = vrsqrt.f32 %v4461_v7  ;;  %v4758_v0 = vld [vmem:[#allocation2 + $0xc8] sm:$0xf] }
 0x649   : > { %5183 = vst.msk [vmem:[#allocation3 + $0x30] sm:$0xf] %vm15370_vm11, %v12575_v15  ;;  %v9308_v44 = vpop.eup %9307  ;;  %v12587_v28 = vmul.f32 %v12290_v24, %v4518_v3  ;;  %v4936_v19 = vrot.slane %v4934_v43, 7  ;;  %v4950_v59 = vshll.u32 %v4755_v38, 16  ;;  %v4956_v40 = vshrl.u32 %v4756_v13, 16  ;;  %vm15376_vm11 = vmmov %vm15341_vm0 }
 0x64a   : > { %4723 = vst.msk [vmem:[#allocation2 + $0x128] sm:$0xf] %vm15371_vm7, %v8993_v26  ;;  %v9310_v53 = vpop.eup %9309  ;;  %v8994_v10 = vpack.c.bf16 %v12579_v54, %v12579_v54  ;;  %v4519_v41 = vmul.f32 %v9308_v44, %v12244_v27  ;;  %v4949_v1 = vrot.slane %v4947_v22, 7  ;;  %v4959_v26 = vshll.u32 %v4756_v13, 16  ;;  %v4761_v44 = vld [vmem:[#allocation2 + $0xe0] sm:$0xf]  ;;  %vm15377_vm7 = vmmov %vm15341_vm0 }
 0x64b   : > { %15372 = vst [vmem:[#allocation37_spill] sm:$0xff] %v12587_v28  ;;  %v8995_v16 = vpack.c.bf16 %v12587_v28, %v12587_v28  ;;  %v4520_v20 = vmul.f32 %v9310_v53, %v12247_v51  ;;  %v4939_v61 = vor.u32 %v4937_v52, %v4936_v19  ;;  %v4958_v43 = vrot.slane %v4956_v40, 7 }
 0x64c   : > { %4724 = vst.msk [vmem:[#allocation2 + $0x12c] sm:$0xf] %vm15373_vm2, %v8994_v10  ;;  %v12597_v38 = vmul.f32 %v12290_v24, %v4519_v41  ;;  %v4952_v7 = vor.u32 %v4950_v59, %v4949_v1  ;;  %v4954_v3 = vrot.slane %v4949_v1, 4  ;;  %v4969_v13 = vshrl.u32 %v4758_v0, 16  ;;  %vm15378_vm2 = vmmov %vm15341_vm0 }
 0x64d   : > { %v9312_v27 = vpop.eup %9311  ;;  %4725 = vst.msk [vmem:[#allocation2 + $0x140] sm:$0xf] %vm15341_vm0, %v8995_v16  ;;  %v12601_v22 = vmul.f32 %v12290_v24, %v4520_v20  ;;  %v12605_v51 = vsel %vm9694_vm3, %v4932_v35, %v4939_v61  ;;  %v4972_v52 = vshll.u32 %v4758_v0, 16  ;;  %v4961_v10 = vor.u32 %v4959_v26, %v4958_v43 }
 0x64e   : > { %15374 = vst [vmem:[#allocation10_spill] sm:$0xff] %v12597_v38  ;;  %v9314_v19 = vpop.eup %9313  ;;  %v8996_v59 = vpack.c.bf16 %v12597_v38, %v12597_v38  ;;  %v4521_v53 = vmul.f32 %v9312_v27, %v12256_v11  ;;  %5247 = vrot.lane.b32.xlu1 %v12605_v51, %s9522_s25  ;;  %5184 = vst.msk [vmem:[#allocation3 + $0x34] sm:$0xf] %vm15376_vm11, %v12605_v51  ;;  %v12617_v35 = vsel %vm9694_vm3, %v12329_v23, %v4952_v7 }
 0x64f   : > { %15375 = vst [vmem:[#allocation38_spill] sm:$0xff] %v12601_v22  ;;  %v8997_v41 = vpack.c.bf16 %v12601_v22, %v12601_v22  ;;  %v4522_v1 = vmul.f32 %v9314_v19, %v12259_v48  ;;  %5249 = vrot.lane.b32.xlu0 %v12617_v35, %s9522_s25  ;;  %5185 = vst.msk [vmem:[#allocation3 + $0x38] sm:$0xf] %vm15377_vm7, %v12617_v35  ;;  %v4971_v11 = vrot.slane %v4969_v13, 7  ;;  %v4978_v40 = vshrl.u32 %v4759_v9, 16 }
 0x650   : > { %4726 = vst.msk [vmem:[#allocation2 + $0x144] sm:$0xf] %vm15378_vm2, %v8996_v59  ;;  %v12628_v0 = vmul.f32 %v12290_v24, %v4521_v53  ;;  %v12632_v23 = vsel %vm9694_vm3, %v4954_v3, %v4961_v10  ;;  %v4981_v16 = vshll.u32 %v4759_v9, 16  ;;  %v4991_v20 = vshrl.u32 %v4761_v44, 16  ;;  %v4762_v48 = vld [vmem:[#allocation2 + $0xe4] sm:$0xf]  ;;  %vm15381_vm11 = vmmov %vm15341_vm0 }
 0x651   : > { %v9316_v61 = vpop.eup %9315  ;;  %4727 = vst.msk [vmem:[#allocation2 + $0x158] sm:$0xf] %vm15341_vm0, %v8997_v41  ;;  %v12636_v26 = vmul.f32 %v12290_v24, %v4522_v1  ;;  %v4974_v7 = vor.u32 %v4972_v52, %v4971_v11  ;;  %v4976_v43 = vrot.slane %v4971_v11, 4  ;;  %v4980_v27 = vrot.slane %v4978_v40, 7  ;;  %v4764_v59 = vld [vmem:[#allocation2 + $0xf8] sm:$0xf]  ;;  %vm15382_vm7 = vmmov %vm15341_vm0 }
 0x652   : > { %15379 = vst [vmem:[#allocation12_spill] sm:$0xff] %v12628_v0  ;;  %5186 = vst.msk [vmem:[#allocation3 + $0x3c] sm:$0xf] %vm15381_vm11, %v12632_v23  ;;  %v8998_v13 = vpack.c.bf16 %v12628_v0, %v12628_v0  ;;  %v4523_v3 = vmul.f32 %v9316_v61, %v12268_v25  ;;  %5251 = vrot.lane.b32.xlu1 %v12632_v23, %s9522_s25  ;;  %v4993_v9 = vrot.slane %v4991_v20, 7  ;;  %v4994_v19 = vshll.u32 %v4761_v44, 16 }
 0x653   : > { %15380 = vst [vmem:[#allocation39_spill] sm:$0xff] %v12636_v26  ;;  %v8999_v53 = vpack.c.bf16 %v12636_v26, %v12636_v26  ;;  %v12650_v52 = vsel %vm9694_vm3, %v12331_v8, %v4974_v7  ;;  %v4983_v10 = vor.u32 %v4981_v16, %v4980_v27  ;;  %v5000_v41 = vshrl.u32 %v4762_v48, 16  ;;  %v4765_v1 = vld [vmem:[#allocation2 + $0xfc] sm:$0xf]  ;;  %vm15384_vm2 = vmmov %vm15341_vm0  ;;  %v4767_v27 = vld [vmem:[#allocation2 + $0x110] sm:$0xf] }
 0x654   : > { %4728 = vst.msk [vmem:[#allocation2 + $0x15c] sm:$0xf] %vm15382_vm7, %v8998_v13  ;;  %v12654_v25 = vmul.f32 %v12290_v24, %v4523_v3  ;;  %5253 = vrot.lane.b32.xlu0 %v12650_v52, %s9522_s25  ;;  %v4996_v44 = vor.u32 %v4994_v19, %v4993_v9  ;;  %v4998_v11 = vrot.slane %v4993_v9, 4  ;;  %v5003_v40 = vshll.u32 %v4762_v48, 16  ;;  %v9318_v20 = vpop.eup %9317  ;;  %vm15385_vm11 = vmmov %vm15341_vm0 }
 0x655   : > { %5187 = vst.msk [vmem:[#allocation3 + $0x40] sm:$0xf] %vm15384_vm2, %v12650_v52  ;;  %v12663_v8 = vsel %vm9694_vm3, %v4976_v43, %v4983_v10  ;;  %v5002_v16 = vrot.slane %v5000_v41, 7  ;;  %v5013_v61 = vshrl.u32 %v4764_v59, 16  ;;  %v5016_v7 = vshll.u32 %v4764_v59, 16  ;;  %v9320_v13 = vpop.eup %9319  ;;  %vm15386_vm7 = vmmov %vm15341_vm0 }
 0x656   : > { %15383 = vst [vmem:[#allocation15_spill] sm:$0xff] %v12654_v25  ;;  %4729 = vst.msk [vmem:[#allocation2 + $0x170] sm:$0xf] %vm15341_vm0, %v8999_v53  ;;  %v9000_v3 = vpack.c.bf16 %v12654_v25, %v12654_v25  ;;  %v4524_v26 = vmul.f32 %v9318_v20, %v12271_v58  ;;  %5255 = vrot.lane.b32.xlu1 %v12663_v8, %s9522_s25  ;;  %v12675_v48 = vsel %vm9694_vm3, %v12338_v37, %v4996_v44  ;;  %v4768_v53 = vld [vmem:[#allocation2 + $0x114] sm:$0xf] }
 0x657   : > { %5188 = vst.msk [vmem:[#allocation3 + $0x44] sm:$0xf] %vm15385_vm11, %v12663_v8  ;;  %v5022_v43 = vshrl.u32 %v4765_v1, 16  ;;  %v4525_v9 = vmul.f32 %v9320_v13, %v12280_v60  ;;  %v5005_v19 = vor.u32 %v5003_v40, %v5002_v16  ;;  %v5015_v59 = vrot.slane %v5013_v61, 7  ;;  %vm15387_vm2 = vmmov %vm15341_vm0  ;;  %v4770_v20 = vld [vmem:[#allocation2 + $0x128] sm:$0xf] }
 0x658   : > { %5189 = vst.msk [vmem:[#allocation3 + $0x48] sm:$0xf] %vm15386_vm7, %v12675_v48  ;;  %v5025_v58 = vshll.u32 %v4765_v1, 16  ;;  %v12682_v10 = vmul.f32 %v12290_v24, %v4524_v26  ;;  %5257 = vrot.lane.b32.xlu0 %v12675_v48, %s9522_s25  ;;  %v5035_v41 = vshrl.u32 %v4767_v27, 16  ;;  %v5038_v44 = vshll.u32 %v4767_v27, 16  ;;  %vm15391_vm11 = vmmov %vm15341_vm0 }
 0x659   : > { %4730 = vst.msk [vmem:[#allocation2 + $0x174] sm:$0xf] %vm15387_vm2, %v9000_v3  ;;  %v5024_v37 = vrot.slane %v5022_v43, 7  ;;  %v12687_v60 = vmul.f32 %v12290_v24, %v4525_v9  ;;  %v12691_v40 = vsel %vm9694_vm3, %v4998_v11, %v5005_v19  ;;  %v5018_v1 = vor.u32 %v5016_v7, %v5015_v59  ;;  %v4771_v24 = vld [vmem:[#allocation2 + $0x12c] sm:$0xf]  ;;  %vm15392_vm7 = vmmov %vm15341_vm0 }
 0x65a   : > { %15388 = vst [vmem:[#allocation40_spill] sm:$0xff] %v12682_v10  ;;  %v5020_v16 = vrot.slane %v5015_v59, 4  ;;  %v9001_v26 = vpack.c.bf16 %v12682_v10, %v12682_v10  ;;  %5259 = vrot.lane.b32.xlu1 %v12691_v40, %s9522_s25  ;;  %5190 = vst.msk [vmem:[#allocation3 + $0x4c] sm:$0xf] %vm15341_vm0, %v12691_v40  ;;  %v5037_v27 = vrot.slane %v5035_v41, 7  ;;  %v5044_v13 = vshrl.u32 %v4768_v53, 16 }
 0x65b   : > { %15389 = vst [vmem:[#allocation17_spill] sm:$0xff] %v12687_v60  ;;  %v5027_v61 = vor.u32 %v5025_v58, %v5024_v37  ;;  %v9002_v3 = vpack.c.bf16 %v12687_v60, %v12687_v60  ;;  %v12704_v11 = vsel %vm9694_vm3, %v12340_v14, %v5018_v1  ;;  %v5057_v7 = vshrl.u32 %v4770_v20, 16  ;;  %v4773_v43 = vld [vmem:[#allocation2 + $0x140] sm:$0xf]  ;;  %v4774_v41 = vld [vmem:[#allocation2 + $0x144] sm:$0xf]  ;;  %vm15393_vm2 = vmmov %vm15341_vm0 }
 0x65c   : > { %v15390_v9 = vshrl.u32 %v12394_v32, 16  ;;  %4731 = vst.msk [vmem:[#allocation2 + $0x188] sm:$0xf] %vm15391_vm11, %v9001_v26  ;;  %5261 = vrot.lane.b32.xlu0 %v12704_v11, %s9522_s25  ;;  %v5040_v14 = vor.u32 %v5038_v44, %v5037_v27  ;;  %v5046_v58 = vrot.slane %v5044_v13, 7  ;;  %v5047_v37 = vshll.u32 %v4768_v53, 16  ;;  %vm15394_vm11 = vmmov %vm15341_vm0 }
 0x65d   : > { %5191 = vst.msk [vmem:[#allocation3 + $0x50] sm:$0xf] %vm15392_vm7, %v12704_v11  ;;  %v12717_v59 = vsel %vm9694_vm3, %v5020_v16, %v5027_v61  ;;  %v5042_v32 = vrot.slane %v5037_v27, 4  ;;  %v5059_v1 = vrot.slane %v5057_v7, 7  ;;  %v5060_v26 = vshll.u32 %v4770_v20, 16  ;;  %vm15395_vm7 = vmmov %vm15341_vm0 }
 0x65e   : > { %v12708_v19 = vrot.slane %v15390_v9, 11  ;;  %4732 = vst.msk [vmem:[#allocation2 + $0x18c] sm:$0xf] %vm15393_vm2, %v9002_v3  ;;  %v5066_v9 = vshrl.u32 %v4771_v24, 16  ;;  %v4776_v10 = vld [vmem:[#allocation2 + $0x158] sm:$0xf]  ;;  %5263 = vrot.lane.b32.xlu1 %v12717_v59, %s9522_s25  ;;  %v12727_v44 = vsel %vm9694_vm3, %v12342_v46, %v5040_v14  ;;  %v5049_v53 = vor.u32 %v5047_v37, %v5046_v58  ;;  %vm15396_vm2 = vmmov %vm15341_vm0 }
 0x65f   : > { %5192 = vst.msk [vmem:[#allocation3 + $0x54] sm:$0xf] %vm15341_vm0, %v12717_v59  ;;  %v5069_v16 = vshll.u32 %v4771_v24, 16  ;;  %v5079_v61 = vshrl.u32 %v4773_v43, 16  ;;  %v5062_v13 = vor.u32 %v5060_v26, %v5059_v1  ;;  %v5082_v3 = vshll.u32 %v4773_v43, 16 }
 0x660   : > { %5193 = vst.msk [vmem:[#allocation3 + $0x58] sm:$0xf] %vm15394_vm11, %v12727_v44  ;;  %v5068_v27 = vrot.slane %v5066_v9, 7  ;;  %v5088_v20 = vshrl.u32 %v4774_v41, 16  ;;  %v4777_v7 = vld [vmem:[#allocation2 + $0x15c] sm:$0xf]  ;;  %5265 = vrot.lane.b32.xlu0 %v12727_v44, %s9522_s25  ;;  %v12735_v60 = vsel %vm9694_vm3, %v5042_v32, %v5049_v53  ;;  %vm15397_vm11 = vmmov %vm15341_vm0 }
 0x661   : > { %v5064_v46 = vrot.slane %v5059_v1, 4  ;;  %v5081_v14 = vrot.slane %v5079_v61, 7  ;;  %v5101_v58 = vshrl.u32 %v4776_v10, 16  ;;  %v4779_v24 = vld [vmem:[#allocation2 + $0x170] sm:$0xf]  ;;  %v12742_v43 = vsel %vm9694_vm3, %v12344_v29, %v5062_v13 }
 0x662   : > { %5194 = vst.msk [vmem:[#allocation3 + $0x5c] sm:$0xf] %vm15395_vm7, %v12735_v60  ;;  %v5071_v37 = vor.u32 %v5069_v16, %v5068_v27  ;;  %v5090_v26 = vrot.slane %v5088_v20, 7  ;;  %v5091_v9 = vshll.u32 %v4774_v41, 16  ;;  %5267 = vrot.lane.b32.xlu1 %v12735_v60, %s9522_s25  ;;  %v5104_v53 = vshll.u32 %v4776_v10, 16  ;;  %vm15398_vm7 = vmmov %vm15341_vm0 }
 0x663   : > { %5195 = vst.msk [vmem:[#allocation3 + $0x60] sm:$0xf] %vm15396_vm2, %v12742_v43  ;;  %v5084_v32 = vor.u32 %v5082_v3, %v5081_v14  ;;  %v5103_v1 = vrot.slane %v5101_v58, 7  ;;  %v5110_v61 = vshrl.u32 %v4777_v7, 16  ;;  %v4780_v25 = vld [vmem:[#allocation2 + $0x174] sm:$0xf]  ;;  %vm15399_vm2 = vmmov %vm15341_vm0 }
 0x664   : > { %v12750_v22 = vsel %vm9694_vm3, %v5064_v46, %v5071_v37  ;;  %v5086_v29 = vrot.slane %v5081_v14, 4  ;;  %v5093_v13 = vor.u32 %v5091_v9, %v5090_v26  ;;  %v5123_v16 = vshrl.u32 %v4779_v24, 16  ;;  %v4782_v27 = vld [vmem:[#allocation2 + $0x188] sm:$0xf]  ;;  %5269 = vrot.lane.b32.xlu0 %v12742_v43, %s9522_s25  ;;  %v4781_v46 = vld [vmem:[#allocation2 + $0x184] sm:$0x8] }
 0x665   : > { %5196 = vst.msk [vmem:[#allocation3 + $0x64] sm:$0xf] %vm15341_vm0, %v12750_v22  ;;  %v12759_v10 = vsel %vm9694_vm3, %v12374_v55, %v5084_v32  ;;  %v5106_v41 = vor.u32 %v5104_v53, %v5103_v1  ;;  %v5112_v3 = vrot.slane %v5110_v61, 7  ;;  %v5113_v20 = vshll.u32 %v4777_v7, 16  ;;  %v4783_v9 = vld [vmem:[#allocation2 + $0x18c] sm:$0xf] }
 0x666   : > { %5197 = vst.msk [vmem:[#allocation3 + $0x68] sm:$0xf] %vm15397_vm11, %v12759_v10  ;;  %v12765_v14 = vsel %vm9694_vm3, %v5086_v29, %v5093_v13  ;;  %v5125_v58 = vrot.slane %v5123_v16, 7  ;;  %v5126_v37 = vshll.u32 %v4779_v24, 16  ;;  %v5132_v26 = vshrl.u32 %v4780_v25, 16  ;;  %5271 = vrot.lane.b32.xlu1 %v12750_v22, %s9522_s25  ;;  %vm15400_vm11 = vmmov %vm15341_vm0 }
 0x667   : > { %5198 = vst.msk [vmem:[#allocation3 + $0x6c] sm:$0xf] %vm15398_vm7, %v12765_v14  ;;  %v12774_v55 = vsel %vm9694_vm3, %v12384_v12, %v5106_v41  ;;  %v5108_v7 = vrot.slane %v5103_v1, 4  ;;  %v5115_v32 = vor.u32 %v5113_v20, %v5112_v3  ;;  %v5209_v53 = vshrl.u32 %v4782_v27, 16  ;;  %vm15401_vm7 = vmmov %vm15341_vm0 }
 0x668   : > { %5199 = vst.msk [vmem:[#allocation3 + $0x70] sm:$0xf] %vm15399_vm2, %v12774_v55  ;;  %v5128_v24 = vor.u32 %v5126_v37, %v5125_v58  ;;  %v5134_v61 = vrot.slane %v5132_v26, 7  ;;  %v5135_v29 = vshll.u32 %v4780_v25, 16  ;;  %5273 = vrot.lane.b32.xlu0 %v12759_v10, %s9522_s25  ;;  %v5204_v16 = vshrl.u32 %v4781_v46, 16 }
 0x669   : > { %v12782_v13 = vsel %vm9694_vm3, %v5108_v7, %v5115_v32  ;;  %v5218_v0 = vshrl.u32 %v4783_v9, 16  ;;  %v5130_v1 = vrot.slane %v5125_v58, 4  ;;  %v5211_v25 = vrot.slane %v5209_v53, 7  ;;  %v5504_v32 = vld [vmem:[#allocation2 + $0xc] sm:$0xf] }
 0x66a   : > { %5200 = vst.msk [vmem:[#allocation3 + $0x74] sm:$0xf] %vm15341_vm0, %v12782_v13  ;;  %v12789_v12 = vsel %vm9694_vm3, %v12708_v19, %v5128_v24  ;;  %v5137_v41 = vor.u32 %v5135_v29, %v5134_v61  ;;  %5275 = vrot.lane.b32.xlu1 %v12765_v14, %s9522_s25  ;;  %v5212_v20 = vshll.u32 %v4782_v27, 16  ;;  %v8895_v19 = vrot.slane %v5204_v16, 11  ;;  %v12899_v61 = vld [vmem:[#allocation2 + $0x20] sm:$0xf] }
 0x66b   : > { %5201 = vst.msk [vmem:[#allocation3 + $0x78] sm:$0xf] %vm15400_vm11, %v12789_v12  ;;  %v5220_v46 = vrot.slane %v5218_v0, 7  ;;  %v5221_v37 = vshll.u32 %v4783_v9, 16  ;;  %v5216_v0 = vrot.slane %v5211_v25, 4  ;;  %vm15402_vm2 = vcmask 257216  }
 0x66c   : > { %v12797_v3 = vsel %vm9694_vm3, %v5130_v1, %v5137_v41  ;;  %5277 = vrot.lane.b32.xlu0 %v12774_v55, %s9522_s25  ;;  %v5214_v58 = vor.u32 %v5212_v20, %v5211_v25  ;;  %vm15403_vm0 = vmmov %vm15402_vm2  ;;  %v12908_v29 = vld [vmem:[#allocation2 + $0x38] sm:$0xf]  ;;  %v12918_v1 = vld [vmem:[#allocation2 + $0x50] sm:$0xf] }
 0x66d   : > { %5202 = vst.msk [vmem:[#allocation3 + $0x7c] sm:$0xf] %vm15401_vm7, %v12797_v3  ;;  %v5223_v26 = vor.u32 %v5221_v37, %v5220_v46  ;;  %vm15404_vm11 = vmmov %vm15403_vm0  ;;  %v12923_v25 = vld [vmem:[#allocation2 + $0x54] sm:$0xf]  ;;  %v12928_v20 = vld [vmem:[#allocation2 + $0x68] sm:$0xf] }
 0x66e   : > { %5279 = vrot.lane.b32.xlu1 %v12782_v13, %s9522_s25  ;;  %v12809_v27 = vsel %vm9694_vm3, %v8895_v19, %v5214_v58  ;;  %vm15405_vm7 = vmmov %vm15403_vm0  ;;  %v12933_v19 = vld [vmem:[#allocation2 + $0x6c] sm:$0xf]  ;;  %v12938_v37 = vld [vmem:[#allocation2 + $0x80] sm:$0xf] }
 0x66f   : > { %v12815_v7 = vsel %vm9694_vm3, %v5216_v0, %v5223_v26 }
 0x670   : > { %5281 = vrot.lane.b32.xlu0 %v12789_v12, %s9522_s25 }
 0x672   : > { %5283 = vrot.lane.b32.xlu1 %v12797_v3, %s9522_s25 }
 0x674   : > { %5285 = vrot.lane.b32.xlu0 %v12809_v27, %s9522_s25 }
 0x676   : > { %5287 = vrot.lane.b32.xlu1 %v12815_v7, %s9522_s25 }
 0x678   : > { %5375 = vrot.lane.b32.xlu0 %v12382_v30, %s9523_s26 }
 0x67a   : > { %5377 = vrot.lane.b32.xlu1 %v12401_v45, %s9523_s26 }
 0x67c   : > { %5379 = vrot.lane.b32.xlu0 %v12419_v2, %s9523_s26 }
 0x67e   : > { %5381 = vrot.lane.b32.xlu1 %v12440_v33, %s9523_s26 }
 0x680   : > { %5383 = vrot.lane.b32.xlu0 %v12475_v6, %s9523_s26 }
 0x682   : > { %5385 = vrot.lane.b32.xlu1 %v12505_v34, %s9523_s26 }
 0x684   : > { %5387 = vrot.lane.b32.xlu0 %v12530_v56, %s9523_s26  ;;  %v4785_v56 = vld [vmem:[#allocation2 + $0x1a0] sm:$0xf] }
 0x686   : > { %5389 = vrot.lane.b32.xlu1 %v12560_v31, %s9523_s26  ;;  %v4786_v31 = vld [vmem:[#allocation2 + $0x1a4] sm:$0xf] }
 0x688   : > { %5391 = vrot.lane.b32.xlu0 %v12575_v15, %s9523_s26  ;;  %v5359_v15 = vshrl.u32 %v4785_v56, 16 }
 0x68a   : > { %5393 = vrot.lane.b32.xlu1 %v12605_v51, %s9523_s26  ;;  %v4784_v51 = vld [vmem:[#allocation2 + $0x19c] sm:$0x8] }
 0x68c   : > { %5395 = vrot.lane.b32.xlu0 %v12617_v35, %s9523_s26  ;;  %v5368_v35 = vshrl.u32 %v4786_v31, 16 }
 0x68d   : > { %v5226_v30 = vpop.permute.xlu1 %5225 }
 0x68e   : > { %5397 = vrot.lane.b32.xlu1 %v12632_v23, %s9523_s26  ;;  %5321 = vst.msk [vmem:[#allocation3] sm:$0xf] %vm15402_vm2, %v5226_v30  ;;  %vm15406_vm2 = vmmov %vm15403_vm0 }
 0x690   : > { %5399 = vrot.lane.b32.xlu0 %v12650_v52, %s9523_s26  ;;  %v5228_v45 = vpop.permute.xlu0 %5227  ;;  %v5361_v52 = vrot.slane %v5359_v15, 7 }
 0x691   : > { %5322 = vst.msk [vmem:[#allocation3 + $0x4] sm:$0xf] %vm15403_vm0, %v5228_v45  ;;  %v12953_v45 = vld [vmem:[#allocation2 + $0x9c] sm:$0xf] }
 0x692   : > { %5401 = vrot.lane.b32.xlu1 %v12663_v8, %s9523_s26  ;;  %v5362_v8 = vshll.u32 %v4785_v56, 16 }
 0x693   : > { %v5230_v2 = vpop.permute.xlu1 %5229 }
 0x694   : > { %5403 = vrot.lane.b32.xlu0 %v12675_v48, %s9523_s26  ;;  %5323 = vst.msk [vmem:[#allocation3 + $0x8] sm:$0xf] %vm15404_vm11, %v5230_v2  ;;  %vm15407_vm11 = vmmov %vm15403_vm0  ;;  %v5370_v48 = vrot.slane %v5368_v35, 7 }
 0x696   : > { %5405 = vrot.lane.b32.xlu1 %v12691_v40, %s9523_s26 }
 0x698   : > { %5407 = vrot.lane.b32.xlu0 %v12704_v11, %s9523_s26  ;;  %v5364_v11 = vor.u32 %v5362_v8, %v5361_v52 }
 0x699   : > { %v5232_v33 = vpop.permute.xlu1 %5231 }
 0x69a   : > { %5409 = vrot.lane.b32.xlu1 %v12717_v59, %s9523_s26  ;;  %5324 = vst.msk [vmem:[#allocation3 + $0xc] sm:$0xf] %vm15405_vm7, %v5232_v33  ;;  %vm15408_vm7 = vmmov %vm15403_vm0  ;;  %v12958_v33 = vld [vmem:[#allocation2 + $0xb0] sm:$0xf] }
 0x69c   : > { %5411 = vrot.lane.b32.xlu0 %v12727_v44, %s9523_s26  ;;  %v5366_v44 = vrot.slane %v5361_v52, 4  ;;  %v12983_v52 = vld [vmem:[#allocation2 + $0xe4] sm:$0xf] }
 0x69e   : > { %5413 = vrot.lane.b32.xlu1 %v12735_v60, %s9523_s26  ;;  %v5234_v6 = vpop.permute.xlu0 %5233  ;;  %v5371_v60 = vshll.u32 %v4786_v31, 16  ;;  %v12968_v31 = vld [vmem:[#allocation2 + $0xc8] sm:$0xf] }
 0x69f   : > { %5325 = vst.msk [vmem:[#allocation3 + $0x10] sm:$0xf] %vm15406_vm2, %v5234_v6  ;;  %vm15409_vm2 = vmmov %vm15403_vm0 }
 0x6a0   : > { %5415 = vrot.lane.b32.xlu0 %v12742_v43, %s9523_s26  ;;  %v5373_v43 = vor.u32 %v5371_v60, %v5370_v48  ;;  %v12988_v48 = vld [vmem:[#allocation2 + $0xf8] sm:$0xf] }
 0x6a2   : > { %5417 = vrot.lane.b32.xlu1 %v12750_v22, %s9523_s26  ;;  %v5236_v34 = vpop.permute.xlu1 %5235  ;;  %v5354_v22 = vshrl.u32 %v4784_v51, 16  ;;  %v5374_v9 = vsel %vm9694_vm3, %v5366_v44, %v5373_v43  ;;  %v12973_v51 = vld [vmem:[#allocation2 + $0xcc] sm:$0xf]  ;;  %v13003_v43 = vld [vmem:[#allocation2 + $0x114] sm:$0xf] }
 0x6a3   : > { %5326 = vst.msk [vmem:[#allocation3 + $0x14] sm:$0xf] %vm15403_vm0, %v5236_v34  ;;  %v12963_v34 = vld [vmem:[#allocation2 + $0xb4] sm:$0xf] }
 0x6a4   : > { %5419 = vrot.lane.b32.xlu0 %v12759_v10, %s9523_s26  ;;  %v8896_v40 = vrot.slane %v5354_v22, 11 }
 0x6a6   : > { %5421 = vrot.lane.b32.xlu1 %v12765_v14, %s9523_s26  ;;  %v5238_v23 = vpop.permute.xlu0 %5237  ;;  %v5365_v10 = vsel %vm9694_vm3, %v8896_v40, %v5364_v11  ;;  %vm15411_vm3 = vmmov %vm15403_vm0  ;;  %v12993_v40 = vld [vmem:[#allocation2 + $0xfc] sm:$0xf] }
 0x6a7   : > { %5327 = vst.msk [vmem:[#allocation3 + $0x18] sm:$0xf] %vm15407_vm11, %v5238_v23  ;;  %vm15410_vm11 = vmmov %vm15403_vm0  ;;  %v12978_v23 = vld [vmem:[#allocation2 + $0xe0] sm:$0xf] }
 0x6a8   : > { %5423 = vrot.lane.b32.xlu0 %v12774_v55, %s9523_s26  ;;  %v5503_v55 = vld [vmem:[#allocation2 + $0x8] sm:$0xf] }
 0x6aa   : > { %5425 = vrot.lane.b32.xlu1 %v12782_v13, %s9523_s26 }
 0x6ac   : > { %5427 = vrot.lane.b32.xlu0 %v12789_v12, %s9523_s26  ;;  %v5240_v59 = vpop.permute.xlu1 %5239  ;;  %v12913_v12 = vld [vmem:[#allocation2 + $0x3c] sm:$0xf] }
 0x6ad   : > { %5328 = vst.msk [vmem:[#allocation3 + $0x1c] sm:$0xf] %vm15408_vm7, %v5240_v59  ;;  %vm15412_vm7 = vmmov %vm15403_vm0  ;;  %v12998_v59 = vld [vmem:[#allocation2 + $0x110] sm:$0xf] }
 0x6ae   : > { %5429 = vrot.lane.b32.xlu1 %v12797_v3, %s9523_s26 }
 0x6b0   : > { %5431 = vrot.lane.b32.xlu0 %v12809_v27, %s9523_s26  ;;  %v12943_v27 = vld [vmem:[#allocation2 + $0x84] sm:$0xf] }
 0x6b2   : > { %5433 = vrot.lane.b32.xlu1 %v12815_v7, %s9523_s26  ;;  %v5242_v14 = vpop.permute.xlu0 %5241  ;;  %v12948_v7 = vld [vmem:[#allocation2 + $0x98] sm:$0xf] }
 0x6b3   : > { %5329 = vst.msk [vmem:[#allocation3 + $0x20] sm:$0xf] %vm15409_vm2, %v5242_v14  ;;  %vm15413_vm2 = vmmov %vm15403_vm0  ;;  %v13008_v14 = vld [vmem:[#allocation2 + $0x128] sm:$0xf] }
 0x6b4   : > { %5435 = vrot.lane.b32.xlu0 %v5365_v10, %s9523_s26 }
 0x6b6   : > { %5437 = vrot.lane.b32.xlu1 %v5374_v9, %s9523_s26 }
 0x6b7   : > { %v5244_v53 = vpop.permute.xlu1 %5243 }
 0x6b8   : > { %5571 = vrot.lane.b32.xlu0 %v5503_v55, %s9524_s27  ;;  %5330 = vst.msk [vmem:[#allocation3 + $0x24] sm:$0xf] %vm15403_vm0, %v5244_v53  ;;  %v13013_v55 = vld [vmem:[#allocation2 + $0x12c] sm:$0xf]  ;;  %v13018_v53 = vld [vmem:[#allocation2 + $0x140] sm:$0xf] }
 0x6ba   : > { %5573 = vrot.lane.b32.xlu1 %v5504_v32, %s9524_s27  ;;  %v5246_v24 = vpop.permute.xlu0 %5245 }
 0x6bb   : > { %5331 = vst.msk [vmem:[#allocation3 + $0x28] sm:$0xf] %vm15410_vm11, %v5246_v24  ;;  %vm15414_vm11 = vmmov %vm15403_vm0 }
 0x6bc   : > { %5575 = vrot.lane.b32.xlu0 %v12899_v61, %s9524_s27 }
 0x6be   : > { %5577 = vrot.lane.b32.xlu1 %v12904_v47, %s9524_s27 }
 0x6c0   : > { %5579 = vrot.lane.b32.xlu0 %v12908_v29, %s9524_s27  ;;  %v5248_v13 = vpop.permute.xlu1 %5247 }
 0x6c1   : > { %v5250_v16 = vpop.permute.xlu0 %5249  ;;  %5332 = vst.msk [vmem:[#allocation3 + $0x2c] sm:$0xf] %vm15411_vm3, %v5248_v13  ;;  %vm15415_vm3 = vmmov %vm15403_vm0  ;;  %v13023_v13 = vld [vmem:[#allocation2 + $0x144] sm:$0xf] }
 0x6c2   : > { %5333 = vst.msk [vmem:[#allocation3 + $0x30] sm:$0xf] %vm15412_vm7, %v5250_v16  ;;  %5581 = vrot.lane.b32.xlu1 %v12913_v12, %s9524_s27  ;;  %vm15416_vm7 = vmmov %vm15403_vm0 }
 0x6c4   : > { %5583 = vrot.lane.b32.xlu0 %v12918_v1, %s9524_s27  ;;  %v5252_v41 = vpop.permute.xlu1 %5251 }
 0x6c5   : > { %5334 = vst.msk [vmem:[#allocation3 + $0x34] sm:$0xf] %vm15413_vm2, %v5252_v41  ;;  %vm15417_vm2 = vmmov %vm15403_vm0  ;;  %v13028_v41 = vld [vmem:[#allocation2 + $0x158] sm:$0xf] }
 0x6c6   : > { %v5254_v3 = vpop.permute.xlu0 %5253  ;;  %5585 = vrot.lane.b32.xlu1 %v12923_v25, %s9524_s27 }
 0x6c7   : > { %5335 = vst.msk [vmem:[#allocation3 + $0x38] sm:$0xf] %vm15403_vm0, %v5254_v3 }
 0x6c8   : > { %5587 = vrot.lane.b32.xlu0 %v12928_v20, %s9524_s27  ;;  %v5256_v46 = vpop.permute.xlu1 %5255 }
 0x6c9   : > { %5336 = vst.msk [vmem:[#allocation3 + $0x3c] sm:$0xf] %vm15414_vm11, %v5256_v46  ;;  %vm15418_vm11 = vmmov %vm15403_vm0  ;;  %v13033_v46 = vld [vmem:[#allocation2 + $0x15c] sm:$0xf] }
 0x6ca   : > { %v5258_v58 = vpop.permute.xlu0 %5257  ;;  %5589 = vrot.lane.b32.xlu1 %v12933_v19, %s9524_s27 }
 0x6cb   : > { %5337 = vst.msk [vmem:[#allocation3 + $0x40] sm:$0xf] %vm15415_vm3, %v5258_v58  ;;  %vm15419_vm3 = vmmov %vm15403_vm0 }
 0x6cc   : > { %5591 = vrot.lane.b32.xlu0 %v12938_v37, %s9524_s27  ;;  %v5260_v26 = vpop.permute.xlu1 %5259 }
 0x6cd   : > { %5338 = vst.msk [vmem:[#allocation3 + $0x44] sm:$0xf] %vm15416_vm7, %v5260_v26  ;;  %vm15420_vm7 = vmmov %vm15403_vm0  ;;  %v13038_v26 = vld [vmem:[#allocation2 + $0x170] sm:$0xf] }
 0x6ce   : > { %v5262_v0 = vpop.permute.xlu0 %5261  ;;  %5593 = vrot.lane.b32.xlu1 %v12943_v27, %s9524_s27 }
 0x6cf   : > { %5339 = vst.msk [vmem:[#allocation3 + $0x48] sm:$0xf] %vm15417_vm2, %v5262_v0  ;;  %vm15421_vm2 = vmmov %vm15403_vm0 }
 0x6d0   : > { %5595 = vrot.lane.b32.xlu0 %v12948_v7, %s9524_s27  ;;  %v5264_v30 = vpop.permute.xlu1 %5263 }
 0x6d1   : > { %5340 = vst.msk [vmem:[#allocation3 + $0x4c] sm:$0xf] %vm15403_vm0, %v5264_v30  ;;  %v13043_v30 = vld [vmem:[#allocation2 + $0x174] sm:$0xf] }
 0x6d2   : > { %v5266_v2 = vpop.permute.xlu0 %5265  ;;  %5597 = vrot.lane.b32.xlu1 %v12953_v45, %s9524_s27 }
 0x6d3   : > { %5341 = vst.msk [vmem:[#allocation3 + $0x50] sm:$0xf] %vm15418_vm11, %v5266_v2  ;;  %vm15422_vm11 = vmmov %vm15403_vm0 }
 0x6d4   : > { %5599 = vrot.lane.b32.xlu0 %v12958_v33, %s9524_s27  ;;  %v5268_v6 = vpop.permute.xlu1 %5267 }
 0x6d5   : > { %5342 = vst.msk [vmem:[#allocation3 + $0x54] sm:$0xf] %vm15419_vm3, %v5268_v6  ;;  %vm15423_vm3 = vmmov %vm15403_vm0 }
 0x6d6   : > { %v5270_v56 = vpop.permute.xlu0 %5269  ;;  %5601 = vrot.lane.b32.xlu1 %v12963_v34, %s9524_s27 }
 0x6d7   : > { %5343 = vst.msk [vmem:[#allocation3 + $0x58] sm:$0xf] %vm15420_vm7, %v5270_v56  ;;  %vm15424_vm7 = vmmov %vm15403_vm0 }
 0x6d8   : > { %5603 = vrot.lane.b32.xlu0 %v12968_v31, %s9524_s27  ;;  %v5272_v15 = vpop.permute.xlu1 %5271 }
 0x6d9   : > { %5344 = vst.msk [vmem:[#allocation3 + $0x5c] sm:$0xf] %vm15421_vm2, %v5272_v15  ;;  %vm15425_vm2 = vmmov %vm15403_vm0 }
 0x6da   : > { %v5274_v35 = vpop.permute.xlu0 %5273  ;;  %5605 = vrot.lane.b32.xlu1 %v12973_v51, %s9524_s27 }
 0x6db   : > { %5345 = vst.msk [vmem:[#allocation3 + $0x60] sm:$0xf] %vm15403_vm0, %v5274_v35 }
 0x6dc   : > { %5607 = vrot.lane.b32.xlu0 %v12978_v23, %s9524_s27  ;;  %v5276_v22 = vpop.permute.xlu1 %5275 }
 0x6dd   : > { %5346 = vst.msk [vmem:[#allocation3 + $0x64] sm:$0xf] %vm15422_vm11, %v5276_v22  ;;  %vm15426_vm11 = vmmov %vm15403_vm0 }
 0x6de   : > { %v5278_v8 = vpop.permute.xlu0 %5277  ;;  %5609 = vrot.lane.b32.xlu1 %v12983_v52, %s9524_s27 }
 0x6df   : > { %5347 = vst.msk [vmem:[#allocation3 + $0x68] sm:$0xf] %vm15423_vm3, %v5278_v8  ;;  %vm15427_vm3 = vmmov %vm15403_vm0 }
 0x6e0   : > { %5611 = vrot.lane.b32.xlu0 %v12988_v48, %s9524_s27  ;;  %v5280_v60 = vpop.permute.xlu1 %5279 }
 0x6e1   : > { %5348 = vst.msk [vmem:[#allocation3 + $0x6c] sm:$0xf] %vm15424_vm7, %v5280_v60  ;;  %vm15428_vm7 = vcmask 454016  }
 0x6e2   : > { %v5282_v11 = vpop.permute.xlu0 %5281  ;;  %5613 = vrot.lane.b32.xlu1 %v12993_v40, %s9524_s27 }
 0x6e3   : > { %5349 = vst.msk [vmem:[#allocation3 + $0x70] sm:$0xf] %vm15425_vm2, %v5282_v11  ;;  %vm15429_vm2 = vmmov %vm15428_vm7 }
 0x6e4   : > { %5615 = vrot.lane.b32.xlu0 %v12998_v59, %s9524_s27  ;;  %v5284_v44 = vpop.permute.xlu1 %5283 }
 0x6e5   : > { %5350 = vst.msk [vmem:[#allocation3 + $0x74] sm:$0xf] %vm15403_vm0, %v5284_v44  ;;  %vm15430_vm0 = vmmov %vm15429_vm2 }
 0x6e6   : > { %v5286_v10 = vpop.permute.xlu0 %5285  ;;  %5617 = vrot.lane.b32.xlu1 %v13003_v43, %s9524_s27 }
 0x6e7   : > { %5351 = vst.msk [vmem:[#allocation3 + $0x78] sm:$0xf] %vm15426_vm11, %v5286_v10  ;;  %vm15431_vm11 = vmmov %vm15430_vm0 }
 0x6e8   : > { %5619 = vrot.lane.b32.xlu0 %v13008_v14, %s9524_s27  ;;  %v5288_v9 = vpop.permute.xlu1 %5287 }
 0x6e9   : > { %5352 = vst.msk [vmem:[#allocation3 + $0x7c] sm:$0xf] %vm15427_vm3, %v5288_v9  ;;  %vm15432_vm3 = vmmov %vm15430_vm0 }
 0x6ea   : > { %v5376_v32 = vpop.permute.xlu0 %5375  ;;  %5621 = vrot.lane.b32.xlu1 %v13013_v55, %s9524_s27 }
 0x6eb   : > { %5471 = vst.msk [vmem:[#allocation3] sm:$0xf] %vm15428_vm7, %v5376_v32  ;;  %vm15433_vm7 = vmmov %vm15430_vm0 }
 0x6ec   : > { %5623 = vrot.lane.b32.xlu0 %v13018_v53, %s9524_s27  ;;  %v5378_v24 = vpop.permute.xlu1 %5377 }
 0x6ed   : > { %5472 = vst.msk [vmem:[#allocation3 + $0x4] sm:$0xf] %vm15429_vm2, %v5378_v24  ;;  %vm15434_vm2 = vmmov %vm15430_vm0 }
 0x6ee   : > { %v5380_v16 = vpop.permute.xlu0 %5379  ;;  %5625 = vrot.lane.b32.xlu1 %v13023_v13, %s9524_s27 }
 0x6ef   : > { %5473 = vst.msk [vmem:[#allocation3 + $0x8] sm:$0xf] %vm15430_vm0, %v5380_v16 }
 0x6f0   : > { %5627 = vrot.lane.b32.xlu0 %v13028_v41, %s9524_s27  ;;  %v5382_v3 = vpop.permute.xlu1 %5381 }
 0x6f1   : > { %5474 = vst.msk [vmem:[#allocation3 + $0xc] sm:$0xf] %vm15431_vm11, %v5382_v3  ;;  %vm15435_vm11 = vmmov %vm15430_vm0 }
 0x6f2   : > { %v5384_v58 = vpop.permute.xlu0 %5383  ;;  %5629 = vrot.lane.b32.xlu1 %v13033_v46, %s9524_s27 }
 0x6f3   : > { %5475 = vst.msk [vmem:[#allocation3 + $0x10] sm:$0xf] %vm15432_vm3, %v5384_v58  ;;  %vm15436_vm3 = vmmov %vm15430_vm0 }
 0x6f4   : > { %5631 = vrot.lane.b32.xlu0 %v13038_v26, %s9524_s27  ;;  %v5386_v0 = vpop.permute.xlu1 %5385 }
 0x6f5   : > { %5476 = vst.msk [vmem:[#allocation3 + $0x14] sm:$0xf] %vm15433_vm7, %v5386_v0  ;;  %vm15437_vm7 = vmmov %vm15430_vm0 }
 0x6f6   : > { %v5388_v2 = vpop.permute.xlu0 %5387  ;;  %5633 = vrot.lane.b32.xlu1 %v13043_v30, %s9524_s27 }
 0x6f7   : > { %5477 = vst.msk [vmem:[#allocation3 + $0x18] sm:$0xf] %vm15434_vm2, %v5388_v2  ;;  %vm15438_vm2 = vmmov %vm15430_vm0 }
 0x6f8   : > { %5701 = vrot.lane.b32.xlu0 %v12899_v61, %s9525_s28  ;;  %v5390_v6 = vpop.permute.xlu1 %5389 }
 0x6f9   : > { %5478 = vst.msk [vmem:[#allocation3 + $0x1c] sm:$0xf] %vm15430_vm0, %v5390_v6 }
 0x6fa   : > { %v5392_v56 = vpop.permute.xlu0 %5391  ;;  %5703 = vrot.lane.b32.xlu1 %v12904_v47, %s9525_s28 }
 0x6fb   : > { %5479 = vst.msk [vmem:[#allocation3 + $0x20] sm:$0xf] %vm15435_vm11, %v5392_v56  ;;  %vm15439_vm11 = vmmov %vm15430_vm0 }
 0x6fc   : > { %5705 = vrot.lane.b32.xlu0 %v12908_v29, %s9525_s28  ;;  %v5394_v15 = vpop.permute.xlu1 %5393 }
 0x6fd   : > { %5480 = vst.msk [vmem:[#allocation3 + $0x24] sm:$0xf] %vm15436_vm3, %v5394_v15  ;;  %vm15440_vm3 = vmmov %vm15430_vm0 }
 0x6fe   : > { %v5396_v35 = vpop.permute.xlu0 %5395  ;;  %5707 = vrot.lane.b32.xlu1 %v12913_v12, %s9525_s28 }
 0x6ff   : > { %5481 = vst.msk [vmem:[#allocation3 + $0x28] sm:$0xf] %vm15437_vm7, %v5396_v35  ;;  %vm15441_vm7 = vmmov %vm15430_vm0 }
 0x700   : > { %5709 = vrot.lane.b32.xlu0 %v12918_v1, %s9525_s28  ;;  %v5398_v61 = vpop.permute.xlu1 %5397 }
 0x701   : > { %5482 = vst.msk [vmem:[#allocation3 + $0x2c] sm:$0xf] %vm15438_vm2, %v5398_v61  ;;  %vm15442_vm2 = vmmov %vm15430_vm0 }
 0x702   : > { %v5400_v47 = vpop.permute.xlu0 %5399  ;;  %5711 = vrot.lane.b32.xlu1 %v12923_v25, %s9525_s28 }
 0x703   : > { %5483 = vst.msk [vmem:[#allocation3 + $0x30] sm:$0xf] %vm15430_vm0, %v5400_v47 }
 0x704   : > { %5713 = vrot.lane.b32.xlu0 %v12928_v20, %s9525_s28  ;;  %v5402_v22 = vpop.permute.xlu1 %5401 }
 0x705   : > { %5484 = vst.msk [vmem:[#allocation3 + $0x34] sm:$0xf] %vm15439_vm11, %v5402_v22  ;;  %vm15443_vm11 = vmmov %vm15430_vm0 }
 0x706   : > { %v5404_v8 = vpop.permute.xlu0 %5403  ;;  %5715 = vrot.lane.b32.xlu1 %v12933_v19, %s9525_s28 }
 0x707   : > { %5485 = vst.msk [vmem:[#allocation3 + $0x38] sm:$0xf] %vm15440_vm3, %v5404_v8  ;;  %vm15444_vm3 = vmmov %vm15430_vm0 }
 0x708   : > { %5717 = vrot.lane.b32.xlu0 %v12938_v37, %s9525_s28  ;;  %v5406_v60 = vpop.permute.xlu1 %5405 }
 0x709   : > { %5486 = vst.msk [vmem:[#allocation3 + $0x3c] sm:$0xf] %vm15441_vm7, %v5406_v60  ;;  %vm15445_vm7 = vmmov %vm15430_vm0 }
 0x70a   : > { %v5408_v11 = vpop.permute.xlu0 %5407  ;;  %5719 = vrot.lane.b32.xlu1 %v12943_v27, %s9525_s28 }
 0x70b   : > { %5487 = vst.msk [vmem:[#allocation3 + $0x40] sm:$0xf] %vm15442_vm2, %v5408_v11  ;;  %vm15446_vm2 = vmmov %vm15430_vm0 }
 0x70c   : > { %5721 = vrot.lane.b32.xlu0 %v12948_v7, %s9525_s28  ;;  %v5410_v44 = vpop.permute.xlu1 %5409 }
 0x70d   : > { %5488 = vst.msk [vmem:[#allocation3 + $0x44] sm:$0xf] %vm15430_vm0, %v5410_v44  ;;  %v13138_v44 = vld [vmem:[#allocation2 + $0x188] sm:$0xf] }
 0x70e   : > { %v5412_v10 = vpop.permute.xlu0 %5411  ;;  %5723 = vrot.lane.b32.xlu1 %v12953_v45, %s9525_s28 }
 0x70f   : > { %5489 = vst.msk [vmem:[#allocation3 + $0x48] sm:$0xf] %vm15443_vm11, %v5412_v10  ;;  %vm15447_vm11 = vmmov %vm15430_vm0 }
 0x710   : > { %5725 = vrot.lane.b32.xlu0 %v12958_v33, %s9525_s28  ;;  %v5414_v9 = vpop.permute.xlu1 %5413 }
 0x711   : > { %5490 = vst.msk [vmem:[#allocation3 + $0x4c] sm:$0xf] %vm15444_vm3, %v5414_v9  ;;  %vm15448_vm3 = vmmov %vm15430_vm0  ;;  %v13143_v9 = vld [vmem:[#allocation2 + $0x18c] sm:$0xf] }
 0x712   : > { %v5416_v32 = vpop.permute.xlu0 %5415  ;;  %5727 = vrot.lane.b32.xlu1 %v12963_v34, %s9525_s28 }
 0x713   : > { %5491 = vst.msk [vmem:[#allocation3 + $0x50] sm:$0xf] %vm15445_vm7, %v5416_v32  ;;  %vm15449_vm7 = vmmov %vm15430_vm0 }
 0x714   : > { %5729 = vrot.lane.b32.xlu0 %v12968_v31, %s9525_s28  ;;  %v5418_v24 = vpop.permute.xlu1 %5417 }
 0x715   : > { %5492 = vst.msk [vmem:[#allocation3 + $0x54] sm:$0xf] %vm15446_vm2, %v5418_v24  ;;  %vm15450_vm2 = vmmov %vm15430_vm0 }
 0x716   : > { %v5420_v16 = vpop.permute.xlu0 %5419  ;;  %5731 = vrot.lane.b32.xlu1 %v12973_v51, %s9525_s28 }
 0x717   : > { %5493 = vst.msk [vmem:[#allocation3 + $0x58] sm:$0xf] %vm15430_vm0, %v5420_v16 }
 0x718   : > { %5733 = vrot.lane.b32.xlu0 %v12978_v23, %s9525_s28  ;;  %v5422_v3 = vpop.permute.xlu1 %5421 }
 0x719   : > { %5494 = vst.msk [vmem:[#allocation3 + $0x5c] sm:$0xf] %vm15447_vm11, %v5422_v3  ;;  %vm15451_vm11 = vmmov %vm15430_vm0 }
 0x71a   : > { %v5424_v58 = vpop.permute.xlu0 %5423  ;;  %5735 = vrot.lane.b32.xlu1 %v12983_v52, %s9525_s28 }
 0x71b   : > { %5495 = vst.msk [vmem:[#allocation3 + $0x60] sm:$0xf] %vm15448_vm3, %v5424_v58  ;;  %vm15452_vm3 = vmmov %vm15430_vm0 }
 0x71c   : > { %5737 = vrot.lane.b32.xlu0 %v12988_v48, %s9525_s28  ;;  %v5426_v0 = vpop.permute.xlu1 %5425 }
 0x71d   : > { %5496 = vst.msk [vmem:[#allocation3 + $0x64] sm:$0xf] %vm15449_vm7, %v5426_v0  ;;  %vm15453_vm7 = vmmov %vm15430_vm0 }
 0x71e   : > { %v5428_v2 = vpop.permute.xlu0 %5427  ;;  %5739 = vrot.lane.b32.xlu1 %v12993_v40, %s9525_s28 }
 0x71f   : > { %5497 = vst.msk [vmem:[#allocation3 + $0x68] sm:$0xf] %vm15450_vm2, %v5428_v2  ;;  %vm15454_vm2 = vmmov %vm15430_vm0 }
 0x720   : > { %5741 = vrot.lane.b32.xlu0 %v12998_v59, %s9525_s28  ;;  %v5430_v6 = vpop.permute.xlu1 %5429 }
 0x721   : > { %5498 = vst.msk [vmem:[#allocation3 + $0x6c] sm:$0xf] %vm15430_vm0, %v5430_v6  ;;  %vm15455_vm0 = vcmask 126016  }
 0x722   : > { %v5432_v56 = vpop.permute.xlu0 %5431  ;;  %5743 = vrot.lane.b32.xlu1 %v13003_v43, %s9525_s28 }
 0x723   : > { %5499 = vst.msk [vmem:[#allocation3 + $0x70] sm:$0xf] %vm15451_vm11, %v5432_v56  ;;  %vm15456_vm11 = vmmov %vm15455_vm0 }
 0x724   : > { %5745 = vrot.lane.b32.xlu0 %v13008_v14, %s9525_s28  ;;  %v5434_v15 = vpop.permute.xlu1 %5433 }
 0x725   : > { %5500 = vst.msk [vmem:[#allocation3 + $0x74] sm:$0xf] %vm15452_vm3, %v5434_v15  ;;  %vm15457_vm3 = vmmov %vm15455_vm0 }
 0x726   : > { %v5436_v35 = vpop.permute.xlu0 %5435  ;;  %5747 = vrot.lane.b32.xlu1 %v13013_v55, %s9525_s28 }
 0x727   : > { %5501 = vst.msk [vmem:[#allocation3 + $0x78] sm:$0xf] %vm15453_vm7, %v5436_v35  ;;  %vm15458_vm7 = vmmov %vm15455_vm0 }
 0x728   : > { %5749 = vrot.lane.b32.xlu0 %v13018_v53, %s9525_s28  ;;  %v5438_v61 = vpop.permute.xlu1 %5437 }
 0x729   : > { %5502 = vst.msk [vmem:[#allocation3 + $0x7c] sm:$0xf] %vm15454_vm2, %v5438_v61  ;;  %vm15459_vm2 = vmmov %vm15455_vm0 }
 0x72a   : > { %v5572_v47 = vpop.permute.xlu0 %5571  ;;  %5751 = vrot.lane.b32.xlu1 %v13023_v13, %s9525_s28 }
 0x72b   : > { %5667 = vst.msk [vmem:[#allocation3] sm:$0xf] %vm15455_vm0, %v5572_v47 }
 0x72c   : > { %5753 = vrot.lane.b32.xlu0 %v13028_v41, %s9525_s28  ;;  %v5574_v22 = vpop.permute.xlu1 %5573 }
 0x72d   : > { %5668 = vst.msk [vmem:[#allocation3 + $0x4] sm:$0xf] %vm15456_vm11, %v5574_v22  ;;  %vm15460_vm11 = vmmov %vm15455_vm0 }
 0x72e   : > { %v5576_v8 = vpop.permute.xlu0 %5575  ;;  %5755 = vrot.lane.b32.xlu1 %v13033_v46, %s9525_s28 }
 0x72f   : > { %5669 = vst.msk [vmem:[#allocation3 + $0x8] sm:$0xf] %vm15457_vm3, %v5576_v8  ;;  %vm15461_vm3 = vmmov %vm15455_vm0 }
 0x730   : > { %5757 = vrot.lane.b32.xlu0 %v13038_v26, %s9525_s28  ;;  %v5578_v60 = vpop.permute.xlu1 %5577 }
 0x731   : > { %5670 = vst.msk [vmem:[#allocation3 + $0xc] sm:$0xf] %vm15458_vm7, %v5578_v60  ;;  %vm15462_vm7 = vmmov %vm15455_vm0  ;;  %v5963_v60 = vld [vmem:[#allocation2 + $0x24] sm:$0xf] }
 0x732   : > { %v5580_v11 = vpop.permute.xlu0 %5579  ;;  %5759 = vrot.lane.b32.xlu1 %v13043_v30, %s9525_s28 }
 0x733   : > { %5671 = vst.msk [vmem:[#allocation3 + $0x10] sm:$0xf] %vm15459_vm2, %v5580_v11  ;;  %vm15463_vm2 = vmmov %vm15455_vm0 }
 0x734   : > { %5761 = vrot.lane.b32.xlu0 %v13138_v44, %s9525_s28  ;;  %v5582_v10 = vpop.permute.xlu1 %5581 }
 0x735   : > { %5672 = vst.msk [vmem:[#allocation3 + $0x14] sm:$0xf] %vm15455_vm0, %v5582_v10  ;;  %v5965_v10 = vld [vmem:[#allocation2 + $0x38] sm:$0xf] }
 0x736   : > { %v5584_v32 = vpop.permute.xlu0 %5583  ;;  %5763 = vrot.lane.b32.xlu1 %v13143_v9, %s9525_s28 }
 0x737   : > { %5673 = vst.msk [vmem:[#allocation3 + $0x18] sm:$0xf] %vm15460_vm11, %v5584_v32  ;;  %vm15464_vm11 = vmmov %vm15455_vm0  ;;  %v5964_v32 = vld [vmem:[#allocation2 + $0x28] sm:$0x1] }
 0x738   : > { %5831 = vrot.lane.b32.xlu0 %v12908_v29, %s9526_s29  ;;  %v5586_v24 = vpop.permute.xlu1 %5585 }
 0x739   : > { %5674 = vst.msk [vmem:[#allocation3 + $0x1c] sm:$0xf] %vm15461_vm3, %v5586_v24  ;;  %vm15465_vm3 = vmmov %vm15455_vm0 }
 0x73a   : > { %v5588_v16 = vpop.permute.xlu0 %5587  ;;  %5833 = vrot.lane.b32.xlu1 %v12913_v12, %s9526_s29 }
 0x73b   : > { %5675 = vst.msk [vmem:[#allocation3 + $0x20] sm:$0xf] %vm15462_vm7, %v5588_v16  ;;  %vm15466_vm7 = vmmov %vm15455_vm0  ;;  %v5961_v16 = vld [vmem:[#allocation2 + $0x10] sm:$0x1] }
 0x73c   : > { %5835 = vrot.lane.b32.xlu0 %v12918_v1, %s9526_s29  ;;  %v5590_v3 = vpop.permute.xlu1 %5589 }
 0x73d   : > { %5676 = vst.msk [vmem:[#allocation3 + $0x24] sm:$0xf] %vm15463_vm2, %v5590_v3  ;;  %vm15467_vm2 = vmmov %vm15455_vm0  ;;  %v5966_v3 = vld [vmem:[#allocation2 + $0x3c] sm:$0xf] }
 0x73e   : > { %v5592_v58 = vpop.permute.xlu0 %5591  ;;  %5837 = vrot.lane.b32.xlu1 %v12923_v25, %s9526_s29 }
 0x73f   : > { %5677 = vst.msk [vmem:[#allocation3 + $0x28] sm:$0xf] %vm15455_vm0, %v5592_v58 }
 0x740   : > { %5839 = vrot.lane.b32.xlu0 %v12928_v20, %s9526_s29  ;;  %v5594_v29 = vpop.permute.xlu1 %5593 }
 0x741   : > { %5678 = vst.msk [vmem:[#allocation3 + $0x2c] sm:$0xf] %vm15464_vm11, %v5594_v29  ;;  %vm15468_vm11 = vmmov %vm15455_vm0 }
 0x742   : > { %v5596_v12 = vpop.permute.xlu0 %5595  ;;  %5841 = vrot.lane.b32.xlu1 %v12933_v19, %s9526_s29 }
 0x743   : > { %5679 = vst.msk [vmem:[#allocation3 + $0x30] sm:$0xf] %vm15465_vm3, %v5596_v12  ;;  %vm15469_vm3 = vmmov %vm15455_vm0  ;;  %v6051_v12 = vshrl.u32 %v5963_v60, 16 }
 0x744   : > { %5843 = vrot.lane.b32.xlu0 %v12938_v37, %s9526_s29  ;;  %v5598_v1 = vpop.permute.xlu1 %5597 }
 0x745   : > { %5680 = vst.msk [vmem:[#allocation3 + $0x34] sm:$0xf] %vm15466_vm7, %v5598_v1  ;;  %vm15470_vm7 = vmmov %vm15455_vm0  ;;  %v5967_v1 = vld [vmem:[#allocation2 + $0x40] sm:$0x1] }
 0x746   : > { %v5600_v25 = vpop.permute.xlu0 %5599  ;;  %5845 = vrot.lane.b32.xlu1 %v12943_v27, %s9526_s29 }
 0x747   : > { %5681 = vst.msk [vmem:[#allocation3 + $0x38] sm:$0xf] %vm15467_vm2, %v5600_v25  ;;  %vm15471_vm2 = vmmov %vm15455_vm0 }
 0x748   : > { %5847 = vrot.lane.b32.xlu0 %v12948_v7, %s9526_s29  ;;  %v5602_v20 = vpop.permute.xlu1 %5601 }
 0x749   : > { %5682 = vst.msk [vmem:[#allocation3 + $0x3c] sm:$0xf] %vm15455_vm0, %v5602_v20  ;;  %v6062_v20 = vshrl.u32 %v5965_v10, 16 }
 0x74a   : > { %v5604_v19 = vpop.permute.xlu0 %5603  ;;  %5849 = vrot.lane.b32.xlu1 %v12953_v45, %s9526_s29 }
 0x74b   : > { %5683 = vst.msk [vmem:[#allocation3 + $0x40] sm:$0xf] %vm15468_vm11, %v5604_v19  ;;  %vm15472_vm11 = vmmov %vm15455_vm0  ;;  %v6065_v19 = vshll.u32 %v5965_v10, 16 }
 0x74c   : > { %5851 = vrot.lane.b32.xlu0 %v12958_v33, %s9526_s29  ;;  %v5606_v37 = vpop.permute.xlu1 %5605 }
 0x74d   : > { %5684 = vst.msk [vmem:[#allocation3 + $0x44] sm:$0xf] %vm15469_vm3, %v5606_v37  ;;  %vm15473_vm3 = vmmov %vm15455_vm0  ;;  %v6033_v37 = vshll.u32 %v5961_v16, 16 }
 0x74e   : > { %v5608_v27 = vpop.permute.xlu0 %5607  ;;  %5853 = vrot.lane.b32.xlu1 %v12963_v34, %s9526_s29 }
 0x74f   : > { %5685 = vst.msk [vmem:[#allocation3 + $0x48] sm:$0xf] %vm15470_vm7, %v5608_v27  ;;  %vm15474_vm7 = vmmov %vm15455_vm0  ;;  %v6071_v27 = vshll.u32 %v5966_v3, 16 }
 0x750   : > { %5855 = vrot.lane.b32.xlu0 %v12968_v31, %s9526_s29  ;;  %v5610_v7 = vpop.permute.xlu1 %5609 }
 0x751   : > { %5686 = vst.msk [vmem:[#allocation3 + $0x4c] sm:$0xf] %vm15471_vm2, %v5610_v7  ;;  %vm15475_vm2 = vmmov %vm15455_vm0  ;;  %v6075_v7 = vshrl.u32 %v5966_v3, 16 }
 0x752   : > { %v5612_v45 = vpop.permute.xlu0 %5611  ;;  %5857 = vrot.lane.b32.xlu1 %v12973_v51, %s9526_s29 }
 0x753   : > { %5687 = vst.msk [vmem:[#allocation3 + $0x50] sm:$0xf] %vm15455_vm0, %v5612_v45  ;;  %v5968_v45 = vld [vmem:[#allocation2 + $0x50] sm:$0xf] }
 0x754   : > { %5859 = vrot.lane.b32.xlu0 %v12978_v23, %s9526_s29  ;;  %v5614_v33 = vpop.permute.xlu1 %5613 }
 0x755   : > { %5688 = vst.msk [vmem:[#allocation3 + $0x54] sm:$0xf] %vm15472_vm11, %v5614_v33  ;;  %vm15476_vm11 = vmmov %vm15455_vm0 }
 0x756   : > { %v5616_v34 = vpop.permute.xlu0 %5615  ;;  %5861 = vrot.lane.b32.xlu1 %v12983_v52, %s9526_s29 }
 0x757   : > { %5689 = vst.msk [vmem:[#allocation3 + $0x58] sm:$0xf] %vm15473_vm3, %v5616_v34  ;;  %vm15477_vm3 = vmmov %vm15455_vm0  ;;  %v6057_v34 = vshll.u32 %v5964_v32, 16 }
 0x758   : > { %5863 = vrot.lane.b32.xlu0 %v12988_v48, %s9526_s29  ;;  %v5618_v31 = vpop.permute.xlu1 %5617 }
 0x759   : > { %5690 = vst.msk [vmem:[#allocation3 + $0x5c] sm:$0xf] %vm15474_vm7, %v5618_v31  ;;  %vm15478_vm7 = vmmov %vm15455_vm0  ;;  %v5969_v31 = vld [vmem:[#allocation2 + $0x54] sm:$0xf] }
 0x75a   : > { %v5620_v51 = vpop.permute.xlu0 %5619  ;;  %5865 = vrot.lane.b32.xlu1 %v12993_v40, %s9526_s29 }
 0x75b   : > { %5691 = vst.msk [vmem:[#allocation3 + $0x60] sm:$0xf] %vm15475_vm2, %v5620_v51  ;;  %vm15479_vm2 = vmmov %vm15455_vm0  ;;  %v6081_v51 = vshll.u32 %v5967_v1, 16 }
 0x75c   : > { %5867 = vrot.lane.b32.xlu0 %v12998_v59, %s9526_s29  ;;  %v5622_v23 = vpop.permute.xlu1 %5621  ;;  %v5959_v59 = vld [vmem:[#allocation2 + $0x8] sm:$0xf] }
 0x75d   : > { %5692 = vst.msk [vmem:[#allocation3 + $0x64] sm:$0xf] %vm15455_vm0, %v5622_v23  ;;  %v6014_v2 = vshrl.u32 %v5959_v59, 16  ;;  %v6017_v6 = vshll.u32 %v5959_v59, 16  ;;  %v13250_v10 = vrot.slane %v6081_v51, 5 }
 0x75e   : > { %v5624_v52 = vpop.permute.xlu0 %5623  ;;  %5869 = vrot.lane.b32.xlu1 %v13003_v43, %s9526_s29  ;;  %v5960_v43 = vld [vmem:[#allocation2 + $0xc] sm:$0xf]  ;;  %v5975_v51 = vld [vmem:[#allocation2 + $0x84] sm:$0xf] }
 0x75f   : > { %5693 = vst.msk [vmem:[#allocation3 + $0x68] sm:$0xf] %vm15476_vm11, %v5624_v52  ;;  %v6027_v15 = vshrl.u32 %v5960_v43, 16  ;;  %vm15480_vm11 = vmmov %vm15455_vm0  ;;  %v6016_v61 = vrot.slane %v6014_v2, 4  ;;  %v6019_v47 = vrot.slane %v6017_v6, 5  ;;  %v6086_v2 = vshrl.u32 %v5968_v45, 16 }
 0x760   : > { %5871 = vrot.lane.b32.xlu0 %v13008_v14, %s9526_s29  ;;  %v5626_v48 = vpop.permute.xlu1 %5625  ;;  %v5962_v14 = vld [vmem:[#allocation2 + $0x20] sm:$0xf]  ;;  %v6089_v6 = vshll.u32 %v5968_v45, 16 }
 0x761   : > { %5694 = vst.msk [vmem:[#allocation3 + $0x6c] sm:$0xf] %vm15477_vm3, %v5626_v48  ;;  %v6041_v22 = vshll.u32 %v5962_v14, 16  ;;  %vm15481_vm3 = vcmask 322816   ;;  %v6029_v11 = vrot.slane %v6027_v15, 4  ;;  %v6020_v58 = vor.u32 %v6019_v47, %v6016_v61 }
 0x762   : > { %v5628_v40 = vpop.permute.xlu0 %5627  ;;  %5873 = vrot.lane.b32.xlu1 %v13013_v55, %s9526_s29  ;;  %v6023_v55 = vshll.u32 %v5960_v43, 16  ;;  %v6067_v43 = vrot.slane %v6065_v19, 5  ;;  %v13243_v15 = vrot.slane %v6071_v27, 5  ;;  %v6059_v61 = vrot.slane %v6057_v34, 5  ;;  %v5977_v19 = vld [vmem:[#allocation2 + $0x98] sm:$0xf] }
 0x763   : > { %5695 = vst.msk [vmem:[#allocation3 + $0x70] sm:$0xf] %vm15478_vm7, %v5628_v40  ;;  %vm15482_vm7 = vmmov %vm15481_vm3  ;;  %v6043_v29 = vrot.slane %v6041_v22, 5  ;;  %v6021_v23 = vrot.slane %v6020_v58, 4  ;;  %v6053_v40 = vrot.slane %v6051_v12, 4  ;;  %v6095_v47 = vshll.u32 %v5969_v31, 16 }
 0x764   : > { %5875 = vrot.lane.b32.xlu0 %v13018_v53, %s9526_s29  ;;  %v5630_v0 = vpop.permute.xlu1 %5629  ;;  %v6038_v53 = vshrl.u32 %v5962_v14, 16  ;;  %v5538_v14 = vld [vmem:[#allocation2 + $0x1a4] sm:$0xf]  ;;  %v5971_v22 = vld [vmem:[#allocation2 + $0x68] sm:$0xf] }
 0x765   : > { %5696 = vst.msk [vmem:[#allocation3 + $0x74] sm:$0xf] %vm15479_vm2, %v5630_v0  ;;  %vm15483_vm2 = vmmov %vm15481_vm3  ;;  %v6064_v0 = vrot.slane %v6062_v20, 4  ;;  %v5972_v12 = vld [vmem:[#allocation2 + $0x6c] sm:$0xf]  ;;  %v6113_v20 = vshll.u32 %v5971_v22, 16 }
 0x766   : > { %v5632_v56 = vpop.permute.xlu0 %5631  ;;  %5877 = vrot.lane.b32.xlu1 %v13023_v13, %s9526_s29  ;;  %v13226_v13 = vrot.slane %v6023_v55, 5  ;;  %v6040_v24 = vrot.slane %v6038_v53, 4  ;;  %v6035_v55 = vrot.slane %v6033_v37, 5  ;;  %v13261_v37 = vrot.slane %v6095_v47, 5 }
 0x767   : > { %5697 = vst.msk [vmem:[#allocation3 + $0x78] sm:$0xf] %vm15455_vm0, %v5632_v56  ;;  %vm15484_vm0 = vmmov %vm15483_vm2  ;;  %v6068_v58 = vor.u32 %v6067_v43, %v6064_v0  ;;  %v6119_v34 = vshll.u32 %v5972_v12, 16  ;;  %v6161_v0 = vshll.u32 %v5977_v19, 16 }
 0x768   : > { %5879 = vrot.lane.b32.xlu0 %v13028_v41, %s9526_s29  ;;  %v5634_v35 = vpop.permute.xlu1 %5633  ;;  %v6044_v52 = vor.u32 %v6043_v29, %v6040_v24  ;;  %v13253_v24 = vld [vmem:[#allocation2 + $0x70] sm:$0x1]  ;;  %v6088_v29 = vrot.slane %v6086_v2, 4 }
 0x769   : > { %5698 = vst.msk [vmem:[#allocation3 + $0x7c] sm:$0xf] %vm15480_vm11, %v5634_v35  ;;  %vm15485_vm11 = vmmov %vm15484_vm0  ;;  %v6077_v35 = vrot.slane %v6075_v7, 4 }
 0x76a   : > { %v5702_v8 = vpop.permute.xlu0 %5701  ;;  %5881 = vrot.lane.b32.xlu1 %v13033_v46, %s9526_s29  ;;  %v6047_v46 = vshll.u32 %v5963_v60, 16  ;;  %v6026_v60 = vsel %vm10432_vm10, %v6021_v23, %v13226_v13  ;;  %v6045_v3 = vrot.slane %v6044_v52, 4 }
 0x76b   : > { %5797 = vst.msk [vmem:[#allocation3] sm:$0xf] %vm15481_vm3, %v5702_v8  ;;  %vm15486_vm3 = vmmov %vm15484_vm0  ;;  %v6078_v1 = vor.u32 %v6077_v35, %v13243_v15 }
 0x76c   : > { %5883 = vrot.lane.b32.xlu0 %v13038_v26, %s9526_s29  ;;  %v5704_v41 = vpop.permute.xlu1 %5703  ;;  %v6030_v26 = vor.u32 %v6029_v11, %v13226_v13  ;;  %v6049_v48 = vrot.slane %v6047_v46, 5  ;;  %v6091_v46 = vrot.slane %v6089_v6, 5 }
 0x76d   : > { %5798 = vst.msk [vmem:[#allocation3 + $0x4] sm:$0xf] %vm15482_vm7, %v5704_v41  ;;  %v5974_v41 = vld [vmem:[#allocation2 + $0x80] sm:$0xf]  ;;  %vm15488_vm7 = vmmov %vm15484_vm0  ;;  %v6079_v2 = vrot.slane %v6078_v1, 4 }
 0x76e   : > { %v5706_v25 = vpop.permute.xlu0 %5705  ;;  %5885 = vrot.lane.b32.xlu1 %v13043_v30, %s9526_s29  ;;  %v5537_v30 = vld [vmem:[#allocation2 + $0x1a0] sm:$0xf]  ;;  %v6031_v56 = vrot.slane %v6030_v26, 4  ;;  %v6054_v11 = vor.u32 %v6053_v40, %v6049_v48  ;;  %v6134_v7 = vshrl.u32 %v5974_v41, 16  ;;  %v6137_v45 = vshll.u32 %v5974_v41, 16 }
 0x76f   : > { %5799 = vst.msk [vmem:[#allocation3 + $0x8] sm:$0xf] %vm15483_vm2, %v5706_v25  ;;  %v6110_v25 = vshrl.u32 %v5971_v22, 16  ;;  %vm15489_vm2 = vmmov %vm15484_vm0  ;;  %v13267_v52 = vsel %vm10432_vm10, %v6045_v3, %v6049_v48  ;;  %v6069_v40 = vrot.slane %v6068_v58, 4  ;;  %v6092_v43 = vor.u32 %v6091_v46, %v6088_v29  ;;  %v5980_v58 = vld [vmem:[#allocation2 + $0xb0] sm:$0xf] }
 0x770   : > { %5887 = vrot.lane.b32.xlu0 %v13138_v44, %s9526_s29  ;;  %v5708_v33 = vpop.permute.xlu1 %5707  ;;  %v13240_v44 = vld [vmem:[#allocation2 + $0x58] sm:$0x1]  ;;  %v6036_v13 = vsel %vm10432_vm10, %v6031_v56, %v6035_v55  ;;  %v6136_v48 = vrot.slane %v6134_v7, 4  ;;  %v6139_v35 = vrot.slane %v6137_v45, 5  ;;  %v6147_v22 = vshrl.u32 %v5975_v51, 16 }
 0x771   : > { %5800 = vst.msk [vmem:[#allocation3 + $0xc] sm:$0xf] %vm15484_vm0, %v5708_v33  ;;  %v6105_v32 = vshll.u32 %v13240_v44, 16  ;;  %v6055_v33 = vrot.slane %v6054_v11, 4  ;;  %v6112_v6 = vrot.slane %v6110_v25, 4  ;;  %v6115_v44 = vrot.slane %v6113_v20, 5 }
 0x772   : > { %v5710_v59 = vpop.permute.xlu0 %5709  ;;  %5889 = vrot.lane.b32.xlu1 %v13143_v9, %s9526_s29  ;;  %v6099_v9 = vshrl.u32 %v5969_v31, 16  ;;  %v6123_v31 = vshrl.u32 %v5972_v12, 16  ;;  %v13285_v29 = vsel %vm10432_vm10, %v6069_v40, %v13243_v15  ;;  %v13292_v1 = vsel %vm10432_vm10, %v6079_v2, %v13250_v10  ;;  %v5981_v45 = vld [vmem:[#allocation2 + $0xb4] sm:$0xf]  ;;  %v5983_v2 = vld [vmem:[#allocation2 + $0xc8] sm:$0xf] }
 0x773   : > { %5801 = vst.msk [vmem:[#allocation3 + $0x10] sm:$0xf] %vm15485_vm11, %v5710_v59  ;;  %v6158_v59 = vshrl.u32 %v5977_v19, 16  ;;  %vm15490_vm11 = vmmov %vm15484_vm0  ;;  %v13277_v47 = vsel %vm10432_vm10, %v6055_v33, %v6059_v61  ;;  %v6093_v61 = vrot.slane %v6092_v43, 4  ;;  %v6116_v46 = vor.u32 %v6115_v44, %v6112_v6 }
 0x774   : > { %5891 = vrot.lane.b32.xlu0 %v5537_v30, %s9526_s29  ;;  %v5712_v53 = vpop.permute.xlu1 %5711  ;;  %v6101_v27 = vrot.slane %v6099_v9, 4  ;;  %v6129_v30 = vshll.u32 %v13253_v24, 16  ;;  %v6121_v9 = vrot.slane %v6119_v34, 5  ;;  %v6163_v24 = vrot.slane %v6161_v0, 5 }
 0x775   : > { %5802 = vst.msk [vmem:[#allocation3 + $0x14] sm:$0xf] %vm15486_vm3, %v5712_v53  ;;  %v6143_v53 = vshll.u32 %v5975_v51, 16  ;;  %v6160_v41 = vrot.slane %v6158_v59, 4  ;;  %vm15491_vm3 = vmmov %vm15484_vm0  ;;  %v6107_v12 = vrot.slane %v6105_v32, 5  ;;  %v6140_v20 = vor.u32 %v6139_v35, %v6136_v48 }
 0x776   : > { %v5714_v16 = vpop.permute.xlu0 %5713  ;;  %5893 = vrot.lane.b32.xlu1 %v5538_v14, %s9526_s29  ;;  %v5978_v14 = vld [vmem:[#allocation2 + $0x9c] sm:$0xf]  ;;  %v6102_v55 = vor.u32 %v6101_v27, %v13261_v37  ;;  %v5979_v27 = vld [vmem:[#allocation2 + $0xa0] sm:$0x1]  ;;  %v6149_v7 = vrot.slane %v6147_v22, 4  ;;  %v6182_v32 = vshrl.u32 %v5980_v58, 16  ;;  %v13301_v40 = vsel %vm10432_vm10, %v6093_v61, %v13261_v37 }
 0x777   : > { %5803 = vst.msk [vmem:[#allocation3 + $0x18] sm:$0xf] %vm15488_vm7, %v5714_v16  ;;  %v6167_v16 = vshll.u32 %v5978_v14, 16  ;;  %v6171_v3 = vshrl.u32 %v5978_v14, 16  ;;  %v6145_v19 = vrot.slane %v6143_v53, 5  ;;  %vm15492_vm7 = vmmov %vm15484_vm0  ;;  %v6185_v33 = vshll.u32 %v5980_v58, 16 }
 0x778   : > { %6397 = vrot.lane.b32.xlu0 %v6026_v60, %s9527_s30  ;;  %v5716_v26 = vpop.permute.xlu1 %5715  ;;  %v6125_v60 = vrot.slane %v6123_v31, 4  ;;  %v6103_v25 = vrot.slane %v6102_v55, 4  ;;  %v6131_v31 = vrot.slane %v6129_v30, 5  ;;  %v6164_v51 = vor.u32 %v6163_v24, %v6160_v41  ;;  %v5984_v55 = vld [vmem:[#allocation2 + $0xcc] sm:$0xf] }
 0x779   : > { %5804 = vst.msk [vmem:[#allocation3 + $0x1c] sm:$0xf] %vm15489_vm2, %v5716_v26  ;;  %v5976_v26 = vld [vmem:[#allocation2 + $0x88] sm:$0x1]  ;;  %v6169_v10 = vrot.slane %v6167_v16, 5  ;;  %vm15493_vm2 = vmmov %vm15484_vm0  ;;  %v6117_v59 = vrot.slane %v6116_v46, 4  ;;  %v6150_v48 = vor.u32 %v6149_v7, %v6145_v19 }
 0x77a   : > { %v5718_v23 = vpop.permute.xlu0 %5717  ;;  %6399 = vrot.lane.b32.xlu1 %v6036_v13, %s9527_s30  ;;  %v6126_v15 = vor.u32 %v6125_v60, %v6121_v9  ;;  %v6153_v0 = vshll.u32 %v5976_v26, 16  ;;  %v6177_v43 = vshll.u32 %v5979_v27, 16  ;;  %v13307_v30 = vsel %vm10432_vm10, %v6103_v25, %v6107_v12  ;;  %v5982_v7 = vld [vmem:[#allocation2 + $0xb8] sm:$0x1] }
 0x77b   : > { %5805 = vst.msk [vmem:[#allocation3 + $0x20] sm:$0xf] %vm15484_vm0, %v5718_v23  ;;  %v6173_v23 = vrot.slane %v6171_v3, 4  ;;  %v6141_v44 = vrot.slane %v6140_v20, 4  ;;  %v6191_v14 = vshll.u32 %v5981_v45, 16  ;;  %v6184_v35 = vrot.slane %v6182_v32, 4 }
 0x77c   : > { %6401 = vrot.lane.b32.xlu0 %v13267_v52, %s9527_s30  ;;  %v5720_v56 = vpop.permute.xlu1 %5719  ;;  %v6127_v37 = vrot.slane %v6126_v15, 4  ;;  %v6187_v53 = vrot.slane %v6185_v33, 5  ;;  %v6165_v60 = vrot.slane %v6164_v51, 4  ;;  %v6206_v41 = vshrl.u32 %v5983_v2, 16  ;;  %v5986_v20 = vld [vmem:[#allocation2 + $0xe0] sm:$0xf] }
 0x77d   : > { %5806 = vst.msk [vmem:[#allocation3 + $0x24] sm:$0xf] %vm15490_vm11, %v5720_v56  ;;  %v6195_v56 = vshrl.u32 %v5981_v45, 16  ;;  %v6209_v24 = vshll.u32 %v5983_v2, 16  ;;  %vm15494_vm11 = vmmov %vm15484_vm0  ;;  %v13315_v16 = vsel %vm10432_vm10, %v6117_v59, %v6121_v9  ;;  %v6215_v3 = vshll.u32 %v5984_v55, 16 }
 0x77e   : > { %v5722_v11 = vpop.permute.xlu0 %5721  ;;  %6403 = vrot.lane.b32.xlu1 %v13277_v47, %s9527_s30  ;;  %v6219_v58 = vshrl.u32 %v5984_v55, 16  ;;  %v6155_v46 = vrot.slane %v6153_v0, 5  ;;  %v13319_v12 = vrot.slane %v6191_v14, 5  ;;  %v13324_v26 = vsel %vm10432_vm10, %v6141_v44, %v6145_v19  ;;  %v5987_v45 = vld [vmem:[#allocation2 + $0xe4] sm:$0xf] }
 0x77f   : > { %5807 = vst.msk [vmem:[#allocation3 + $0x28] sm:$0xf] %vm15491_vm3, %v5722_v11  ;;  %v6174_v11 = vor.u32 %v6173_v23, %v6169_v10  ;;  %v6197_v25 = vrot.slane %v6195_v56, 4  ;;  %vm15495_vm3 = vmmov %vm15484_vm0  ;;  %v13328_v9 = vsel %vm10432_vm10, %v6127_v37, %v6131_v31  ;;  %v6151_v27 = vrot.slane %v6150_v48, 4  ;;  %v5989_v23 = vld [vmem:[#allocation2 + $0xf8] sm:$0xf] }
 0x780   : > { %6405 = vrot.lane.b32.xlu0 %v13285_v29, %s9527_s30  ;;  %v5724_v13 = vpop.permute.xlu1 %5723  ;;  %v6188_v15 = vor.u32 %v6187_v53, %v6184_v35  ;;  %v13334_v33 = vsel %vm10432_vm10, %v6165_v60, %v6169_v10  ;;  %v6208_v51 = vrot.slane %v6206_v41, 4  ;;  %v6211_v19 = vrot.slane %v6209_v24, 5  ;;  %v5990_v2 = vld [vmem:[#allocation2 + $0xfc] sm:$0xf]  ;;  %v5985_v55 = vld [vmem:[#allocation2 + $0xd0] sm:$0x1] }
 0x781   : > { %5808 = vst.msk [vmem:[#allocation3 + $0x2c] sm:$0xf] %vm15492_vm7, %v5724_v13  ;;  %v6179_v13 = vrot.slane %v6177_v43, 5  ;;  %vm15496_vm7 = vmmov %vm15484_vm0  ;;  %v13337_v31 = vrot.slane %v6215_v3, 5  ;;  %v6230_v59 = vshrl.u32 %v5986_v20, 16  ;;  %v6233_v0 = vshll.u32 %v5986_v20, 16 }
 0x782   : > { %v5726_v34 = vpop.permute.xlu0 %5725  ;;  %6407 = vrot.lane.b32.xlu1 %v13292_v1, %s9527_s30  ;;  %v6221_v43 = vrot.slane %v6219_v58, 4  ;;  %v6198_v44 = vor.u32 %v6197_v25, %v13319_v12  ;;  %v6201_v10 = vshll.u32 %v5982_v7, 16  ;;  %v6239_v14 = vshll.u32 %v5987_v45, 16  ;;  %v5992_v3 = vld [vmem:[#allocation2 + $0x110] sm:$0xf] }
 0x783   : > { %5809 = vst.msk [vmem:[#allocation3 + $0x30] sm:$0xf] %vm15493_vm2, %v5726_v34  ;;  %v6175_v34 = vrot.slane %v6174_v11, 4  ;;  %v6243_v56 = vshrl.u32 %v5987_v45, 16  ;;  %vm15497_vm2 = vmmov %vm15484_vm0  ;;  %v13345_v37 = vsel %vm10432_vm10, %v6151_v27, %v6155_v46  ;;  %v6189_v48 = vrot.slane %v6188_v15, 4 }
 0x784   : > { %6409 = vrot.lane.b32.xlu0 %v13301_v40, %s9527_s30  ;;  %v5728_v6 = vpop.permute.xlu1 %5727  ;;  %v6254_v35 = vshrl.u32 %v5989_v23, 16  ;;  %v6257_v53 = vshll.u32 %v5989_v23, 16  ;;  %v6212_v11 = vor.u32 %v6211_v19, %v6208_v51  ;;  %v6263_v41 = vshll.u32 %v5990_v2, 16  ;;  %v5993_v51 = vld [vmem:[#allocation2 + $0x114] sm:$0xf] }
 0x785   : > { %5810 = vst.msk [vmem:[#allocation3 + $0x34] sm:$0xf] %vm15484_vm0, %v5728_v6  ;;  %v13351_v60 = vsel %vm10432_vm10, %v6175_v34, %v6179_v13  ;;  %v6267_v24 = vshrl.u32 %v5990_v2, 16  ;;  %v6232_v58 = vrot.slane %v6230_v59, 4  ;;  %v6222_v46 = vor.u32 %v6221_v43, %v13337_v31  ;;  %v5988_v13 = vld [vmem:[#allocation2 + $0xe8] sm:$0x1] }
 0x786   : > { %v5730_v22 = vpop.permute.xlu0 %5729  ;;  %6411 = vrot.lane.b32.xlu1 %v13307_v30, %s9527_s30  ;;  %v6225_v25 = vshll.u32 %v5985_v55, 16  ;;  %v6199_v27 = vrot.slane %v6198_v44, 4  ;;  %v6203_v15 = vrot.slane %v6201_v10, 5  ;;  %v13357_v7 = vrot.slane %v6239_v14, 5  ;;  %v5991_v2 = vld [vmem:[#allocation2 + $0x100] sm:$0x1] }
 0x787   : > { %5811 = vst.msk [vmem:[#allocation3 + $0x38] sm:$0xf] %vm15494_vm11, %v5730_v22  ;;  %v6245_v45 = vrot.slane %v6243_v56, 4  ;;  %vm15498_vm11 = vmmov %vm15484_vm0  ;;  %v6259_v34 = vrot.slane %v6257_v53, 5  ;;  %v6278_v19 = vshrl.u32 %v5992_v3, 16  ;;  %v6281_v23 = vshll.u32 %v5992_v3, 16 }
 0x788   : > { %6413 = vrot.lane.b32.xlu0 %v13315_v16, %s9527_s30  ;;  %v5732_v61 = vpop.permute.xlu1 %5731  ;;  %v13367_v43 = vrot.slane %v6263_v41, 5  ;;  %v6213_v44 = vrot.slane %v6212_v11, 4  ;;  %v6223_v14 = vrot.slane %v6222_v46, 4  ;;  %v6227_v56 = vrot.slane %v6225_v25, 5  ;;  %v5995_v55 = vld [vmem:[#allocation2 + $0x128] sm:$0xf] }
 0x789   : > { %5812 = vst.msk [vmem:[#allocation3 + $0x3c] sm:$0xf] %vm15495_vm3, %v5732_v61  ;;  %v6235_v61 = vrot.slane %v6233_v0, 5  ;;  %v13363_v0 = vsel %vm10432_vm10, %v6189_v48, %v13319_v12  ;;  %vm15499_vm3 = vmmov %vm15484_vm0  ;;  %v6246_v12 = vor.u32 %v6245_v45, %v13357_v7  ;;  %v6249_v48 = vshll.u32 %v5988_v13, 16  ;;  %v5996_v25 = vld [vmem:[#allocation2 + $0x12c] sm:$0xf] }
 0x78a   : > { %v5734_v32 = vpop.permute.xlu0 %5733  ;;  %6415 = vrot.lane.b32.xlu1 %v13328_v9, %s9527_s30  ;;  %v6287_v53 = vshll.u32 %v5993_v51, 16  ;;  %v13376_v41 = vsel %vm10432_vm10, %v6199_v27, %v6203_v15  ;;  %v6283_v3 = vrot.slane %v6281_v23, 5  ;;  %v6273_v46 = vshll.u32 %v5991_v2, 16 }
 0x78b   : > { %5813 = vst.msk [vmem:[#allocation3 + $0x40] sm:$0xf] %vm15496_vm7, %v5734_v32  ;;  %v6256_v32 = vrot.slane %v6254_v35, 4  ;;  %v6236_v10 = vor.u32 %v6235_v61, %v6232_v58  ;;  %vm15500_vm7 = vmmov %vm15484_vm0  ;;  %v6305_v13 = vshll.u32 %v5995_v55, 16  ;;  %v13385_v27 = vsel %vm10432_vm10, %v6213_v44, %v13337_v31 }
 0x78c   : > { %6417 = vrot.lane.b32.xlu0 %v13324_v26, %s9527_s30  ;;  %v5736_v6 = vpop.permute.xlu1 %5735  ;;  %v13389_v45 = vsel %vm10432_vm10, %v6223_v14, %v6227_v56  ;;  %v6311_v31 = vshll.u32 %v5996_v25, 16  ;;  %v6315_v44 = vshrl.u32 %v5996_v25, 16  ;;  %v6275_v56 = vrot.slane %v6273_v46, 5  ;;  %v5997_v46 = vld [vmem:[#allocation2 + $0x130] sm:$0x1] }
 0x78d   : > { %5814 = vst.msk [vmem:[#allocation3 + $0x44] sm:$0xf] %vm15497_vm2, %v5736_v6  ;;  %v6269_v6 = vrot.slane %v6267_v24, 4  ;;  %v6260_v11 = vor.u32 %v6259_v34, %v6256_v32  ;;  %v6280_v24 = vrot.slane %v6278_v19, 4  ;;  %vm15501_vm2 = vmmov %vm15484_vm0  ;;  %v6237_v15 = vrot.slane %v6236_v10, 4 }
 0x78e   : > { %v5738_v22 = vpop.permute.xlu0 %5737  ;;  %6419 = vrot.lane.b32.xlu1 %v13345_v37, %s9527_s30  ;;  %v6247_v34 = vrot.slane %v6246_v12, 4  ;;  %v6289_v19 = vrot.slane %v6287_v53, 5  ;;  %v5994_v10 = vld [vmem:[#allocation2 + $0x118] sm:$0x1]  ;;  %v5999_v12 = vld [vmem:[#allocation2 + $0x144] sm:$0xf] }
 0x78f   : > { %5815 = vst.msk [vmem:[#allocation3 + $0x48] sm:$0xf] %vm15484_vm0, %v5738_v22  ;;  %v6291_v22 = vshrl.u32 %v5993_v51, 16  ;;  %v6270_v61 = vor.u32 %v6269_v6, %v13367_v43  ;;  %v6251_v51 = vrot.slane %v6249_v48, 5  ;;  %v6261_v2 = vrot.slane %v6260_v11, 4 }
 0x790   : > { %6421 = vrot.lane.b32.xlu0 %v13334_v33, %s9527_s30  ;;  %v5740_v20 = vpop.permute.xlu1 %5739  ;;  %v6284_v6 = vor.u32 %v6283_v3, %v6280_v24  ;;  %v13400_v48 = vsel %vm10432_vm10, %v6237_v15, %v13357_v7  ;;  %v6001_v25 = vld [vmem:[#allocation2 + $0x158] sm:$0xf]  ;;  %v6339_v7 = vshrl.u32 %v5999_v12, 16  ;;  %v6317_v15 = vrot.slane %v6315_v44, 4 }
 0x791   : > { %5816 = vst.msk [vmem:[#allocation3 + $0x4c] sm:$0xf] %vm15498_vm11, %v5740_v20  ;;  %v6302_v20 = vshrl.u32 %v5995_v55, 16  ;;  %v6293_v23 = vrot.slane %v6291_v22, 4  ;;  %v6271_v14 = vrot.slane %v6270_v61, 4  ;;  %vm15502_vm11 = vmmov %vm15484_vm0  ;;  %v13406_v24 = vsel %vm10432_vm10, %v6247_v34, %v6251_v51 }
 0x792   : > { %v5742_v59 = vpop.permute.xlu0 %5741  ;;  %6423 = vrot.lane.b32.xlu1 %v13351_v60, %s9527_s30  ;;  %v6297_v61 = vshll.u32 %v5994_v10, 16  ;;  %v6285_v34 = vrot.slane %v6284_v6, 4  ;;  %v6350_v10 = vshrl.u32 %v6001_v25, 16  ;;  %v6321_v28 = vshll.u32 %v5997_v46, 16 }
 0x793   : > { %5817 = vst.msk [vmem:[#allocation3 + $0x50] sm:$0xf] %vm15499_vm3, %v5742_v59  ;;  %v5998_v59 = vld [vmem:[#allocation2 + $0x140] sm:$0xf]  ;;  %v6294_v3 = vor.u32 %v6293_v23, %v6289_v19  ;;  %vm15503_vm3 = vmmov %vm15484_vm0  ;;  %v13418_v51 = vsel %vm10432_vm10, %v6271_v14, %v6275_v56 }
 0x794   : > { %6425 = vrot.lane.b32.xlu0 %v13363_v0, %s9527_s30  ;;  %v5744_v35 = vpop.permute.xlu1 %5743  ;;  %v6326_v53 = vshrl.u32 %v5998_v59, 16  ;;  %v6329_v22 = vshll.u32 %v5998_v59, 16  ;;  %v6352_v46 = vrot.slane %v6350_v10, 4 }
 0x795   : > { %5818 = vst.msk [vmem:[#allocation3 + $0x54] sm:$0xf] %vm15500_vm7, %v5744_v35  ;;  %v6304_v35 = vrot.slane %v6302_v20, 4  ;;  %v6313_v20 = vrot.slane %v6311_v31, 5  ;;  %vm15504_vm7 = vmmov %vm15484_vm0 }
 0x796   : > { %v5746_v58 = vpop.permute.xlu0 %5745  ;;  %6427 = vrot.lane.b32.xlu1 %v13376_v41, %s9527_s30  ;;  %v6328_v31 = vrot.slane %v6326_v53, 4  ;;  %v6331_v44 = vrot.slane %v6329_v22, 5  ;;  %v13426_v53 = vsel %vm10432_vm10, %v6285_v34, %v6289_v19  ;;  %v6000_v22 = vld [vmem:[#allocation2 + $0x148] sm:$0x1]  ;;  %v6323_v19 = vrot.slane %v6321_v28, 5 }
 0x797   : > { %5819 = vst.msk [vmem:[#allocation3 + $0x58] sm:$0xf] %vm15501_vm2, %v5746_v58  ;;  %v6307_v58 = vrot.slane %v6305_v13, 5  ;;  %v6335_v13 = vshll.u32 %v5999_v12, 16  ;;  %v6353_v12 = vshll.u32 %v6001_v25, 16  ;;  %vm15505_vm2 = vmmov %vm15484_vm0  ;;  %v6318_v14 = vor.u32 %v6317_v15, %v6313_v20 }
 0x798   : > { %6429 = vrot.lane.b32.xlu0 %v13385_v27, %s9527_s30  ;;  %v5748_v32 = vpop.permute.xlu1 %5747  ;;  %v6345_v34 = vshll.u32 %v6000_v22, 16 }
 0x799   : > { %5820 = vst.msk [vmem:[#allocation3 + $0x5c] sm:$0xf] %vm15484_vm0, %v5748_v32  ;;  %v6002_v32 = vld [vmem:[#allocation2 + $0x15c] sm:$0xf]  ;;  %v6308_v23 = vor.u32 %v6307_v58, %v6304_v35  ;;  %v6337_v6 = vrot.slane %v6335_v13, 5  ;;  %v6341_v35 = vrot.slane %v6339_v7, 4 }
 0x79a   : > { %v5750_v55 = vpop.permute.xlu0 %5749  ;;  %6431 = vrot.lane.b32.xlu1 %v13389_v45, %s9527_s30  ;;  %v6359_v38 = vshll.u32 %v6002_v32, 16  ;;  %v6363_v56 = vshrl.u32 %v6002_v32, 16  ;;  %v6355_v25 = vrot.slane %v6353_v12, 5  ;;  %v6319_v32 = vrot.slane %v6318_v14, 4 }
 0x79b   : > { %5821 = vst.msk [vmem:[#allocation3 + $0x60] sm:$0xf] %vm15502_vm11, %v5750_v55  ;;  %v13412_v55 = vsel %vm10432_vm10, %v6261_v2, %v13367_v43  ;;  %v6295_v2 = vrot.slane %v6294_v3, 4  ;;  %v6309_v3 = vrot.slane %v6308_v23, 4  ;;  %vm15506_vm11 = vmmov %vm15484_vm0  ;;  %v6347_v14 = vrot.slane %v6345_v34, 5 }
 0x79c   : > { %6433 = vrot.lane.b32.xlu0 %v13400_v48, %s9527_s30  ;;  %v5752_v11 = vpop.permute.xlu1 %5751  ;;  %v6361_v15 = vrot.slane %v6359_v38, 5  ;;  %v6365_v23 = vrot.slane %v6363_v56, 4  ;;  %v6356_v28 = vor.u32 %v6355_v25, %v6352_v46 }
 0x79d   : > { %5822 = vst.msk [vmem:[#allocation3 + $0x64] sm:$0xf] %vm15503_vm3, %v5752_v11  ;;  %v6299_v11 = vrot.slane %v6297_v61, 5  ;;  %v6332_v61 = vor.u32 %v6331_v44, %v6328_v31  ;;  %vm15507_vm3 = vmmov %vm15484_vm0  ;;  %v13443_v44 = vsel %vm10432_vm10, %v6309_v3, %v6313_v20  ;;  %v9172_v3 = vld [vmem:[%s14940_s2 + $0x20] ss:$0 sps:$4 sm:$0xff]  }
 0x79e   : > { %v5754_v59 = vpop.permute.xlu0 %5753  ;;  %6435 = vrot.lane.b32.xlu1 %v13406_v24, %s9527_s30  ;;  %v6366_v56 = vor.u32 %v6365_v23, %v6361_v15 }
 0x79f   : > { %5823 = vst.msk [vmem:[#allocation3 + $0x68] sm:$0xf] %vm15504_vm7, %v5754_v59  ;;  %v13435_v7 = vsel %vm10432_vm10, %v6295_v2, %v6299_v11  ;;  %v6342_v59 = vor.u32 %v6341_v35, %v6337_v6  ;;  %v6333_v10 = vrot.slane %v6332_v61, 4  ;;  %vm15508_vm7 = vmmov %vm15484_vm0  ;;  %v13450_v2 = vsel %vm10432_vm10, %v6319_v32, %v6323_v19 }
 0x7a0   : > { %6437 = vrot.lane.b32.xlu0 %v13412_v55, %s9527_s30  ;;  %v5756_v43 = vpop.permute.xlu1 %5755  ;;  %v6367_v46 = vrot.slane %v6366_v56, 4 }
 0x7a1   : > { %5824 = vst.msk [vmem:[#allocation3 + $0x6c] sm:$0xf] %vm15505_vm2, %v5756_v43  ;;  %v6003_v43 = vld [vmem:[#allocation2 + $0x160] sm:$0x1]  ;;  %v6343_v11 = vrot.slane %v6342_v59, 4  ;;  %vm15509_vm2 = vcmask 519616   ;;  %v13457_v20 = vsel %vm10432_vm10, %v6333_v10, %v6337_v6 }
 0x7a2   : > { %v5758_v58 = vpop.permute.xlu0 %5757  ;;  %6439 = vrot.lane.b32.xlu1 %v13418_v51, %s9527_s30  ;;  %v6369_v12 = vshll.u32 %v6003_v43, 16  ;;  %v9173_v59 = vld [vmem:[%s14940_s2 + $0x18] sm:$0xff]  }
 0x7a3   : > { %5825 = vst.msk [vmem:[#allocation3 + $0x70] sm:$0xf] %vm15484_vm0, %v5758_v58  ;;  %v6357_v58 = vrot.slane %v6356_v28, 4  ;;  %vm15510_vm0 = vmmov %vm15509_vm2  ;;  %v13467_v61 = vsel %vm10432_vm10, %v6343_v11, %v6347_v14  ;;  %v9175_v28 = vld [vmem:[%s14940_s2 + $0x8] sm:$0xff]  }
 0x7a4   : > { %6441 = vrot.lane.b32.xlu0 %v13426_v53, %s9527_s30  ;;  %v5760_v13 = vpop.permute.xlu1 %5759  ;;  %v6371_v25 = vrot.slane %v6369_v12, 5 }
 0x7a5   : > { %5826 = vst.msk [vmem:[#allocation3 + $0x74] sm:$0xf] %vm15506_vm11, %v5760_v13  ;;  %vm15511_vm11 = vcmask 1043456   ;;  %v13476_v19 = vsel %vm10432_vm10, %v6357_v58, %v6361_v15  ;;  %v9174_v15 = vld [vmem:[%s14940_s2 + $0x10] sm:$0xff]  }
 0x7a6   : > { %v5762_v31 = vpop.permute.xlu0 %5761  ;;  %6443 = vrot.lane.b32.xlu1 %v13435_v7, %s9527_s30  ;;  %9130 = vmatprep.subr.msk.bf16.mxu1 %vm15511_vm11, %v9172_v3  ;;  %v13486_v34 = vsel %vm10432_vm10, %v6367_v46, %v6371_v25 }
 0x7a7   : > { %5827 = vst.msk [vmem:[#allocation3 + $0x78] sm:$0xf] %vm15507_vm3, %v5762_v31  ;;  %vm15512_vm3 = vmmov %vm15511_vm11 }
 0x7a8   : > { %6445 = vrot.lane.b32.xlu0 %v13443_v44, %s9527_s30  ;;  %v5764_v38 = vpop.permute.xlu1 %5763  ;;  %v7017_v6 = vsel %vm15512_vm3, %v9172_v3, 0  ;;  %vm15515_vm11 = vmmov %vm15510_vm0 }
 0x7a9   : > { %5828 = vst.msk [vmem:[#allocation3 + $0x7c] sm:$0xf] %vm15508_vm7, %v5764_v38  ;;  %vm15513_vm7 = vmmov %vm15510_vm0  ;;  %9088 = vmatpush3.bf16.msra.mxu1 %v7017_v6 }
 0x7aa   : > { %v5832_v35 = vpop.permute.xlu0 %5831  ;;  %6447 = vrot.lane.b32.xlu1 %v13450_v2, %s9527_s30  ;;  %9089 = vmatprep.subr.bf16.mxu1 %v9173_v59  ;;  %vm15516_vm3 = vmmov %vm15510_vm0 }
 0x7ab   : > { %5927 = vst.msk [vmem:[#allocation3] sm:$0xf] %vm15509_vm2, %v5832_v35  ;;  %vm15514_vm2 = vmmov %vm15510_vm0 }
 0x7ac   : > { %6449 = vrot.lane.b32.xlu0 %v13457_v20, %s9527_s30  ;;  %v5834_v22 = vpop.permute.xlu1 %5833 }
 0x7ad   : > { %5928 = vst.msk [vmem:[#allocation3 + $0x4] sm:$0xf] %vm15510_vm0, %v5834_v22  ;;  %9090 = vmatpush3.bf16.msra.mxu1 %v9173_v59 }
 0x7ae   : > { %v5836_v13 = vpop.permute.xlu0 %5835  ;;  %6451 = vrot.lane.b32.xlu1 %v13467_v61, %s9527_s30  ;;  %9091 = vmatprep.subr.bf16.mxu1 %v9174_v15 }
 0x7af   : > { %5929 = vst.msk [vmem:[#allocation3 + $0x8] sm:$0xf] %vm15513_vm7, %v5836_v13  ;;  %vm15517_vm7 = vmmov %vm15510_vm0 }
 0x7b0   : > { %6453 = vrot.lane.b32.xlu0 %v13476_v19, %s9527_s30  ;;  %v5838_v32 = vpop.permute.xlu1 %5837 }
 0x7b1   : > { %5930 = vst.msk [vmem:[#allocation3 + $0xc] sm:$0xf] %vm15514_vm2, %v5838_v32  ;;  %9092 = vmatpush3.bf16.msra.mxu1 %v9174_v15  ;;  %vm15518_vm2 = vmmov %vm15510_vm0 }
 0x7b2   : > { %v5840_v43 = vpop.permute.xlu0 %5839  ;;  %6455 = vrot.lane.b32.xlu1 %v13486_v34, %s9527_s30  ;;  %9093 = vmatprep.subr.bf16.mxu1 %v9175_v28 }
 0x7b3   : > { %5931 = vst.msk [vmem:[#allocation3 + $0x10] sm:$0xf] %vm15510_vm0, %v5840_v43 }
 0x7b4   : > { %6549 = vrot.lane.b32.xlu0 %v13267_v52, %s9528_s6  ;;  %v5842_v23 = vpop.permute.xlu1 %5841 }
 0x7b5   : > { %5932 = vst.msk [vmem:[#allocation3 + $0x14] sm:$0xf] %vm15515_vm11, %v5842_v23  ;;  %9094 = vmatpush3.bf16.msra.mxu1 %v9175_v28  ;;  %vm15519_vm11 = vmmov %vm15510_vm0 }
 0x7b6   : > { %v5844_v31 = vpop.permute.xlu0 %5843  ;;  %6551 = vrot.lane.b32.xlu1 %v13277_v47, %s9528_s6  ;;  %v9176_v47 = vld [vmem:[%s14940_s2] sm:$0xff]  }
 0x7b7   : > { %5933 = vst.msk [vmem:[#allocation3 + $0x18] sm:$0xf] %vm15516_vm3, %v5844_v31  ;;  %9095 = vmatprep.subr.bf16.mxu1 %v9176_v47  ;;  %vm15520_vm3 = vmmov %vm15510_vm0 }
 0x7b8   : > { %6553 = vrot.lane.b32.xlu0 %v13285_v29, %s9528_s6  ;;  %v5846_v10 = vpop.permute.xlu1 %5845 }
 0x7b9   : > { %5934 = vst.msk [vmem:[#allocation3 + $0x1c] sm:$0xf] %vm15517_vm7, %v5846_v10  ;;  %9096 = vmatpush3.bf16.msra.mxu1 %v9176_v47  ;;  %vm15521_vm7 = vmmov %vm15510_vm0  ;;  %v6004_v47 = vld [vmem:[#allocation2 + $0x170] sm:$0xf] }
 0x7ba   : > { %v5848_v52 = vpop.permute.xlu0 %5847  ;;  %6555 = vrot.lane.b32.xlu1 %v13292_v1, %s9528_s6 }
 0x7bb   : > { %5935 = vst.msk [vmem:[#allocation3 + $0x20] sm:$0xf] %vm15518_vm2, %v5848_v52  ;;  %vm15522_vm2 = vmmov %vm15510_vm0 }
 0x7bc   : > { %6701 = vrot.lane.b32.xlu0 %v13285_v29, %s9529_s17  ;;  %v5850_v38 = vpop.permute.xlu1 %5849 }
 0x7bd   : > { %5936 = vst.msk [vmem:[#allocation3 + $0x24] sm:$0xf] %vm15510_vm0, %v5850_v38  ;;  %v6005_v38 = vld [vmem:[#allocation2 + $0x174] sm:$0xf] }
 0x7be   : > { %v5852_v12 = vpop.permute.xlu0 %5851  ;;  %6703 = vrot.lane.b32.xlu1 %v13292_v1, %s9529_s17 }
 0x7bf   : > { %5937 = vst.msk [vmem:[#allocation3 + $0x28] sm:$0xf] %vm15519_vm11, %v5852_v12  ;;  %vm15523_vm11 = vmmov %vm15510_vm0  ;;  %v6374_v12 = vshrl.u32 %v6004_v47, 16 }
 0x7c0   : > { %6705 = vrot.lane.b32.xlu0 %v13301_v40, %s9529_s17  ;;  %v5854_v11 = vpop.permute.xlu1 %5853 }
 0x7c1   : > { %5938 = vst.msk [vmem:[#allocation3 + $0x2c] sm:$0xf] %vm15520_vm3, %v5854_v11  ;;  %vm15524_vm3 = vmmov %vm15510_vm0  ;;  %v6377_v11 = vshll.u32 %v6004_v47, 16 }
 0x7c2   : > { %v5856_v14 = vpop.permute.xlu0 %5855  ;;  %6707 = vrot.lane.b32.xlu1 %v13307_v30, %s9529_s17 }
 0x7c3   : > { %5939 = vst.msk [vmem:[#allocation3 + $0x30] sm:$0xf] %vm15521_vm7, %v5856_v14  ;;  %vm15525_vm7 = vmmov %vm15510_vm0 }
 0x7c4   : > { %6557 = vrot.lane.b32.xlu0 %v13301_v40, %s9528_s6  ;;  %v5858_v29 = vpop.permute.xlu1 %5857 }
 0x7c5   : > { %5940 = vst.msk [vmem:[#allocation3 + $0x34] sm:$0xf] %vm15522_vm2, %v5858_v29  ;;  %vm15526_vm2 = vmmov %vm15510_vm0  ;;  %v6387_v29 = vshrl.u32 %v6005_v38, 16 }
 0x7c6   : > { %v5860_v1 = vpop.permute.xlu0 %5859  ;;  %6559 = vrot.lane.b32.xlu1 %v13307_v30, %s9528_s6 }
 0x7c7   : > { %5941 = vst.msk [vmem:[#allocation3 + $0x38] sm:$0xf] %vm15510_vm0, %v5860_v1 }
 0x7c8   : > { %6561 = vrot.lane.b32.xlu0 %v13315_v16, %s9528_s6  ;;  %v5862_v56 = vpop.permute.xlu1 %5861 }
 0x7c9   : > { %5942 = vst.msk [vmem:[#allocation3 + $0x3c] sm:$0xf] %vm15523_vm11, %v5862_v56  ;;  %vm15527_vm11 = vmmov %vm15510_vm0  ;;  %v6379_v56 = vrot.slane %v6377_v11, 5 }
 0x7ca   : > { %v5864_v35 = vpop.permute.xlu0 %5863  ;;  %6563 = vrot.lane.b32.xlu1 %v13328_v9, %s9528_s6 }
 0x7cb   : > { %5943 = vst.msk [vmem:[#allocation3 + $0x40] sm:$0xf] %vm15524_vm3, %v5864_v35  ;;  %vm15528_vm3 = vmmov %vm15510_vm0 }
 0x7cc   : > { %6709 = vrot.lane.b32.xlu0 %v13315_v16, %s9529_s17  ;;  %v5866_v40 = vpop.permute.xlu1 %5865 }
 0x7cd   : > { %5944 = vst.msk [vmem:[#allocation3 + $0x44] sm:$0xf] %vm15525_vm7, %v5866_v40  ;;  %vm15529_vm7 = vmmov %vm15510_vm0 }
 0x7ce   : > { %v5868_v30 = vpop.permute.xlu0 %5867  ;;  %6711 = vrot.lane.b32.xlu1 %v13328_v9, %s9529_s17 }
 0x7cf   : > { %5945 = vst.msk [vmem:[#allocation3 + $0x48] sm:$0xf] %vm15526_vm2, %v5868_v30  ;;  %vm15530_vm2 = vmmov %vm15510_vm0  ;;  %v6389_v30 = vrot.slane %v6387_v29, 4 }
 0x7d0   : > { %6713 = vrot.lane.b32.xlu0 %v13324_v26, %s9529_s17  ;;  %v5870_v58 = vpop.permute.xlu1 %5869 }
 0x7d1   : > { %5946 = vst.msk [vmem:[#allocation3 + $0x4c] sm:$0xf] %vm15510_vm0, %v5870_v58 }
 0x7d2   : > { %v5872_v22 = vpop.permute.xlu0 %5871  ;;  %6715 = vrot.lane.b32.xlu1 %v13345_v37, %s9529_s17 }
 0x7d3   : > { %5947 = vst.msk [vmem:[#allocation3 + $0x50] sm:$0xf] %vm15527_vm11, %v5872_v22  ;;  %vm15531_vm11 = vmmov %vm15510_vm0  ;;  %v6006_v22 = vld [vmem:[#allocation2 + $0x178] sm:$0x1] }
 0x7d4   : > { %6565 = vrot.lane.b32.xlu0 %v13324_v26, %s9528_s6  ;;  %v5874_v16 = vpop.permute.xlu1 %5873 }
 0x7d5   : > { %5948 = vst.msk [vmem:[#allocation3 + $0x54] sm:$0xf] %vm15528_vm3, %v5874_v16  ;;  %vm15532_vm3 = vmmov %vm15510_vm0 }
 0x7d6   : > { %v5876_v9 = vpop.permute.xlu0 %5875  ;;  %6567 = vrot.lane.b32.xlu1 %v13345_v37, %s9528_s6 }
 0x7d7   : > { %5949 = vst.msk [vmem:[#allocation3 + $0x58] sm:$0xf] %vm15529_vm7, %v5876_v9  ;;  %vm15533_vm7 = vmmov %vm15510_vm0 }
 0x7d8   : > { %6569 = vrot.lane.b32.xlu0 %v13334_v33, %s9528_s6  ;;  %v5878_v3 = vpop.permute.xlu1 %5877 }
 0x7d9   : > { %5950 = vst.msk [vmem:[#allocation3 + $0x5c] sm:$0xf] %vm15530_vm2, %v5878_v3  ;;  %vm15534_vm2 = vmmov %vm15510_vm0  ;;  %v6007_v3 = vld [vmem:[#allocation2 + $0x188] sm:$0xf] }
 0x7da   : > { %v5880_v46 = vpop.permute.xlu0 %5879  ;;  %6571 = vrot.lane.b32.xlu1 %v13351_v60, %s9528_s6 }
 0x7db   : > { %5951 = vst.msk [vmem:[#allocation3 + $0x60] sm:$0xf] %vm15510_vm0, %v5880_v46  ;;  %v6393_v46 = vshll.u32 %v6006_v22, 16 }
 0x7dc   : > { %6717 = vrot.lane.b32.xlu0 %v13334_v33, %s9529_s17  ;;  %v5882_v26 = vpop.permute.xlu1 %5881 }
 0x7dd   : > { %5952 = vst.msk [vmem:[#allocation3 + $0x64] sm:$0xf] %vm15531_vm11, %v5882_v26  ;;  %vm15535_vm11 = vmmov %vm15510_vm0  ;;  %v6008_v26 = vld [vmem:[#allocation2 + $0x18c] sm:$0xf] }
 0x7de   : > { %v5884_v37 = vpop.permute.xlu0 %5883  ;;  %6719 = vrot.lane.b32.xlu1 %v13351_v60, %s9529_s17 }
 0x7df   : > { %5953 = vst.msk [vmem:[#allocation3 + $0x68] sm:$0xf] %vm15532_vm3, %v5884_v37  ;;  %vm15536_vm3 = vmmov %vm15510_vm0 }
 0x7e0   : > { %6721 = vrot.lane.b32.xlu0 %v13363_v0, %s9529_s17  ;;  %v5886_v25 = vpop.permute.xlu1 %5885 }
 0x7e1   : > { %5954 = vst.msk [vmem:[#allocation3 + $0x6c] sm:$0xf] %vm15533_vm7, %v5886_v25  ;;  %vm15537_vm7 = vcmask 191616   ;;  %v6526_v25 = vshrl.u32 %v6007_v3, 16 }
 0x7e2   : > { %v5888_v13 = vpop.permute.xlu0 %5887  ;;  %6723 = vrot.lane.b32.xlu1 %v13376_v41, %s9529_s17 }
 0x7e3   : > { %5955 = vst.msk [vmem:[#allocation3 + $0x70] sm:$0xf] %vm15534_vm2, %v5888_v13  ;;  %vm15538_vm2 = vmmov %vm15537_vm7  ;;  %v6529_v13 = vshll.u32 %v6007_v3, 16 }
 0x7e4   : > { %6573 = vrot.lane.b32.xlu0 %v13363_v0, %s9528_s6  ;;  %v5890_v33 = vpop.permute.xlu1 %5889 }
 0x7e5   : > { %5956 = vst.msk [vmem:[#allocation3 + $0x74] sm:$0xf] %vm15510_vm0, %v5890_v33  ;;  %vm15539_vm0 = vmmov %vm15538_vm2 }
 0x7e6   : > { %v5892_v60 = vpop.permute.xlu0 %5891  ;;  %6575 = vrot.lane.b32.xlu1 %v13376_v41, %s9528_s6 }
 0x7e7   : > { %5957 = vst.msk [vmem:[#allocation3 + $0x78] sm:$0xf] %vm15535_vm11, %v5892_v60  ;;  %vm15540_vm11 = vmmov %vm15539_vm0  ;;  %v6535_v60 = vshll.u32 %v6008_v26, 16 }
 0x7e8   : > { %6577 = vrot.lane.b32.xlu0 %v13385_v27, %s9528_s6  ;;  %v5894_v6 = vpop.permute.xlu1 %5893 }
 0x7e9   : > { %5958 = vst.msk [vmem:[#allocation3 + $0x7c] sm:$0xf] %vm15536_vm3, %v5894_v6  ;;  %vm15541_vm3 = vmmov %vm15539_vm0 }
 0x7ea   : > { %v6398_v32 = vpop.permute.xlu0 %6397  ;;  %6579 = vrot.lane.b32.xlu1 %v13389_v45, %s9528_s6 }
 0x7eb   : > { %6493 = vst.msk [vmem:[#allocation3] sm:$0xf] %vm15537_vm7, %v6398_v32  ;;  %vm15542_vm7 = vmmov %vm15539_vm0  ;;  %v6395_v32 = vrot.slane %v6393_v46, 5 }
 0x7ec   : > { %6725 = vrot.lane.b32.xlu0 %v13385_v27, %s9529_s17  ;;  %v6400_v0 = vpop.permute.xlu1 %6399 }
 0x7ed   : > { %6494 = vst.msk [vmem:[#allocation3 + $0x4] sm:$0xf] %vm15538_vm2, %v6400_v0  ;;  %vm15543_vm2 = vmmov %vm15539_vm0  ;;  %v6539_v0 = vshrl.u32 %v6008_v26, 16 }
 0x7ee   : > { %v6402_v41 = vpop.permute.xlu0 %6401  ;;  %6727 = vrot.lane.b32.xlu1 %v13389_v45, %s9529_s17 }
 0x7ef   : > { %6495 = vst.msk [vmem:[#allocation3 + $0x8] sm:$0xf] %vm15539_vm0, %v6402_v41 }
 0x7f0   : > { %6729 = vrot.lane.b32.xlu0 %v13400_v48, %s9529_s17  ;;  %v6404_v59 = vpop.permute.xlu1 %6403 }
 0x7f1   : > { %6496 = vst.msk [vmem:[#allocation3 + $0xc] sm:$0xf] %vm15540_vm11, %v6404_v59  ;;  %vm15544_vm11 = vmmov %vm15539_vm0  ;;  %v6010_v59 = vld [vmem:[#allocation2 + $0x1a0] sm:$0xf] }
 0x7f2   : > { %v6406_v43 = vpop.permute.xlu0 %6405  ;;  %6731 = vrot.lane.b32.xlu1 %v13406_v24, %s9529_s17 }
 0x7f3   : > { %6497 = vst.msk [vmem:[#allocation3 + $0x10] sm:$0xf] %vm15541_vm3, %v6406_v43  ;;  %vm15545_vm3 = vmmov %vm15539_vm0 }
 0x7f4   : > { %6581 = vrot.lane.b32.xlu0 %v13400_v48, %s9528_s6  ;;  %v6408_v27 = vpop.permute.xlu1 %6407 }
 0x7f5   : > { %6498 = vst.msk [vmem:[#allocation3 + $0x14] sm:$0xf] %vm15542_vm7, %v6408_v27  ;;  %vm15546_vm7 = vmmov %vm15539_vm0  ;;  %v6528_v27 = vrot.slane %v6526_v25, 4 }
 0x7f6   : > { %v6410_v45 = vpop.permute.xlu0 %6409  ;;  %6583 = vrot.lane.b32.xlu1 %v13406_v24, %s9528_s6 }
 0x7f7   : > { %6499 = vst.msk [vmem:[#allocation3 + $0x18] sm:$0xf] %vm15543_vm2, %v6410_v45  ;;  %vm15547_vm2 = vmmov %vm15539_vm0  ;;  %v6531_v45 = vrot.slane %v6529_v13, 5 }
 0x7f8   : > { %6585 = vrot.lane.b32.xlu0 %v13412_v55, %s9528_s6  ;;  %v6412_v15 = vpop.permute.xlu1 %6411 }
 0x7f9   : > { %6500 = vst.msk [vmem:[#allocation3 + $0x1c] sm:$0xf] %vm15539_vm0, %v6412_v15  ;;  %v6537_v15 = vrot.slane %v6535_v60, 5 }
 0x7fa   : > { %v6414_v23 = vpop.permute.xlu0 %6413  ;;  %6587 = vrot.lane.b32.xlu1 %v13418_v51, %s9528_s6 }
 0x7fb   : > { %6501 = vst.msk [vmem:[#allocation3 + $0x20] sm:$0xf] %vm15544_vm11, %v6414_v23  ;;  %vm15548_vm11 = vmmov %vm15539_vm0  ;;  %v6011_v23 = vld [vmem:[#allocation2 + $0x1a4] sm:$0xf] }
 0x7fc   : > { %6733 = vrot.lane.b32.xlu0 %v13412_v55, %s9529_s17  ;;  %v6416_v48 = vpop.permute.xlu1 %6415 }
 0x7fd   : > { %6502 = vst.msk [vmem:[#allocation3 + $0x24] sm:$0xf] %vm15545_vm3, %v6416_v48  ;;  %vm15549_vm3 = vmmov %vm15539_vm0 }
 0x7fe   : > { %v6418_v24 = vpop.permute.xlu0 %6417  ;;  %6735 = vrot.lane.b32.xlu1 %v13418_v51, %s9529_s17 }
 0x7ff   : > { %6503 = vst.msk [vmem:[#allocation3 + $0x28] sm:$0xf] %vm15546_vm7, %v6418_v24  ;;  %vm15550_vm7 = vmmov %vm15539_vm0  ;;  %v6541_v24 = vrot.slane %v6539_v0, 4 }
 0x800   : > { %6737 = vrot.lane.b32.xlu0 %v13426_v53, %s9529_s17  ;;  %v6420_v31 = vpop.permute.xlu1 %6419 }
 0x801   : > { %6504 = vst.msk [vmem:[#allocation3 + $0x2c] sm:$0xf] %vm15547_vm2, %v6420_v31  ;;  %vm15551_vm2 = vmmov %vm15539_vm0  ;;  %v6681_v31 = vshll.u32 %v6010_v59, 16  ;;  %v6542_v47 = vor.u32 %v6541_v24, %v6537_v15 }
 0x802   : > { %v6422_v10 = vpop.permute.xlu0 %6421  ;;  %6739 = vrot.lane.b32.xlu1 %v13435_v7, %s9529_s17 }
 0x803   : > { %6505 = vst.msk [vmem:[#allocation3 + $0x30] sm:$0xf] %vm15539_vm0, %v6422_v10 }
 0x804   : > { %6589 = vrot.lane.b32.xlu0 %v13426_v53, %s9528_s6  ;;  %v6424_v55 = vpop.permute.xlu1 %6423 }
 0x805   : > { %6506 = vst.msk [vmem:[#allocation3 + $0x34] sm:$0xf] %vm15548_vm11, %v6424_v55  ;;  %vm15552_vm11 = vmmov %vm15539_vm0  ;;  %v6009_v55 = vld [vmem:[#allocation2 + $0x190] sm:$0x1] }
 0x806   : > { %v6426_v51 = vpop.permute.xlu0 %6425  ;;  %6591 = vrot.lane.b32.xlu1 %v13435_v7, %s9528_s6 }
 0x807   : > { %6507 = vst.msk [vmem:[#allocation3 + $0x38] sm:$0xf] %vm15549_vm3, %v6426_v51  ;;  %vm15553_vm3 = vmmov %vm15539_vm0  ;;  %v6532_v51 = vor.u32 %v6531_v45, %v6528_v27 }
 0x808   : > { %6593 = vrot.lane.b32.xlu0 %v13443_v44, %s9528_s6  ;;  %v6428_v28 = vpop.permute.xlu1 %6427 }
 0x809   : > { %6508 = vst.msk [vmem:[#allocation3 + $0x3c] sm:$0xf] %vm15550_vm7, %v6428_v28  ;;  %vm15554_vm7 = vmmov %vm15539_vm0  ;;  %v6687_v28 = vshll.u32 %v6011_v23, 16 }
 0x80a   : > { %v6430_v52 = vpop.permute.xlu0 %6429  ;;  %6595 = vrot.lane.b32.xlu1 %v13450_v2, %s9528_s6 }
 0x80b   : > { %6509 = vst.msk [vmem:[#allocation3 + $0x40] sm:$0xf] %vm15551_vm2, %v6430_v52  ;;  %vm15555_vm2 = vmmov %vm15539_vm0  ;;  %v6691_v52 = vshrl.u32 %v6011_v23, 16 }
 0x80c   : > { %6741 = vrot.lane.b32.xlu0 %v13443_v44, %s9529_s17  ;;  %v6432_v53 = vpop.permute.xlu1 %6431  ;;  %v6383_v44 = vshll.u32 %v6005_v38, 16 }
 0x80d   : > { %6510 = vst.msk [vmem:[#allocation3 + $0x44] sm:$0xf] %vm15539_vm0, %v6432_v53  ;;  %v6693_v29 = vrot.slane %v6691_v52, 4 }
 0x80e   : > { %v6434_v7 = vpop.permute.xlu0 %6433  ;;  %6743 = vrot.lane.b32.xlu1 %v13450_v2, %s9529_s17  ;;  %v6376_v2 = vrot.slane %v6374_v12, 4  ;;  %v6385_v40 = vrot.slane %v6383_v44, 5  ;;  %v6683_v12 = vrot.slane %v6681_v31, 5  ;;  %v6689_v44 = vrot.slane %v6687_v28, 5 }
 0x80f   : > { %6511 = vst.msk [vmem:[#allocation3 + $0x48] sm:$0xf] %vm15552_vm11, %v6434_v7  ;;  %vm15556_vm11 = vmmov %vm15539_vm0  ;;  %v6545_v7 = vshll.u32 %v6009_v55, 16 }
 0x810   : > { %6745 = vrot.lane.b32.xlu0 %v13457_v20, %s9529_s17  ;;  %v6436_v14 = vpop.permute.xlu1 %6435  ;;  %v6380_v16 = vor.u32 %v6379_v56, %v6376_v2  ;;  %v6012_v2 = vld [vmem:[#allocation2 + $0x1a8] sm:$0x1]  ;;  %v6543_v56 = vrot.slane %v6542_v47, 4  ;;  %v6694_v22 = vor.u32 %v6693_v29, %v6689_v44 }
 0x811   : > { %6512 = vst.msk [vmem:[#allocation3 + $0x4c] sm:$0xf] %vm15553_vm3, %v6436_v14  ;;  %vm15557_vm3 = vmmov %vm15539_vm0  ;;  %v6533_v14 = vrot.slane %v6532_v51, 4 }
 0x812   : > { %v6438_v1 = vpop.permute.xlu0 %6437  ;;  %6747 = vrot.lane.b32.xlu1 %v13467_v61, %s9529_s17  ;;  %v6695_v26 = vrot.slane %v6694_v22, 4 }
 0x813   : > { %6513 = vst.msk [vmem:[#allocation3 + $0x50] sm:$0xf] %vm15554_vm7, %v6438_v1  ;;  %vm15558_vm7 = vmmov %vm15539_vm0 }
 0x814   : > { %6597 = vrot.lane.b32.xlu0 %v13457_v20, %s9528_s6  ;;  %v6440_v35 = vpop.permute.xlu1 %6439  ;;  %v6390_v20 = vor.u32 %v6389_v30, %v6385_v40 }
 0x815   : > { %6514 = vst.msk [vmem:[#allocation3 + $0x54] sm:$0xf] %vm15555_vm2, %v6440_v35  ;;  %vm15559_vm2 = vmmov %vm15539_vm0  ;;  %v6547_v35 = vrot.slane %v6545_v7, 5 }
 0x816   : > { %v6442_v58 = vpop.permute.xlu0 %6441  ;;  %6599 = vrot.lane.b32.xlu1 %v13467_v61, %s9528_s6  ;;  %v6381_v61 = vrot.slane %v6380_v16, 4  ;;  %v6391_v6 = vrot.slane %v6390_v20, 4  ;;  %v6697_v16 = vshll.u32 %v6012_v2, 16 }
 0x817   : > { %6515 = vst.msk [vmem:[#allocation3 + $0x58] sm:$0xf] %vm15539_vm0, %v6442_v58  ;;  %v6538_v58 = vsel %vm10432_vm10, %v6533_v14, %v6537_v15  ;;  %v6548_v3 = vsel %vm10432_vm10, %v6543_v56, %v6547_v35 }
 0x818   : > { %6601 = vrot.lane.b32.xlu0 %v13476_v19, %s9528_s6  ;;  %v6444_v9 = vpop.permute.xlu1 %6443  ;;  %v6386_v43 = vsel %vm10432_vm10, %v6381_v61, %v6385_v40  ;;  %v6396_v48 = vsel %vm10432_vm10, %v6391_v6, %v6395_v32 }
 0x819   : > { %6516 = vst.msk [vmem:[#allocation3 + $0x5c] sm:$0xf] %vm15556_vm11, %v6444_v9  ;;  %vm15560_vm11 = vmmov %vm15539_vm0 }
 0x81a   : > { %v6446_v37 = vpop.permute.xlu0 %6445  ;;  %6603 = vrot.lane.b32.xlu1 %v13486_v34, %s9528_s6 }
 0x81b   : > { %6517 = vst.msk [vmem:[#allocation3 + $0x60] sm:$0xf] %vm15557_vm3, %v6446_v37  ;;  %vm15561_vm3 = vmmov %vm15539_vm0  ;;  %v6699_v37 = vrot.slane %v6697_v16, 5 }
 0x81c   : > { %6749 = vrot.lane.b32.xlu0 %v13476_v19, %s9529_s17  ;;  %v6448_v33 = vpop.permute.xlu1 %6447 }
 0x81d   : > { %6518 = vst.msk [vmem:[#allocation3 + $0x64] sm:$0xf] %vm15558_vm7, %v6448_v33  ;;  %vm15562_vm7 = vcmask 388416   ;;  %v6700_v33 = vsel %vm10432_vm10, %v6695_v26, %v6699_v37 }
 0x81e   : > { %v6450_v41 = vpop.permute.xlu0 %6449  ;;  %6751 = vrot.lane.b32.xlu1 %v13486_v34, %s9529_s17  ;;  %v6678_v34 = vshrl.u32 %v6010_v59, 16 }
 0x81f   : > { %6519 = vst.msk [vmem:[#allocation3 + $0x68] sm:$0xf] %vm15559_vm2, %v6450_v41  ;;  %vm15563_vm2 = vmmov %vm15562_vm7 }
 0x820   : > { %6753 = vrot.lane.b32.xlu0 %v6386_v43, %s9529_s17  ;;  %v6452_v19 = vpop.permute.xlu1 %6451  ;;  %v6680_v38 = vrot.slane %v6678_v34, 4 }
 0x821   : > { %6520 = vst.msk [vmem:[#allocation3 + $0x6c] sm:$0xf] %vm15539_vm0, %v6452_v19  ;;  %vm15564_vm0 = vmmov %vm15563_vm2 }
 0x822   : > { %v6454_v10 = vpop.permute.xlu0 %6453  ;;  %6755 = vrot.lane.b32.xlu1 %v6396_v48, %s9529_s17  ;;  %v6684_v40 = vor.u32 %v6683_v12, %v6680_v38 }
 0x823   : > { %6521 = vst.msk [vmem:[#allocation3 + $0x70] sm:$0xf] %vm15560_vm11, %v6454_v10  ;;  %vm15565_vm11 = vmmov %vm15564_vm0 }
 0x824   : > { %6457 = vrot.lane.b32.xlu0 %v6386_v43, %s9527_s30  ;;  %v6456_v53 = vpop.permute.xlu1 %6455  ;;  %v6685_v20 = vrot.slane %v6684_v40, 4 }
 0x825   : > { %6522 = vst.msk [vmem:[#allocation3 + $0x74] sm:$0xf] %vm15561_vm3, %v6456_v53  ;;  %vm15566_vm3 = vcmask 585216  }
 0x826   : > { %v6550_v11 = vpop.permute.xlu0 %6549  ;;  %6459 = vrot.lane.b32.xlu1 %v6396_v48, %s9527_s30  ;;  %v6690_v25 = vsel %vm10432_vm10, %v6685_v20, %v6689_v44 }
 0x827   : > { %6645 = vst.msk [vmem:[#allocation3] sm:$0xf] %vm15562_vm7, %v6550_v11  ;;  %vm15567_vm7 = vmmov %vm15566_vm3 }
 0x828   : > { %6605 = vrot.lane.b32.xlu0 %v6386_v43, %s9528_s6  ;;  %v6552_v1 = vpop.permute.xlu1 %6551 }
 0x829   : > { %6646 = vst.msk [vmem:[#allocation3 + $0x4] sm:$0xf] %vm15563_vm2, %v6552_v1  ;;  %vm15568_vm2 = vmmov %vm15566_vm3 }
 0x82a   : > { %v6554_v30 = vpop.permute.xlu0 %6553  ;;  %6607 = vrot.lane.b32.xlu1 %v6396_v48, %s9528_s6 }
 0x82b   : > { %6647 = vst.msk [vmem:[#allocation3 + $0x8] sm:$0xf] %vm15564_vm0, %v6554_v30  ;;  %vm15569_vm0 = vmmov %vm15568_vm2 }
 0x82c   : > { %6609 = vrot.lane.b32.xlu0 %v6538_v58, %s9528_s6  ;;  %v6556_v9 = vpop.permute.xlu1 %6555 }
 0x82d   : > { %6648 = vst.msk [vmem:[#allocation3 + $0xc] sm:$0xf] %vm15565_vm11, %v6556_v9 }
 0x82e   : > { %v6702_v46 = vpop.permute.xlu0 %6701  ;;  %6611 = vrot.lane.b32.xlu1 %v6548_v3, %s9528_s6 }
 0x82f   : > { %6797 = vst.msk [vmem:[#allocation3] sm:$0xf] %vm15566_vm3, %v6702_v46  ;;  %vm15570_vm3 = vmmov %vm15565_vm11 }
 0x830   : > { %6757 = vrot.lane.b32.xlu0 %v6538_v58, %s9529_s17  ;;  %v6704_v61 = vpop.permute.xlu1 %6703 }
 0x831   : > { %6798 = vst.msk [vmem:[#allocation3 + $0x4] sm:$0xf] %vm15567_vm7, %v6704_v61  ;;  %vm15571_vm7 = vcmask 588800  }
 0x832   : > { %v6706_v13 = vpop.permute.xlu0 %6705  ;;  %6759 = vrot.lane.b32.xlu1 %v6548_v3, %s9529_s17 }
 0x833   : > { %6799 = vst.msk [vmem:[#allocation3 + $0x8] sm:$0xf] %vm15568_vm2, %v6706_v13  ;;  %vm15572_vm2 = vmmov %vm15570_vm3 }
 0x834   : > { %v6708_v60 = vpop.permute.xlu1 %6707  ;;  %6761 = vrot.lane.b32.xlu0 %v6690_v25, %s9529_s17  ;;  %vm15573_vm10 = vmmov %vm15572_vm2 }
 0x835   : > { %6800 = vst.msk [vmem:[#allocation3 + $0xc] sm:$0xf] %vm15569_vm0, %v6708_v60  ;;  %vm15574_vm0 = vmmov %vm15571_vm7 }
 0x836   : > { %v6558_v6 = vpop.permute.xlu0 %6557  ;;  %6763 = vrot.lane.b32.xlu1 %v6700_v33, %s9529_s17 }
 0x837   : > { %6649 = vst.msk [vmem:[#allocation3 + $0x10] sm:$0xf] %vm15565_vm11, %v6558_v6  ;;  %vm15576_vm11 = vmmov %vm15575_vm4 }
 0x838   : > { %v6560_v32 = vpop.permute.xlu1 %6559  ;;  %v9177_v0 = vld [vmem:[#allocation3] sm:$0xff]  }
 0x839   : > { %6650 = vst.msk [vmem:[#allocation3 + $0x14] sm:$0xf] %vm15570_vm3, %v6560_v32  ;;  %9097 = vmatprep.mubr.msk.bf16.mxu1 %vm15571_vm7, %v9177_v0  ;;  %vm15578_vm3 = vmmov %vm15575_vm4 }
 0x83a   : > { %v6562_v41 = vpop.permute.xlu0 %6561  ;;  %vm15579_vm7 = vmmov %vm15572_vm2 }
 0x83b   : > { %6651 = vst.msk [vmem:[#allocation3 + $0x18] sm:$0xf] %vm15572_vm2, %v6562_v41 }
 0x83c   : > { %v6564_v8 = vpop.permute.xlu1 %6563  ;;  %v9178_v59 = vld [vmem:[#allocation3 + $0x8] sm:$0xff]  }
 0x83d   : > { %6652 = vst.msk [vmem:[#allocation3 + $0x1c] sm:$0xf] %vm15573_vm10, %v6564_v8  ;;  %9098 = vmatmul.mubr.msk.bf16.vlgmr.msra.gmra.mxu1 %vm15574_vm0, %v9178_v59  ;;  %vm15580_vm10 = vmmov %vm15574_vm0 }
 0x83e   : > { %v6710_v43 = vpop.permute.xlu0 %6709  ;;  %vm15582_vm0 = vmmov %vm15572_vm2 }
 0x83f   : > { %6801 = vst.msk [vmem:[#allocation3 + $0x10] sm:$0xf] %vm15575_vm4, %v6710_v43  ;;  %vm15581_vm4 = vmmov %vm15572_vm2 }
 0x840   : > { %v6712_v27 = vpop.permute.xlu1 %6711 }
 0x841   : > { %6802 = vst.msk [vmem:[#allocation3 + $0x14] sm:$0xf] %vm15576_vm11, %v6712_v27  ;;  %vm15584_vm11 = vmmov %vm15578_vm3 }
 0x842   : > { %v6714_v45 = vpop.permute.xlu0 %6713 }
 0x843   : > { %6803 = vst.msk [vmem:[#allocation3 + $0x18] sm:$0xf] %vm15577_vm5, %v6714_v45  ;;  %vm15583_vm5 = vmmov %vm15580_vm10 }
 0x844   : > { %v6716_v19 = vpop.permute.xlu1 %6715 }
 0x845   : > { %6804 = vst.msk [vmem:[#allocation3 + $0x1c] sm:$0xf] %vm15578_vm3, %v6716_v19 }
 0x846   : > { %v6566_v15 = vpop.permute.xlu0 %6565 }
 0x847   : > { %6653 = vst.msk [vmem:[#allocation3 + $0x20] sm:$0xf] %vm15579_vm7, %v6566_v15  ;;  %vm15585_vm7 = vmmov %vm15578_vm3 }
 0x848   : > { %v6568_v23 = vpop.permute.xlu1 %6567  ;;  %v9179_v48 = vld [vmem:[#allocation3 + $0x10] sm:$0xff]  }
 0x849   : > { %6654 = vst.msk [vmem:[#allocation3 + $0x24] sm:$0xf] %vm15572_vm2, %v6568_v23  ;;  %9101 = vmatprep.mubr.msk.bf16.mxu1 %vm15580_vm10, %v9179_v48  ;;  %vm15586_vm2 = vmmov %vm15578_vm3 }
 0x84a   : > { %v6570_v24 = vpop.permute.xlu0 %6569  ;;  %vm15587_vm10 = vmmov %vm15582_vm0 }
 0x84b   : > { %6655 = vst.msk [vmem:[#allocation3 + $0x28] sm:$0xf] %vm15581_vm4, %v6570_v24  ;;  %vm15588_vm4 = vmmov %vm15582_vm0 }
 0x84c   : > { %v6572_v34 = vpop.permute.xlu1 %6571  ;;  %v9180_v31 = vld [vmem:[#allocation3 + $0x18] sm:$0xff]  }
 0x84d   : > { %6656 = vst.msk [vmem:[#allocation3 + $0x2c] sm:$0xf] %vm15582_vm0, %v6572_v34  ;;  %9102 = vmatmul.mubr.msk.bf16.gmra.mxu1 %vm15583_vm5, %v9180_v31  ;;  %vm15589_vm0 = vmmov %vm15583_vm5 }
 0x84e   : > { %v6718_v10 = vpop.permute.xlu0 %6717  ;;  %vm15590_vm5 = vmmov %vm15588_vm4 }
 0x84f   : > { %6805 = vst.msk [vmem:[#allocation3 + $0x20] sm:$0xf] %vm15584_vm11, %v6718_v10  ;;  %vm15591_vm11 = vmmov %vm15588_vm4 }
 0x850   : > { %v6720_v55 = vpop.permute.xlu1 %6719 }
 0x851   : > { %6806 = vst.msk [vmem:[#allocation3 + $0x24] sm:$0xf] %vm15578_vm3, %v6720_v55  ;;  %vm15592_vm3 = vmmov %vm15589_vm0 }
 0x852   : > { %v6722_v51 = vpop.permute.xlu0 %6721 }
 0x853   : > { %6807 = vst.msk [vmem:[#allocation3 + $0x28] sm:$0xf] %vm15585_vm7, %v6722_v51  ;;  %vm15593_vm7 = vmmov %vm15586_vm2 }
 0x854   : > { %v6724_v28 = vpop.permute.xlu1 %6723 }
 0x855   : > { %6808 = vst.msk [vmem:[#allocation3 + $0x2c] sm:$0xf] %vm15586_vm2, %v6724_v28 }
 0x856   : > { %v6574_v52 = vpop.permute.xlu0 %6573 }
 0x857   : > { %6657 = vst.msk [vmem:[#allocation3 + $0x30] sm:$0xf] %vm15587_vm10, %v6574_v52  ;;  %vm15594_vm10 = vmmov %vm15586_vm2 }
 0x858   : > { %v6576_v53 = vpop.permute.xlu1 %6575  ;;  %v9181_v47 = vld [vmem:[#allocation3 + $0x20] sm:$0xff]  }
 0x859   : > { %6658 = vst.msk [vmem:[#allocation3 + $0x34] sm:$0xf] %vm15588_vm4, %v6576_v53  ;;  %9105 = vmatprep.mubr.msk.bf16.mxu1 %vm15589_vm0, %v9181_v47  ;;  %vm15595_vm4 = vmmov %vm15586_vm2 }
 0x85a   : > { %v6578_v7 = vpop.permute.xlu0 %6577  ;;  %vm15596_vm0 = vmmov %vm15590_vm5 }
 0x85b   : > { %6659 = vst.msk [vmem:[#allocation3 + $0x38] sm:$0xf] %vm15590_vm5, %v6578_v7  ;;  %vm15597_vm5 = vmmov %vm15596_vm0 }
 0x85c   : > { %v6580_v38 = vpop.permute.xlu1 %6579  ;;  %v9182_v12 = vld [vmem:[#allocation3 + $0x28] sm:$0xff]  }
 0x85d   : > { %6660 = vst.msk [vmem:[#allocation3 + $0x3c] sm:$0xf] %vm15591_vm11, %v6580_v38  ;;  %9106 = vmatmul.mubr.msk.bf16.gmra.mxu1 %vm15592_vm3, %v9182_v12  ;;  %vm15598_vm11 = vmmov %vm15592_vm3 }
 0x85e   : > { %v6726_v11 = vpop.permute.xlu0 %6725  ;;  %vm15599_vm3 = vmmov %vm15596_vm0 }
 0x85f   : > { %6809 = vst.msk [vmem:[#allocation3 + $0x30] sm:$0xf] %vm15593_vm7, %v6726_v11  ;;  %vm15600_vm7 = vmmov %vm15596_vm0 }
 0x860   : > { %v6728_v14 = vpop.permute.xlu1 %6727 }
 0x861   : > { %6810 = vst.msk [vmem:[#allocation3 + $0x34] sm:$0xf] %vm15586_vm2, %v6728_v14  ;;  %vm15601_vm2 = vmmov %vm15598_vm11 }
 0x862   : > { %v6730_v44 = vpop.permute.xlu0 %6729 }
 0x863   : > { %6811 = vst.msk [vmem:[#allocation3 + $0x38] sm:$0xf] %vm15594_vm10, %v6730_v44  ;;  %vm15602_vm10 = vmmov %vm15595_vm4 }
 0x864   : > { %v6732_v29 = vpop.permute.xlu1 %6731 }
 0x865   : > { %6812 = vst.msk [vmem:[#allocation3 + $0x3c] sm:$0xf] %vm15595_vm4, %v6732_v29 }
 0x866   : > { %v6582_v1 = vpop.permute.xlu0 %6581 }
 0x867   : > { %6661 = vst.msk [vmem:[#allocation3 + $0x40] sm:$0xf] %vm15596_vm0, %v6582_v1  ;;  %vm15603_vm0 = vmmov %vm15595_vm4 }
 0x868   : > { %v6584_v2 = vpop.permute.xlu1 %6583  ;;  %v9183_v56 = vld [vmem:[#allocation3 + $0x30] sm:$0xff]  }
 0x869   : > { %6662 = vst.msk [vmem:[#allocation3 + $0x44] sm:$0xf] %vm15597_vm5, %v6584_v2  ;;  %9109 = vmatprep.mubr.msk.bf16.mxu1 %vm15598_vm11, %v9183_v56  ;;  %vm15604_vm5 = vmmov %vm15603_vm0 }
 0x86a   : > { %v6586_v35 = vpop.permute.xlu0 %6585  ;;  %vm15605_vm11 = vmmov %vm15599_vm3 }
 0x86b   : > { %6663 = vst.msk [vmem:[#allocation3 + $0x48] sm:$0xf] %vm15599_vm3, %v6586_v35 }
 0x86c   : > { %v6588_v40 = vpop.permute.xlu1 %6587  ;;  %v9184_v30 = vld [vmem:[#allocation3 + $0x38] sm:$0xff]  }
 0x86d   : > { %6664 = vst.msk [vmem:[#allocation3 + $0x4c] sm:$0xf] %vm15600_vm7, %v6588_v40  ;;  %9110 = vmatmul.mubr.msk.bf16.gmra.mxu1 %vm15601_vm2, %v9184_v30  ;;  %vm15606_vm7 = vmmov %vm15601_vm2 }
 0x86e   : > { %v6734_v58 = vpop.permute.xlu0 %6733  ;;  %vm15607_vm2 = vmmov %vm15599_vm3 }
 0x86f   : > { %6813 = vst.msk [vmem:[#allocation3 + $0x40] sm:$0xf] %vm15602_vm10, %v6734_v58  ;;  %vm15608_vm10 = vmmov %vm15607_vm2 }
 0x870   : > { %v6736_v22 = vpop.permute.xlu1 %6735 }
 0x871   : > { %6814 = vst.msk [vmem:[#allocation3 + $0x44] sm:$0xf] %vm15595_vm4, %v6736_v22  ;;  %vm15609_vm4 = vmmov %vm15606_vm7 }
 0x872   : > { %v6738_v16 = vpop.permute.xlu0 %6737 }
 0x873   : > { %6815 = vst.msk [vmem:[#allocation3 + $0x48] sm:$0xf] %vm15603_vm0, %v6738_v16 }
 0x874   : > { %v6740_v9 = vpop.permute.xlu1 %6739 }
 0x875   : > { %6816 = vst.msk [vmem:[#allocation3 + $0x4c] sm:$0xf] %vm15604_vm5, %v6740_v9  ;;  %vm15610_vm5 = vmmov %vm15603_vm0 }
 0x876   : > { %v6590_v3 = vpop.permute.xlu0 %6589 }
 0x877   : > { %6665 = vst.msk [vmem:[#allocation3 + $0x50] sm:$0xf] %vm15605_vm11, %v6590_v3  ;;  %vm15611_vm11 = vmmov %vm15603_vm0 }
 0x878   : > { %v6592_v20 = vpop.permute.xlu1 %6591  ;;  %v9185_v46 = vld [vmem:[#allocation3 + $0x40] sm:$0xff]  }
 0x879   : > { %6666 = vst.msk [vmem:[#allocation3 + $0x54] sm:$0xf] %vm15599_vm3, %v6592_v20  ;;  %9113 = vmatprep.mubr.msk.bf16.mxu1 %vm15606_vm7, %v9185_v46  ;;  %vm15612_vm3 = vmmov %vm15603_vm0 }
 0x87a   : > { %v6594_v26 = vpop.permute.xlu0 %6593  ;;  %vm15613_vm7 = vmmov %vm15607_vm2 }
 0x87b   : > { %6667 = vst.msk [vmem:[#allocation3 + $0x58] sm:$0xf] %vm15607_vm2, %v6594_v26 }
 0x87c   : > { %v6596_v37 = vpop.permute.xlu1 %6595  ;;  %v9186_v61 = vld [vmem:[#allocation3 + $0x48] sm:$0xff]  }
 0x87d   : > { %6668 = vst.msk [vmem:[#allocation3 + $0x5c] sm:$0xf] %vm15608_vm10, %v6596_v37  ;;  %9114 = vmatmul.mubr.msk.bf16.gmra.mxu1 %vm15609_vm4, %v9186_v61  ;;  %vm15614_vm10 = vmmov %vm15609_vm4 }
 0x87e   : > { %v6742_v25 = vpop.permute.xlu0 %6741  ;;  %vm15615_vm4 = vmmov %vm15607_vm2 }
 0x87f   : > { %6817 = vst.msk [vmem:[#allocation3 + $0x50] sm:$0xf] %vm15603_vm0, %v6742_v25  ;;  %vm15616_vm0 = vmmov %vm15607_vm2 }
 0x880   : > { %v6744_v13 = vpop.permute.xlu1 %6743 }
 0x881   : > { %6818 = vst.msk [vmem:[#allocation3 + $0x54] sm:$0xf] %vm15610_vm5, %v6744_v13  ;;  %vm15617_vm5 = vmmov %vm15614_vm10 }
 0x882   : > { %v6746_v33 = vpop.permute.xlu0 %6745 }
 0x883   : > { %6819 = vst.msk [vmem:[#allocation3 + $0x58] sm:$0xf] %vm15611_vm11, %v6746_v33  ;;  %vm15618_vm11 = vmmov %vm15612_vm3 }
 0x884   : > { %v6748_v60 = vpop.permute.xlu1 %6747 }
 0x885   : > { %6820 = vst.msk [vmem:[#allocation3 + $0x5c] sm:$0xf] %vm15612_vm3, %v6748_v60 }
 0x886   : > { %v6598_v6 = vpop.permute.xlu0 %6597 }
 0x887   : > { %6669 = vst.msk [vmem:[#allocation3 + $0x60] sm:$0xf] %vm15613_vm7, %v6598_v6  ;;  %vm15619_vm7 = vmmov %vm15612_vm3 }
 0x888   : > { %v6600_v32 = vpop.permute.xlu1 %6599  ;;  %v9187_v0 = vld [vmem:[#allocation3 + $0x50] sm:$0xff]  }
 0x889   : > { %6670 = vst.msk [vmem:[#allocation3 + $0x64] sm:$0xf] %vm15607_vm2, %v6600_v32  ;;  %9117 = vmatprep.mubr.msk.bf16.mxu1 %vm15614_vm10, %v9187_v0  ;;  %vm15620_vm2 = vmmov %vm15612_vm3  ;;  %vm15621_vm10 = vcmask 191616  }
 0x88a   : > { %v6602_v41 = vpop.permute.xlu0 %6601 }
 0x88b   : > { %6671 = vst.msk [vmem:[#allocation3 + $0x68] sm:$0xf] %vm15615_vm4, %v6602_v41  ;;  %vm15622_vm4 = vmmov %vm15621_vm10 }
 0x88c   : > { %v6604_v8 = vpop.permute.xlu1 %6603  ;;  %v9188_v59 = vld [vmem:[#allocation3 + $0x58] sm:$0xff]  }
 0x88d   : > { %6672 = vst.msk [vmem:[#allocation3 + $0x6c] sm:$0xf] %vm15616_vm0, %v6604_v8  ;;  %9118 = vmatmul.mubr.msk.bf16.gmra.mxu1 %vm15617_vm5, %v9188_v59  ;;  %vm15623_vm0 = vmmov %vm15617_vm5  ;;  %vm15624_vm5 = vcmask 388416  }
 0x88e   : > { %v6750_v43 = vpop.permute.xlu0 %6749 }
 0x88f   : > { %6821 = vst.msk [vmem:[#allocation3 + $0x60] sm:$0xf] %vm15618_vm11, %v6750_v43  ;;  %vm15625_vm11 = vmmov %vm15624_vm5  ;;  %v15653_v43 = vld [vmem:[#allocation33_spill] sm:$0xff] }
 0x890   : > { %v6752_v27 = vpop.permute.xlu1 %6751 }
 0x891   : > { %6822 = vst.msk [vmem:[#allocation3 + $0x64] sm:$0xf] %vm15612_vm3, %v6752_v27  ;;  %vm15626_vm3 = vmmov %vm15623_vm0  ;;  %v7340_v27 = vmul.f32 %v15653_v43, %v15653_v43  ;;  %v7346_v43 = vmul.f32 %v12370_v42, %v12370_v42 }
 0x892   : > { %v6754_v45 = vpop.permute.xlu0 %6753 }
 0x893   : > { %6823 = vst.msk [vmem:[#allocation3 + $0x68] sm:$0xf] %vm15619_vm7, %v6754_v45  ;;  %vm15627_vm7 = vmmov %vm15624_vm5 }
 0x894   : > { %v6756_v19 = vpop.permute.xlu1 %6755 }
 0x895   : > { %6824 = vst.msk [vmem:[#allocation3 + $0x6c] sm:$0xf] %vm15620_vm2, %v6756_v19  ;;  %vm15628_vm2 = vmmov %vm15624_vm5  ;;  %v15655_v19 = vld [vmem:[#allocation32_spill] sm:$0xff] }
 0x896   : > { %v6458_v15 = vpop.permute.xlu0 %6457 }
 0x897   : > { %6523 = vst.msk [vmem:[#allocation3 + $0x78] sm:$0xf] %vm15621_vm10, %v6458_v15  ;;  %vm15629_vm10 = vcmask 585216   ;;  %v7342_v15 = vmul.f32 %v15655_v19, %v15655_v19  ;;  %v7348_v19 = vmul.f32 %v12406_v18, %v12406_v18 }
 0x898   : > { %v6460_v23 = vpop.permute.xlu1 %6459  ;;  %v9189_v48 = vld [vmem:[#allocation3 + $0x60] sm:$0xff]  }
 0x899   : > { %6524 = vst.msk [vmem:[#allocation3 + $0x7c] sm:$0xf] %vm15622_vm4, %v6460_v23  ;;  %9121 = vmatprep.mubr.msk.bf16.mxu1 %vm15623_vm0, %v9189_v48  ;;  %vm15630_vm4 = vmmov %vm15629_vm10  ;;  %v15657_v48 = vld [vmem:[#allocation9_spill] sm:$0xff] }
 0x89a   : > { %v6606_v24 = vpop.permute.xlu0 %6605  ;;  %vm15631_vm0 = vmmov %vm15630_vm4 }
 0x89b   : > { %6673 = vst.msk [vmem:[#allocation3 + $0x70] sm:$0xf] %vm15624_vm5, %v6606_v24  ;;  %vm15632_vm5 = vmmov %vm15631_vm0  ;;  %v7343_v24 = vmul.f32 %v15657_v48, %v15657_v48 }
 0x89c   : > { %v6608_v34 = vpop.permute.xlu1 %6607  ;;  %v9190_v31 = vld [vmem:[#allocation3 + $0x68] sm:$0xff]  }
 0x89d   : > { %6674 = vst.msk [vmem:[#allocation3 + $0x74] sm:$0xf] %vm15625_vm11, %v6608_v34  ;;  %9122 = vmatmul.mubr.msk.bf16.gmra.mxu1 %vm15626_vm3, %v9190_v31  ;;  %vm15633_vm11 = vmmov %vm15626_vm3  ;;  %v15658_v34 = vld [vmem:[#allocation7_spill] sm:$0xff] }
 0x89e   : > { %v6610_v10 = vpop.permute.xlu0 %6609  ;;  %v7341_v31 = vmul.f32 %v15658_v34, %v15658_v34  ;;  %v7352_v34 = vmul.f32 %v12454_v36, %v12454_v36 }
 0x89f   : > { %6675 = vst.msk [vmem:[#allocation3 + $0x78] sm:$0xf] %vm15627_vm7, %v6610_v10  ;;  %vm15654_vm7 = vcmask 64512  }
 0x8a0   : > { %v6612_v55 = vpop.permute.xlu1 %6611  ;;  %v7372_v45 = vsel %vm15654_vm7, %v7340_v27, 0.0  ;;  %v7349_v27 = vmul.f32 %v12423_v49, %v12423_v49 }
 0x8a1   : > { %6676 = vst.msk [vmem:[#allocation3 + $0x7c] sm:$0xf] %vm15628_vm2, %v6612_v55  ;;  %vm15656_vm2 = vmmov %vm15654_vm7  ;;  %v7345_v55 = vmul.f32 %v12356_v5, %v12356_v5 }
 0x8a2   : > { %v6758_v51 = vpop.permute.xlu0 %6757  ;;  %v7378_v23 = vsel %vm15656_vm2, %v7342_v15, 0.0  ;;  %v7351_v15 = vmul.f32 %v12446_v50, %v12446_v50 }
 0x8a3   : > { %6825 = vst.msk [vmem:[#allocation3 + $0x70] sm:$0xf] %vm15629_vm10, %v6758_v51  ;;  %vm15659_vm10 = vmmov %vm15656_vm2 }
 0x8a4   : > { %v6760_v28 = vpop.permute.xlu1 %6759  ;;  %v7381_v10 = vsel %vm15659_vm10, %v7343_v24, 0.0  ;;  %v7353_v24 = vmul.f32 %v12466_v17, %v12466_v17 }
 0x8a5   : > { %6826 = vst.msk [vmem:[#allocation3 + $0x74] sm:$0xf] %vm15630_vm4, %v6760_v28  ;;  %vm15660_vm4 = vmmov %vm15656_vm2  ;;  %v15661_v28 = vld [vmem:[#allocation34_spill] sm:$0xff] }
 0x8a6   : > { %v6762_v52 = vpop.permute.xlu0 %6761  ;;  %v7375_v51 = vsel %vm15660_vm4, %v7341_v31, 0.0  ;;  %v7355_v31 = vmul.f32 %v12489_v4, %v12489_v4 }
 0x8a7   : > { %6827 = vst.msk [vmem:[#allocation3 + $0x78] sm:$0xf] %vm15631_vm0, %v6762_v52  ;;  %v7344_v52 = vmul.f32 %v15661_v28, %v15661_v28  ;;  %vm15662_vm0 = vmmov %vm15656_vm2  ;;  %v15674_v28 = vld [vmem:[#allocation35_spill] sm:$0xff] }
 0x8a8   : > { %v6764_v53 = vpop.permute.xlu1 %6763  ;;  %vm15666_vm7 = vmmov %vm15662_vm0  ;;  %v7411_v50 = vsel %vm15662_vm0, %v7353_v24, 0.0  ;;  %v15686_v24 = vld [vmem:[#allocation37_spill] sm:$0xff] }
 0x8a9   : > { %6828 = vst.msk [vmem:[#allocation3 + $0x7c] sm:$0xf] %vm15632_vm5, %v6764_v53  ;;  %v7387_v53 = vsel %vm15662_vm0, %v7345_v55, 0.0  ;;  %vm15663_vm5 = vmmov %vm15662_vm0  ;;  %v7354_v55 = vmul.f32 %v12470_v21, %v12470_v21 }
 0x8aa   : > { %vm15667_vm2 = vmmov %vm15662_vm0 }
 0x8ab   : > { %v7396_v42 = vsel %vm15667_vm2, %v7348_v19, 0.0  ;;  %vm15669_vm10 = vmmov %vm15662_vm0 }
 0x8ac   : > { %v9191_v47 = vld [vmem:[#allocation3 + $0x70] sm:$0xff]   ;;  %v7405_v49 = vsel %vm15669_vm10, %v7351_v15, 0.0  ;;  %vm15670_vm4 = vmmov %vm15662_vm0 }
 0x8ad   : > { %9125 = vmatprep.mubr.msk.bf16.mxu1 %vm15633_vm11, %v9191_v47  ;;  %v7347_v47 = vmul.f32 %v12388_v57, %v12388_v57  ;;  %vm15664_vm11 = vmmov %vm15662_vm0  ;;  %v7399_v57 = vsel %vm15666_vm7, %v7349_v27, 0.0 }
 0x8ae   : > { %vm15675_vm7 = vmmov %vm15662_vm0 }
 0x8af   : > { %v7393_v5 = vsel %vm15664_vm11, %v7347_v47, 0.0  ;;  %vm15672_vm11 = vmmov %vm15662_vm0 }
 0x8b0   : > { %v9192_v7 = vld [vmem:[#allocation3 + $0x78] sm:$0xff]   ;;  %v7417_v17 = vsel %vm15672_vm11, %v7355_v31, 0.0  ;;  %vm15677_vm2 = vmmov %vm15662_vm0 }
 0x8b1   : > { %9126 = vmatmul.mubr.msk.bf16.gmra.mxu1 %vm15626_vm3, %v9192_v7  ;;  %v7384_v7 = vsel %vm15663_vm5, %v7344_v52, 0.0  ;;  %vm15665_vm3 = vmmov %vm15662_vm0  ;;  %v7356_v52 = vmul.f32 %v15674_v28, %v15674_v28 }
 0x8b2   : > { %vm15671_vm5 = vmmov %vm15662_vm0 }
 0x8b3   : > { %v7420_v21 = vsel %vm15677_vm2, %v7356_v52, 0.0  ;;  %vm15679_vm10 = vmmov %vm15662_vm0  ;;  %v15694_v52 = vld [vmem:[#allocation39_spill] sm:$0xff] }
 0x8b4   : > { %vm15683_vm11 = vmmov %vm15662_vm0 }
 0x8b5   : > { %vm15689_vm2 = vmmov %vm15662_vm0 }
 0x8fd   : > { %v13771_v38 = vpop.f32.mrf.mxu1 }
 0x8ff   : > { %v13773_v12 = vpop.f32.mrf.mxu1 }
 0x900   : > { %7212 = vrot.lane.b32.xlu0 %v13773_v12, %s9530_s20 }
 0x901   : > { %v13777_v11 = vpop.f32.mrf.mxu1 }
 0x903   : > { %v13779_v14 = vpop.f32.mrf.mxu1 }
 0x904   : > { %7216 = vrot.lane.b32.xlu0 %v13771_v38, %s9530_s20  ;;  %7214 = vrot.lane.b32.xlu1 %v13779_v14, %s9530_s20 }
 0x908   : > { %7218 = vrot.lane.b32.xlu1 %v13777_v11, %s9530_s20 }
 0x90d   : > { %v13787_v44 = vpop.f32.mrf.mxu1 }
 0x90f   : > { %v13789_v29 = vpop.f32.mrf.mxu1 }
 0x910   : > { %7220 = vrot.lane.b32.xlu0 %v13789_v29, %s9530_s20 }
 0x911   : > { %v13793_v1 = vpop.f32.mrf.mxu1 }
 0x913   : > { %v13795_v2 = vpop.f32.mrf.mxu1 }
 0x914   : > { %7224 = vrot.lane.b32.xlu0 %v13787_v44, %s9530_s20  ;;  %7222 = vrot.lane.b32.xlu1 %v13795_v2, %s9530_s20 }
 0x918   : > { %7226 = vrot.lane.b32.xlu1 %v13793_v1, %s9530_s20 }
 0x91d   : > { %v13803_v56 = vpop.f32.mrf.mxu1 }
 0x91f   : > { %v13805_v35 = vpop.f32.mrf.mxu1 }
 0x920   : > { %7228 = vrot.lane.b32.xlu0 %v13805_v35, %s9530_s20 }
 0x921   : > { %v13809_v40 = vpop.f32.mrf.mxu1 }
 0x923   : > { %v13811_v30 = vpop.f32.mrf.mxu1 }
 0x924   : > { %7232 = vrot.lane.b32.xlu0 %v13803_v56, %s9530_s20  ;;  %7230 = vrot.lane.b32.xlu1 %v13811_v30, %s9530_s20 }
 0x928   : > { %7234 = vrot.lane.b32.xlu1 %v13809_v40, %s9530_s20 }
 0x92d   : > { %v13819_v58 = vpop.f32.mrf.mxu1 }
 0x92e   : > { %15634 = vst [vmem:[#allocation41_spill] sm:$0xff] %v13819_v58 }
 0x92f   : > { %v13821_v22 = vpop.f32.mrf.mxu1 }
 0x930   : > { %7236 = vrot.lane.b32.xlu0 %v13821_v22, %s9530_s20 }
 0x931   : > { %v13825_v16 = vpop.f32.mrf.mxu1 }
 0x932   : > { %15635 = vst [vmem:[#allocation14_spill] sm:$0xff] %v13825_v16 }
 0x933   : > { %v13827_v9 = vpop.f32.mrf.mxu1 }
 0x934   : > { %15636 = vst [vmem:[#allocation42_spill] sm:$0xff] %v13827_v9  ;;  %7240 = vrot.lane.b32.xlu0 %v13819_v58, %s9530_s20  ;;  %7238 = vrot.lane.b32.xlu1 %v13827_v9, %s9530_s20 }
 0x938   : > { %7242 = vrot.lane.b32.xlu1 %v13825_v16, %s9530_s20 }
 0x93d   : > { %v13835_v3 = vpop.f32.mrf.mxu1 }
 0x93e   : > { %15637 = vst [vmem:[#allocation16_spill] sm:$0xff] %v13835_v3 }
 0x93f   : > { %v13837_v20 = vpop.f32.mrf.mxu1 }
 0x940   : > { %15638 = vst [vmem:[#allocation43_spill] sm:$0xff] %v13837_v20  ;;  %7244 = vrot.lane.b32.xlu0 %v13837_v20, %s9530_s20 }
 0x941   : > { %v13841_v46 = vpop.f32.mrf.mxu1 }
 0x942   : > { %15639 = vst [vmem:[#allocation19_spill] sm:$0xff] %v13841_v46 }
 0x943   : > { %v13843_v26 = vpop.f32.mrf.mxu1 }
 0x944   : > { %15640 = vst [vmem:[#allocation44_spill] sm:$0xff] %v13843_v26  ;;  %7248 = vrot.lane.b32.xlu0 %v13835_v3, %s9530_s20  ;;  %7246 = vrot.lane.b32.xlu1 %v13843_v26, %s9530_s20 }
 0x948   : > { %7250 = vrot.lane.b32.xlu1 %v13841_v46, %s9530_s20 }
 0x94d   : > { %v13851_v37 = vpop.f32.mrf.mxu1 }
 0x94e   : > { %15641 = vst [vmem:[#allocation21_spill] sm:$0xff] %v13851_v37 }
 0x94f   : > { %v13853_v61 = vpop.f32.mrf.mxu1 }
 0x950   : > { %15642 = vst [vmem:[#allocation45_spill] sm:$0xff] %v13853_v61  ;;  %7252 = vrot.lane.b32.xlu0 %v13853_v61, %s9530_s20 }
 0x951   : > { %v13857_v25 = vpop.f32.mrf.mxu1 }
 0x952   : > { %15643 = vst [vmem:[#allocation18_spill] sm:$0xff] %v13857_v25 }
 0x953   : > { %v13859_v13 = vpop.f32.mrf.mxu1 }
 0x954   : > { %15644 = vst [vmem:[#allocation46_spill] sm:$0xff] %v13859_v13  ;;  %7256 = vrot.lane.b32.xlu0 %v13851_v37, %s9530_s20  ;;  %7254 = vrot.lane.b32.xlu1 %v13859_v13, %s9530_s20 }
 0x958   : > { %7258 = vrot.lane.b32.xlu1 %v13857_v25, %s9530_s20 }
 0x95d   : > { %v13867_v33 = vpop.f32.mrf.mxu1 }
 0x95e   : > { %15645 = vst [vmem:[#allocation20_spill] sm:$0xff] %v13867_v33 }
 0x95f   : > { %v13869_v60 = vpop.f32.mrf.mxu1 }
 0x960   : > { %15646 = vst [vmem:[#allocation47_spill] sm:$0xff] %v13869_v60  ;;  %7260 = vrot.lane.b32.xlu0 %v13869_v60, %s9530_s20 }
 0x961   : > { %v13873_v6 = vpop.f32.mrf.mxu1 }
 0x962   : > { %15647 = vst [vmem:[#allocation23_spill] sm:$0xff] %v13873_v6 }
 0x963   : > { %v13875_v32 = vpop.f32.mrf.mxu1 }
 0x964   : > { %15648 = vst [vmem:[#allocation48_spill] sm:$0xff] %v13875_v32  ;;  %7264 = vrot.lane.b32.xlu0 %v13867_v33, %s9530_s20  ;;  %7262 = vrot.lane.b32.xlu1 %v13875_v32, %s9530_s20 }
 0x968   : > { %7266 = vrot.lane.b32.xlu1 %v13873_v6, %s9530_s20 }
 0x971   : > { %v13883_v0 = vpop.f32.mrf.mxu1 }
 0x972   : > { %15649 = vst [vmem:[#allocation25_spill] sm:$0xff] %v13883_v0 }
 0x973   : > { %v13885_v41 = vpop.f32.mrf.mxu1 }
 0x974   : > { %15650 = vst [vmem:[#allocation49_spill] sm:$0xff] %v13885_v41  ;;  %7268 = vrot.lane.b32.xlu0 %v13885_v41, %s9530_s20 }
 0x975   : > { %v13889_v8 = vpop.f32.mrf.mxu1 }
 0x976   : > { %15651 = vst [vmem:[#allocation22_spill] sm:$0xff] %v13889_v8 }
 0x977   : > { %v13891_v59 = vpop.f32.mrf.mxu1 }
 0x978   : > { %15652 = vst [vmem:[#allocation50_spill] sm:$0xff] %v13891_v59  ;;  %7272 = vrot.lane.b32.xlu0 %v13883_v0, %s9530_s20  ;;  %7270 = vrot.lane.b32.xlu1 %v13891_v59, %s9530_s20 }
 0x97c   : > { %7274 = vrot.lane.b32.xlu1 %v13889_v8, %s9530_s20 }
 0x997   : > { %7373 = vadd.xlane.f32.xlu0 %v7372_v45  ;;  %v7390_v45 = vsel %vm15665_vm3, %v7346_v43, 0.0  ;;  %vm15673_vm3 = vmmov %vm15662_vm0 }
 0x998   : > { %v7414_v36 = vsel %vm15673_vm3, %v7354_v55, 0.0  ;;  %vm15685_vm3 = vmmov %vm15662_vm0 }
 0x99b   : > { %7379 = vadd.xlane.f32.xlu0 %v7378_v23  ;;  %v15668_v23 = vld [vmem:[#allocation8_spill] sm:$0xff] }
 0x99c   : > { %v7350_v48 = vmul.f32 %v15668_v23, %v15668_v23 }
 0x99e   : > { %v7402_v18 = vsel %vm15670_vm4, %v7350_v48, 0.0  ;;  %vm15680_vm4 = vmmov %vm15662_vm0  ;;  %v15684_v48 = vld [vmem:[#allocation10_spill] sm:$0xff] }
 0x99f   : > { %7382 = vadd.xlane.f32.xlu0 %v7381_v10  ;;  %v7408_v10 = vsel %vm15671_vm5, %v7352_v34, 0.0  ;;  %vm15681_vm5 = vmmov %vm15662_vm0  ;;  %v15688_v34 = vld [vmem:[#allocation12_spill] sm:$0xff] }
 0x9a0   : > { %7376 = vadd.xlane.f32.xlu1 %v7375_v51  ;;  %v7357_v51 = vmul.f32 %v12509_v63, %v12509_v63 }
 0x9a2   : > { %v7423_v4 = vsel %vm15675_vm7, %v7357_v51, 0.0  ;;  %vm15687_vm7 = vmmov %vm15662_vm0  ;;  %v15692_v51 = vld [vmem:[#allocation15_spill] sm:$0xff] }
 0x9a3   : > { %7388 = vadd.xlane.f32.xlu0 %v7387_v53  ;;  %v15676_v53 = vld [vmem:[#allocation36_spill] sm:$0xff] }
 0x9a4   : > { %7385 = vadd.xlane.f32.xlu1 %v7384_v7  ;;  %v7359_v47 = vmul.f32 %v15676_v53, %v15676_v53  ;;  %v15678_v7 = vld [vmem:[#allocation11_spill] sm:$0xff]  ;;  %v13987_v53 = vpop.permute.xlu0 %7212 }
 0x9a5   : > { %v7358_v43 = vmul.f32 %v15678_v7, %v15678_v7 }
 0x9a6   : > { %v7429_v63 = vsel %vm15679_vm10, %v7359_v47, 0.0  ;;  %vm15691_vm10 = vmmov %vm15662_vm0 }
 0x9a7   : > { %7394 = vadd.xlane.f32.xlu0 %v7393_v5  ;;  %v7361_v5 = vmul.f32 %v12552_v39, %v12552_v39  ;;  %v7426_v27 = vsel %vm15680_vm4, %v7358_v43, 0.0  ;;  %vm15693_vm4 = vmmov %vm15662_vm0 }
 0x9a8   : > { %7391 = vadd.xlane.f32.xlu1 %v7390_v45  ;;  %v7360_v45 = vmul.f32 %v12542_v62, %v12542_v62 }
 0x9a9   : > { %v7435_v19 = vsel %vm15662_vm0, %v7361_v5, 0.0 }
 0x9aa   : > { %v7432_v15 = vsel %vm15681_vm5, %v7360_v45, 0.0  ;;  %vm15696_vm5 = vmmov %vm15662_vm0 }
 0x9ab   : > { %7400 = vadd.xlane.f32.xlu0 %v7399_v57  ;;  %v7363_v57 = vmul.f32 %v12579_v54, %v12579_v54 }
 0x9ac   : > { %7397 = vadd.xlane.f32.xlu1 %v7396_v42  ;;  %v15682_v42 = vld [vmem:[#allocation13_spill] sm:$0xff] }
 0x9ad   : > { %v7362_v23 = vmul.f32 %v15682_v42, %v15682_v42  ;;  %v7441_v39 = vsel %vm15683_vm11, %v7363_v57, 0.0  ;;  %vm15698_vm11 = vmmov %vm15662_vm0  ;;  %v13999_v57 = vpop.permute.xlu1 %7214 }
 0x9af   : > { %7406 = vadd.xlane.f32.xlu0 %v7405_v49  ;;  %v7365_v49 = vmul.f32 %v15684_v48, %v15684_v48  ;;  %v7438_v62 = vsel %vm15685_vm3, %v7362_v23, 0.0  ;;  %vm15699_vm3 = vmmov %vm15662_vm0 }
 0x9b0   : > { %7403 = vadd.xlane.f32.xlu1 %v7402_v18  ;;  %v7364_v18 = vmul.f32 %v15686_v24, %v15686_v24 }
 0x9b1   : > { %v7447_v54 = vsel %vm15687_vm7, %v7365_v49, 0.0  ;;  %v14003_v42 = vpop.permute.xlu1 %7218  ;;  %vm15718_vm7 = vcmask 7168  }
 0x9b2   : > { %v7444_v31 = vsel %vm15689_vm2, %v7364_v18, 0.0  ;;  %vm15720_vm2 = vmmov %vm15718_vm7 }
 0x9b3   : > { %7412 = vadd.xlane.f32.xlu0 %v7411_v50  ;;  %v7367_v50 = vmul.f32 %v15688_v34, %v15688_v34 }
 0x9b4   : > { %7409 = vadd.xlane.f32.xlu1 %v7408_v10  ;;  %v15690_v10 = vld [vmem:[#allocation38_spill] sm:$0xff] }
 0x9b5   : > { %v7366_v55 = vmul.f32 %v15690_v10, %v15690_v10 }
 0x9b7   : > { %7418 = vadd.xlane.f32.xlu0 %v7417_v17  ;;  %v7453_v17 = vsel %vm15691_vm10, %v7367_v50, 0.0  ;;  %v7450_v28 = vsel %vm15693_vm4, %v7366_v55, 0.0  ;;  %vm15721_vm10 = vmmov %vm15720_vm2 }
 0x9b8   : > { %7415 = vadd.xlane.f32.xlu1 %v7414_v36  ;;  %v7369_v36 = vmul.f32 %v15692_v51, %v15692_v51  ;;  %vm15722_vm4 = vmmov %vm15720_vm2 }
 0x9ba   : > { %v7459_v47 = vsel %vm15662_vm0, %v7369_v36, 0.0  ;;  %vm15723_vm0 = vmmov %vm15720_vm2 }
 0x9bb   : > { %7424 = vadd.xlane.f32.xlu0 %v7423_v4  ;;  %v7368_v4 = vmul.f32 %v15694_v52, %v15694_v52 }
 0x9bc   : > { %7421 = vadd.xlane.f32.xlu1 %v7420_v21  ;;  %v15695_v21 = vld [vmem:[#allocation17_spill] sm:$0xff] }
 0x9bd   : > { %v7371_v7 = vmul.f32 %v15695_v21, %v15695_v21  ;;  %v7456_v43 = vsel %vm15696_vm5, %v7368_v4, 0.0  ;;  %vm15725_vm5 = vmmov %vm15723_vm0 }
 0x9bf   : > { %7430 = vadd.xlane.f32.xlu0 %v7429_v63  ;;  %v15697_v63 = vld [vmem:[#allocation40_spill] sm:$0xff]  ;;  %v7465_v45 = vsel %vm15698_vm11, %v7371_v7, 0.0  ;;  %vm15726_vm11 = vmmov %vm15723_vm0 }
 0x9c0   : > { %7427 = vadd.xlane.f32.xlu1 %v7426_v27  ;;  %v7370_v5 = vmul.f32 %v15697_v63, %v15697_v63  ;;  %v13995_v27 = vpop.permute.xlu0 %7216 }
 0x9c3   : > { %7436 = vadd.xlane.f32.xlu0 %v7435_v19  ;;  %v7462_v19 = vsel %vm15699_vm3, %v7370_v5, 0.0  ;;  %vm15730_vm3 = vmmov %vm15723_vm0 }
 0x9c4   : > { %7433 = vadd.xlane.f32.xlu1 %v7432_v15  ;;  %v14001_v15 = vpop.permute.xlu0 %7220 }
 0x9c7   : > { %7442 = vadd.xlane.f32.xlu0 %v7441_v39  ;;  %v14007_v39 = vpop.permute.xlu1 %7222 }
 0x9c8   : > { %7439 = vadd.xlane.f32.xlu1 %v7438_v62  ;;  %v14005_v23 = vpop.permute.xlu0 %7224 }
 0x9cb   : > { %7448 = vadd.xlane.f32.xlu0 %v7447_v54  ;;  %v14011_v49 = vpop.permute.xlu1 %7226 }
 0x9cc   : > { %7445 = vadd.xlane.f32.xlu1 %v7444_v31  ;;  %v14009_v48 = vpop.permute.xlu0 %7228 }
 0x9cf   : > { %7454 = vadd.xlane.f32.xlu0 %v7453_v17  ;;  %v14015_v24 = vpop.permute.xlu1 %7230 }
 0x9d0   : > { %7451 = vadd.xlane.f32.xlu1 %v7450_v28  ;;  %v14013_v62 = vpop.permute.xlu0 %7232 }
 0x9d3   : > { %7460 = vadd.xlane.f32.xlu0 %v7459_v47  ;;  %v14019_v54 = vpop.permute.xlu1 %7234 }
 0x9d4   : > { %7457 = vadd.xlane.f32.xlu1 %v7456_v43  ;;  %v14017_v18 = vpop.permute.xlu0 %7236 }
 0x9d7   : > { %7466 = vadd.xlane.f32.xlu0 %v7465_v45  ;;  %v14023_v50 = vpop.permute.xlu1 %7238 }
 0x9d8   : > { %7463 = vadd.xlane.f32.xlu1 %v7462_v19  ;;  %v14021_v34 = vpop.permute.xlu0 %7240  ;;  %15701 = vst [vmem:[#allocation51_spill] sm:$0xff] %v14023_v50 }
 0x9d9   : > { %15700 = vst [vmem:[#allocation24_spill] sm:$0xff] %v14021_v34 }
 0x9db   : > { %v14027_v10 = vpop.permute.xlu1 %7242 }
 0x9dc   : > { %v14025_v31 = vpop.permute.xlu0 %7244  ;;  %15703 = vst [vmem:[#allocation52_spill] sm:$0xff] %v14027_v10 }
 0x9dd   : > { %15702 = vst [vmem:[#allocation27_spill] sm:$0xff] %v14025_v31 }
 0x9df   : > { %v14031_v17 = vpop.permute.xlu1 %7246 }
 0x9e0   : > { %v14029_v55 = vpop.permute.xlu0 %7248  ;;  %15705 = vst [vmem:[#allocation53_spill] sm:$0xff] %v14031_v17 }
 0x9e1   : > { %15704 = vst [vmem:[#allocation29_spill] sm:$0xff] %v14029_v55 }
 0x9e3   : > { %v14035_v36 = vpop.permute.xlu1 %7250 }
 0x9e4   : > { %v14033_v51 = vpop.permute.xlu0 %7252  ;;  %15707 = vst [vmem:[#allocation54_spill] sm:$0xff] %v14035_v36 }
 0x9e5   : > { %15706 = vst [vmem:[#allocation26_spill] sm:$0xff] %v14033_v51 }
 0x9e7   : > { %v14039_v52 = vpop.permute.xlu1 %7254 }
 0x9e8   : > { %v14037_v28 = vpop.permute.xlu0 %7256  ;;  %15709 = vst [vmem:[#allocation55_spill] sm:$0xff] %v14039_v52 }
 0x9e9   : > { %15708 = vst [vmem:[#allocation28_spill] sm:$0xff] %v14037_v28 }
 0x9eb   : > { %v14043_v47 = vpop.permute.xlu1 %7258 }
 0x9ec   : > { %v14041_v4 = vpop.permute.xlu0 %7260  ;;  %15711 = vst [vmem:[#allocation56_spill] sm:$0xff] %v14043_v47 }
 0x9ed   : > { %15710 = vst [vmem:[#allocation31_spill] sm:$0xff] %v14041_v4 }
 0x9ef   : > { %v14047_v7 = vpop.permute.xlu1 %7262 }
 0x9f0   : > { %v14045_v21 = vpop.permute.xlu0 %7264  ;;  %15713 = vst [vmem:[#allocation5_spill] sm:$0xff] %v14047_v7 }
 0x9f1   : > { %15712 = vst [vmem:[#allocation30_spill] sm:$0xff] %v14045_v21 }
 0x9f3   : > { %v14051_v63 = vpop.permute.xlu1 %7266 }
 0x9f4   : > { %v14049_v43 = vpop.permute.xlu0 %7268  ;;  %15715 = vst [vmem:[#allocation33_spill] sm:$0xff] %v14051_v63 }
 0x9f5   : > { %15714 = vst [vmem:[#allocation6_spill] sm:$0xff] %v14049_v43 }
 0x9f7   : > { %v14055_v45 = vpop.permute.xlu1 %7270 }
 0x9f8   : > { %v14053_v5 = vpop.permute.xlu0 %7272  ;;  %15717 = vst [vmem:[#allocation9_spill] sm:$0xff] %v14055_v45 }
 0x9f9   : > { %15716 = vst [vmem:[#allocation32_spill] sm:$0xff] %v14053_v5 }
 0x9fb   : > { %v14058_v59 = vpop.permute.xlu1 %7274 }
 0x9fc   : > { %15719 = vst [vmem:[#allocation7_spill] sm:$0xff] %v14058_v59 }
 0xa20   : > { %v7374_v19 = vpop.xlane.xlu0 %7373 }
 0xa21   : > { %7468 = vst.msk [vmem:[#allocation4 + $0x10] sm:$0xff] %vm15718_vm7, %v7374_v19  ;;  %vm15735_vm7 = vmmov %vm15723_vm0 }
 0xa24   : > { %v7380_v8 = vpop.xlane.xlu0 %7379 }
 0xa25   : > { %7470 = vst.msk [vmem:[#allocation4 + $0x20] sm:$0xff] %vm15720_vm2, %v7380_v8  ;;  %vm15736_vm2 = vmmov %vm15723_vm0 }
 0xa28   : > { %v7383_v0 = vpop.xlane.xlu0 %7382  ;;  %v7500_v41 = vld [vmem:[#allocation4 + $0xf] sm:$0xff] }
 0xa29   : > { %7471 = vst.msk [vmem:[#allocation4 + $0x28] sm:$0xff] %vm15721_vm10, %v7383_v0  ;;  %v7377_v6 = vpop.xlane.xlu1 %7376  ;;  %v7532_v43 = vsel %vm11274_vm9, 0.0, %v7500_v41  ;;  %vm15729_vm9 = vmmov %vm15723_vm0 }
 0xa2a   : > { %7469 = vst.msk [vmem:[#allocation4 + $0x18] sm:$0xff] %vm15722_vm4, %v7377_v6  ;;  %v7628_v59 = vadd.f32 %v7532_v43, %v7374_v19  ;;  %vm15737_vm10 = vmmov %vm15723_vm0 }
 0xa2b   : > { %vm15742_vm4 = vmmov %vm15723_vm0 }
 0xa2c   : > { %v7389_v63 = vpop.xlane.xlu0 %7388 }
 0xa2d   : > { %7473 = vst.msk [vmem:[#allocation4 + $0x38] sm:$0xff] %vm15723_vm0, %v7389_v63  ;;  %v7386_v5 = vpop.xlane.xlu1 %7385 }
 0xa2e   : > { %7472 = vst.msk [vmem:[#allocation4 + $0x30] sm:$0xff] %vm15725_vm5, %v7386_v5  ;;  %vm15744_vm5 = vmmov %vm15723_vm0 }
 0xa30   : > { %v7395_v32 = vpop.xlane.xlu0 %7394  ;;  %v7503_v47 = vld [vmem:[#allocation4 + $0x27] sm:$0xff] }
 0xa31   : > { %v7501_v7 = vld [vmem:[#allocation4 + $0x17] sm:$0xff]  ;;  %v7502_v33 = vld [vmem:[#allocation4 + $0x1f] sm:$0xff]  ;;  %7475 = vst.msk [vmem:[#allocation4 + $0x48] sm:$0xff] %vm15726_vm11, %v7395_v32  ;;  %v7392_v25 = vpop.xlane.xlu1 %7391  ;;  %v7631_v36 = vadd.f32 %v7503_v47, %v7383_v0 }
 0xa32   : > { %v7565_v21 = vld [vmem:[#allocation4 + $0x19] sm:$0xff]  ;;  %v7534_v4 = vsel %vm11287_vm1, 0.0, %v7502_v33  ;;  %v7629_v37 = vadd.f32 %v7501_v7, %v7377_v6  ;;  %v7564_v45 = vld [vmem:[#allocation4 + $0x11] sm:$0xff]  ;;  %7474 = vst.msk [vmem:[#allocation4 + $0x40] sm:$0xff] %vm15729_vm9, %v7392_v25  ;;  %v7566_v43 = vld [vmem:[#allocation4 + $0x21] sm:$0xff] }
 0xa33   : > { %v7597_v52 = vsel %vm11292_vm15, 0.0, %v7565_v21  ;;  %v7630_v41 = vadd.f32 %v7534_v4, %v7380_v8  ;;  %v7660_v28 = vadd.f32 %v7628_v59, %v7564_v45  ;;  %vm15731_vm1 = vmmov %vm15723_vm0  ;;  %v15740_v6 = vld [vmem:[#allocation63_spill] sm:$0xff]  ;;  %v7725_v59 = vld [vmem:[#allocation4 + $0x8] sm:$0xff] }
 0xa34   : > { %v7661_v19 = vadd.f32 %v7629_v37, %v7597_v52  ;;  %v14073_v46 = vpop.xlane.xlu0 %7400  ;;  %vm15732_vm15 = vmmov %vm15723_vm0 }
 0xa35   : > { %v7662_v61 = vadd.f32 %v7630_v41, %v7566_v43  ;;  %7692 = vst.msk [vmem:[#allocation4 + $0x10] sm:$0xff] %vm15730_vm3, %v7660_v28  ;;  %v7504_v51 = vld [vmem:[#allocation4 + $0x2f] sm:$0xff]  ;;  %v7398_v13 = vpop.xlane.xlu1 %7397  ;;  %v7505_v33 = vld [vmem:[#allocation4 + $0x37] sm:$0xff]  ;;  %v7724_v43 = vld [vmem:[#allocation4] sm:$0xff] }
 0xa36   : > { %v7567_v60 = vld [vmem:[#allocation4 + $0x29] sm:$0xff]  ;;  %7477 = vst.msk [vmem:[#allocation4 + $0x58] sm:$0xff] %vm15731_vm1, %v14073_v46  ;;  %v7536_v8 = vsel %vm11296_vm14, 0.0, %v7504_v51  ;;  %v7568_v4 = vld [vmem:[#allocation4 + $0x31] sm:$0xff]  ;;  %v7633_v21 = vadd.f32 %v7505_v33, %v7389_v63  ;;  %vm15741_vm14 = vnez %v15740_v6  ;;  %vm15749_vm3 = vmmov %vm15723_vm0 }
 0xa37   : > { %7693 = vst.msk [vmem:[#allocation4 + $0x18] sm:$0xff] %vm15732_vm15, %v7661_v19  ;;  %v7599_v37 = vsel %vm11305_vm13, 0.0, %v7567_v60  ;;  %v7632_v0 = vadd.f32 %v7536_v8, %v7386_v5  ;;  %vm15738_vm13 = vmmov %vm15723_vm0 }
 0xa38   : > { %7476 = vst.msk [vmem:[#allocation4 + $0x50] sm:$0xff] %vm15735_vm7, %v7398_v13  ;;  %v14085_v52 = vadd.f32 %v7631_v36, %v7599_v37  ;;  %v14087_v47 = vpop.xlane.xlu0 %7406  ;;  %vm15750_vm1 = vmmov %vm15723_vm0 }
 0xa39   : > { %7694 = vst.msk [vmem:[#allocation4 + $0x20] sm:$0xff] %vm15736_vm2, %v7662_v61  ;;  %v14089_v7 = vadd.f32 %v7632_v0, %v7568_v4  ;;  %v7506_v51 = vld [vmem:[#allocation4 + $0x3f] sm:$0xff]  ;;  %v7404_v41 = vpop.xlane.xlu1 %7403  ;;  %v7507_v60 = vld [vmem:[#allocation4 + $0x47] sm:$0xff]  ;;  %v7760_v4 = vadd.f32 %v7724_v43, %v7660_v28  ;;  %vm15751_vm15 = vmmov %vm15723_vm0 }
 0xa3a   : > { %7695 = vst.msk [vmem:[#allocation4 + $0x28] sm:$0xff] %vm15737_vm10, %v14085_v52  ;;  %v7569_v45 = vld [vmem:[#allocation4 + $0x39] sm:$0xff]  ;;  %v7538_v36 = vsel %vm11326_vm12, 0.0, %v7506_v51  ;;  %v7570_v37 = vld [vmem:[#allocation4 + $0x41] sm:$0xff]  ;;  %v7635_v26 = vadd.f32 %v7507_v60, %v7395_v32  ;;  %vm15743_vm12 = vmmov %vm15723_vm0  ;;  %v7761_v32 = vadd.f32 %v7725_v59, %v7661_v19 }
 0xa3b   : > { %7479 = vst.msk [vmem:[#allocation4 + $0x68] sm:$0xff] %vm15738_vm13, %v14087_v47  ;;  %v7601_v8 = vsel %vm15741_vm14, 0.0, %v7569_v45  ;;  %v7634_v63 = vadd.f32 %v7538_v36, %v7392_v25  ;;  %v15745_v36 = vld [vmem:[#allocation64_spill] sm:$0xff]  ;;  %vm15752_vm7 = vmmov %vm15723_vm0 }
 0xa3c   : > { %7478 = vst.msk [vmem:[#allocation4 + $0x60] sm:$0xff] %vm15742_vm4, %v7404_v41  ;;  %v14102_v33 = vadd.f32 %v7633_v21, %v7601_v8  ;;  %v14104_v0 = vpop.xlane.xlu0 %7412  ;;  %v7726_v21 = vld [vmem:[#allocation4 + $0x10] sm:$0xff]  ;;  %vm15746_vm11 = vnez %v15745_v36  ;;  %v15747_v8 = vld [vmem:[#allocation65_spill] sm:$0xff]  ;;  %vm15757_vm13 = vmmov %vm15723_vm0 }
 0xa3d   : > { %7696 = vst.msk [vmem:[#allocation4 + $0x30] sm:$0xff] %vm15723_vm0, %v14089_v7  ;;  %v14106_v17 = vadd.f32 %v7634_v63, %v7570_v37  ;;  %v7410_v5 = vpop.xlane.xlu1 %7409  ;;  %vm15748_vm9 = vnez %v15747_v8  ;;  %v7762_v10 = vadd.f32 %v7726_v21, %v7662_v61  ;;  %v15755_v61 = vld [vmem:[#allocation67_spill] sm:$0xff]  ;;  %vm15758_vm14 = vmmov %vm15723_vm0 }
 0xa3e   : > { %7697 = vst.msk [vmem:[#allocation4 + $0x38] sm:$0xff] %vm15743_vm12, %v14102_v33  ;;  %v7727_v36 = vld [vmem:[#allocation4 + $0x18] sm:$0xff]  ;;  %vm15756_vm10 = vnez %v15755_v61  ;;  %vm15759_vm4 = vmmov %vm15723_vm0 }
 0xa3f   : > { %v7508_v51 = vld [vmem:[#allocation4 + $0x4f] sm:$0xff]  ;;  %7481 = vst.msk [vmem:[#allocation4 + $0x78] sm:$0xff] %vm15744_vm5, %v14104_v0  ;;  %v7509_v60 = vld [vmem:[#allocation4 + $0x57] sm:$0xff] }
 0xa40   : > { %v7571_v45 = vld [vmem:[#allocation4 + $0x49] sm:$0xff]  ;;  %v7728_v25 = vld [vmem:[#allocation4 + $0x20] sm:$0xff]  ;;  %v7540_v6 = vsel %vm15746_vm11, 0.0, %v7508_v51  ;;  %7480 = vst.msk [vmem:[#allocation4 + $0x70] sm:$0xff] %vm15749_vm3, %v7410_v5  ;;  %v7572_v3 = vld [vmem:[#allocation4 + $0x51] sm:$0xff]  ;;  %v14121_v55 = vpop.xlane.xlu0 %7418 }
 0xa41   : > { %v7603_v28 = vsel %vm15748_vm9, 0.0, %v7571_v45  ;;  %v7792_v43 = vadd.f32 %v7760_v4, %v7728_v25  ;;  %7698 = vst.msk [vmem:[#allocation4 + $0x40] sm:$0xff] %vm15750_vm1, %v14106_v17  ;;  %v7636_v63 = vadd.f32 %v7540_v6, %v7398_v13  ;;  %v7729_v16 = vld [vmem:[#allocation4 + $0x28] sm:$0xff]  ;;  %v14129_v13 = vpop.xlane.xlu1 %7415  ;;  %v7637_v45 = vadd.f32 %v7509_v60, %v14073_v46  ;;  %vm15764_vm11 = vmmov %vm15723_vm0 }
 0xa42   : > { %v14119_v37 = vadd.f32 %v7635_v26, %v7603_v28  ;;  %7483 = vst.msk [vmem:[#allocation4 + $0x88] sm:$0xff] %vm15752_vm7, %v14121_v55  ;;  %v7793_v26 = vadd.f32 %v7761_v32, %v7729_v16  ;;  %v15753_v6 = vld [vmem:[#allocation66_spill] sm:$0xff]  ;;  %v7763_v32 = vadd.f32 %v7727_v36, %v14085_v52  ;;  %vm15765_vm9 = vmmov %vm15723_vm0 }
 0xa43   : > { %v7824_v51 = vadd.f32 1e-06, %v7792_v43  ;;  %v14123_v8 = vadd.f32 %v7636_v63, %v7572_v3  ;;  %v7510_v19 = vld [vmem:[#allocation4 + $0x5f] sm:$0xff]  ;;  %vm15754_vm2 = vnez %v15753_v6  ;;  %7482 = vst.msk [vmem:[#allocation4 + $0x80] sm:$0xff] %vm15757_vm13, %v14129_v13  ;;  %v7511_v43 = vld [vmem:[#allocation4 + $0x67] sm:$0xff]  ;;  %vm15766_vm3 = vmmov %vm15723_vm0 }
 0xa44   : > { %7699 = vst.msk [vmem:[#allocation4 + $0x48] sm:$0xff] %vm15751_vm15, %v14119_v37  ;;  %v7573_v59 = vld [vmem:[#allocation4 + $0x59] sm:$0xff]  ;;  %v7730_v4 = vld [vmem:[#allocation4 + $0x30] sm:$0xff]  ;;  %v7542_v28 = vsel %vm15754_vm2, 0.0, %v7510_v19  ;;  %v7574_v20 = vld [vmem:[#allocation4 + $0x61] sm:$0xff]  ;;  %v14143_v60 = vpop.xlane.xlu0 %7424 }
 0xa45   : > { %v7605_v3 = vsel %vm15756_vm10, 0.0, %v7573_v59  ;;  %9321 = vrsqrt.f32 %v7824_v51  ;;  %v7794_v21 = vadd.f32 %v7762_v10, %v7730_v4  ;;  %7700 = vst.msk [vmem:[#allocation4 + $0x50] sm:$0xff] %vm15758_vm14, %v14123_v8  ;;  %v7638_v63 = vadd.f32 %v7542_v28, %v7404_v41  ;;  %v7731_v6 = vld [vmem:[#allocation4 + $0x38] sm:$0xff]  ;;  %v14150_v41 = vpop.xlane.xlu1 %7421  ;;  %vm15767_vm1 = vmmov %vm15723_vm0 }
 0xa46   : > { %v14141_v46 = vadd.f32 %v7637_v45, %v7605_v3  ;;  %v7825_v19 = vadd.f32 1e-06, %v7793_v26  ;;  %v7764_v59 = vadd.f32 %v7728_v25, %v14089_v7  ;;  %7485 = vst.msk [vmem:[#allocation4 + $0x98] sm:$0xff] %vm15759_vm4, %v14143_v60  ;;  %v7795_v52 = vadd.f32 %v7763_v32, %v7731_v6  ;;  %v15760_v26 = vld [vmem:[#allocation68_spill] sm:$0xff]  ;;  %v15762_v25 = vld [vmem:[#allocation69_spill] sm:$0xff]  ;;  %vm15772_vm2 = vmmov %vm15723_vm0 }
 0xa47   : > { %v7826_v61 = vadd.f32 1e-06, %v7794_v21  ;;  %v14146_v31 = vadd.f32 %v7638_v63, %v7574_v20  ;;  %v7512_v10 = vld [vmem:[#allocation4 + $0x6f] sm:$0xff]  ;;  %v7639_v45 = vadd.f32 %v7511_v43, %v14087_v47  ;;  %vm15761_vm12 = vnez %v15760_v26  ;;  %7484 = vst.msk [vmem:[#allocation4 + $0x90] sm:$0xff] %vm15764_vm11, %v14150_v41  ;;  %v7513_v3 = vld [vmem:[#allocation4 + $0x77] sm:$0xff]  ;;  %vm15773_vm10 = vmmov %vm15723_vm0 }
 0xa48   : > { %v7575_v51 = vld [vmem:[#allocation4 + $0x69] sm:$0xff]  ;;  %v7732_v36 = vld [vmem:[#allocation4 + $0x40] sm:$0xff]  ;;  %7701 = vst.msk [vmem:[#allocation4 + $0x58] sm:$0xff] %vm15723_vm0, %v14141_v46  ;;  %v7544_v7 = vsel %vm15761_vm12, 0.0, %v7512_v10  ;;  %vm15763_vm5 = vnez %v15762_v25  ;;  %9323 = vrsqrt.f32 %v7825_v19  ;;  %v7765_v21 = vadd.f32 %v7729_v16, %v14102_v33  ;;  %v7576_v43 = vld [vmem:[#allocation4 + $0x71] sm:$0xff]  ;;  %v14166_v32 = vpop.xlane.xlu0 %7430 }
 0xa49   : > { %v7607_v20 = vsel %vm15763_vm5, 0.0, %v7575_v51  ;;  %9325 = vrsqrt.f32 %v7826_v61  ;;  %v7796_v28 = vadd.f32 %v7764_v59, %v7732_v36  ;;  %7702 = vst.msk [vmem:[#allocation4 + $0x60] sm:$0xff] %vm15765_vm9, %v14146_v31  ;;  %v7640_v47 = vadd.f32 %v7544_v7, %v7410_v5  ;;  %v14173_v5 = vpop.xlane.xlu1 %7427  ;;  %vm15774_vm13 = vmmov %vm15723_vm0 }
 0xa4a   : > { %v14164_v63 = vadd.f32 %v7639_v45, %v7607_v20  ;;  %v7827_v10 = vadd.f32 1e-06, %v7795_v52  ;;  %v7766_v26 = vadd.f32 %v7730_v4, %v14106_v17  ;;  %v7514_v59 = vld [vmem:[#allocation4 + $0x7f] sm:$0xff]  ;;  %7487 = vst.msk [vmem:[#allocation4 + $0xa8] sm:$0xff] %vm15766_vm3, %v14166_v32  ;;  %v7641_v45 = vadd.f32 %v7513_v3, %v14104_v0  ;;  %v15768_v52 = vld [vmem:[#allocation70_spill] sm:$0xff]  ;;  %v15770_v4 = vld [vmem:[#allocation71_spill] sm:$0xff] }
 0xa4b   : > { %v7733_v51 = vld [vmem:[#allocation4 + $0x48] sm:$0xff]  ;;  %v7828_v25 = vadd.f32 1e-06, %v7796_v28  ;;  %v14169_v19 = vadd.f32 %v7640_v47, %v7576_v43  ;;  %v7577_v61 = vld [vmem:[#allocation4 + $0x79] sm:$0xff]  ;;  %vm15769_vm15 = vnez %v15768_v52  ;;  %vm15771_vm7 = vnez %v15770_v4  ;;  %7486 = vst.msk [vmem:[#allocation4 + $0xa0] sm:$0xff] %vm15772_vm2, %v14173_v5  ;;  %vm15775_vm14 = vmmov %vm15723_vm0 }
 0xa4c   : > { %v7797_v16 = vadd.f32 %v7765_v21, %v7733_v51  ;;  %v7734_v33 = vld [vmem:[#allocation4 + $0x50] sm:$0xff]  ;;  %7703 = vst.msk [vmem:[#allocation4 + $0x68] sm:$0xff] %vm15767_vm1, %v14164_v63  ;;  %v7546_v17 = vsel %vm15769_vm15, 0.0, %v7514_v59  ;;  %v7609_v7 = vsel %vm15771_vm7, 0.0, %v7577_v61  ;;  %9327 = vrsqrt.f32 %v7827_v10  ;;  %v7515_v28 = vld [vmem:[#allocation4 + $0x87] sm:$0xff]  ;;  %v14189_v21 = vpop.xlane.xlu0 %7436  ;;  %vm15780_vm12 = vmmov %vm15767_vm1 }
 0xa4d   : > { %9329 = vrsqrt.f32 %v7828_v25  ;;  %v7798_v20 = vadd.f32 %v7766_v26, %v7734_v33  ;;  %7704 = vst.msk [vmem:[#allocation4 + $0x70] sm:$0xff] %vm15773_vm10, %v14169_v19  ;;  %v7642_v0 = vadd.f32 %v7546_v17, %v14129_v13  ;;  %v7578_v3 = vld [vmem:[#allocation4 + $0x81] sm:$0xff]  ;;  %v14187_v47 = vadd.f32 %v7641_v45, %v7609_v7  ;;  %v14196_v26 = vpop.xlane.xlu1 %7433  ;;  %vm15781_vm5 = vmmov %vm15767_vm1 }
 0xa4e   : > { %v7829_v43 = vadd.f32 1e-06, %v7797_v16  ;;  %v7768_v59 = vadd.f32 %v7732_v36, %v14123_v8  ;;  %v7516_v10 = vld [vmem:[#allocation4 + $0x8f] sm:$0xff]  ;;  %7489 = vst.msk [vmem:[#allocation4 + $0xb8] sm:$0xff] %vm15774_vm13, %v14189_v21  ;;  %v7767_v13 = vadd.f32 %v7731_v6, %v14119_v37  ;;  %v7643_v45 = vadd.f32 %v7515_v28, %v14121_v55  ;;  %v15776_v16 = vld [vmem:[#allocation72_spill] sm:$0xff]  ;;  %v15778_v36 = vld [vmem:[#allocation73_spill] sm:$0xff] }
 0xa4f   : > { %v7830_v61 = vadd.f32 1e-06, %v7798_v20  ;;  %v14192_v52 = vadd.f32 %v7642_v0, %v7578_v3  ;;  %v7579_v25 = vld [vmem:[#allocation4 + $0x89] sm:$0xff]  ;;  %7705 = vst.msk [vmem:[#allocation4 + $0x78] sm:$0xff] %vm15775_vm14, %v14187_v47  ;;  %vm15777_vm4 = vnez %v15776_v16  ;;  %vm15779_vm0 = vnez %v15778_v36  ;;  %v7735_v7 = vld [vmem:[#allocation4 + $0x58] sm:$0xff]  ;;  %vm15782_vm11 = vmmov %vm15767_vm1 }
 0xa50   : > { %v7736_v17 = vld [vmem:[#allocation4 + $0x60] sm:$0xff]  ;;  %v7548_v8 = vsel %vm15777_vm4, 0.0, %v7516_v10  ;;  %v7611_v4 = vsel %vm15779_vm0, 0.0, %v7579_v25  ;;  %7488 = vst.msk [vmem:[#allocation4 + $0xb0] sm:$0xff] %vm15780_vm12, %v14196_v26  ;;  %9331 = vrsqrt.f32 %v7829_v43  ;;  %v7517_v55 = vld [vmem:[#allocation4 + $0x97] sm:$0xff]  ;;  %v14213_v3 = vpop.xlane.xlu0 %7442  ;;  %v7799_v10 = vadd.f32 %v7767_v13, %v7735_v7  ;;  %vm15783_vm9 = vmmov %vm15767_vm1 }
 0xa51   : > { %9333 = vrsqrt.f32 %v7830_v61  ;;  %v7800_v20 = vadd.f32 %v7768_v59, %v7736_v17  ;;  %7706 = vst.msk [vmem:[#allocation4 + $0x80] sm:$0xff] %vm15781_vm5, %v14192_v52  ;;  %v7644_v37 = vadd.f32 %v7548_v8, %v14150_v41  ;;  %v7580_v28 = vld [vmem:[#allocation4 + $0x91] sm:$0xff]  ;;  %v14211_v0 = vadd.f32 %v7643_v45, %v7611_v4  ;;  %v14220_v36 = vpop.xlane.xlu1 %7439  ;;  %v15784_v13 = vld [vmem:[#allocation74_spill] sm:$0xff]  ;;  %vm15788_vm15 = vmmov %vm15772_vm2 }
 0xa52   : > { %v9322_v6 = vpop.eup %9321  ;;  %v7770_v25 = vadd.f32 %v7734_v33, %v14146_v31  ;;  %v7518_v61 = vld [vmem:[#allocation4 + $0x9f] sm:$0xff]  ;;  %7491 = vst.msk [vmem:[#allocation4 + $0xc8] sm:$0xff] %vm15782_vm11, %v14213_v3  ;;  %v7769_v41 = vadd.f32 %v7733_v51, %v14141_v46  ;;  %v7645_v45 = vadd.f32 %v7517_v55, %v14143_v60  ;;  %vm15785_vm3 = vnez %v15784_v13  ;;  %v15786_v33 = vld [vmem:[#allocation75_spill] sm:$0xff]  ;;  %vm15789_vm7 = vmmov %vm15772_vm2 }
 0xa53   : > { %v7832_v16 = vadd.f32 1e-06, %v7800_v20  ;;  %v14216_v43 = vadd.f32 %v7644_v37, %v7580_v28  ;;  %v7581_v59 = vld [vmem:[#allocation4 + $0x99] sm:$0xff]  ;;  %7707 = vst.msk [vmem:[#allocation4 + $0x88] sm:$0xff] %vm15783_vm9, %v14211_v0  ;;  %v7550_v31 = vsel %vm15785_vm3, 0.0, %v7518_v61  ;;  %vm15787_vm1 = vnez %v15786_v33  ;;  %v7519_v46 = vld [vmem:[#allocation4 + $0xa7] sm:$0xff]  ;;  %vm15790_vm10 = vmmov %vm15772_vm2 }
 0xa54   : > { %v7738_v8 = vld [vmem:[#allocation4 + $0x70] sm:$0xff]  ;;  %v7613_v4 = vsel %vm15787_vm1, 0.0, %v7581_v59  ;;  %7490 = vst.msk [vmem:[#allocation4 + $0xc0] sm:$0xff] %vm15788_vm15, %v14220_v36  ;;  %v7888_v20 = vmul.f32 11.785113, %v9322_v6  ;;  %v7646_v60 = vadd.f32 %v7550_v31, %v14173_v5  ;;  %v7737_v51 = vld [vmem:[#allocation4 + $0x68] sm:$0xff]  ;;  %v14237_v59 = vpop.xlane.xlu0 %7448  ;;  %vm15795_vm4 = vmmov %vm15772_vm2 }
 0xa55   : > { %v9324_v37 = vpop.eup %9323  ;;  %9335 = vrsqrt.f32 %v7832_v16  ;;  %v7802_v28 = vadd.f32 %v7770_v25, %v7738_v8  ;;  %7708 = vst.msk [vmem:[#allocation4 + $0x90] sm:$0xff] %vm15789_vm7, %v14216_v43  ;;  %v7582_v13 = vld [vmem:[#allocation4 + $0xa1] sm:$0xff]  ;;  %v14235_v61 = vadd.f32 %v7645_v45, %v7613_v4  ;;  %v7831_v9 = vadd.f32 1e-06, %v7799_v10  ;;  %v14244_v5 = vpop.xlane.xlu1 %7445  ;;  %v15791_v10 = vld [vmem:[#allocation76_spill] sm:$0xff]  ;;  %vm15796_vm0 = vmmov %vm15772_vm2 }
 0xa56   : > { %v9326_v55 = vpop.eup %9325  ;;  %7986 = vperm.xlu1 %9150, %v7888_v20   ;;  %v7889_v33 = vmul.f32 11.785113, %v9324_v37  ;;  %v7801_v6 = vadd.f32 %v7769_v41, %v7737_v51  ;;  %v7772_v16 = vadd.f32 %v7736_v17, %v14169_v19  ;;  %v14240_v50 = vadd.f32 %v7646_v60, %v7582_v13  ;;  %7493 = vst.msk [vmem:[#allocation4 + $0xd8] sm:$0xff] %vm15772_vm2, %v14237_v59  ;;  %v15793_v17 = vld [vmem:[#allocation77_spill] sm:$0xff]  ;;  %vm15797_vm12 = vmmov %vm15796_vm0 }
 0xa57   : > { %v7834_v25 = vadd.f32 1e-06, %v7802_v28  ;;  %v7520_v58 = vld [vmem:[#allocation4 + $0xaf] sm:$0xff]  ;;  %v7771_v45 = vadd.f32 %v7735_v7, %v14164_v63  ;;  %v7647_v4 = vadd.f32 %v7519_v46, %v14166_v32  ;;  %7709 = vst.msk [vmem:[#allocation4 + $0x98] sm:$0xff] %vm15790_vm10, %v14235_v61  ;;  %vm15792_vm13 = vnez %v15791_v10  ;;  %v7521_v32 = vld [vmem:[#allocation4 + $0xb7] sm:$0xff]  ;;  %vm15798_vm5 = vmmov %vm15796_vm0 }
 0xa58   : > { %v7583_v34 = vld [vmem:[#allocation4 + $0xa9] sm:$0xff]  ;;  %v7740_v31 = vld [vmem:[#allocation4 + $0x80] sm:$0xff]  ;;  %v7552_v19 = vsel %vm15792_vm13, 0.0, %v7520_v58  ;;  %vm15794_vm14 = vnez %v15793_v17  ;;  %7991 = vperm.xlu0 %9151, %v7889_v33   ;;  %7492 = vst.msk [vmem:[#allocation4 + $0xd0] sm:$0xff] %vm15795_vm4, %v14244_v5  ;;  %v7890_v20 = vmul.f32 11.785113, %v9326_v55  ;;  %v7774_v63 = vadd.f32 %v7738_v8, %v14192_v52  ;;  %v14262_v13 = vpop.xlane.xlu0 %7454  ;;  %vm15803_vm3 = vmmov %vm15796_vm0 }
 0xa59   : > { %v7615_v41 = vsel %vm15794_vm14, 0.0, %v7583_v34  ;;  %v9328_v37 = vpop.eup %9327  ;;  %9337 = vrsqrt.f32 %v7834_v25  ;;  %v7804_v7 = vadd.f32 %v7772_v16, %v7740_v31  ;;  %7710 = vst.msk [vmem:[#allocation4 + $0xa0] sm:$0xff] %vm15796_vm0, %v14240_v50  ;;  %v7648_v28 = vadd.f32 %v7552_v19, %v14196_v26  ;;  %v7739_v58 = vld [vmem:[#allocation4 + $0x78] sm:$0xff]  ;;  %v14269_v26 = vpop.xlane.xlu1 %7451  ;;  %vm15804_vm1 = vmmov %vm15796_vm0 }
 0xa5a   : > { %v9330_v46 = vpop.eup %9329  ;;  %v7584_v60 = vld [vmem:[#allocation4 + $0xb1] sm:$0xff]  ;;  %v14260_v34 = vadd.f32 %v7647_v4, %v7615_v41  ;;  %7996 = vperm.xlu1 %9150, %v7890_v20   ;;  %9339 = vrsqrt.f32 %v7831_v9  ;;  %v7833_v55 = vadd.f32 1e-06, %v7801_v6  ;;  %v7773_v33 = vadd.f32 %v7737_v51, %v14187_v47  ;;  %7495 = vst.msk [vmem:[#allocation4 + $0xe8] sm:$0xff] %vm15797_vm12, %v14262_v13  ;;  %v15799_v9 = vld [vmem:[#allocation78_spill] sm:$0xff]  ;;  %vm15805_vm15 = vmmov %vm15796_vm0 }
 0xa5b   : > { %v7836_v52 = vadd.f32 1e-06, %v7804_v7  ;;  %v14265_v8 = vadd.f32 %v7648_v28, %v7584_v60  ;;  %v7522_v16 = vld [vmem:[#allocation4 + $0xbf] sm:$0xff]  ;;  %v7891_v10 = vmul.f32 11.785113, %v9328_v37  ;;  %v7803_v4 = vadd.f32 %v7771_v45, %v7739_v58  ;;  %v15801_v51 = vld [vmem:[#allocation79_spill] sm:$0xff]  ;;  %vm15806_vm7 = vmmov %vm15796_vm0 }
 0xa5c   : > { %v7585_v25 = vld [vmem:[#allocation4 + $0xb9] sm:$0xff]  ;;  %v7742_v19 = vld [vmem:[#allocation4 + $0x90] sm:$0xff]  ;;  %v7649_v17 = vadd.f32 %v7521_v32, %v14189_v21  ;;  %7711 = vst.msk [vmem:[#allocation4 + $0xa8] sm:$0xff] %vm15798_vm5, %v14260_v34  ;;  %vm15800_vm11 = vnez %v15799_v9  ;;  %vm15802_vm9 = vnez %v15801_v51  ;;  %v7892_v41 = vmul.f32 11.785113, %v9330_v46  ;;  %v7523_v21 = vld [vmem:[#allocation4 + $0xc7] sm:$0xff] }
 0xa5d   : > { %v7554_v47 = vsel %vm15800_vm11, 0.0, %v7522_v16  ;;  %v7617_v6 = vsel %vm15802_vm9, 0.0, %v7585_v25  ;;  %7494 = vst.msk [vmem:[#allocation4 + $0xe0] sm:$0xff] %vm15803_vm3, %v14269_v26  ;;  %v9332_v20 = vpop.eup %9331  ;;  %9341 = vrsqrt.f32 %v7836_v52  ;;  %v7776_v45 = vadd.f32 %v7740_v31, %v14216_v43  ;;  %v7741_v32 = vld [vmem:[#allocation4 + $0x88] sm:$0xff]  ;;  %v14286_v25 = vpop.xlane.xlu0 %7460  ;;  %vm15810_vm10 = vmmov %vm15796_vm0 }
 0xa5e   : > { %v7806_v37 = vadd.f32 %v7774_v63, %v7742_v19  ;;  %7712 = vst.msk [vmem:[#allocation4 + $0xb0] sm:$0xff] %vm15804_vm1, %v14265_v8  ;;  %v7650_v7 = vadd.f32 %v7554_v47, %v14220_v36  ;;  %v9334_v28 = vpop.eup %9333  ;;  %v7586_v60 = vld [vmem:[#allocation4 + $0xc1] sm:$0xff]  ;;  %v14284_v16 = vadd.f32 %v7649_v17, %v7617_v6  ;;  %8001 = vperm.xlu1 %9150, %v7891_v10   ;;  %9343 = vrsqrt.f32 %v7833_v55  ;;  %v14293_v36 = vpop.xlane.xlu1 %7457  ;;  %v15807_v55 = vld [vmem:[#allocation80_spill] sm:$0xff]  ;;  %vm15811_vm13 = vmmov %vm15796_vm0 }
 0xa5f   : > { %8006 = vperm.xlu0 %9151, %v7892_v41   ;;  %v7835_v46 = vadd.f32 1e-06, %v7803_v4  ;;  %v7775_v43 = vadd.f32 %v7739_v58, %v14211_v0  ;;  %v7524_v52 = vld [vmem:[#allocation4 + $0xcf] sm:$0xff]  ;;  %7497 = vst.msk [vmem:[#allocation4 + $0xf8] sm:$0xff] %vm15805_vm15, %v14286_v25  ;;  %v7893_v17 = vmul.f32 11.785113, %v9332_v20  ;;  %v7805_v47 = vadd.f32 %v7773_v33, %v7741_v32  ;;  %vm15813_vm14 = vmmov %vm15796_vm0 }
 0xa60   : > { %v7838_v31 = vadd.f32 1e-06, %v7806_v37  ;;  %v14289_v63 = vadd.f32 %v7650_v7, %v7586_v60  ;;  %v7587_v9 = vld [vmem:[#allocation4 + $0xc9] sm:$0xff]  ;;  %v7744_v10 = vld [vmem:[#allocation4 + $0xa0] sm:$0xff]  ;;  %v7651_v51 = vadd.f32 %v7523_v21, %v14213_v3  ;;  %7713 = vst.msk [vmem:[#allocation4 + $0xb8] sm:$0xff] %vm15806_vm7, %v14284_v16  ;;  %vm15808_vm2 = vnez %v15807_v55  ;;  %v7525_v33 = vld [vmem:[#allocation4 + $0xd7] sm:$0xff] }
 0xa61   : > { %v7556_v0 = vsel %vm15808_vm2, 0.0, %v7524_v52  ;;  %v7619_v4 = vsel %vm11678_vm8, 0.0, %v7587_v9  ;;  %7496 = vst.msk [vmem:[#allocation4 + $0xf0] sm:$0xff] %vm15810_vm10, %v14293_v36  ;;  %v7894_v6 = vmul.f32 11.785113, %v9334_v28  ;;  %v7808_v41 = vadd.f32 %v7776_v45, %v7744_v10  ;;  %v7743_v20 = vld [vmem:[#allocation4 + $0x98] sm:$0xff]  ;;  %v14309_v60 = vpop.xlane.xlu0 %7466  ;;  %vm15812_vm8 = vmmov %vm15796_vm0 }
 0xa62   : > { %9345 = vrsqrt.f32 %v7838_v31  ;;  %7714 = vst.msk [vmem:[#allocation4 + $0xc0] sm:$0xff] %vm15811_vm13, %v14289_v63  ;;  %v7652_v3 = vadd.f32 %v7556_v0, %v14244_v5  ;;  %v9336_v37 = vpop.eup %9335  ;;  %v7588_v21 = vld [vmem:[#allocation4 + $0xd1] sm:$0xff]  ;;  %v14307_v7 = vadd.f32 %v7651_v51, %v7619_v4  ;;  %8011 = vperm.xlu1 %9150, %v7893_v17   ;;  %v7837_v52 = vadd.f32 1e-06, %v7805_v47  ;;  %v14316_v5 = vpop.xlane.xlu1 %7463  ;;  %vm15817_vm12 = vmmov %vm15796_vm0 }
 0xa63   : > { %8016 = vperm.xlu0 %9151, %v7894_v6   ;;  %9347 = vrsqrt.f32 %v7835_v46  ;;  %v7807_v28 = vadd.f32 %v7775_v43, %v7743_v20  ;;  %v7778_v45 = vadd.f32 %v7742_v19, %v14240_v50  ;;  %v7840_v31 = vadd.f32 1e-06, %v7808_v41  ;;  %7499 = vst.msk [vmem:[#allocation4 + $0x108] sm:$0xff] %vm15812_vm8, %v14309_v60  ;;  %v15815_v43 = vld [vmem:[#allocation83_spill] sm:$0xff]  ;;  %v7745_v6 = vld [vmem:[#allocation4 + $0xa8] sm:$0xff]  ;;  %vm15823_vm9 = vmmov %vm15796_vm0 }
 0xa64   : > { %v14312_v9 = vadd.f32 %v7652_v3, %v7588_v21  ;;  %v7526_v55 = vld [vmem:[#allocation4 + $0xdf] sm:$0xff]  ;;  %v7777_v17 = vadd.f32 %v7741_v32, %v14235_v61  ;;  %v7653_v0 = vadd.f32 %v7525_v33, %v14237_v59  ;;  %7715 = vst.msk [vmem:[#allocation4 + $0xc8] sm:$0xff] %vm15813_vm14, %v14307_v7  ;;  %v7527_v46 = vld [vmem:[#allocation4 + $0xe7] sm:$0xff]  ;;  %vm15816_vm4 = vnez %v15815_v43  ;;  %vm15824_vm3 = vmmov %vm15796_vm0 }
 0xa65   : > { %v7589_v58 = vld [vmem:[#allocation4 + $0xd9] sm:$0xff]  ;;  %v7746_v51 = vld [vmem:[#allocation4 + $0xb0] sm:$0xff]  ;;  %v7558_v19 = vsel %vm11720_vm6, 0.0, %v7526_v55  ;;  %7498 = vst.msk [vmem:[#allocation4 + $0x100] sm:$0xff] %vm15796_vm0, %v14316_v5  ;;  %v7896_v4 = vmul.f32 11.785113, %v9336_v37  ;;  %9349 = vrsqrt.f32 %v7840_v31  ;;  %v7780_v61 = vadd.f32 %v7744_v10, %v14265_v8  ;;  %vm15818_vm6 = vmmov %vm15796_vm0 }
 0xa66   : > { %v7621_v47 = vsel %vm15816_vm4, 0.0, %v7589_v58  ;;  %v7810_v32 = vadd.f32 %v7778_v45, %v7746_v51  ;;  %7716 = vst.msk [vmem:[#allocation4 + $0xd0] sm:$0xff] %vm15817_vm12, %v14312_v9  ;;  %v7654_v59 = vadd.f32 %v7558_v19, %v14269_v26  ;;  %v9338_v41 = vpop.eup %9337  ;;  %v7590_v33 = vld [vmem:[#allocation4 + $0xe1] sm:$0xff]  ;;  %9351 = vrsqrt.f32 %v7837_v52  ;;  %v15819_v52 = vld [vmem:[#allocation84_spill] sm:$0xff]  ;;  %vm15829_vm7 = vmmov %vm15796_vm0 }
 0xa67   : > { %v14332_v3 = vadd.f32 %v7653_v0, %v7621_v47  ;;  %8026 = vperm.xlu0 %9151, %v7896_v4   ;;  %v7839_v21 = vadd.f32 1e-06, %v7807_v28  ;;  %v7809_v55 = vadd.f32 %v7777_v17, %v7745_v6  ;;  %v9340_v58 = vpop.eup %9339  ;;  %v7655_v31 = vadd.f32 %v7527_v46, %v14262_v13  ;;  %v15821_v17 = vld [vmem:[#allocation85_spill] sm:$0xff]  ;;  %vm15832_vm10 = vmmov %vm15796_vm0 }
 0xa68   : > { %v7842_v37 = vadd.f32 1e-06, %v7810_v32  ;;  %v14335_v8 = vadd.f32 %v7654_v59, %v7590_v33  ;;  %v7528_v10 = vld [vmem:[#allocation4 + $0xef] sm:$0xff]  ;;  %v7779_v50 = vadd.f32 %v7743_v20, %v14260_v34  ;;  %v7782_v26 = vadd.f32 %v7746_v51, %v14289_v63  ;;  %v7529_v0 = vld [vmem:[#allocation4 + $0xf7] sm:$0xff]  ;;  %vm15833_vm13 = vmmov %vm15796_vm0 }
 0xa69   : > { %v7591_v45 = vld [vmem:[#allocation4 + $0xe9] sm:$0xff]  ;;  %v7748_v19 = vld [vmem:[#allocation4 + $0xc0] sm:$0xff]  ;;  %7717 = vst.msk [vmem:[#allocation4 + $0xd8] sm:$0xff] %vm15818_vm6, %v14332_v3  ;;  %vm15820_vm5 = vnez %v15819_v52  ;;  %vm15822_vm11 = vnez %v15821_v17  ;;  %v7895_v13 = vmul.f32 11.785113, %v9340_v58  ;;  %v7747_v63 = vld [vmem:[#allocation4 + $0xb8] sm:$0xff]  ;;  %v7781_v20 = vadd.f32 %v7745_v6, %v14284_v16 }
 0xa6a   : > { %v7560_v28 = vsel %vm15820_vm5, 0.0, %v7528_v10  ;;  %v7623_v43 = vsel %vm15822_vm11, 0.0, %v7591_v45  ;;  %9353 = vrsqrt.f32 %v7842_v37  ;;  %v7812_v46 = vadd.f32 %v7780_v61, %v7748_v19  ;;  %7718 = vst.msk [vmem:[#allocation4 + $0xe0] sm:$0xff] %vm15823_vm9, %v14335_v8  ;;  %v9342_v51 = vpop.eup %9341  ;;  %v7592_v47 = vld [vmem:[#allocation4 + $0xf1] sm:$0xff]  ;;  %v7595_v32 = vld [vmem:[#allocation4 + $0x109] sm:$0xff]  ;;  %vm15834_vm8 = vmmov %vm15796_vm0 }
 0xa6b   : > { %v7656_v34 = vadd.f32 %v7560_v28, %v14293_v36  ;;  %v14349_v4 = vadd.f32 %v7655_v31, %v7623_v43  ;;  %8021 = vperm.xlu1 %9150, %v7895_v13   ;;  %v7898_v59 = vmul.f32 11.785113, %v9338_v41  ;;  %9355 = vrsqrt.f32 %v7839_v21  ;;  %v9344_v58 = vpop.eup %9343  ;;  %v15825_v6 = vld [vmem:[#allocation86_spill] sm:$0xff]  ;;  %v15827_v41 = vld [vmem:[#allocation87_spill] sm:$0xff] }
 0xa6c   : > { %v7841_v33 = vadd.f32 1e-06, %v7809_v55  ;;  %v7844_v37 = vadd.f32 1e-06, %v7812_v46  ;;  %v7657_v61 = vadd.f32 %v7529_v0, %v14286_v25  ;;  %v7530_v45 = vld [vmem:[#allocation4 + $0xff] sm:$0xff]  ;;  %v7531_v36 = vld [vmem:[#allocation4 + $0x107] sm:$0xff]  ;;  %v7811_v28 = vadd.f32 %v7779_v50, %v7747_v63 }
 0xa6d   : > { %v14352_v10 = vadd.f32 %v7656_v34, %v7592_v47  ;;  %v7593_v52 = vld [vmem:[#allocation4 + $0xf9] sm:$0xff]  ;;  %v7750_v16 = vld [vmem:[#allocation4 + $0xd0] sm:$0xff]  ;;  %7719 = vst.msk [vmem:[#allocation4 + $0xe8] sm:$0xff] %vm15824_vm3, %v14349_v4  ;;  %vm15826_vm1 = vnez %v15825_v6  ;;  %vm15828_vm15 = vnez %v15827_v41  ;;  %v7659_v55 = vadd.f32 %v7531_v36, %v14309_v60  ;;  %8036 = vperm.xlu0 %9151, %v7898_v59   ;;  %v7749_v13 = vld [vmem:[#allocation4 + $0xc8] sm:$0xff] }
 0xa6e   : > { %v7562_v31 = vsel %vm15826_vm1, 0.0, %v7530_v45  ;;  %v7625_v21 = vsel %vm15828_vm15, 0.0, %v7593_v52  ;;  %v7897_v17 = vmul.f32 11.785113, %v9344_v58  ;;  %9357 = vrsqrt.f32 %v7844_v37  ;;  %v15830_v50 = vld [vmem:[#allocation88_spill] sm:$0xff]  ;;  %v7594_v34 = vld [vmem:[#allocation4 + $0x101] sm:$0xff] }
 0xa6f   : > { %v7814_v25 = vadd.f32 %v7782_v26, %v7750_v16  ;;  %7720 = vst.msk [vmem:[#allocation4 + $0xf0] sm:$0xff] %vm15829_vm7, %v14352_v10  ;;  %vm15831_vm2 = vnez %v15830_v50  ;;  %v7658_v43 = vadd.f32 %v7562_v31, %v14316_v5  ;;  %v9346_v46 = vpop.eup %9345  ;;  %v7689_v47 = vadd.f32 %v7657_v61, %v7625_v21 }
 0xa70   : > { %v7627_v0 = vsel %vm15831_vm2, 0.0, %v7595_v32  ;;  %8031 = vperm.xlu1 %9150, %v7897_v17   ;;  %v7900_v60 = vmul.f32 11.785113, %v9342_v51  ;;  %9359 = vrsqrt.f32 %v7841_v33  ;;  %v9348_v59 = vpop.eup %9347  ;;  %v7784_v26 = vadd.f32 %v7748_v19, %v14312_v9  ;;  %v7751_v6 = vld [vmem:[#allocation4 + $0xd8] sm:$0xff] }
 0xa71   : > { %v14366_v45 = vadd.f32 %v7659_v55, %v7627_v0  ;;  %v7846_v58 = vadd.f32 1e-06, %v7814_v25  ;;  %v7690_v37 = vadd.f32 %v7658_v43, %v7594_v34  ;;  %v7843_v36 = vadd.f32 1e-06, %v7811_v28  ;;  %v7752_v52 = vld [vmem:[#allocation4 + $0xe0] sm:$0xff]  ;;  %7721 = vst.msk [vmem:[#allocation4 + $0xf8] sm:$0xff] %vm15832_vm10, %v7689_v47 }
 0xa72   : > { %v7899_v5 = vmul.f32 11.785113, %v9348_v59  ;;  %8046 = vperm.xlu0 %9151, %v7900_v60   ;;  %v7902_v32 = vmul.f32 11.785113, %v9346_v46  ;;  %v7813_v61 = vadd.f32 %v7781_v20, %v7749_v13  ;;  %v7783_v51 = vadd.f32 %v7747_v63, %v14307_v7  ;;  %v9350_v9 = vpop.eup %9349 }
 0xa73   : > { %7723 = vst.msk [vmem:[#allocation4 + $0x108] sm:$0xff] %vm15833_vm13, %v14366_v45  ;;  %9361 = vrsqrt.f32 %v7846_v58  ;;  %v7816_v33 = vadd.f32 %v7784_v26, %v7752_v52  ;;  %v7785_v31 = vadd.f32 %v7749_v13, %v14332_v3  ;;  %v9352_v41 = vpop.eup %9351  ;;  %v7786_v21 = vadd.f32 %v7750_v16, %v14335_v8  ;;  %v7758_v8 = vld [vmem:[#allocation4 + $0x110] sm:$0xff] }
 0xa74   : > { %7722 = vst.msk [vmem:[#allocation4 + $0x100] sm:$0xff] %vm15834_vm8, %v7690_v37  ;;  %8041 = vperm.xlu1 %9150, %v7899_v5   ;;  %9363 = vrsqrt.f32 %v7843_v36  ;;  %v7845_v19 = vadd.f32 1e-06, %v7813_v61  ;;  %v7815_v28 = vadd.f32 %v7783_v51, %v7751_v6  ;;  %v7904_v17 = vmul.f32 11.785113, %v9350_v9  ;;  %v7753_v20 = vld [vmem:[#allocation4 + $0xe8] sm:$0xff] }
 0xa75   : > { %v7848_v55 = vadd.f32 1e-06, %v7816_v33  ;;  %v7901_v50 = vmul.f32 11.785113, %v9352_v41  ;;  %v7817_v63 = vadd.f32 %v7785_v31, %v7753_v20  ;;  %v7787_v34 = vadd.f32 %v7751_v6, %v14349_v4  ;;  %v7759_v31 = vld [vmem:[#allocation4 + $0x118] sm:$0xff] }
 0xa76   : > { %v7754_v25 = vld [vmem:[#allocation4 + $0xf0] sm:$0xff]  ;;  %8056 = vperm.xlu0 %9151, %v7902_v32   ;;  %9365 = vrsqrt.f32 %v7845_v19  ;;  %v7847_v7 = vadd.f32 1e-06, %v7815_v28  ;;  %v7788_v13 = vadd.f32 %v7752_v52, %v14352_v10  ;;  %vm15835_vm14 = vcmask 64512  }
 0xa77   : > { %9367 = vrsqrt.f32 %v7848_v55  ;;  %v7818_v0 = vadd.f32 %v7786_v21, %v7754_v25  ;;  %v9354_v43 = vpop.eup %9353  ;;  %v7790_v46 = vadd.f32 %v7754_v25, %v7690_v37  ;;  %v7849_v60 = vadd.f32 1e-06, %v7817_v63  ;;  %vm15836_vm4 = vmmov %vm15835_vm14 }
 0xa78   : > { %8051 = vperm.xlu1 %9150, %v7901_v50   ;;  %v9356_v3 = vpop.eup %9355  ;;  %v7755_v59 = vld [vmem:[#allocation4 + $0xf8] sm:$0xff]  ;;  %v7906_v58 = vmul.f32 11.785113, %v9354_v43  ;;  %9369 = vrsqrt.f32 %v7847_v7  ;;  %v7789_v37 = vadd.f32 %v7753_v20, %v7689_v47  ;;  %vm15837_vm0 = vmmov %vm15836_vm4 }
 0xa79   : > { %v7850_v16 = vadd.f32 1e-06, %v7818_v0  ;;  %v7903_v26 = vmul.f32 11.785113, %v9356_v3  ;;  %v7819_v36 = vadd.f32 %v7787_v34, %v7755_v59  ;;  %v7822_v33 = vadd.f32 %v7790_v46, %v7758_v8  ;;  %vm15838_vm12 = vmmov %vm15837_vm0 }
 0xa7a   : > { %8066 = vperm.xlu0 %9151, %v7904_v17   ;;  %v7757_v32 = vld [vmem:[#allocation4 + $0x108] sm:$0xff]  ;;  %v7791_v28 = vadd.f32 %v7755_v59, %v14366_v45  ;;  %vm15839_vm6 = vmmov %vm15837_vm0 }
 0xa7b   : > { %v7756_v5 = vld [vmem:[#allocation4 + $0x100] sm:$0xff]  ;;  %9371 = vrsqrt.f32 %v7850_v16  ;;  %v9358_v51 = vpop.eup %9357  ;;  %v7821_v52 = vadd.f32 %v7789_v37, %v7757_v32  ;;  %v7851_v19 = vadd.f32 1e-06, %v7819_v36  ;;  %v7854_v21 = vadd.f32 1e-06, %v7822_v33  ;;  %vm15840_vm5 = vmmov %vm15837_vm0 }
 0xa7c   : > { %v7820_v61 = vadd.f32 %v7788_v13, %v7756_v5  ;;  %8061 = vperm.xlu1 %9150, %v7903_v26   ;;  %9373 = vrsqrt.f32 %v7849_v60  ;;  %v7908_v9 = vmul.f32 11.785113, %v9358_v51  ;;  %v7823_v25 = vadd.f32 %v7791_v28, %v7759_v31  ;;  %vm15841_vm11 = vmmov %vm15837_vm0 }
 0xa7d   : > { %v9360_v4 = vpop.eup %9359  ;;  %v7853_v47 = vadd.f32 1e-06, %v7821_v52  ;;  %v7308_v51 = vmax.f32 %v13773_v12, %v13987_v53  ;;  %v7309_v33 = vmax.f32 %v13779_v14, %v13999_v57  ;;  %v7314_v14 = vmax.f32 %v13787_v44, %v14005_v23  ;;  %vm15842_vm9 = vmmov %vm15837_vm0 }
 0xa7e   : > { %v7852_v10 = vadd.f32 1e-06, %v7820_v61  ;;  %v7905_v6 = vmul.f32 11.785113, %v9360_v4  ;;  %8076 = vperm.xlu0 %9151, %v7906_v58   ;;  %v7855_v45 = vadd.f32 1e-06, %v7823_v25  ;;  %v7316_v44 = vmax.f32 %v13805_v35, %v14009_v48  ;;  %vm15847_vm3 = vmmov %vm15837_vm0 }
 0xa7f   : > { %v7920_v4 = vand.u32 2147483647, %v7308_v51  ;;  %v7921_v52 = vand.u32 2147483647, %v7309_v33  ;;  %vm15850_vm1 = vmmov %vm15837_vm0 }
 0xa80   : > { %9375 = vrsqrt.f32 %v7852_v10  ;;  %v9362_v41 = vpop.eup %9361  ;;  %8071 = vperm.xlu1 %9150, %v7905_v6   ;;  %v7310_v10 = vmax.f32 %v13771_v38, %v13995_v27  ;;  %v7311_v6 = vmax.f32 %v13777_v11, %v14003_v42  ;;  %v7313_v38 = vmax.f32 %v13795_v2, %v14007_v39  ;;  %vm15853_vm15 = vmmov %vm15837_vm0 }
 0xa81   : > { %v9364_v55 = vpop.eup %9363  ;;  %v7910_v20 = vmul.f32 11.785113, %v9362_v41  ;;  %9377 = vrsqrt.f32 %v7851_v19  ;;  %v7952_v28 = vmul.f32 %v7920_v4, %v7308_v51  ;;  %v7953_v12 = vmul.f32 %v7921_v52, %v7309_v33  ;;  %v15845_v52 = vld [vmem:[#allocation51_spill] sm:$0xff]  ;;  %vm15856_vm7 = vmmov %vm15837_vm0 }
 0xa82   : > { %v7907_v17 = vmul.f32 11.785113, %v9364_v55  ;;  %8086 = vperm.xlu0 %9151, %v7908_v9   ;;  %9379 = vrsqrt.f32 %v7854_v21  ;;  %v7312_v9 = vmax.f32 %v13789_v29, %v14001_v15  ;;  %v7922_v19 = vand.u32 2147483647, %v7310_v10  ;;  %vm15859_vm2 = vmmov %vm15837_vm0 }
 0xa83   : > { %v9366_v50 = vpop.eup %9365  ;;  %9381 = vrsqrt.f32 %v7853_v47  ;;  %v7923_v53 = vand.u32 2147483647, %v7311_v6  ;;  %v7926_v47 = vand.u32 2147483647, %v7314_v14  ;;  %v7925_v23 = vand.u32 2147483647, %v7313_v38  ;;  %vm15862_vm10 = vmmov %vm15837_vm0 }
 0xa84   : > { %v9368_v7 = vpop.eup %9367  ;;  %8081 = vperm.xlu1 %9150, %v7907_v17   ;;  %v7909_v63 = vmul.f32 11.785113, %v9366_v50  ;;  %9383 = vrsqrt.f32 %v7855_v45  ;;  %v7924_v21 = vand.u32 2147483647, %v7312_v9  ;;  %v7954_v29 = vmul.f32 %v7922_v19, %v7310_v10  ;;  %vm15865_vm13 = vmmov %vm15837_vm0 }
 0xa85   : > { %v7912_v0 = vmul.f32 11.785113, %v9368_v7  ;;  %v9370_v43 = vpop.eup %9369  ;;  %v7955_v17 = vmul.f32 %v7923_v53, %v7311_v6  ;;  %v7958_v45 = vmul.f32 %v7926_v47, %v7314_v14  ;;  %v15846_v6 = vld [vmem:[#allocation42_spill] sm:$0xff]  ;;  %v15849_v53 = vld [vmem:[#allocation43_spill] sm:$0xff]  ;;  %vm15868_vm8 = vmmov %vm15837_vm0 }
 0xa86   : > { %8096 = vperm.xlu0 %9151, %v7910_v20   ;;  %v7911_v3 = vmul.f32 11.785113, %v9370_v43  ;;  %v7956_v2 = vmul.f32 %v7924_v21, %v7312_v9  ;;  %v7957_v43 = vmul.f32 %v7925_v23, %v7313_v38  ;;  %v7321_v9 = vmax.f32 %v15846_v6, %v15845_v52  ;;  %v15867_v52 = vld [vmem:[#allocation21_spill] sm:$0xff] }
 0xa88   : > { %v9372_v46 = vpop.eup %9371  ;;  %8091 = vperm.xlu1 %9150, %v7909_v63   ;;  %v7315_v63 = vmax.f32 %v13793_v1, %v14011_v49  ;;  %v7317_v49 = vmax.f32 %v13811_v30, %v14015_v24  ;;  %v7933_v47 = vand.u32 2147483647, %v7321_v9 }
 0xa89   : > { %v9374_v34 = vpop.eup %9373  ;;  %v7914_v13 = vmul.f32 11.785113, %v9372_v46 }
 0xa8a   : > { %8106 = vperm.xlu0 %9151, %v7912_v0   ;;  %v7913_v16 = vmul.f32 11.785113, %v9374_v34  ;;  %v7928_v0 = vand.u32 2147483647, %v7316_v44  ;;  %v7927_v1 = vand.u32 2147483647, %v7315_v63 }
 0xa8b   : > { %v7929_v30 = vand.u32 2147483647, %v7317_v49 }
 0xa8c   : > { %8101 = vperm.xlu1 %9150, %v7911_v3   ;;  %v7318_v3 = vmax.f32 %v13803_v56, %v14013_v62  ;;  %v7320_v56 = vmax.f32 %v13821_v22, %v14017_v18  ;;  %v7959_v24 = vmul.f32 %v7927_v1, %v7315_v63 }
 0xa8d   : > { %v9376_v8 = vpop.eup %9375  ;;  %v7961_v19 = vmul.f32 %v7929_v30, %v7317_v49 }
 0xa8e   : > { %8116 = vperm.xlu0 %9151, %v7914_v13   ;;  %v7916_v60 = vmul.f32 11.785113, %v9376_v8  ;;  %v9378_v59 = vpop.eup %9377  ;;  %v7932_v33 = vand.u32 2147483647, %v7320_v56 }
 0xa8f   : > { %v9380_v26 = vpop.eup %9379  ;;  %v7915_v58 = vmul.f32 11.785113, %v9378_v59 }
 0xa90   : > { %8111 = vperm.xlu1 %9150, %v7913_v16   ;;  %v9382_v36 = vpop.eup %9381  ;;  %v7918_v5 = vmul.f32 11.785113, %v9380_v26  ;;  %v7960_v16 = vmul.f32 %v7928_v0, %v7316_v44 }
 0xa91   : > { %v7917_v32 = vmul.f32 11.785113, %v9382_v36  ;;  %v9384_v61 = vpop.eup %9383  ;;  %v7319_v36 = vmax.f32 %v13809_v40, %v14019_v54 }
 0xa92   : > { %8126 = vperm.xlu0 %9151, %v7916_v60   ;;  %v7919_v37 = vmul.f32 11.785113, %v9384_v61  ;;  %v15844_v61 = vld [vmem:[#allocation41_spill] sm:$0xff] }
 0xa93   : > { %v7931_v22 = vand.u32 2147483647, %v7319_v36 }
 0xa94   : > { %8121 = vperm.xlu1 %9150, %v7915_v58   ;;  %v7930_v58 = vand.u32 2147483647, %v7318_v3 }
 0xa96   : > { %8136 = vperm.xlu0 %9151, %v7918_v5   ;;  %v7962_v10 = vmul.f32 %v7930_v58, %v7318_v3  ;;  %v15861_v58 = vld [vmem:[#allocation45_spill] sm:$0xff] }
 0xa98   : > { %8131 = vperm.xlu1 %9150, %v7917_v32   ;;  %v15843_v32 = vld [vmem:[#allocation24_spill] sm:$0xff] }
 0xa9c   : > { %8141 = vperm.xlu1 %9150, %v7919_v37   ;;  %v7322_v37 = vmax.f32 %v15844_v61, %v15843_v32  ;;  %v15864_v32 = vld [vmem:[#allocation19_spill] sm:$0xff] }
 0xad1   : > { %v7987_v31 = vpop.permute.xlu1 %7986 }
 0xad2   : > { %v14389_v41 = vmul.f32 %v7987_v31, %v7952_v28  ;;  %v7934_v28 = vand.u32 2147483647, %v7322_v37 }
 0xad3   : > { %v7992_v57 = vpop.permute.xlu0 %7991 }
 0xad4   : > { %v14395_v27 = vmul.f32 %v7992_v57, %v7953_v12  ;;  %v8177_v11 = vsel %vm15835_vm14, %v14389_v41, 0.0  ;;  %v15848_v12 = vld [vmem:[#allocation27_spill] sm:$0xff]  ;;  %v7964_v57 = vmul.f32 %v7932_v33, %v7320_v56  ;;  %vm15871_vm14 = vmmov %vm15837_vm0 }
 0xad5   : > { %8178 = vadd.xlane.f32.xlu0 %v8177_v11  ;;  %v7997_v15 = vpop.permute.xlu1 %7996  ;;  %v7324_v21 = vmax.f32 %v15849_v53, %v15848_v12  ;;  %v15851_v11 = vld [vmem:[#allocation52_spill] sm:$0xff] }
 0xad6   : > { %v14399_v42 = vmul.f32 %v7997_v15, %v7954_v29  ;;  %v8180_v55 = vsel %vm15836_vm4, %v14395_v27, 0.0  ;;  %v15852_v29 = vld [vmem:[#allocation14_spill] sm:$0xff]  ;;  %vm15874_vm4 = vmmov %vm15837_vm0 }
 0xad7   : > { %8181 = vadd.xlane.f32.xlu1 %v8180_v55  ;;  %v7323_v15 = vmax.f32 %v15852_v29, %v15851_v11  ;;  %v7936_v63 = vand.u32 2147483647, %v7324_v21 }
 0xad8   : > { %v8183_v39 = vsel %vm15837_vm0, %v14399_v42, 0.0 }
 0xad9   : > { %8184 = vadd.xlane.f32.xlu0 %v8183_v39  ;;  %v8002_v25 = vpop.permute.xlu1 %8001  ;;  %v15854_v39 = vld [vmem:[#allocation29_spill] sm:$0xff]  ;;  %v7968_v30 = vmul.f32 %v7936_v63, %v7324_v21  ;;  %v15869_v21 = vld [vmem:[#allocation55_spill] sm:$0xff]  ;;  %v15875_v63 = vld [vmem:[#allocation56_spill] sm:$0xff] }
 0xada   : > { %v8007_v20 = vpop.permute.xlu0 %8006  ;;  %v14409_v7 = vmul.f32 %v8002_v25, %v7955_v17  ;;  %v15855_v17 = vld [vmem:[#allocation16_spill] sm:$0xff] }
 0xadb   : > { %v14407_v50 = vmul.f32 %v8007_v20, %v7956_v2  ;;  %v7963_v2 = vmul.f32 %v7931_v22, %v7319_v36  ;;  %v7326_v20 = vmax.f32 %v15855_v17, %v15854_v39 }
 0xadc   : > { %v8186_v48 = vsel %vm15839_vm6, %v14409_v7, 0.0  ;;  %vm15882_vm6 = vmmov %vm15837_vm0 }
 0xadd   : > { %v8189_v35 = vsel %vm15838_vm12, %v14407_v50, 0.0  ;;  %8187 = vadd.xlane.f32.xlu0 %v8186_v48  ;;  %v8012_v34 = vpop.permute.xlu1 %8011  ;;  %v7935_v48 = vand.u32 2147483647, %v7323_v15  ;;  %vm15879_vm12 = vmmov %vm15837_vm0 }
 0xade   : > { %v8017_v46 = vpop.permute.xlu0 %8016  ;;  %8190 = vadd.xlane.f32.xlu1 %v8189_v35  ;;  %v14421_v8 = vmul.f32 %v8012_v34, %v7957_v43  ;;  %v15858_v34 = vld [vmem:[#allocation44_spill] sm:$0xff] }
 0xadf   : > { %v14419_v13 = vmul.f32 %v8017_v46, %v7958_v45  ;;  %v7966_v45 = vmul.f32 %v7934_v28, %v7322_v37  ;;  %v15857_v46 = vld [vmem:[#allocation53_spill] sm:$0xff]  ;;  %v7967_v22 = vmul.f32 %v7935_v48, %v7323_v15 }
 0xae0   : > { %v8192_v59 = vsel %vm15841_vm11, %v14421_v8, 0.0  ;;  %v7325_v3 = vmax.f32 %v15858_v34, %v15857_v46  ;;  %vm15888_vm11 = vmmov %vm15837_vm0 }
 0xae1   : > { %v8195_v60 = vsel %vm15840_vm5, %v14419_v13, 0.0  ;;  %8193 = vadd.xlane.f32.xlu0 %v8192_v59  ;;  %vm15885_vm5 = vmmov %vm15837_vm0 }
 0xae2   : > { %v8027_v26 = vpop.permute.xlu0 %8026  ;;  %8196 = vadd.xlane.f32.xlu1 %v8195_v60  ;;  %v7938_v60 = vand.u32 2147483647, %v7326_v20 }
 0xae3   : > { %v14431_v62 = vmul.f32 %v8027_v26, %v7960_v16  ;;  %v7965_v16 = vmul.f32 %v7933_v47, %v7321_v9  ;;  %v15860_v26 = vld [vmem:[#allocation26_spill] sm:$0xff] }
 0xae4   : > { %v7328_v56 = vmax.f32 %v15861_v58, %v15860_v26  ;;  %v7970_v28 = vmul.f32 %v7938_v60, %v7326_v20 }
 0xae5   : > { %v8201_v5 = vsel %vm15842_vm9, %v14431_v62, 0.0  ;;  %vm15891_vm9 = vmmov %vm15837_vm0 }
 0xae6   : > { %v8022_v51 = vpop.permute.xlu1 %8021  ;;  %8202 = vadd.xlane.f32.xlu1 %v8201_v5  ;;  %v15863_v5 = vld [vmem:[#allocation54_spill] sm:$0xff] }
 0xae7   : > { %v14439_v4 = vmul.f32 %v8022_v51, %v7959_v24  ;;  %v7327_v61 = vmax.f32 %v15864_v32, %v15863_v5  ;;  %v7937_v51 = vand.u32 2147483647, %v7325_v3  ;;  %v15880_v32 = vld [vmem:[#allocation5_spill] sm:$0xff] }
 0xae8   : > { %v8037_v18 = vpop.permute.xlu0 %8036 }
 0xae9   : > { %v14443_v40 = vmul.f32 %v8037_v18, %v7962_v10  ;;  %v8198_v54 = vsel %vm15847_vm3, %v14439_v4, 0.0  ;;  %v15866_v18 = vld [vmem:[#allocation28_spill] sm:$0xff]  ;;  %v7939_v12 = vand.u32 2147483647, %v7327_v61  ;;  %v7969_v15 = vmul.f32 %v7937_v51, %v7325_v3  ;;  %vm15894_vm3 = vmmov %vm15837_vm0 }
 0xaea   : > { %8199 = vadd.xlane.f32.xlu0 %v8198_v54  ;;  %v7330_v6 = vmax.f32 %v15867_v52, %v15866_v18  ;;  %v7940_v54 = vand.u32 2147483647, %v7328_v56 }
 0xaeb   : > { %v8032_v31 = vpop.permute.xlu1 %8031  ;;  %v8207_v38 = vsel %vm15850_vm1, %v14443_v40, 0.0  ;;  %v7971_v3 = vmul.f32 %v7939_v12, %v7327_v61  ;;  %vm15895_vm1 = vmmov %vm15837_vm0 }
 0xaec   : > { %v14449_v14 = vmul.f32 %v8032_v31, %v7961_v19  ;;  %8208 = vadd.xlane.f32.xlu1 %v8207_v38  ;;  %v7972_v20 = vmul.f32 %v7940_v54, %v7328_v56 }
 0xaed   : > { %v8047_v55 = vpop.permute.xlu0 %8046 }
 0xaee   : > { %v14455_v44 = vmul.f32 %v8047_v55, %v7964_v57  ;;  %v8204_v23 = vsel %vm15853_vm15, %v14449_v14, 0.0  ;;  %v15870_v57 = vld [vmem:[#allocation46_spill] sm:$0xff]  ;;  %v7942_v55 = vand.u32 2147483647, %v7330_v6  ;;  %vm15898_vm15 = vmmov %vm15837_vm0 }
 0xaef   : > { %8205 = vadd.xlane.f32.xlu0 %v8204_v23  ;;  %v8042_v25 = vpop.permute.xlu1 %8041  ;;  %v7329_v38 = vmax.f32 %v15870_v57, %v15869_v21  ;;  %v15872_v23 = vld [vmem:[#allocation31_spill] sm:$0xff] }
 0xaf0   : > { %v14461_v0 = vmul.f32 %v8042_v25, %v7963_v2  ;;  %v8213_v35 = vsel %vm15856_vm7, %v14455_v44, 0.0  ;;  %v15873_v2 = vld [vmem:[#allocation47_spill] sm:$0xff]  ;;  %v7974_v56 = vmul.f32 %v7942_v55, %v7330_v6  ;;  %v15884_v6 = vld [vmem:[#allocation49_spill] sm:$0xff]  ;;  %vm15899_vm7 = vmmov %vm15837_vm0 }
 0xaf1   : > { %v8057_v43 = vpop.permute.xlu0 %8056  ;;  %8214 = vadd.xlane.f32.xlu1 %v8213_v35  ;;  %v7332_v39 = vmax.f32 %v15873_v2, %v15872_v23  ;;  %v15887_v21 = vld [vmem:[#allocation23_spill] sm:$0xff] }
 0xaf2   : > { %v14467_v1 = vmul.f32 %v8057_v43, %v7966_v45  ;;  %v8210_v49 = vsel %vm15859_vm2, %v14461_v0, 0.0  ;;  %v15876_v45 = vld [vmem:[#allocation18_spill] sm:$0xff]  ;;  %v7941_v43 = vand.u32 2147483647, %v7329_v38  ;;  %vm15900_vm2 = vmmov %vm15837_vm0 }
 0xaf3   : > { %8211 = vadd.xlane.f32.xlu0 %v8210_v49  ;;  %v8052_v59 = vpop.permute.xlu1 %8051  ;;  %v7331_v35 = vmax.f32 %v15876_v45, %v15875_v63  ;;  %v15877_v49 = vld [vmem:[#allocation30_spill] sm:$0xff]  ;;  %v7944_v26 = vand.u32 2147483647, %v7332_v39 }
 0xaf4   : > { %v14473_v36 = vmul.f32 %v8052_v59, %v7965_v16  ;;  %v8219_v24 = vsel %vm15862_vm10, %v14467_v1, 0.0  ;;  %v15878_v16 = vld [vmem:[#allocation20_spill] sm:$0xff]  ;;  %vm15901_vm10 = vmmov %vm15837_vm0 }
 0xaf5   : > { %v8067_v37 = vpop.permute.xlu0 %8066  ;;  %8220 = vadd.xlane.f32.xlu1 %v8219_v24  ;;  %v7334_v60 = vmax.f32 %v15878_v16, %v15877_v49  ;;  %v7943_v24 = vand.u32 2147483647, %v7331_v35  ;;  %v15893_v49 = vld [vmem:[#allocation50_spill] sm:$0xff] }
 0xaf6   : > { %v14479_v33 = vmul.f32 %v8067_v37, %v7968_v30  ;;  %v8216_v10 = vsel %vm15865_vm13, %v14473_v36, 0.0  ;;  %v15881_v37 = vld [vmem:[#allocation48_spill] sm:$0xff]  ;;  %vm15902_vm13 = vmmov %vm15837_vm0 }
 0xaf7   : > { %8217 = vadd.xlane.f32.xlu0 %v8216_v10  ;;  %v8062_v9 = vpop.permute.xlu1 %8061  ;;  %v7333_v51 = vmax.f32 %v15881_v37, %v15880_v32  ;;  %v7946_v18 = vand.u32 2147483647, %v7334_v60 }
 0xaf8   : > { %v14485_v19 = vmul.f32 %v8062_v9, %v7967_v22  ;;  %v8225_v31 = vsel %vm15868_vm8, %v14479_v33, 0.0  ;;  %v7973_v22 = vmul.f32 %v7941_v43, %v7329_v38  ;;  %v15883_v9 = vld [vmem:[#allocation6_spill] sm:$0xff]  ;;  %vm15903_vm8 = vmmov %vm15837_vm0 }
 0xaf9   : > { %v8077_v53 = vpop.permute.xlu0 %8076  ;;  %8226 = vadd.xlane.f32.xlu1 %v8225_v31  ;;  %v7336_v54 = vmax.f32 %v15884_v6, %v15883_v9  ;;  %v7976_v31 = vmul.f32 %v7944_v26, %v7332_v39  ;;  %v7978_v2 = vmul.f32 %v7946_v18, %v7334_v60  ;;  %v15889_v39 = vld [vmem:[#allocation32_spill] sm:$0xff]  ;;  %v15897_v18 = vld [vmem:[#allocation22_spill] sm:$0xff] }
 0xafa   : > { %v14491_v11 = vmul.f32 %v8077_v53, %v7970_v28  ;;  %v8222_v29 = vsel %vm15871_vm14, %v14485_v19, 0.0  ;;  %v15886_v53 = vld [vmem:[#allocation33_spill] sm:$0xff]  ;;  %vm15904_vm14 = vmmov %vm15837_vm0 }
 0xafb   : > { %8223 = vadd.xlane.f32.xlu0 %v8222_v29  ;;  %v8072_v47 = vpop.permute.xlu1 %8071  ;;  %v7335_v57 = vmax.f32 %v15887_v21, %v15886_v53 }
 0xafc   : > { %v14497_v17 = vmul.f32 %v8072_v47, %v7969_v15  ;;  %v8231_v25 = vsel %vm15874_vm4, %v14491_v11, 0.0  ;;  %v7945_v15 = vand.u32 2147483647, %v7333_v51  ;;  %v7975_v47 = vmul.f32 %v7943_v24, %v7331_v35  ;;  %vm15905_vm4 = vmmov %vm15837_vm0 }
 0xafd   : > { %v8087_v48 = vpop.permute.xlu0 %8086  ;;  %8232 = vadd.xlane.f32.xlu1 %v8231_v25  ;;  %v15890_v25 = vld [vmem:[#allocation25_spill] sm:$0xff]  ;;  %v7947_v43 = vand.u32 2147483647, %v7335_v57 }
 0xafe   : > { %v14503_v46 = vmul.f32 %v8087_v48, %v7972_v20  ;;  %v8228_v34 = vsel %vm15837_vm0, %v14497_v17, 0.0  ;;  %v7948_v20 = vand.u32 2147483647, %v7336_v54  ;;  %v7338_v63 = vmax.f32 %v15890_v25, %v15889_v39 }
 0xaff   : > { %8229 = vadd.xlane.f32.xlu0 %v8228_v34  ;;  %v8082_v59 = vpop.permute.xlu1 %8081  ;;  %v7977_v60 = vmul.f32 %v7945_v15, %v7333_v51  ;;  %v7979_v37 = vmul.f32 %v7947_v43, %v7335_v57 }
 0xb00   : > { %v14509_v58 = vmul.f32 %v8082_v59, %v7971_v3  ;;  %v8237_v30 = vsel %vm15879_vm12, %v14503_v46, 0.0  ;;  %v15892_v3 = vld [vmem:[#allocation9_spill] sm:$0xff]  ;;  %vm15906_vm12 = vmmov %vm15837_vm0 }
 0xb01   : > { %v8097_v5 = vpop.permute.xlu0 %8096  ;;  %8238 = vadd.xlane.f32.xlu1 %v8237_v30  ;;  %v7337_v16 = vmax.f32 %v15893_v49, %v15892_v3 }
 0xb02   : > { %v14515_v10 = vmul.f32 %v8097_v5, %v7974_v56  ;;  %v8234_v61 = vsel %vm15882_vm6, %v14509_v58, 0.0  ;;  %v7950_v56 = vand.u32 2147483647, %v7338_v63  ;;  %v7980_v5 = vmul.f32 %v7948_v20, %v7336_v54  ;;  %vm15907_vm6 = vmmov %vm15837_vm0 }
 0xb03   : > { %8235 = vadd.xlane.f32.xlu0 %v8234_v61  ;;  %v8092_v52 = vpop.permute.xlu1 %8091  ;;  %v7949_v61 = vand.u32 2147483647, %v7337_v16 }
 0xb04   : > { %v14521_v28 = vmul.f32 %v8092_v52, %v7973_v22  ;;  %v8243_v12 = vsel %vm15885_vm5, %v14515_v10, 0.0  ;;  %v15896_v22 = vld [vmem:[#allocation7_spill] sm:$0xff]  ;;  %v7982_v54 = vmul.f32 %v7950_v56, %v7338_v63  ;;  %vm15908_vm5 = vmmov %vm15837_vm0 }
 0xb05   : > { %v8107_v29 = vpop.permute.xlu0 %8106  ;;  %8244 = vadd.xlane.f32.xlu1 %v8243_v12  ;;  %v7339_v52 = vmax.f32 %v15897_v18, %v15896_v22  ;;  %v7981_v15 = vmul.f32 %v7949_v61, %v7337_v16 }
 0xb06   : > { %v14527_v55 = vmul.f32 %v8107_v29, %v7976_v31  ;;  %v8240_v38 = vsel %vm15888_vm11, %v14521_v28, 0.0  ;;  %vm15909_vm11 = vmmov %vm15837_vm0 }
 0xb07   : > { %8241 = vadd.xlane.f32.xlu0 %v8240_v38  ;;  %v8102_v23 = vpop.permute.xlu1 %8101  ;;  %v7951_v21 = vand.u32 2147483647, %v7339_v52 }
 0xb08   : > { %v14533_v45 = vmul.f32 %v8102_v23, %v7975_v47  ;;  %v8249_v48 = vsel %vm15891_vm9, %v14527_v55, 0.0  ;;  %vm15910_vm9 = vmmov %vm15837_vm0 }
 0xb09   : > { %v8117_v34 = vpop.permute.xlu0 %8116  ;;  %8250 = vadd.xlane.f32.xlu1 %v8249_v48  ;;  %v7983_v20 = vmul.f32 %v7951_v21, %v7339_v52 }
 0xb0a   : > { %v14539_v59 = vmul.f32 %v8117_v34, %v7978_v2  ;;  %v8246_v35 = vsel %vm15894_vm3, %v14533_v45, 0.0  ;;  %vm15911_vm3 = vmmov %vm15837_vm0 }
 0xb0b   : > { %8247 = vadd.xlane.f32.xlu0 %v8246_v35  ;;  %v8112_v26 = vpop.permute.xlu1 %8111 }
 0xb0c   : > { %v14543_v30 = vmul.f32 %v8112_v26, %v7977_v60  ;;  %v8255_v24 = vsel %vm15895_vm1, %v14539_v59, 0.0  ;;  %vm15912_vm1 = vmmov %vm15837_vm0 }
 0xb0d   : > { %8256 = vadd.xlane.f32.xlu1 %v8255_v24  ;;  %v8127_v32 = vpop.permute.xlu0 %8126 }
 0xb0e   : > { %v14549_v9 = vmul.f32 %v8127_v32, %v7980_v5  ;;  %v8252_v51 = vsel %vm15898_vm15, %v14543_v30, 0.0  ;;  %vm15913_vm15 = vmmov %vm15837_vm0 }
 0xb0f   : > { %8253 = vadd.xlane.f32.xlu0 %v8252_v51  ;;  %v8122_v6 = vpop.permute.xlu1 %8121 }
 0xb10   : > { %v14553_v31 = vmul.f32 %v8122_v6, %v7979_v37  ;;  %v8261_v12 = vsel %vm15899_vm7, %v14549_v9, 0.0  ;;  %vm15914_vm7 = vmmov %vm15837_vm0 }
 0xb11   : > { %8262 = vadd.xlane.f32.xlu1 %v8261_v12  ;;  %v8137_v53 = vpop.permute.xlu0 %8136 }
 0xb12   : > { %v14557_v57 = vmul.f32 %v8137_v53, %v7982_v54  ;;  %v8258_v29 = vsel %vm15900_vm2, %v14553_v31, 0.0  ;;  %vm15915_vm2 = vmmov %vm15837_vm0 }
 0xb13   : > { %8259 = vadd.xlane.f32.xlu0 %v8258_v29  ;;  %v8132_v38 = vpop.permute.xlu1 %8131 }
 0xb14   : > { %v14561_v47 = vmul.f32 %v8132_v38, %v7981_v15  ;;  %v8267_v23 = vsel %vm15901_vm10, %v14557_v57, 0.0  ;;  %vm15916_vm10 = vmmov %vm15837_vm0 }
 0xb15   : > { %8268 = vadd.xlane.f32.xlu1 %v8267_v23 }
 0xb16   : > { %v8264_v2 = vsel %vm15902_vm13, %v14561_v47, 0.0  ;;  %vm15917_vm13 = vmmov %vm15837_vm0 }
 0xb17   : > { %8265 = vadd.xlane.f32.xlu0 %v8264_v2  ;;  %v8142_v39 = vpop.permute.xlu1 %8141 }
 0xb18   : > { %v14567_v25 = vmul.f32 %v8142_v39, %v7983_v20 }
 0xb1a   : > { %v8270_v63 = vsel %vm15903_vm8, %v14567_v25, 0.0  ;;  %vm15918_vm8 = vmmov %vm15837_vm0 }
 0xb1b   : > { %8271 = vadd.xlane.f32.xlu0 %v8270_v63 }
 0xb5e   : > { %v8179_v48 = vpop.xlane.xlu0 %8178 }
 0xb5f   : > { %v8273_v43 = vmul.f32 0.125, %v8179_v48 }
 0xb60   : > { %v8182_v34 = vpop.xlane.xlu1 %8181 }
 0xb61   : > { %v14572_v3 = vsub.f32 %v14389_v41, %v8273_v43  ;;  %v8274_v49 = vmul.f32 0.125, %v8182_v34 }
 0xb62   : > { %v8185_v16 = vpop.xlane.xlu0 %8184 }
 0xb63   : > { %v14575_v35 = vsub.f32 %v14395_v27, %v8274_v49  ;;  %v8275_v60 = vmul.f32 0.125, %v8185_v16  ;;  %v8337_v26 = vmul.f32 %v14572_v3, %v14572_v3 }
 0xb65   : > { %v14580_v56 = vsub.f32 %v14399_v42, %v8275_v60  ;;  %v8369_v24 = vsel %vm15904_vm14, %v8337_v26, 0.0  ;;  %v8338_v5 = vmul.f32 %v14575_v35, %v14575_v35  ;;  %vm15919_vm14 = vmmov %vm15837_vm0 }
 0xb66   : > { %8370 = vadd.xlane.f32.xlu1 %v8369_v24  ;;  %v8188_v41 = vpop.xlane.xlu0 %8187 }
 0xb67   : > { %v8191_v32 = vpop.xlane.xlu1 %8190  ;;  %v8276_v37 = vmul.f32 0.125, %v8188_v41  ;;  %v8372_v27 = vsel %vm15905_vm4, %v8338_v5, 0.0  ;;  %v8339_v22 = vmul.f32 %v14580_v56, %v14580_v56  ;;  %vm15920_vm4 = vmmov %vm15837_vm0 }
 0xb68   : > { %v8277_v61 = vmul.f32 0.125, %v8191_v32  ;;  %8373 = vadd.xlane.f32.xlu0 %v8372_v27 }
 0xb69   : > { %v14589_v18 = vsub.f32 %v14409_v7, %v8276_v37  ;;  %v8375_v52 = vsel %vm15837_vm0, %v8339_v22, 0.0 }
 0xb6a   : > { %v14592_v42 = vsub.f32 %v14407_v50, %v8277_v61  ;;  %8376 = vadd.xlane.f32.xlu1 %v8375_v52  ;;  %v8194_v51 = vpop.xlane.xlu0 %8193 }
 0xb6b   : > { %v8197_v6 = vpop.xlane.xlu1 %8196  ;;  %v8278_v12 = vmul.f32 0.125, %v8194_v51  ;;  %v8340_v53 = vmul.f32 %v14589_v18, %v14589_v18 }
 0xb6c   : > { %v8279_v54 = vmul.f32 0.125, %v8197_v6  ;;  %v8341_v21 = vmul.f32 %v14592_v42, %v14592_v42 }
 0xb6d   : > { %v14600_v29 = vsub.f32 %v14421_v8, %v8278_v12  ;;  %v8378_v50 = vsel %vm15906_vm12, %v8340_v53, 0.0  ;;  %vm15921_vm12 = vmmov %vm15837_vm0 }
 0xb6e   : > { %v14603_v7 = vsub.f32 %v14419_v13, %v8279_v54  ;;  %v8381_v15 = vsel %vm15907_vm6, %v8341_v21, 0.0  ;;  %8379 = vadd.xlane.f32.xlu0 %v8378_v50  ;;  %vm15922_vm6 = vmmov %vm15837_vm0 }
 0xb6f   : > { %8382 = vadd.xlane.f32.xlu1 %v8381_v15  ;;  %v8203_v38 = vpop.xlane.xlu1 %8202  ;;  %v8342_v2 = vmul.f32 %v14600_v29, %v14600_v29 }
 0xb70   : > { %v8281_v23 = vmul.f32 0.125, %v8203_v38  ;;  %v8343_v20 = vmul.f32 %v14603_v7, %v14603_v7 }
 0xb71   : > { %v8384_v13 = vsel %vm15908_vm5, %v8342_v2, 0.0  ;;  %vm15923_vm5 = vmmov %vm15837_vm0 }
 0xb72   : > { %v14612_v8 = vsub.f32 %v14431_v62, %v8281_v23  ;;  %v8387_v39 = vsel %vm15909_vm11, %v8343_v20, 0.0  ;;  %8385 = vadd.xlane.f32.xlu0 %v8384_v13  ;;  %vm15924_vm11 = vmmov %vm15837_vm0 }
 0xb73   : > { %v8200_v63 = vpop.xlane.xlu0 %8199  ;;  %8388 = vadd.xlane.f32.xlu1 %v8387_v39 }
 0xb74   : > { %v8280_v48 = vmul.f32 0.125, %v8200_v63  ;;  %v8345_v43 = vmul.f32 %v14612_v8, %v14612_v8 }
 0xb75   : > { %v8209_v34 = vpop.xlane.xlu1 %8208 }
 0xb76   : > { %v14619_v49 = vsub.f32 %v14439_v4, %v8280_v48  ;;  %v8283_v16 = vmul.f32 0.125, %v8209_v34  ;;  %v8393_v60 = vsel %vm15910_vm9, %v8345_v43, 0.0  ;;  %vm15925_vm9 = vmmov %vm15837_vm0 }
 0xb77   : > { %8394 = vadd.xlane.f32.xlu1 %v8393_v60 }
 0xb78   : > { %v8206_v62 = vpop.xlane.xlu0 %8205  ;;  %v14623_v24 = vsub.f32 %v14443_v40, %v8283_v16  ;;  %v8344_v5 = vmul.f32 %v14619_v49, %v14619_v49 }
 0xb79   : > { %v8282_v26 = vmul.f32 0.125, %v8206_v62 }
 0xb7a   : > { %v8215_v41 = vpop.xlane.xlu1 %8214  ;;  %v8390_v37 = vsel %vm15911_vm3, %v8344_v5, 0.0  ;;  %v8347_v61 = vmul.f32 %v14623_v24, %v14623_v24  ;;  %vm15926_vm3 = vmmov %vm15837_vm0 }
 0xb7b   : > { %v14628_v32 = vsub.f32 %v14449_v14, %v8282_v26  ;;  %v8285_v4 = vmul.f32 0.125, %v8215_v41  ;;  %8391 = vadd.xlane.f32.xlu0 %v8390_v37 }
 0xb7c   : > { %v8212_v27 = vpop.xlane.xlu0 %8211  ;;  %v8399_v51 = vsel %vm15912_vm1, %v8347_v61, 0.0  ;;  %vm15927_vm1 = vmmov %vm15837_vm0 }
 0xb7d   : > { %v8284_v22 = vmul.f32 0.125, %v8212_v27  ;;  %v14634_v52 = vsub.f32 %v14455_v44, %v8285_v4  ;;  %v8346_v40 = vmul.f32 %v14628_v32, %v14628_v32  ;;  %8400 = vadd.xlane.f32.xlu1 %v8399_v51 }
 0xb7e   : > { %v8221_v14 = vpop.xlane.xlu1 %8220 }
 0xb7f   : > { %v14640_v6 = vsub.f32 %v14461_v0, %v8284_v22  ;;  %v8396_v12 = vsel %vm15913_vm15, %v8346_v40, 0.0  ;;  %v8287_v54 = vmul.f32 0.125, %v8221_v14  ;;  %v8349_v53 = vmul.f32 %v14634_v52, %v14634_v52  ;;  %vm15928_vm15 = vmmov %vm15837_vm0 }
 0xb80   : > { %v8218_v21 = vpop.xlane.xlu0 %8217  ;;  %8397 = vadd.xlane.f32.xlu0 %v8396_v12 }
 0xb81   : > { %v8286_v44 = vmul.f32 0.125, %v8218_v21  ;;  %v14646_v50 = vsub.f32 %v14467_v1, %v8287_v54  ;;  %v8348_v15 = vmul.f32 %v14640_v6, %v14640_v6  ;;  %v8405_v38 = vsel %vm15914_vm7, %v8349_v53, 0.0  ;;  %vm15929_vm7 = vmmov %vm15837_vm0 }
 0xb82   : > { %8406 = vadd.xlane.f32.xlu1 %v8405_v38  ;;  %v8227_v0 = vpop.xlane.xlu1 %8226 }
 0xb83   : > { %v14652_v23 = vsub.f32 %v14473_v36, %v8286_v44  ;;  %v8402_v2 = vsel %vm15915_vm2, %v8348_v15, 0.0  ;;  %v8289_v20 = vmul.f32 0.125, %v8227_v0  ;;  %v8351_v13 = vmul.f32 %v14646_v50, %v14646_v50  ;;  %vm15930_vm2 = vmmov %vm15837_vm0 }
 0xb84   : > { %v8224_v39 = vpop.xlane.xlu0 %8223  ;;  %8403 = vadd.xlane.f32.xlu0 %v8402_v2 }
 0xb85   : > { %v8288_v1 = vmul.f32 0.125, %v8224_v39  ;;  %v14658_v63 = vsub.f32 %v14479_v33, %v8289_v20  ;;  %v8350_v48 = vmul.f32 %v14652_v23, %v14652_v23  ;;  %v8411_v43 = vsel %vm15916_vm10, %v8351_v13, 0.0  ;;  %vm15931_vm10 = vmmov %vm15837_vm0 }
 0xb86   : > { %8412 = vadd.xlane.f32.xlu1 %v8411_v43  ;;  %v8233_v36 = vpop.xlane.xlu1 %8232 }
 0xb87   : > { %v14664_v34 = vsub.f32 %v14485_v19, %v8288_v1  ;;  %v8408_v16 = vsel %vm15917_vm13, %v8350_v48, 0.0  ;;  %v8291_v60 = vmul.f32 0.125, %v8233_v36  ;;  %v8353_v62 = vmul.f32 %v14658_v63, %v14658_v63  ;;  %vm15932_vm13 = vmmov %vm15837_vm0 }
 0xb88   : > { %v8230_v26 = vpop.xlane.xlu0 %8229  ;;  %8409 = vadd.xlane.f32.xlu0 %v8408_v16 }
 0xb89   : > { %v8290_v33 = vmul.f32 0.125, %v8230_v26  ;;  %v14670_v5 = vsub.f32 %v14491_v11, %v8291_v60  ;;  %v8352_v41 = vmul.f32 %v14664_v34, %v14664_v34  ;;  %v8417_v37 = vsel %vm15918_vm8, %v8353_v62, 0.0  ;;  %vm15933_vm8 = vmmov %vm15837_vm0 }
 0xb8a   : > { %8418 = vadd.xlane.f32.xlu1 %v8417_v37  ;;  %v8239_v19 = vpop.xlane.xlu1 %8238 }
 0xb8b   : > { %v14676_v4 = vsub.f32 %v14497_v17, %v8290_v33  ;;  %v8414_v61 = vsel %vm15919_vm14, %v8352_v41, 0.0  ;;  %v8293_v27 = vmul.f32 0.125, %v8239_v19  ;;  %v8355_v22 = vmul.f32 %v14670_v5, %v14670_v5  ;;  %vm15934_vm14 = vmmov %vm15837_vm0 }
 0xb8c   : > { %v8236_v40 = vpop.xlane.xlu0 %8235  ;;  %8415 = vadd.xlane.f32.xlu0 %v8414_v61 }
 0xb8d   : > { %v8292_v11 = vmul.f32 0.125, %v8236_v40  ;;  %v14682_v51 = vsub.f32 %v14503_v46, %v8293_v27  ;;  %v8354_v14 = vmul.f32 %v14676_v4, %v14676_v4  ;;  %v8423_v12 = vsel %vm15920_vm4, %v8355_v22, 0.0  ;;  %vm15935_vm4 = vmmov %vm15837_vm0 }
 0xb8e   : > { %8424 = vadd.xlane.f32.xlu1 %v8423_v12  ;;  %v8245_v17 = vpop.xlane.xlu1 %8244 }
 0xb8f   : > { %v14688_v54 = vsub.f32 %v14509_v58, %v8292_v11  ;;  %v8420_v53 = vsel %vm15837_vm0, %v8354_v14, 0.0  ;;  %v8295_v21 = vmul.f32 0.125, %v8245_v17  ;;  %v8357_v44 = vmul.f32 %v14682_v51, %v14682_v51 }
 0xb90   : > { %v8242_v15 = vpop.xlane.xlu0 %8241  ;;  %8421 = vadd.xlane.f32.xlu0 %v8420_v53 }
 0xb91   : > { %v8294_v46 = vmul.f32 0.125, %v8242_v15  ;;  %v14694_v38 = vsub.f32 %v14515_v10, %v8295_v21  ;;  %v8356_v0 = vmul.f32 %v14688_v54, %v14688_v54  ;;  %v8429_v2 = vsel %vm15921_vm12, %v8357_v44, 0.0  ;;  %vm15936_vm12 = vmmov %vm15837_vm0 }
 0xb92   : > { %8430 = vadd.xlane.f32.xlu1 %v8429_v2  ;;  %v8251_v58 = vpop.xlane.xlu1 %8250 }
 0xb93   : > { %v14700_v20 = vsub.f32 %v14521_v28, %v8294_v46  ;;  %v8426_v13 = vsel %vm15922_vm6, %v8356_v0, 0.0  ;;  %v8297_v39 = vmul.f32 0.125, %v8251_v58  ;;  %v8359_v1 = vmul.f32 %v14694_v38, %v14694_v38  ;;  %vm15937_vm6 = vmmov %vm15837_vm0 }
 0xb94   : > { %v8248_v48 = vpop.xlane.xlu0 %8247  ;;  %8427 = vadd.xlane.f32.xlu0 %v8426_v13 }
 0xb95   : > { %v8296_v10 = vmul.f32 0.125, %v8248_v48  ;;  %v14706_v43 = vsub.f32 %v14527_v55, %v8297_v39  ;;  %v8358_v36 = vmul.f32 %v14700_v20, %v14700_v20  ;;  %v8435_v16 = vsel %vm15923_vm5, %v8359_v1, 0.0  ;;  %vm15938_vm5 = vmmov %vm15837_vm0 }
 0xb96   : > { %8436 = vadd.xlane.f32.xlu1 %v8435_v16  ;;  %v8257_v28 = vpop.xlane.xlu1 %8256 }
 0xb97   : > { %v14712_v60 = vsub.f32 %v14533_v45, %v8296_v10  ;;  %v8432_v62 = vsel %vm15924_vm11, %v8358_v36, 0.0  ;;  %v8299_v26 = vmul.f32 0.125, %v8257_v28  ;;  %v8361_v33 = vmul.f32 %v14706_v43, %v14706_v43  ;;  %vm15939_vm11 = vmmov %vm15837_vm0 }
 0xb98   : > { %v8254_v41 = vpop.xlane.xlu0 %8253  ;;  %8433 = vadd.xlane.f32.xlu0 %v8432_v62 }
 0xb99   : > { %v8298_v55 = vmul.f32 0.125, %v8254_v41  ;;  %v14718_v37 = vsub.f32 %v14539_v59, %v8299_v26  ;;  %v8360_v19 = vmul.f32 %v14712_v60, %v14712_v60  ;;  %v8441_v61 = vsel %vm15925_vm9, %v8361_v33, 0.0  ;;  %vm15940_vm9 = vmmov %vm15837_vm0 }
 0xb9a   : > { %8442 = vadd.xlane.f32.xlu1 %v8441_v61  ;;  %v8263_v45 = vpop.xlane.xlu1 %8262 }
 0xb9b   : > { %v14724_v27 = vsub.f32 %v14543_v30, %v8298_v55  ;;  %v8438_v22 = vsel %vm15926_vm3, %v8360_v19, 0.0  ;;  %v8301_v40 = vmul.f32 0.125, %v8263_v45  ;;  %v8363_v11 = vmul.f32 %v14718_v37, %v14718_v37  ;;  %vm15941_vm3 = vmmov %vm15837_vm0 }
 0xb9c   : > { %v8260_v14 = vpop.xlane.xlu0 %8259  ;;  %8439 = vadd.xlane.f32.xlu0 %v8438_v22 }
 0xb9d   : > { %v8300_v59 = vmul.f32 0.125, %v8260_v14  ;;  %v14730_v12 = vsub.f32 %v14549_v9, %v8301_v40  ;;  %v8362_v17 = vmul.f32 %v14724_v27, %v14724_v27  ;;  %v8447_v53 = vsel %vm15927_vm1, %v8363_v11, 0.0  ;;  %vm15942_vm1 = vmmov %vm15837_vm0 }
 0xb9e   : > { %8448 = vadd.xlane.f32.xlu1 %v8447_v53  ;;  %v8269_v30 = vpop.xlane.xlu1 %8268 }
 0xb9f   : > { %v14736_v21 = vsub.f32 %v14553_v31, %v8300_v59  ;;  %v8444_v44 = vsel %vm15928_vm15, %v8362_v17, 0.0  ;;  %v8303_v15 = vmul.f32 0.125, %v8269_v30  ;;  %v8365_v46 = vmul.f32 %v14730_v12, %v14730_v12  ;;  %vm15943_vm15 = vmmov %vm15837_vm0 }
 0xba0   : > { %v8266_v0 = vpop.xlane.xlu0 %8265  ;;  %8445 = vadd.xlane.f32.xlu0 %v8444_v44 }
 0xba1   : > { %v8302_v9 = vmul.f32 0.125, %v8266_v0  ;;  %v14742_v2 = vsub.f32 %v14557_v57, %v8303_v15  ;;  %v8364_v58 = vmul.f32 %v14736_v21, %v14736_v21  ;;  %v8453_v13 = vsel %vm15929_vm7, %v8365_v46, 0.0  ;;  %vm15944_vm7 = vmmov %vm15837_vm0 }
 0xba2   : > { %8454 = vadd.xlane.f32.xlu1 %v8453_v13 }
 0xba3   : > { %v14748_v31 = vsub.f32 %v14561_v47, %v8302_v9  ;;  %v8450_v39 = vsel %vm15930_vm2, %v8364_v58, 0.0  ;;  %v8367_v1 = vmul.f32 %v14742_v2, %v14742_v2  ;;  %vm15945_vm2 = vmmov %vm15837_vm0 }
 0xba4   : > { %v8272_v48 = vpop.xlane.xlu0 %8271  ;;  %8451 = vadd.xlane.f32.xlu0 %v8450_v39 }
 0xba5   : > { %v8304_v10 = vmul.f32 0.125, %v8272_v48  ;;  %v8366_v57 = vmul.f32 %v14748_v31, %v14748_v31  ;;  %v8459_v36 = vsel %vm15931_vm10, %v8367_v1, 0.0  ;;  %v14766_v1 = vld [vmem:[%s14942_s4] ss:$0 sm:$0xff]  ;;  %vm15946_vm10 = vmmov %vm15837_vm0 }
 0xba6   : > { %8460 = vadd.xlane.f32.xlu1 %v8459_v36 }
 0xba7   : > { %v14757_v16 = vsub.f32 %v14567_v25, %v8304_v10  ;;  %v8456_v47 = vsel %vm15932_vm13, %v8366_v57, 0.0  ;;  %vm15947_vm13 = vmmov %vm15837_vm0 }
 0xba8   : > { %8457 = vadd.xlane.f32.xlu0 %v8456_v47 }
 0xba9   : > { %v8368_v28 = vmul.f32 %v14757_v16, %v14757_v16 }
 0xbab   : > { %v8462_v62 = vsel %vm15933_vm8, %v8368_v28, 0.0  ;;  %vm15948_vm8 = vmmov %vm15837_vm0 }
 0xbac   : > { %8463 = vadd.xlane.f32.xlu0 %v8462_v62 }
 0xbef   : > { %v8371_v26 = vpop.xlane.xlu1 %8370 }
 0xbf0   : > { %v8465_v33 = vmul.f32 0.125, %v8371_v26 }
 0xbf1   : > { %v8374_v41 = vpop.xlane.xlu0 %8373 }
 0xbf2   : > { %v8497_v55 = vadd.f32 1e-05, %v8465_v33  ;;  %v8466_v19 = vmul.f32 0.125, %v8374_v41 }
 0xbf3   : > { %v8377_v61 = vpop.xlane.xlu1 %8376 }
 0xbf4   : > { %9385 = vrsqrt.f32 %v8497_v55  ;;  %v8498_v45 = vadd.f32 1e-05, %v8466_v19  ;;  %v8467_v22 = vmul.f32 0.125, %v8377_v61 }
 0xbf6   : > { %9387 = vrsqrt.f32 %v8498_v45  ;;  %v8499_v25 = vadd.f32 1e-05, %v8467_v22  ;;  %v9482_v22 = vld [vmem:[%s9632_s24 + $0x8] sm:$0xff] }
 0xbf7   : > { %v8380_v40 = vpop.xlane.xlu0 %8379 }
 0xbf8   : > { %v8383_v11 = vpop.xlane.xlu1 %8382  ;;  %9389 = vrsqrt.f32 %v8499_v25  ;;  %v8468_v14 = vmul.f32 0.125, %v8380_v40 }
 0xbf9   : > { %v8469_v59 = vmul.f32 0.125, %v8383_v11 }
 0xbfa   : > { %v8500_v17 = vadd.f32 1e-05, %v8468_v14 }
 0xbfb   : > { %v8501_v53 = vadd.f32 1e-05, %v8469_v59  ;;  %v8386_v30 = vpop.xlane.xlu0 %8385 }
 0xbfc   : > { %v8389_v44 = vpop.xlane.xlu1 %8388  ;;  %9391 = vrsqrt.f32 %v8500_v17  ;;  %v8470_v15 = vmul.f32 0.125, %v8386_v30  ;;  %v9483_v30 = vld [vmem:[%s9632_s24 + $0x10] sm:$0xff] }
 0xbfd   : > { %v8471_v46 = vmul.f32 0.125, %v8389_v44  ;;  %9393 = vrsqrt.f32 %v8501_v53 }
 0xbfe   : > { %v8502_v0 = vadd.f32 1e-05, %v8470_v15 }
 0xbff   : > { %v8503_v9 = vadd.f32 1e-05, %v8471_v46 }
 0xc00   : > { %v8395_v58 = vpop.xlane.xlu1 %8394  ;;  %9395 = vrsqrt.f32 %v8502_v0 }
 0xc01   : > { %v8473_v13 = vmul.f32 0.125, %v8395_v58  ;;  %v9386_v39 = vpop.eup %9385  ;;  %9397 = vrsqrt.f32 %v8503_v9 }
 0xc02   : > { %v8561_v48 = vmul.f32 %v9386_v39, %v14572_v3  ;;  %v9481_v3 = vld [vmem:[%s9632_s24] sm:$0xff] }
 0xc03   : > { %v8505_v10 = vadd.f32 1e-05, %v8473_v13  ;;  %v9388_v57 = vpop.eup %9387 }
 0xc04   : > { %v8392_v36 = vpop.xlane.xlu0 %8391  ;;  %v8599_v47 = vmul.f32 %v14766_v1, %v8561_v48  ;;  %v8562_v28 = vmul.f32 %v9388_v57, %v14575_v35 }
 0xc05   : > { %v8472_v62 = vmul.f32 0.125, %v8392_v36  ;;  %9399 = vrsqrt.f32 %v8505_v10  ;;  %v9390_v26 = vpop.eup %9389  ;;  %v9484_v36 = vld [vmem:[%s9632_s24 + $0x18] sm:$0xff] }
 0xc06   : > { %v8401_v33 = vpop.xlane.xlu1 %8400  ;;  %v8631_v41 = vadd.f32 %v9481_v3, %v8599_v47  ;;  %v8600_v55 = vmul.f32 %v14766_v1, %v8562_v28  ;;  %v8563_v19 = vmul.f32 %v9390_v26, %v14580_v56 }
 0xc07   : > { %v8504_v35 = vadd.f32 1e-05, %v8472_v62  ;;  %v8475_v45 = vmul.f32 0.125, %v8401_v33  ;;  %v9485_v62 = vld [vmem:[%s9632_s24 + $0x20] sm:$0xff] }
 0xc08   : > { %8663 = vst.msk [vmem:[%s14776_s14] sm:$0xff] %vm15934_vm14, %v8631_v41  ;;  %v8632_v25 = vadd.f32 %v9482_v22, %v8600_v55  ;;  %v8601_v40 = vmul.f32 %v14766_v1, %v8563_v19  ;;  %v9486_v22 = vld [vmem:[%s9632_s24 + $0x28] sm:$0xff]  ;;  %vm15949_vm14 = vmmov %vm15837_vm0 }
 0xc09   : > { %v8398_v61 = vpop.xlane.xlu0 %8397  ;;  %9401 = vrsqrt.f32 %v8504_v35  ;;  %v9392_v14 = vpop.eup %9391  ;;  %v8507_v59 = vadd.f32 1e-05, %v8475_v45 }
 0xc0a   : > { %v8474_v11 = vmul.f32 0.125, %v8398_v61  ;;  %v9394_v53 = vpop.eup %9393  ;;  %8664 = vst.msk [vmem:[%s14776_s14 + $0x8] sm:$0xff] %vm15935_vm4, %v8632_v25  ;;  %v8633_v56 = vadd.f32 %v9483_v30, %v8601_v40  ;;  %v8564_v44 = vmul.f32 %v9392_v14, %v14589_v18  ;;  %v9487_v14 = vld [vmem:[%s9632_s24 + $0x30] sm:$0xff]  ;;  %vm15950_vm4 = vmmov %vm15837_vm0 }
 0xc0b   : > { %v8407_v17 = vpop.xlane.xlu1 %8406  ;;  %v8565_v0 = vmul.f32 %v9394_v53, %v14592_v42  ;;  %9403 = vrsqrt.f32 %v8507_v59 }
 0xc0c   : > { %v8506_v15 = vadd.f32 1e-05, %v8474_v11  ;;  %v8477_v46 = vmul.f32 0.125, %v8407_v17  ;;  %8665 = vst.msk [vmem:[%s14776_s14 + $0x10] sm:$0xff] %vm15837_vm0, %v8633_v56  ;;  %v8602_v58 = vmul.f32 %v14766_v1, %v8564_v44 }
 0xc0d   : > { %v8404_v9 = vpop.xlane.xlu0 %8403  ;;  %v9396_v48 = vpop.eup %9395  ;;  %v8603_v10 = vmul.f32 %v14766_v1, %v8565_v0 }
 0xc0e   : > { %9405 = vrsqrt.f32 %v8506_v15  ;;  %v8476_v13 = vmul.f32 0.125, %v8404_v9  ;;  %v8509_v39 = vadd.f32 1e-05, %v8477_v46  ;;  %v9398_v18 = vpop.eup %9397  ;;  %v8634_v47 = vadd.f32 %v9484_v36, %v8602_v58  ;;  %v9488_v46 = vld [vmem:[%s9632_s24 + $0x40] sm:$0xff] }
 0xc0f   : > { %v8413_v57 = vpop.xlane.xlu1 %8412  ;;  %v8566_v42 = vmul.f32 %v9396_v48, %v14600_v29  ;;  %v8635_v26 = vadd.f32 %v9485_v62, %v8603_v10  ;;  %v8567_v33 = vmul.f32 %v9398_v18, %v14603_v7 }
 0xc10   : > { %v8508_v28 = vadd.f32 1e-05, %v8476_v13  ;;  %9407 = vrsqrt.f32 %v8509_v39  ;;  %v8479_v41 = vmul.f32 0.125, %v8413_v57  ;;  %8666 = vst.msk [vmem:[%s14776_s14 + $0x18] sm:$0xff] %vm15936_vm12, %v8634_v47  ;;  %v9489_v47 = vld [vmem:[%s9632_s24 + $0x38] sm:$0xff]  ;;  %vm15951_vm12 = vmmov %vm15837_vm0 }
 0xc11   : > { %v8410_v3 = vpop.xlane.xlu0 %8409  ;;  %v8604_v55 = vmul.f32 %v14766_v1, %v8566_v42  ;;  %8667 = vst.msk [vmem:[%s14776_s14 + $0x20] sm:$0xff] %vm15937_vm6, %v8635_v26  ;;  %v8605_v29 = vmul.f32 %v14766_v1, %v8567_v33  ;;  %vm15952_vm6 = vmmov %vm15837_vm0 }
 0xc12   : > { %9409 = vrsqrt.f32 %v8508_v28  ;;  %v8478_v19 = vmul.f32 0.125, %v8410_v3  ;;  %v9400_v35 = vpop.eup %9399  ;;  %v8511_v61 = vadd.f32 1e-05, %v8479_v41 }
 0xc13   : > { %v8419_v45 = vpop.xlane.xlu1 %8418  ;;  %v8636_v7 = vadd.f32 %v9486_v22, %v8604_v55  ;;  %v8569_v25 = vmul.f32 %v9400_v35, %v14612_v8  ;;  %v8637_v59 = vadd.f32 %v9487_v14, %v8605_v29  ;;  %v9491_v22 = vld [vmem:[%s9632_s24 + $0x48] sm:$0xff] }
 0xc14   : > { %v8510_v40 = vadd.f32 1e-05, %v8478_v19  ;;  %v8481_v11 = vmul.f32 0.125, %v8419_v45  ;;  %9411 = vrsqrt.f32 %v8511_v61 }
 0xc15   : > { %v8416_v17 = vpop.xlane.xlu0 %8415  ;;  %8668 = vst.msk [vmem:[%s14776_s14 + $0x28] sm:$0xff] %vm15938_vm5, %v8636_v7  ;;  %v8607_v53 = vmul.f32 %v14766_v1, %v8569_v25  ;;  %vm15953_vm5 = vmmov %vm15837_vm0 }
 0xc16   : > { %9413 = vrsqrt.f32 %v8510_v40  ;;  %v8480_v30 = vmul.f32 0.125, %v8416_v17  ;;  %v8513_v56 = vadd.f32 1e-05, %v8481_v11  ;;  %v9402_v44 = vpop.eup %9401  ;;  %8669 = vst.msk [vmem:[%s14776_s14 + $0x30] sm:$0xff] %vm15939_vm11, %v8637_v59  ;;  %vm15954_vm11 = vmmov %vm15837_vm0 }
 0xc17   : > { %v8425_v15 = vpop.xlane.xlu1 %8424  ;;  %v8568_v8 = vmul.f32 %v9402_v44, %v14619_v49  ;;  %v8639_v0 = vadd.f32 %v9488_v46, %v8607_v53  ;;  %v9492_v53 = vld [vmem:[%s9632_s24 + $0x60] sm:$0xff]  ;;  %v9493_v46 = vld [vmem:[%s9632_s24 + $0x58] sm:$0xff] }
 0xc18   : > { %v8512_v9 = vadd.f32 1e-05, %v8480_v30  ;;  %9415 = vrsqrt.f32 %v8513_v56  ;;  %v8483_v13 = vmul.f32 0.125, %v8425_v15  ;;  %v9404_v39 = vpop.eup %9403 }
 0xc19   : > { %v8422_v58 = vpop.xlane.xlu0 %8421  ;;  %v8606_v48 = vmul.f32 %v14766_v1, %v8568_v8  ;;  %8671 = vst.msk [vmem:[%s14776_s14 + $0x40] sm:$0xff] %vm15940_vm9, %v8639_v0  ;;  %v8571_v18 = vmul.f32 %v9404_v39, %v14623_v24  ;;  %vm15955_vm9 = vmmov %vm15837_vm0 }
 0xc1a   : > { %9417 = vrsqrt.f32 %v8512_v9  ;;  %v8482_v10 = vmul.f32 0.125, %v8422_v58  ;;  %v8515_v36 = vadd.f32 1e-05, %v8483_v13 }
 0xc1b   : > { %v9406_v57 = vpop.eup %9405  ;;  %v8431_v49 = vpop.xlane.xlu1 %8430  ;;  %v8638_v42 = vadd.f32 %v9489_v47, %v8606_v48  ;;  %v8609_v3 = vmul.f32 %v14766_v1, %v8571_v18 }
 0xc1c   : > { %v8570_v28 = vmul.f32 %v9406_v57, %v14628_v32  ;;  %v8514_v62 = vadd.f32 1e-05, %v8482_v10  ;;  %v8485_v26 = vmul.f32 0.125, %v8431_v49  ;;  %9419 = vrsqrt.f32 %v8515_v36  ;;  %v9490_v32 = vld [vmem:[%s9632_s24 + $0x50] sm:$0xff] }
 0xc1d   : > { %v9408_v33 = vpop.eup %9407  ;;  %v8428_v41 = vpop.xlane.xlu0 %8427  ;;  %8670 = vst.msk [vmem:[%s14776_s14 + $0x38] sm:$0xff] %vm15941_vm3, %v8638_v42  ;;  %v8641_v29 = vadd.f32 %v9490_v32, %v8609_v3  ;;  %vm15956_vm3 = vmmov %vm15837_vm0 }
 0xc1e   : > { %v8608_v24 = vmul.f32 %v14766_v1, %v8570_v28  ;;  %v8573_v55 = vmul.f32 %v9408_v33, %v14634_v52  ;;  %9421 = vrsqrt.f32 %v8514_v62  ;;  %v8484_v19 = vmul.f32 0.125, %v8428_v41  ;;  %v9495_v28 = vld [vmem:[%s9632_s24 + $0x68] sm:$0xff] }
 0xc1f   : > { %v9410_v35 = vpop.eup %9409  ;;  %v8517_v61 = vadd.f32 1e-05, %v8485_v26  ;;  %v8437_v45 = vpop.xlane.xlu1 %8436  ;;  %8673 = vst.msk [vmem:[%s14776_s14 + $0x50] sm:$0xff] %vm15942_vm1, %v8641_v29  ;;  %vm15957_vm1 = vmmov %vm15837_vm0 }
 0xc20   : > { %v8640_v7 = vadd.f32 %v9491_v22, %v8608_v24  ;;  %v8572_v25 = vmul.f32 %v9410_v35, %v14640_v6  ;;  %v8611_v40 = vmul.f32 %v14766_v1, %v8573_v55  ;;  %v8516_v11 = vadd.f32 1e-05, %v8484_v19  ;;  %v9496_v19 = vld [vmem:[%s9632_s24 + $0x80] sm:$0xff]  ;;  %v9497_v22 = vld [vmem:[%s9632_s24 + $0x78] sm:$0xff] }
 0xc21   : > { %9423 = vrsqrt.f32 %v8517_v61  ;;  %v8434_v52 = vpop.xlane.xlu0 %8433  ;;  %v8487_v14 = vmul.f32 0.125, %v8437_v45  ;;  %v9412_v59 = vpop.eup %9411 }
 0xc22   : > { %8672 = vst.msk [vmem:[%s14776_s14 + $0x48] sm:$0xff] %vm15943_vm15, %v8640_v7  ;;  %v8610_v17 = vmul.f32 %v14766_v1, %v8572_v25  ;;  %v8643_v30 = vadd.f32 %v9492_v53, %v8611_v40  ;;  %9425 = vrsqrt.f32 %v8516_v11  ;;  %v8486_v6 = vmul.f32 0.125, %v8434_v52  ;;  %vm15958_vm15 = vmmov %vm15837_vm0 }
 0xc23   : > { %v9414_v56 = vpop.eup %9413  ;;  %v8575_v44 = vmul.f32 %v9412_v59, %v14646_v50  ;;  %v8519_v15 = vadd.f32 1e-05, %v8487_v14  ;;  %v8443_v8 = vpop.xlane.xlu1 %8442 }
 0xc24   : > { %v8642_v0 = vadd.f32 %v9493_v46, %v8610_v17  ;;  %8675 = vst.msk [vmem:[%s14776_s14 + $0x60] sm:$0xff] %vm15944_vm7, %v8643_v30  ;;  %v8574_v9 = vmul.f32 %v9414_v56, %v14652_v23  ;;  %v8518_v58 = vadd.f32 1e-05, %v8486_v6  ;;  %v8489_v13 = vmul.f32 0.125, %v8443_v8  ;;  %v9494_v23 = vld [vmem:[%s9632_s24 + $0x70] sm:$0xff]  ;;  %vm15959_vm7 = vmmov %vm15837_vm0 }
 0xc25   : > { %v9416_v39 = vpop.eup %9415  ;;  %v8613_v48 = vmul.f32 %v14766_v1, %v8575_v44  ;;  %9427 = vrsqrt.f32 %v8519_v15  ;;  %v8440_v10 = vpop.xlane.xlu0 %8439  ;;  %v9498_v6 = vld [vmem:[%s9632_s24 + $0x90] sm:$0xff]  ;;  %v9499_v15 = vld [vmem:[%s9632_s24 + $0x88] sm:$0xff] }
 0xc26   : > { %8674 = vst.msk [vmem:[%s14776_s14 + $0x58] sm:$0xff] %vm15945_vm2, %v8642_v0  ;;  %v8612_v50 = vmul.f32 %v14766_v1, %v8574_v9  ;;  %v8577_v57 = vmul.f32 %v9416_v39, %v14658_v63  ;;  %9429 = vrsqrt.f32 %v8518_v58  ;;  %v8488_v18 = vmul.f32 0.125, %v8440_v10  ;;  %vm15960_vm2 = vmmov %vm15837_vm0 }
 0xc27   : > { %v9418_v36 = vpop.eup %9417  ;;  %v8645_v49 = vadd.f32 %v9494_v23, %v8613_v48  ;;  %v8521_v47 = vadd.f32 1e-05, %v8489_v13  ;;  %v8449_v42 = vpop.xlane.xlu1 %8448 }
 0xc28   : > { %v8644_v62 = vadd.f32 %v9495_v28, %v8612_v50  ;;  %v8576_v26 = vmul.f32 %v9418_v36, %v14664_v34  ;;  %v8615_v33 = vmul.f32 %v14766_v1, %v8577_v57  ;;  %v8520_v3 = vadd.f32 1e-05, %v8488_v18  ;;  %v9501_v36 = vld [vmem:[%s9632_s24 + $0x98] sm:$0xff] }
 0xc29   : > { %8677 = vst.msk [vmem:[%s14776_s14 + $0x70] sm:$0xff] %vm15946_vm10, %v8645_v49  ;;  %9431 = vrsqrt.f32 %v8521_v47  ;;  %v8446_v63 = vpop.xlane.xlu0 %8445  ;;  %v8491_v41 = vmul.f32 0.125, %v8449_v42  ;;  %v9420_v24 = vpop.eup %9419  ;;  %vm15961_vm10 = vmmov %vm15837_vm0 }
 0xc2a   : > { %8676 = vst.msk [vmem:[%s14776_s14 + $0x68] sm:$0xff] %vm15947_vm13, %v8644_v62  ;;  %v8614_v55 = vmul.f32 %v14766_v1, %v8576_v26  ;;  %v8647_v35 = vadd.f32 %v9496_v19, %v8615_v33  ;;  %9433 = vrsqrt.f32 %v8520_v3  ;;  %v8490_v34 = vmul.f32 0.125, %v8446_v63  ;;  %v9502_v3 = vld [vmem:[%s9632_s24 + $0xb0] sm:$0xff]  ;;  %vm15962_vm13 = vmmov %vm15837_vm0 }
 0xc2b   : > { %v9422_v32 = vpop.eup %9421  ;;  %v8579_v29 = vmul.f32 %v9420_v24, %v14670_v5  ;;  %v8523_v61 = vadd.f32 1e-05, %v8491_v41  ;;  %v8455_v45 = vpop.xlane.xlu1 %8454  ;;  %v9503_v41 = vld [vmem:[%s9632_s24 + $0xa8] sm:$0xff] }
 0xc2c   : > { %v8646_v7 = vadd.f32 %v9497_v22, %v8614_v55  ;;  %8679 = vst.msk [vmem:[%s14776_s14 + $0x80] sm:$0xff] %vm15948_vm8, %v8647_v35  ;;  %v8578_v25 = vmul.f32 %v9422_v32, %v14676_v4  ;;  %v8522_v40 = vadd.f32 1e-05, %v8490_v34  ;;  %v8493_v11 = vmul.f32 0.125, %v8455_v45  ;;  %v9505_v45 = vld [vmem:[%s9632_s24 + $0xb8] sm:$0xff]  ;;  %vm15963_vm8 = vmmov %vm15837_vm0 }
 0xc2d   : > { %v8617_v52 = vmul.f32 %v14766_v1, %v8579_v29  ;;  %9435 = vrsqrt.f32 %v8523_v61  ;;  %v8452_v14 = vpop.xlane.xlu0 %8451 }
 0xc2e   : > { %v9424_v59 = vpop.eup %9423  ;;  %8678 = vst.msk [vmem:[%s14776_s14 + $0x78] sm:$0xff] %vm15949_vm14, %v8646_v7  ;;  %v8616_v5 = vmul.f32 %v14766_v1, %v8578_v25  ;;  %9437 = vrsqrt.f32 %v8522_v40  ;;  %v8492_v17 = vmul.f32 0.125, %v8452_v14  ;;  %v8525_v53 = vadd.f32 1e-05, %v8493_v11  ;;  %v9506_v14 = vld [vmem:[%s9632_s24 + $0xd0] sm:$0xff] }
 0xc2f   : > { %v9426_v30 = vpop.eup %9425  ;;  %v8649_v4 = vadd.f32 %v9498_v6, %v8617_v52  ;;  %v8581_v56 = vmul.f32 %v9424_v59, %v14682_v51  ;;  %v8461_v44 = vpop.xlane.xlu1 %8460  ;;  %v9508_v6 = vld [vmem:[%s9632_s24 + $0xe0] sm:$0xff] }
 0xc30   : > { %v8648_v8 = vadd.f32 %v9499_v15, %v8616_v5  ;;  %v8580_v46 = vmul.f32 %v9426_v30, %v14688_v54  ;;  %v8524_v0 = vadd.f32 1e-05, %v8492_v17  ;;  %9439 = vrsqrt.f32 %v8525_v53  ;;  %v9500_v54 = vld [vmem:[%s9632_s24 + $0xa0] sm:$0xff]  ;;  %v9507_v5 = vld [vmem:[%s9632_s24 + $0xc8] sm:$0xff]  ;;  %v9509_v15 = vld [vmem:[%s9632_s24 + $0xd8] sm:$0xff] }
 0xc31   : > { %8681 = vst.msk [vmem:[%s14776_s14 + $0x90] sm:$0xff] %vm15950_vm4, %v8649_v4  ;;  %v8619_v9 = vmul.f32 %v14766_v1, %v8581_v56  ;;  %v8458_v58 = vpop.xlane.xlu0 %8457  ;;  %v8495_v13 = vmul.f32 0.125, %v8461_v44 }
 0xc32   : > { %v9428_v39 = vpop.eup %9427  ;;  %8680 = vst.msk [vmem:[%s14776_s14 + $0x88] sm:$0xff] %vm15837_vm0, %v8648_v8  ;;  %v8618_v51 = vmul.f32 %v14766_v1, %v8580_v46  ;;  %9441 = vrsqrt.f32 %v8524_v0  ;;  %v8494_v48 = vmul.f32 0.125, %v8458_v58  ;;  %v9510_v58 = vld [vmem:[%s9632_s24 + $0xf0] sm:$0xff] }
 0xc33   : > { %v9430_v10 = vpop.eup %9429  ;;  %v8651_v50 = vadd.f32 %v9500_v54, %v8619_v9  ;;  %v8583_v57 = vmul.f32 %v9428_v39, %v14694_v38  ;;  %v8527_v18 = vadd.f32 1e-05, %v8495_v13  ;;  %v9511_v39 = vld [vmem:[%s9632_s24 + $0xe8] sm:$0xff] }
 0xc34   : > { %v8650_v23 = vadd.f32 %v9501_v36, %v8618_v51  ;;  %v8582_v49 = vmul.f32 %v9430_v10, %v14700_v20  ;;  %v8526_v47 = vadd.f32 1e-05, %v8494_v48 }
 0xc35   : > { %8683 = vst.msk [vmem:[%s14776_s14 + $0xa0] sm:$0xff] %vm15951_vm12, %v8651_v50  ;;  %v8621_v42 = vmul.f32 %v14766_v1, %v8583_v57  ;;  %9443 = vrsqrt.f32 %v8527_v18  ;;  %v8464_v28 = vpop.xlane.xlu0 %8463 }
 0xc36   : > { %v9432_v62 = vpop.eup %9431  ;;  %8682 = vst.msk [vmem:[%s14776_s14 + $0x98] sm:$0xff] %vm15952_vm6, %v8650_v23  ;;  %v8620_v38 = vmul.f32 %v14766_v1, %v8582_v49  ;;  %9445 = vrsqrt.f32 %v8526_v47  ;;  %v8496_v26 = vmul.f32 0.125, %v8464_v28 }
 0xc37   : > { %v9434_v33 = vpop.eup %9433  ;;  %v8653_v20 = vadd.f32 %v9502_v3, %v8621_v42  ;;  %v8585_v63 = vmul.f32 %v9432_v62, %v14706_v43  ;;  %v9504_v43 = vld [vmem:[%s9632_s24 + $0xc0] sm:$0xff] }
 0xc38   : > { %v8652_v24 = vadd.f32 %v9503_v41, %v8620_v38  ;;  %v8584_v55 = vmul.f32 %v9434_v33, %v14712_v60  ;;  %v8528_v19 = vadd.f32 1e-05, %v8496_v26 }
 0xc39   : > { %8685 = vst.msk [vmem:[%s14776_s14 + $0xb0] sm:$0xff] %vm15953_vm5, %v8653_v20  ;;  %v8623_v35 = vmul.f32 %v14766_v1, %v8585_v63 }
 0xc3a   : > { %v9436_v34 = vpop.eup %9435  ;;  %8684 = vst.msk [vmem:[%s14776_s14 + $0xa8] sm:$0xff] %vm15954_vm11, %v8652_v24  ;;  %v8622_v32 = vmul.f32 %v14766_v1, %v8584_v55  ;;  %9447 = vrsqrt.f32 %v8528_v19 }
 0xc3b   : > { %v9438_v29 = vpop.eup %9437  ;;  %v8655_v61 = vadd.f32 %v9504_v43, %v8623_v35  ;;  %v8587_v60 = vmul.f32 %v9436_v34, %v14718_v37 }
 0xc3c   : > { %v8654_v22 = vadd.f32 %v9505_v45, %v8622_v32  ;;  %v8586_v7 = vmul.f32 %v9438_v29, %v14724_v27 }
 0xc3d   : > { %v9440_v25 = vpop.eup %9439  ;;  %8687 = vst.msk [vmem:[%s14776_s14 + $0xc0] sm:$0xff] %vm15955_vm9, %v8655_v61  ;;  %v8625_v40 = vmul.f32 %v14766_v1, %v8587_v60 }
 0xc3e   : > { %8686 = vst.msk [vmem:[%s14776_s14 + $0xb8] sm:$0xff] %vm15956_vm3, %v8654_v22  ;;  %v8624_v11 = vmul.f32 %v14766_v1, %v8586_v7  ;;  %v8589_v52 = vmul.f32 %v9440_v25, %v14730_v12 }
 0xc3f   : > { %v9442_v37 = vpop.eup %9441  ;;  %v8657_v59 = vadd.f32 %v9506_v14, %v8625_v40 }
 0xc40   : > { %v8656_v27 = vadd.f32 %v9507_v5, %v8624_v11  ;;  %v8588_v17 = vmul.f32 %v9442_v37, %v14736_v21  ;;  %v8627_v53 = vmul.f32 %v14766_v1, %v8589_v52 }
 0xc41   : > { %8689 = vst.msk [vmem:[%s14776_s14 + $0xd0] sm:$0xff] %vm15957_vm1, %v8657_v59 }
 0xc42   : > { %v9444_v30 = vpop.eup %9443  ;;  %8688 = vst.msk [vmem:[%s14776_s14 + $0xc8] sm:$0xff] %vm15958_vm15, %v8656_v27  ;;  %v8626_v12 = vmul.f32 %v14766_v1, %v8588_v17  ;;  %v8659_v4 = vadd.f32 %v9508_v6, %v8627_v53 }
 0xc43   : > { %v9446_v56 = vpop.eup %9445  ;;  %v8591_v44 = vmul.f32 %v9444_v30, %v14742_v2 }
 0xc44   : > { %v8658_v21 = vadd.f32 %v9509_v15, %v8626_v12  ;;  %8691 = vst.msk [vmem:[%s14776_s14 + $0xe0] sm:$0xff] %vm15959_vm7, %v8659_v4  ;;  %v8590_v8 = vmul.f32 %v9446_v56, %v14748_v31  ;;  %v9512_v31 = vld [vmem:[%s9632_s24 + $0xf8] sm:$0xff] }
 0xc45   : > { %v8629_v46 = vmul.f32 %v14766_v1, %v8591_v44 }
 0xc46   : > { %8690 = vst.msk [vmem:[%s14776_s14 + $0xd8] sm:$0xff] %vm15960_vm2, %v8658_v21  ;;  %v8628_v0 = vmul.f32 %v14766_v1, %v8590_v8 }
 0xc47   : > { %v9448_v9 = vpop.eup %9447  ;;  %v8661_v13 = vadd.f32 %v9510_v58, %v8629_v46 }
 0xc48   : > { %v8660_v51 = vadd.f32 %v9511_v39, %v8628_v0  ;;  %v8592_v2 = vmul.f32 %v9448_v9, %v14757_v16 }
 0xc49   : > { %8693 = vst.msk [vmem:[%s14776_s14 + $0xf0] sm:$0xff] %vm15961_vm10, %v8661_v13 }
 0xc4a   : > { %8692 = vst.msk [vmem:[%s14776_s14 + $0xe8] sm:$0xff] %vm15962_vm13, %v8660_v51  ;;  %v8630_v48 = vmul.f32 %v14766_v1, %v8592_v2 }
 0xc4c   : > { %v8662_v10 = vadd.f32 %v9512_v31, %v8630_v48 }
 0xc4e   : > { %8694 = vst.msk [vmem:[%s14776_s14 + $0xf8] sm:$0xff] %vm15963_vm8, %v8662_v10 }
 0xc4f PF: > { %s15_s18 = sadd.s32 1, %s9519_s18  }
 0xc50   : > { %p12_p4 = scmp.ge.s32.totalorder %s15_s18, 4  }
 0xc52   :  { %14 = sbr.rel (!%p12_p4) target bundleno = 1 (0x1), region = 72 }

</bundles_post_ra>
